<compile_context>
chip_gen: v7x
topology: tpu7x:2x2x1
jax: 0.10.0
libtpu: 0.0.40
codegen_flags: <defaults>
</compile_context>

<pallas_src>
import jax
import jax.numpy as jnp
import numpy as np
from jax.experimental import pallas as pl
from jax.experimental.pallas import tpu as pltpu

LANE = 128


def _ceil_to(n, m):
    return ((n + m - 1) // m) * m


def tree_jet_classifier(x, params, *, tb=512):
    """x: (B, S, F) float32; params: dict of weights. Returns (B, 1) probs."""
    B, S, F = x.shape
    H = params["we"].shape[1]
    Fp = _ceil_to(F, 8)             # pad features (sublane dim of we)
    Hp = _ceil_to(H, LANE)          # pad hidden to lane width (128 for H<=128)

    # Batch tile: as large as allowed but keep >= 2 grid steps when the batch
    # permits (v7x megacore splits the "parallel" axis across its 2 TCs).
    max_tile = _ceil_to(max(B // 2, 8), 8) if B >= 16 else _ceil_to(B, 8)
    TB = _ceil_to(max(8, min(int(tb), max_tile)), 8)
    Bp = _ceil_to(B, TB)
    num_blocks = Bp // TB

    # ---- host-side padding / casting / layout (done outside the kernel) ----
    # x laid out (S, Bp, Fp): each grid step DMAs one (S, TB, Fp) slab; inside
    # the kernel the S per-node slices are embedded and mean-pooled.
    xb = jnp.pad(x.astype(jnp.bfloat16), ((0, Bp - B), (0, 0), (0, Fp - F)))
    xb = jnp.transpose(xb, (1, 0, 2))                     # (S, Bp, Fp)

    def pad2(a, rows, cols, dtype):
        return jnp.pad(a, ((0, rows - a.shape[0]),
                           (0, cols - a.shape[1]))).astype(dtype)

    we = pad2(params["we"], Fp, Hp, jnp.bfloat16)         # (Fp, Hp)
    be = pad2(params["be"], 1, Hp, jnp.float32)           # (1, Hp)
    w1 = pad2(params["w1"], Hp, Hp, jnp.bfloat16)
    b1 = pad2(params["b1"], 1, Hp, jnp.float32)
    w2 = pad2(params["w2"], Hp, Hp, jnp.bfloat16)
    b2 = pad2(params["b2"], 1, Hp, jnp.float32)
    w3 = pad2(params["w3"].T, 1, Hp, jnp.float32)         # (1, Hp) row, f32
    b3 = params["b3"].astype(jnp.float32)                 # (1, 1)

    def kernel(x_ref, we_ref, be_ref, w1_ref, b1_ref, w2_ref, b2_ref,
               w3_ref, b3_ref, out_ref):
        # ---- Transform: per-node Linear+ReLU, mean pool over the S nodes ----
        h = jnp.maximum(
            jnp.dot(x_ref[0], we_ref[...],
                    preferred_element_type=jnp.float32) + be_ref[...], 0.0)
        for s in range(1, S):                 # unrolled: S-1 VPU adds
            h = h + jnp.maximum(
                jnp.dot(x_ref[s], we_ref[...],
                        preferred_element_type=jnp.float32) + be_ref[...], 0.0)
        h = h * (1.0 / S)                     # (TB, Hp) f32 mean pool

        # ---- Predictor (READOUTS['clf']): fc1+ReLU, fc2+ReLU, fc3, sigmoid --
        h1 = jnp.maximum(
            jnp.dot(h.astype(jnp.bfloat16), w1_ref[...],
                    preferred_element_type=jnp.float32) + b1_ref[...], 0.0)
        h2 = jnp.maximum(
            jnp.dot(h1.astype(jnp.bfloat16), w2_ref[...],
                    preferred_element_type=jnp.float32) + b2_ref[...], 0.0)
        # Final (H, 1) layer as lane-broadcast multiply + lane reduce in f32:
        # one value per jet, written as a compact (TB, 1) column.
        logits = (jnp.sum(h2 * w3_ref[...], axis=1, keepdims=True)
                  + b3_ref[...])              # (TB, 1) f32
        out_ref[...] = jax.nn.sigmoid(logits)

    def resident(shape):
        # Weights/biases: constant block index -> fetched once, VMEM-resident.
        return pl.BlockSpec(shape, lambda i, _nd=len(shape): (0,) * _nd)

    flops = (2 * Bp * S * Fp * Hp             # node embedding matmuls
             + Bp * S * Hp                    # pooling adds + 1/S scale
             + 2 * Bp * Hp * Hp * 2           # fc1, fc2
             + 3 * Bp * Hp)                   # fc3 multiply + lane reduce
    bytes_accessed = (xb.size * 2 + Bp * 4
                      + (we.size + w1.size + w2.size) * 2
                      + (be.size + b1.size + b2.size + w3.size + b3.size) * 4)

    out = pl.pallas_call(
        kernel,
        out_shape=jax.ShapeDtypeStruct((Bp, 1), jnp.float32),
        grid=(num_blocks,),
        in_specs=[
            pl.BlockSpec((S, TB, Fp), lambda i: (0, i, 0)),   # x tile (pipelined)
            resident((Fp, Hp)), resident((1, Hp)),            # we, be
            resident((Hp, Hp)), resident((1, Hp)),            # w1, b1
            resident((Hp, Hp)), resident((1, Hp)),            # w2, b2
            resident((1, Hp)), resident((1, 1)),              # w3 (row), b3
        ],
        out_specs=pl.BlockSpec((TB, 1), lambda i: (i, 0)),
        compiler_params=pltpu.CompilerParams(
            dimension_semantics=("parallel",),
            vmem_limit_bytes=32 * 1024 * 1024,
        ),
        cost_estimate=pl.CostEstimate(
            flops=flops,
            transcendentals=Bp,
            bytes_accessed=bytes_accessed),
    )(xb, we, be, w1, b1, w2, b2, w3, b3)

    return out[:B, :]


def init_params(key, n_features, hidden):
    """Deterministic synthetic parameters (shapes as implied by the module)."""
    ks = jax.random.split(key, 8)
    s = 0.1
    return {
        # transform: node-feature embedding
        "we": s * jax.random.normal(ks[0], (n_features, hidden), jnp.float32),
        "be": s * jax.random.normal(ks[1], (1, hidden), jnp.float32),
        # predictor READOUTS['clf'](hidden): fc1, fc2, fc3
        "w1": s * jax.random.normal(ks[2], (hidden, hidden), jnp.float32),
        "b1": s * jax.random.normal(ks[3], (1, hidden), jnp.float32),
        "w2": s * jax.random.normal(ks[4], (hidden, hidden), jnp.float32),
        "b2": s * jax.random.normal(ks[5], (1, hidden), jnp.float32),
        "w3": s * jax.random.normal(ks[6], (hidden, 1), jnp.float32),
        "b3": s * jax.random.normal(ks[7], (1, 1), jnp.float32),
    }


def reference(x, p):
    """Pure-JAX reference mirroring the kernel's bf16/f32 arithmetic."""
    B, S, F = x.shape
    xb = x.astype(jnp.bfloat16).reshape(B * S, F)
    e = jnp.dot(xb, p["we"].astype(jnp.bfloat16),
                preferred_element_type=jnp.float32) + p["be"]
    e = jnp.maximum(e, 0.0)
    h = jnp.mean(e.reshape(B, S, -1), axis=1)            # f32 mean pool
    h1 = jnp.maximum(
        jnp.dot(h.astype(jnp.bfloat16), p["w1"].astype(jnp.bfloat16),
                preferred_element_type=jnp.float32) + p["b1"], 0.0)
    h2 = jnp.maximum(
        jnp.dot(h1.astype(jnp.bfloat16), p["w2"].astype(jnp.bfloat16),
                preferred_element_type=jnp.float32) + p["b2"], 0.0)
    logits = (jnp.sum(h2 * p["w3"][:, 0][None, :], axis=1, keepdims=True)
              + p["b3"])
    return jax.nn.sigmoid(logits)


if __name__ == "__main__":
    # jets, nodes per jet, node features, hidden  (2 grid steps at TB=512)
    B, S, F, H = 1024, 8, 4, 32
    key = jax.random.PRNGKey(0)
    kx, kp = jax.random.split(key)
    x = jax.random.normal(kx, (B, S, F), jnp.float32)
    params = init_params(kp, F, H)

    out = jax.block_until_ready(tree_jet_classifier(x, params))
    ref = jax.block_until_ready(reference(x, params))

    assert out.shape == (B, 1)
    np.testing.assert_allclose(np.asarray(out), np.asarray(ref),
                               rtol=2e-3, atol=2e-3)
    print("KERNEL_OK")
</pallas_src>

<mosaic_0001>
module attributes {stable_mosaic.version = 11 : i64} {
  func.func @kernel(%arg0: i32, %arg1: memref<8x512x8xbf16, #tpu.memory_space<vmem>>, %arg2: memref<8x128xbf16, #tpu.memory_space<vmem>>, %arg3: memref<1x128xf32, #tpu.memory_space<vmem>>, %arg4: memref<128x128xbf16, #tpu.memory_space<vmem>>, %arg5: memref<1x128xf32, #tpu.memory_space<vmem>>, %arg6: memref<128x128xbf16, #tpu.memory_space<vmem>>, %arg7: memref<1x128xf32, #tpu.memory_space<vmem>>, %arg8: memref<1x128xf32, #tpu.memory_space<vmem>>, %arg9: memref<1x1xf32, #tpu.memory_space<vmem>>, %arg10: memref<512x1xf32, #tpu.memory_space<vmem>>) attributes {dimension_semantics = [#tpu.dimension_semantics<parallel>], iteration_bounds = array<i64: 2>, scalar_prefetch = 0 : i64, scratch_operands = 0 : i64, tpu.core_type = #tpu.core_type<tc>, window_params = [{transform_indices = @transform_0, window_bounds = array<i64: 8, 512, 8>}, {pipeline_mode = #tpu.pipeline_mode<synchronous>, transform_indices = @transform_1, window_bounds = array<i64: 8, 128>}, {pipeline_mode = #tpu.pipeline_mode<synchronous>, transform_indices = @transform_2, window_bounds = array<i64: 1, 128>}, {pipeline_mode = #tpu.pipeline_mode<synchronous>, transform_indices = @transform_3, window_bounds = array<i64: 128, 128>}, {pipeline_mode = #tpu.pipeline_mode<synchronous>, transform_indices = @transform_4, window_bounds = array<i64: 1, 128>}, {pipeline_mode = #tpu.pipeline_mode<synchronous>, transform_indices = @transform_5, window_bounds = array<i64: 128, 128>}, {pipeline_mode = #tpu.pipeline_mode<synchronous>, transform_indices = @transform_6, window_bounds = array<i64: 1, 128>}, {pipeline_mode = #tpu.pipeline_mode<synchronous>, transform_indices = @transform_7, window_bounds = array<i64: 1, 128>}, {pipeline_mode = #tpu.pipeline_mode<synchronous>, transform_indices = @transform_8, window_bounds = array<i64: 1, 1>}, {transform_indices = @transform_9, window_bounds = array<i64: 512, 1>}]} {
    %c0 = arith.constant 0 : index
    %c0_0 = arith.constant 0 : index
    %c0_1 = arith.constant 0 : index
    %0 = vector.load %arg1[%c0, %c0_0, %c0_1] : memref<8x512x8xbf16, #tpu.memory_space<vmem>>, vector<1x512x8xbf16>
    %1 = vector.shape_cast %0 : vector<1x512x8xbf16> to vector<512x8xbf16>
    %c0_2 = arith.constant 0 : index
    %c0_3 = arith.constant 0 : index
    %2 = vector.load %arg2[%c0_2, %c0_3] : memref<8x128xbf16, #tpu.memory_space<vmem>>, vector<8x128xbf16>
    %cst = arith.constant dense<0.000000e+00> : vector<512x128xf32>
    %3 = tpu.matmul %1, %2, %cst {dimension_numbers = #tpu.dot_dimension_numbers<[1], [0], [0], [1], [0, 0, 1, 1], [], []>} : vector<512x8xbf16>, vector<8x128xbf16>, vector<512x128xf32> -> vector<512x128xf32>
    %c0_4 = arith.constant 0 : index
    %c0_5 = arith.constant 0 : index
    %4 = vector.load %arg3[%c0_4, %c0_5] : memref<1x128xf32, #tpu.memory_space<vmem>>, vector<1x128xf32>
    %5 = vector.broadcast %4 : vector<1x128xf32> to vector<512x128xf32>
    %6 = arith.addf %3, %5 : vector<512x128xf32>
    %cst_6 = arith.constant 0.000000e+00 : f32
    %7 = vector.broadcast %cst_6 : f32 to vector<512x128xf32>
    %8 = arith.maximumf %6, %7 : vector<512x128xf32>
    %c1 = arith.constant 1 : index
    %c0_7 = arith.constant 0 : index
    %c0_8 = arith.constant 0 : index
    %9 = vector.load %arg1[%c1, %c0_7, %c0_8] : memref<8x512x8xbf16, #tpu.memory_space<vmem>>, vector<1x512x8xbf16>
    %10 = vector.shape_cast %9 : vector<1x512x8xbf16> to vector<512x8xbf16>
    %c0_9 = arith.constant 0 : index
    %c0_10 = arith.constant 0 : index
    %11 = vector.load %arg2[%c0_9, %c0_10] : memref<8x128xbf16, #tpu.memory_space<vmem>>, vector<8x128xbf16>
    %cst_11 = arith.constant dense<0.000000e+00> : vector<512x128xf32>
    %12 = tpu.matmul %10, %11, %cst_11 {dimension_numbers = #tpu.dot_dimension_numbers<[1], [0], [0], [1], [0, 0, 1, 1], [], []>} : vector<512x8xbf16>, vector<8x128xbf16>, vector<512x128xf32> -> vector<512x128xf32>
    %c0_12 = arith.constant 0 : index
    %c0_13 = arith.constant 0 : index
    %13 = vector.load %arg3[%c0_12, %c0_13] : memref<1x128xf32, #tpu.memory_space<vmem>>, vector<1x128xf32>
    %14 = vector.broadcast %13 : vector<1x128xf32> to vector<512x128xf32>
    %15 = arith.addf %12, %14 : vector<512x128xf32>
    %cst_14 = arith.constant 0.000000e+00 : f32
    %16 = vector.broadcast %cst_14 : f32 to vector<512x128xf32>
    %17 = arith.maximumf %15, %16 : vector<512x128xf32>
    %18 = arith.addf %8, %17 : vector<512x128xf32>
    %c2 = arith.constant 2 : index
    %c0_15 = arith.constant 0 : index
    %c0_16 = arith.constant 0 : index
    %19 = vector.load %arg1[%c2, %c0_15, %c0_16] : memref<8x512x8xbf16, #tpu.memory_space<vmem>>, vector<1x512x8xbf16>
    %20 = vector.shape_cast %19 : vector<1x512x8xbf16> to vector<512x8xbf16>
    %c0_17 = arith.constant 0 : index
    %c0_18 = arith.constant 0 : index
    %21 = vector.load %arg2[%c0_17, %c0_18] : memref<8x128xbf16, #tpu.memory_space<vmem>>, vector<8x128xbf16>
    %cst_19 = arith.constant dense<0.000000e+00> : vector<512x128xf32>
    %22 = tpu.matmul %20, %21, %cst_19 {dimension_numbers = #tpu.dot_dimension_numbers<[1], [0], [0], [1], [0, 0, 1, 1], [], []>} : vector<512x8xbf16>, vector<8x128xbf16>, vector<512x128xf32> -> vector<512x128xf32>
    %c0_20 = arith.constant 0 : index
    %c0_21 = arith.constant 0 : index
    %23 = vector.load %arg3[%c0_20, %c0_21] : memref<1x128xf32, #tpu.memory_space<vmem>>, vector<1x128xf32>
    %24 = vector.broadcast %23 : vector<1x128xf32> to vector<512x128xf32>
    %25 = arith.addf %22, %24 : vector<512x128xf32>
    %cst_22 = arith.constant 0.000000e+00 : f32
    %26 = vector.broadcast %cst_22 : f32 to vector<512x128xf32>
    %27 = arith.maximumf %25, %26 : vector<512x128xf32>
    %28 = arith.addf %18, %27 : vector<512x128xf32>
    %c3 = arith.constant 3 : index
    %c0_23 = arith.constant 0 : index
    %c0_24 = arith.constant 0 : index
    %29 = vector.load %arg1[%c3, %c0_23, %c0_24] : memref<8x512x8xbf16, #tpu.memory_space<vmem>>, vector<1x512x8xbf16>
    %30 = vector.shape_cast %29 : vector<1x512x8xbf16> to vector<512x8xbf16>
    %c0_25 = arith.constant 0 : index
    %c0_26 = arith.constant 0 : index
    %31 = vector.load %arg2[%c0_25, %c0_26] : memref<8x128xbf16, #tpu.memory_space<vmem>>, vector<8x128xbf16>
    %cst_27 = arith.constant dense<0.000000e+00> : vector<512x128xf32>
    %32 = tpu.matmul %30, %31, %cst_27 {dimension_numbers = #tpu.dot_dimension_numbers<[1], [0], [0], [1], [0, 0, 1, 1], [], []>} : vector<512x8xbf16>, vector<8x128xbf16>, vector<512x128xf32> -> vector<512x128xf32>
    %c0_28 = arith.constant 0 : index
    %c0_29 = arith.constant 0 : index
    %33 = vector.load %arg3[%c0_28, %c0_29] : memref<1x128xf32, #tpu.memory_space<vmem>>, vector<1x128xf32>
    %34 = vector.broadcast %33 : vector<1x128xf32> to vector<512x128xf32>
    %35 = arith.addf %32, %34 : vector<512x128xf32>
    %cst_30 = arith.constant 0.000000e+00 : f32
    %36 = vector.broadcast %cst_30 : f32 to vector<512x128xf32>
    %37 = arith.maximumf %35, %36 : vector<512x128xf32>
    %38 = arith.addf %28, %37 : vector<512x128xf32>
    %c4 = arith.constant 4 : index
    %c0_31 = arith.constant 0 : index
    %c0_32 = arith.constant 0 : index
    %39 = vector.load %arg1[%c4, %c0_31, %c0_32] : memref<8x512x8xbf16, #tpu.memory_space<vmem>>, vector<1x512x8xbf16>
    %40 = vector.shape_cast %39 : vector<1x512x8xbf16> to vector<512x8xbf16>
    %c0_33 = arith.constant 0 : index
    %c0_34 = arith.constant 0 : index
    %41 = vector.load %arg2[%c0_33, %c0_34] : memref<8x128xbf16, #tpu.memory_space<vmem>>, vector<8x128xbf16>
    %cst_35 = arith.constant dense<0.000000e+00> : vector<512x128xf32>
    %42 = tpu.matmul %40, %41, %cst_35 {dimension_numbers = #tpu.dot_dimension_numbers<[1], [0], [0], [1], [0, 0, 1, 1], [], []>} : vector<512x8xbf16>, vector<8x128xbf16>, vector<512x128xf32> -> vector<512x128xf32>
    %c0_36 = arith.constant 0 : index
    %c0_37 = arith.constant 0 : index
    %43 = vector.load %arg3[%c0_36, %c0_37] : memref<1x128xf32, #tpu.memory_space<vmem>>, vector<1x128xf32>
    %44 = vector.broadcast %43 : vector<1x128xf32> to vector<512x128xf32>
    %45 = arith.addf %42, %44 : vector<512x128xf32>
    %cst_38 = arith.constant 0.000000e+00 : f32
    %46 = vector.broadcast %cst_38 : f32 to vector<512x128xf32>
    %47 = arith.maximumf %45, %46 : vector<512x128xf32>
    %48 = arith.addf %38, %47 : vector<512x128xf32>
    %c5 = arith.constant 5 : index
    %c0_39 = arith.constant 0 : index
    %c0_40 = arith.constant 0 : index
    %49 = vector.load %arg1[%c5, %c0_39, %c0_40] : memref<8x512x8xbf16, #tpu.memory_space<vmem>>, vector<1x512x8xbf16>
    %50 = vector.shape_cast %49 : vector<1x512x8xbf16> to vector<512x8xbf16>
    %c0_41 = arith.constant 0 : index
    %c0_42 = arith.constant 0 : index
    %51 = vector.load %arg2[%c0_41, %c0_42] : memref<8x128xbf16, #tpu.memory_space<vmem>>, vector<8x128xbf16>
    %cst_43 = arith.constant dense<0.000000e+00> : vector<512x128xf32>
    %52 = tpu.matmul %50, %51, %cst_43 {dimension_numbers = #tpu.dot_dimension_numbers<[1], [0], [0], [1], [0, 0, 1, 1], [], []>} : vector<512x8xbf16>, vector<8x128xbf16>, vector<512x128xf32> -> vector<512x128xf32>
    %c0_44 = arith.constant 0 : index
    %c0_45 = arith.constant 0 : index
    %53 = vector.load %arg3[%c0_44, %c0_45] : memref<1x128xf32, #tpu.memory_space<vmem>>, vector<1x128xf32>
    %54 = vector.broadcast %53 : vector<1x128xf32> to vector<512x128xf32>
    %55 = arith.addf %52, %54 : vector<512x128xf32>
    %cst_46 = arith.constant 0.000000e+00 : f32
    %56 = vector.broadcast %cst_46 : f32 to vector<512x128xf32>
    %57 = arith.maximumf %55, %56 : vector<512x128xf32>
    %58 = arith.addf %48, %57 : vector<512x128xf32>
    %c6 = arith.constant 6 : index
    %c0_47 = arith.constant 0 : index
    %c0_48 = arith.constant 0 : index
    %59 = vector.load %arg1[%c6, %c0_47, %c0_48] : memref<8x512x8xbf16, #tpu.memory_space<vmem>>, vector<1x512x8xbf16>
    %60 = vector.shape_cast %59 : vector<1x512x8xbf16> to vector<512x8xbf16>
    %c0_49 = arith.constant 0 : index
    %c0_50 = arith.constant 0 : index
    %61 = vector.load %arg2[%c0_49, %c0_50] : memref<8x128xbf16, #tpu.memory_space<vmem>>, vector<8x128xbf16>
    %cst_51 = arith.constant dense<0.000000e+00> : vector<512x128xf32>
    %62 = tpu.matmul %60, %61, %cst_51 {dimension_numbers = #tpu.dot_dimension_numbers<[1], [0], [0], [1], [0, 0, 1, 1], [], []>} : vector<512x8xbf16>, vector<8x128xbf16>, vector<512x128xf32> -> vector<512x128xf32>
    %c0_52 = arith.constant 0 : index
    %c0_53 = arith.constant 0 : index
    %63 = vector.load %arg3[%c0_52, %c0_53] : memref<1x128xf32, #tpu.memory_space<vmem>>, vector<1x128xf32>
    %64 = vector.broadcast %63 : vector<1x128xf32> to vector<512x128xf32>
    %65 = arith.addf %62, %64 : vector<512x128xf32>
    %cst_54 = arith.constant 0.000000e+00 : f32
    %66 = vector.broadcast %cst_54 : f32 to vector<512x128xf32>
    %67 = arith.maximumf %65, %66 : vector<512x128xf32>
    %68 = arith.addf %58, %67 : vector<512x128xf32>
    %c7 = arith.constant 7 : index
    %c0_55 = arith.constant 0 : index
    %c0_56 = arith.constant 0 : index
    %69 = vector.load %arg1[%c7, %c0_55, %c0_56] : memref<8x512x8xbf16, #tpu.memory_space<vmem>>, vector<1x512x8xbf16>
    %70 = vector.shape_cast %69 : vector<1x512x8xbf16> to vector<512x8xbf16>
    %c0_57 = arith.constant 0 : index
    %c0_58 = arith.constant 0 : index
    %71 = vector.load %arg2[%c0_57, %c0_58] : memref<8x128xbf16, #tpu.memory_space<vmem>>, vector<8x128xbf16>
    %cst_59 = arith.constant dense<0.000000e+00> : vector<512x128xf32>
    %72 = tpu.matmul %70, %71, %cst_59 {dimension_numbers = #tpu.dot_dimension_numbers<[1], [0], [0], [1], [0, 0, 1, 1], [], []>} : vector<512x8xbf16>, vector<8x128xbf16>, vector<512x128xf32> -> vector<512x128xf32>
    %c0_60 = arith.constant 0 : index
    %c0_61 = arith.constant 0 : index
    %73 = vector.load %arg3[%c0_60, %c0_61] : memref<1x128xf32, #tpu.memory_space<vmem>>, vector<1x128xf32>
    %74 = vector.broadcast %73 : vector<1x128xf32> to vector<512x128xf32>
    %75 = arith.addf %72, %74 : vector<512x128xf32>
    %cst_62 = arith.constant 0.000000e+00 : f32
    %76 = vector.broadcast %cst_62 : f32 to vector<512x128xf32>
    %77 = arith.maximumf %75, %76 : vector<512x128xf32>
    %78 = arith.addf %68, %77 : vector<512x128xf32>
    %cst_63 = arith.constant 1.250000e-01 : f32
    %79 = vector.broadcast %cst_63 : f32 to vector<512x128xf32>
    %80 = arith.mulf %78, %79 : vector<512x128xf32>
    %81 = arith.truncf %80 : vector<512x128xf32> to vector<512x128xbf16>
    %c0_64 = arith.constant 0 : index
    %c0_65 = arith.constant 0 : index
    %82 = vector.load %arg4[%c0_64, %c0_65] : memref<128x128xbf16, #tpu.memory_space<vmem>>, vector<128x128xbf16>
    %cst_66 = arith.constant dense<0.000000e+00> : vector<512x128xf32>
    %83 = tpu.matmul %81, %82, %cst_66 {dimension_numbers = #tpu.dot_dimension_numbers<[1], [0], [0], [1], [0, 0, 1, 1], [], []>} : vector<512x128xbf16>, vector<128x128xbf16>, vector<512x128xf32> -> vector<512x128xf32>
    %c0_67 = arith.constant 0 : index
    %c0_68 = arith.constant 0 : index
    %84 = vector.load %arg5[%c0_67, %c0_68] : memref<1x128xf32, #tpu.memory_space<vmem>>, vector<1x128xf32>
    %85 = vector.broadcast %84 : vector<1x128xf32> to vector<512x128xf32>
    %86 = arith.addf %83, %85 : vector<512x128xf32>
    %cst_69 = arith.constant 0.000000e+00 : f32
    %87 = vector.broadcast %cst_69 : f32 to vector<512x128xf32>
    %88 = arith.maximumf %86, %87 : vector<512x128xf32>
    %89 = arith.truncf %88 : vector<512x128xf32> to vector<512x128xbf16>
    %c0_70 = arith.constant 0 : index
    %c0_71 = arith.constant 0 : index
    %90 = vector.load %arg6[%c0_70, %c0_71] : memref<128x128xbf16, #tpu.memory_space<vmem>>, vector<128x128xbf16>
    %cst_72 = arith.constant dense<0.000000e+00> : vector<512x128xf32>
    %91 = tpu.matmul %89, %90, %cst_72 {dimension_numbers = #tpu.dot_dimension_numbers<[1], [0], [0], [1], [0, 0, 1, 1], [], []>} : vector<512x128xbf16>, vector<128x128xbf16>, vector<512x128xf32> -> vector<512x128xf32>
    %c0_73 = arith.constant 0 : index
    %c0_74 = arith.constant 0 : index
    %92 = vector.load %arg7[%c0_73, %c0_74] : memref<1x128xf32, #tpu.memory_space<vmem>>, vector<1x128xf32>
    %93 = vector.broadcast %92 : vector<1x128xf32> to vector<512x128xf32>
    %94 = arith.addf %91, %93 : vector<512x128xf32>
    %cst_75 = arith.constant 0.000000e+00 : f32
    %95 = vector.broadcast %cst_75 : f32 to vector<512x128xf32>
    %96 = arith.maximumf %94, %95 : vector<512x128xf32>
    %c0_76 = arith.constant 0 : index
    %c0_77 = arith.constant 0 : index
    %97 = vector.load %arg8[%c0_76, %c0_77] : memref<1x128xf32, #tpu.memory_space<vmem>>, vector<1x128xf32>
    %98 = vector.broadcast %97 : vector<1x128xf32> to vector<512x128xf32>
    %99 = arith.mulf %96, %98 : vector<512x128xf32>
    %cst_78 = arith.constant dense<0.000000e+00> : vector<512xf32>
    %100 = vector.multi_reduction <add>, %99, %cst_78 [1] : vector<512x128xf32> to vector<512xf32>
    %101 = vector.shape_cast %100 : vector<512xf32> to vector<512x1xf32>
    %c0_79 = arith.constant 0 : index
    %c0_80 = arith.constant 0 : index
    %102 = vector.load %arg9[%c0_79, %c0_80] : memref<1x1xf32, #tpu.memory_space<vmem>>, vector<1x1xf32>
    %103 = vector.broadcast %102 : vector<1x1xf32> to vector<512x1xf32>
    %104 = arith.addf %101, %103 : vector<512x1xf32>
    %105 = arith.negf %104 : vector<512x1xf32>
    %106 = math.exp %105 : vector<512x1xf32>
    %cst_81 = arith.constant 1.000000e+00 : f32
    %107 = vector.broadcast %cst_81 : f32 to vector<512x1xf32>
    %108 = arith.addf %107, %106 : vector<512x1xf32>
    %109 = arith.divf %107, %108 : vector<512x1xf32>
    %c0_82 = arith.constant 0 : index
    %c0_83 = arith.constant 0 : index
    %110 = vector.load %arg10[%c0_82, %c0_83] : memref<512x1xf32, #tpu.memory_space<vmem>>, vector<512x1xf32>
    tpu.vector_store %arg10[%c0_82, %c0_83], %109 {strides = array<i32>} : memref<512x1xf32, #tpu.memory_space<vmem>>, vector<512x1xf32>,
    return
  }
  func.func @transform_0(%arg0: i32) -> (i32, i32, i32) {
    %c0_i32 = arith.constant 0 : i32
    %c0_i32_0 = arith.constant 0 : i32
    %c0_i32_1 = arith.constant 0 : i32
    return %c0_i32, %arg0, %c0_i32_0 : i32, i32, i32
  }
  func.func @transform_1(%arg0: i32) -> (i32, i32) {
    %c0_i32 = arith.constant 0 : i32
    %c0_i32_0 = arith.constant 0 : i32
    %c0_i32_1 = arith.constant 0 : i32
    return %c0_i32, %c0_i32_0 : i32, i32
  }
  func.func @transform_2(%arg0: i32) -> (i32, i32) {
    %c0_i32 = arith.constant 0 : i32
    %c0_i32_0 = arith.constant 0 : i32
    %c0_i32_1 = arith.constant 0 : i32
    return %c0_i32, %c0_i32_0 : i32, i32
  }
  func.func @transform_3(%arg0: i32) -> (i32, i32) {
    %c0_i32 = arith.constant 0 : i32
    %c0_i32_0 = arith.constant 0 : i32
    %c0_i32_1 = arith.constant 0 : i32
    return %c0_i32, %c0_i32_0 : i32, i32
  }
  func.func @transform_4(%arg0: i32) -> (i32, i32) {
    %c0_i32 = arith.constant 0 : i32
    %c0_i32_0 = arith.constant 0 : i32
    %c0_i32_1 = arith.constant 0 : i32
    return %c0_i32, %c0_i32_0 : i32, i32
  }
  func.func @transform_5(%arg0: i32) -> (i32, i32) {
    %c0_i32 = arith.constant 0 : i32
    %c0_i32_0 = arith.constant 0 : i32
    %c0_i32_1 = arith.constant 0 : i32
    return %c0_i32, %c0_i32_0 : i32, i32
  }
  func.func @transform_6(%arg0: i32) -> (i32, i32) {
    %c0_i32 = arith.constant 0 : i32
    %c0_i32_0 = arith.constant 0 : i32
    %c0_i32_1 = arith.constant 0 : i32
    return %c0_i32, %c0_i32_0 : i32, i32
  }
  func.func @transform_7(%arg0: i32) -> (i32, i32) {
    %c0_i32 = arith.constant 0 : i32
    %c0_i32_0 = arith.constant 0 : i32
    %c0_i32_1 = arith.constant 0 : i32
    return %c0_i32, %c0_i32_0 : i32, i32
  }
  func.func @transform_8(%arg0: i32) -> (i32, i32) {
    %c0_i32 = arith.constant 0 : i32
    %c0_i32_0 = arith.constant 0 : i32
    %c0_i32_1 = arith.constant 0 : i32
    return %c0_i32, %c0_i32_0 : i32, i32
  }
  func.func @transform_9(%arg0: i32) -> (i32, i32) {
    %c0_i32 = arith.constant 0 : i32
    %c0_i32_0 = arith.constant 0 : i32
    return %arg0, %c0_i32 : i32, i32
  }
}

</mosaic_0001>

<bundles_post_ra>
// kernel: tpu_custom_call.1
= control target key start
LH: loop header
LB: loop body
LE: loop exit
PB: predicated region body
PF: predicated region fallthrough
CT: control target
= control target key end

     0   :  { %s17533_s0 = inlined_call_operand.vmem [shape: bf16[8,1024,8], index: 0, kind: input, shape index: {}]   ;;  %s17534_s1 = inlined_call_operand.vmem [shape: bf16[8,128], index: 1, kind: input, shape index: {}]   ;;  %s17535_s2 = inlined_call_operand.vmem [shape: f32[1,128], index: 2, kind: input, shape index: {}]   ;;  %s17536_s3 = inlined_call_operand.vmem [shape: bf16[128,128], index: 3, kind: input, shape index: {}]   ;;  %s17537_s4 = inlined_call_operand.vmem [shape: f32[1,128], index: 4, kind: input, shape index: {}]   ;;  %s17538_s5 = inlined_call_operand.vmem [shape: bf16[128,128], index: 5, kind: input, shape index: {}]   ;;  %s17539_s6 = inlined_call_operand.vmem [shape: f32[1,128], index: 6, kind: input, shape index: {}]   ;;  %s17540_s7 = inlined_call_operand.vmem [shape: f32[1,128], index: 7, kind: input, shape index: {}]   ;;  %s17541_s8 = inlined_call_operand.<no memory space> [shape: f32[1,1], index: 8, kind: input, shape index: {}]   ;;  %s17542_s9 = inlined_call_operand.vmem [shape: f32[1024,1], index: 9, kind: output, shape index: {}]  }
   0x1   :  { %v14_v0 = vstv %s17541_s8 }
   0x2   :  { %15 = vst [vmem:[#allocation2] sm:$0x1] %v14_v0 }
   0x3   :  { %s14852_s11 = smov 0   ;;  %s14854_s12 = smov 0  }
   0x4   :  { %s14856_s13 = smov 0  }
   0x5 LB: > { %s12119_s8 = sadd.s32 4294967295, %s14797_s13   ;;  %s14869_s14 = sadd.s32 1, %s14797_s13   ;;  %s14797_s13 = sphi %s14856_s13, %s17685_s13   ;;  %s14793_s12 = sphi %s14854_s12, %s17684_s12   ;;  %s14789_s11 = sphi %s14852_s11, %s17683_s11  }
   0x6   : > { %s25_s15 = ssub.s32 %s14797_s13, %s14869_s14  ;;  %s28_s16 = sadd.s32 1, %s14793_s12 }
   0x7   : > { %p26_p0 = scmp.eq.s32.totalorder %s25_s15, 0  ;;  %p35_p1 = scmp.ne.s32.totalorder %s14793_s12, %s14789_s11 }
   0x8   : > { %p36_p2 = scmp.eq.s32.totalorder %s14797_s13, 0  ;;  %p12122_p4 = scmp.ge.s32.totalorder %s14797_s13, 2 }
   0x9   : > { %s14878_s17 = scalar_select %p26_p0, %s14793_s12, %s28_s16  }
   0xa   : > { %p37_p3 = por %p36_p2, %p35_p1  ;;  %279 = sbr.rel (%p12122_p4) target bundleno = 149 (0x95), region = 48 }
  0x11   : > { %282 = sbr.rel (!%p37_p3) target bundleno = 149 (0x95), region = 52  ;;  %s284_s18 = sand.u32 (%p37_p3), 1, %s14793_s12  }
  0x12   : > { %s13177_s19 = sshll.u32 (%p37_p3), %s14797_s13, 8  ;;  %s12123_s20 = sshll.u32 (%p37_p3), %s284_s18, 11 }
  0x13   : > { %s14886_s23 = scalar_lea.vmem (%p37_p3), %s17533_s0, %s13177_s19  ;;  %s14891_s24 = scalar_lea.vmem (%p37_p3), [#allocation3], %s12123_s20 }
  0x14   : > { %v305_v1 = vld [vmem:[%s14886_s23] sm:$0xff] (%p37_p3)   ;;  %v309_v2 = vld [vmem:[%s14886_s23 + $0x8] sm:$0xff] (%p37_p3)   ;;  %v313_v3 = vld [vmem:[%s14886_s23 + $0x10] sm:$0xff] (%p37_p3)  }
  0x15   : > { %306 = vst [vmem:[%s14891_s24] sm:$0xff] (%p37_p3), %v305_v1   ;;  %310 = vst [vmem:[%s14891_s24 + $0x8] sm:$0xff] (%p37_p3), %v309_v2   ;;  %v317_v4 = vld [vmem:[%s14886_s23 + $0x18] sm:$0xff] (%p37_p3)   ;;  %v321_v5 = vld [vmem:[%s14886_s23 + $0x20] sm:$0xff] (%p37_p3)  }
  0x16   : > { %314 = vst [vmem:[%s14891_s24 + $0x10] sm:$0xff] (%p37_p3), %v313_v3   ;;  %v325_v6 = vld [vmem:[%s14886_s23 + $0x28] sm:$0xff] (%p37_p3)   ;;  %318 = vst [vmem:[%s14891_s24 + $0x18] sm:$0xff] (%p37_p3), %v317_v4   ;;  %v329_v7 = vld [vmem:[%s14886_s23 + $0x30] sm:$0xff] (%p37_p3)  }
  0x17   : > { %322 = vst [vmem:[%s14891_s24 + $0x20] sm:$0xff] (%p37_p3), %v321_v5   ;;  %326 = vst [vmem:[%s14891_s24 + $0x28] sm:$0xff] (%p37_p3), %v325_v6   ;;  %v333_v8 = vld [vmem:[%s14886_s23 + $0x38] sm:$0xff] (%p37_p3)   ;;  %v337_v9 = vld [vmem:[%s14886_s23 + $0x40] sm:$0xff] (%p37_p3)  }
  0x18   : > { %330 = vst [vmem:[%s14891_s24 + $0x30] sm:$0xff] %v329_v7   ;;  %334 = vst [vmem:[%s14891_s24 + $0x38] sm:$0xff] %v333_v8   ;;  %v341_v10 = vld [vmem:[%s14886_s23 + $0x48] sm:$0xff]   ;;  %v345_v11 = vld [vmem:[%s14886_s23 + $0x50] sm:$0xff]  }
  0x19   : > { %338 = vst [vmem:[%s14891_s24 + $0x40] sm:$0xff] %v337_v9   ;;  %v349_v12 = vld [vmem:[%s14886_s23 + $0x58] sm:$0xff]   ;;  %342 = vst [vmem:[%s14891_s24 + $0x48] sm:$0xff] %v341_v10   ;;  %v353_v13 = vld [vmem:[%s14886_s23 + $0x60] sm:$0xff]  }
  0x1a   : > { %346 = vst [vmem:[%s14891_s24 + $0x50] sm:$0xff] %v345_v11   ;;  %350 = vst [vmem:[%s14891_s24 + $0x58] sm:$0xff] %v349_v12   ;;  %v357_v14 = vld [vmem:[%s14886_s23 + $0x68] sm:$0xff]   ;;  %v361_v15 = vld [vmem:[%s14886_s23 + $0x70] sm:$0xff]  }
  0x1b   : > { %354 = vst [vmem:[%s14891_s24 + $0x60] sm:$0xff] %v353_v13   ;;  %358 = vst [vmem:[%s14891_s24 + $0x68] sm:$0xff] %v357_v14   ;;  %v365_v16 = vld [vmem:[%s14886_s23 + $0x78] sm:$0xff]   ;;  %v369_v17 = vld [vmem:[%s14886_s23 + $0x80] sm:$0xff]  }
  0x1c   : > { %362 = vst [vmem:[%s14891_s24 + $0x70] sm:$0xff] %v361_v15   ;;  %v373_v18 = vld [vmem:[%s14886_s23 + $0x88] sm:$0xff]   ;;  %366 = vst [vmem:[%s14891_s24 + $0x78] sm:$0xff] %v365_v16   ;;  %v377_v19 = vld [vmem:[%s14886_s23 + $0x90] sm:$0xff]  }
  0x1d   : > { %370 = vst [vmem:[%s14891_s24 + $0x80] sm:$0xff] %v369_v17   ;;  %374 = vst [vmem:[%s14891_s24 + $0x88] sm:$0xff] %v373_v18   ;;  %v381_v20 = vld [vmem:[%s14886_s23 + $0x98] sm:$0xff]   ;;  %v385_v21 = vld [vmem:[%s14886_s23 + $0xa0] sm:$0xff]  }
  0x1e   : > { %378 = vst [vmem:[%s14891_s24 + $0x90] sm:$0xff] %v377_v19   ;;  %382 = vst [vmem:[%s14891_s24 + $0x98] sm:$0xff] %v381_v20   ;;  %v389_v22 = vld [vmem:[%s14886_s23 + $0xa8] sm:$0xff]   ;;  %v393_v23 = vld [vmem:[%s14886_s23 + $0xb0] sm:$0xff]  }
  0x1f   : > { %386 = vst [vmem:[%s14891_s24 + $0xa0] sm:$0xff] %v385_v21   ;;  %v397_v24 = vld [vmem:[%s14886_s23 + $0xb8] sm:$0xff]   ;;  %390 = vst [vmem:[%s14891_s24 + $0xa8] sm:$0xff] %v389_v22   ;;  %v401_v25 = vld [vmem:[%s14886_s23 + $0xc0] sm:$0xff]  }
  0x20   : > { %394 = vst [vmem:[%s14891_s24 + $0xb0] sm:$0xff] %v393_v23   ;;  %398 = vst [vmem:[%s14891_s24 + $0xb8] sm:$0xff] %v397_v24   ;;  %v405_v26 = vld [vmem:[%s14886_s23 + $0xc8] sm:$0xff]   ;;  %v409_v27 = vld [vmem:[%s14886_s23 + $0xd0] sm:$0xff]  }
  0x21   : > { %402 = vst [vmem:[%s14891_s24 + $0xc0] sm:$0xff] %v401_v25   ;;  %406 = vst [vmem:[%s14891_s24 + $0xc8] sm:$0xff] %v405_v26   ;;  %v413_v28 = vld [vmem:[%s14886_s23 + $0xd8] sm:$0xff]   ;;  %v417_v29 = vld [vmem:[%s14886_s23 + $0xe0] sm:$0xff]  }
  0x22   : > { %410 = vst [vmem:[%s14891_s24 + $0xd0] sm:$0xff] %v409_v27   ;;  %v421_v30 = vld [vmem:[%s14886_s23 + $0xe8] sm:$0xff]   ;;  %414 = vst [vmem:[%s14891_s24 + $0xd8] sm:$0xff] %v413_v28   ;;  %v425_v31 = vld [vmem:[%s14886_s23 + $0xf0] sm:$0xff]  }
  0x23   : > { %418 = vst [vmem:[%s14891_s24 + $0xe0] sm:$0xff] %v417_v29   ;;  %422 = vst [vmem:[%s14891_s24 + $0xe8] sm:$0xff] %v421_v30   ;;  %v429_v32 = vld [vmem:[%s14886_s23 + $0xf8] sm:$0xff]   ;;  %v433_v33 = vld [vmem:[%s14886_s23 + $0x200] sm:$0xff]  }
  0x24   : > { %426 = vst [vmem:[%s14891_s24 + $0xf0] sm:$0xff] %v425_v31   ;;  %430 = vst [vmem:[%s14891_s24 + $0xf8] sm:$0xff] %v429_v32   ;;  %v437_v34 = vld [vmem:[%s14886_s23 + $0x208] sm:$0xff]   ;;  %v441_v35 = vld [vmem:[%s14886_s23 + $0x210] sm:$0xff]  }
  0x25   : > { %434 = vst [vmem:[%s14891_s24 + $0x100] sm:$0xff] %v433_v33   ;;  %v445_v36 = vld [vmem:[%s14886_s23 + $0x218] sm:$0xff]   ;;  %438 = vst [vmem:[%s14891_s24 + $0x108] sm:$0xff] %v437_v34   ;;  %v449_v37 = vld [vmem:[%s14886_s23 + $0x220] sm:$0xff]  }
  0x26   : > { %442 = vst [vmem:[%s14891_s24 + $0x110] sm:$0xff] %v441_v35   ;;  %446 = vst [vmem:[%s14891_s24 + $0x118] sm:$0xff] %v445_v36   ;;  %v453_v38 = vld [vmem:[%s14886_s23 + $0x228] sm:$0xff]   ;;  %v457_v39 = vld [vmem:[%s14886_s23 + $0x230] sm:$0xff]  }
  0x27   : > { %450 = vst [vmem:[%s14891_s24 + $0x120] sm:$0xff] %v449_v37   ;;  %454 = vst [vmem:[%s14891_s24 + $0x128] sm:$0xff] %v453_v38   ;;  %v461_v40 = vld [vmem:[%s14886_s23 + $0x238] sm:$0xff]   ;;  %v465_v41 = vld [vmem:[%s14886_s23 + $0x240] sm:$0xff]  }
  0x28   : > { %458 = vst [vmem:[%s14891_s24 + $0x130] sm:$0xff] %v457_v39   ;;  %v469_v42 = vld [vmem:[%s14886_s23 + $0x248] sm:$0xff]   ;;  %462 = vst [vmem:[%s14891_s24 + $0x138] sm:$0xff] %v461_v40   ;;  %v473_v43 = vld [vmem:[%s14886_s23 + $0x250] sm:$0xff]  }
  0x29   : > { %466 = vst [vmem:[%s14891_s24 + $0x140] sm:$0xff] %v465_v41   ;;  %470 = vst [vmem:[%s14891_s24 + $0x148] sm:$0xff] %v469_v42   ;;  %v477_v44 = vld [vmem:[%s14886_s23 + $0x258] sm:$0xff]   ;;  %v481_v45 = vld [vmem:[%s14886_s23 + $0x260] sm:$0xff]  }
  0x2a   : > { %474 = vst [vmem:[%s14891_s24 + $0x150] sm:$0xff] %v473_v43   ;;  %478 = vst [vmem:[%s14891_s24 + $0x158] sm:$0xff] %v477_v44   ;;  %v485_v46 = vld [vmem:[%s14886_s23 + $0x268] sm:$0xff]   ;;  %v489_v47 = vld [vmem:[%s14886_s23 + $0x270] sm:$0xff]  }
  0x2b   : > { %482 = vst [vmem:[%s14891_s24 + $0x160] sm:$0xff] %v481_v45   ;;  %v493_v48 = vld [vmem:[%s14886_s23 + $0x278] sm:$0xff]   ;;  %486 = vst [vmem:[%s14891_s24 + $0x168] sm:$0xff] %v485_v46   ;;  %v497_v49 = vld [vmem:[%s14886_s23 + $0x280] sm:$0xff]  }
  0x2c   : > { %490 = vst [vmem:[%s14891_s24 + $0x170] sm:$0xff] %v489_v47   ;;  %494 = vst [vmem:[%s14891_s24 + $0x178] sm:$0xff] %v493_v48   ;;  %v501_v50 = vld [vmem:[%s14886_s23 + $0x288] sm:$0xff]   ;;  %v505_v51 = vld [vmem:[%s14886_s23 + $0x290] sm:$0xff]  }
  0x2d   : > { %498 = vst [vmem:[%s14891_s24 + $0x180] sm:$0xff] %v497_v49   ;;  %502 = vst [vmem:[%s14891_s24 + $0x188] sm:$0xff] %v501_v50   ;;  %v509_v52 = vld [vmem:[%s14886_s23 + $0x298] sm:$0xff]   ;;  %v513_v53 = vld [vmem:[%s14886_s23 + $0x2a0] sm:$0xff]  }
  0x2e   : > { %506 = vst [vmem:[%s14891_s24 + $0x190] sm:$0xff] %v505_v51   ;;  %v517_v54 = vld [vmem:[%s14886_s23 + $0x2a8] sm:$0xff]   ;;  %510 = vst [vmem:[%s14891_s24 + $0x198] sm:$0xff] %v509_v52   ;;  %v521_v55 = vld [vmem:[%s14886_s23 + $0x2b0] sm:$0xff]  }
  0x2f   : > { %514 = vst [vmem:[%s14891_s24 + $0x1a0] sm:$0xff] %v513_v53   ;;  %518 = vst [vmem:[%s14891_s24 + $0x1a8] sm:$0xff] %v517_v54   ;;  %v525_v56 = vld [vmem:[%s14886_s23 + $0x2b8] sm:$0xff]   ;;  %v529_v57 = vld [vmem:[%s14886_s23 + $0x2c0] sm:$0xff]  }
  0x30   : > { %522 = vst [vmem:[%s14891_s24 + $0x1b0] sm:$0xff] %v521_v55   ;;  %526 = vst [vmem:[%s14891_s24 + $0x1b8] sm:$0xff] %v525_v56   ;;  %v533_v58 = vld [vmem:[%s14886_s23 + $0x2c8] sm:$0xff]   ;;  %v537_v59 = vld [vmem:[%s14886_s23 + $0x2d0] sm:$0xff]  }
  0x31   : > { %530 = vst [vmem:[%s14891_s24 + $0x1c0] sm:$0xff] %v529_v57   ;;  %v541_v60 = vld [vmem:[%s14886_s23 + $0x2d8] sm:$0xff]   ;;  %534 = vst [vmem:[%s14891_s24 + $0x1c8] sm:$0xff] %v533_v58   ;;  %v545_v61 = vld [vmem:[%s14886_s23 + $0x2e0] sm:$0xff]  }
  0x32   : > { %538 = vst [vmem:[%s14891_s24 + $0x1d0] sm:$0xff] %v537_v59   ;;  %542 = vst [vmem:[%s14891_s24 + $0x1d8] sm:$0xff] %v541_v60   ;;  %v549_v62 = vld [vmem:[%s14886_s23 + $0x2e8] sm:$0xff]   ;;  %v553_v63 = vld [vmem:[%s14886_s23 + $0x2f0] sm:$0xff]  }
  0x33   : > { %546 = vst [vmem:[%s14891_s24 + $0x1e0] sm:$0xff] %v545_v61   ;;  %550 = vst [vmem:[%s14891_s24 + $0x1e8] sm:$0xff] %v549_v62   ;;  %v557_v0 = vld [vmem:[%s14886_s23 + $0x2f8] sm:$0xff]   ;;  %v561_v1 = vld [vmem:[%s14886_s23 + $0x400] sm:$0xff]  }
  0x34   : > { %554 = vst [vmem:[%s14891_s24 + $0x1f0] sm:$0xff] %v553_v63   ;;  %v565_v2 = vld [vmem:[%s14886_s23 + $0x408] sm:$0xff]   ;;  %558 = vst [vmem:[%s14891_s24 + $0x1f8] sm:$0xff] %v557_v0   ;;  %v569_v3 = vld [vmem:[%s14886_s23 + $0x410] sm:$0xff]  }
  0x35   : > { %562 = vst [vmem:[%s14891_s24 + $0x200] sm:$0xff] %v561_v1   ;;  %566 = vst [vmem:[%s14891_s24 + $0x208] sm:$0xff] %v565_v2   ;;  %v573_v4 = vld [vmem:[%s14886_s23 + $0x418] sm:$0xff]   ;;  %v577_v5 = vld [vmem:[%s14886_s23 + $0x420] sm:$0xff]  }
  0x36   : > { %570 = vst [vmem:[%s14891_s24 + $0x210] sm:$0xff] %v569_v3   ;;  %574 = vst [vmem:[%s14891_s24 + $0x218] sm:$0xff] %v573_v4   ;;  %v581_v6 = vld [vmem:[%s14886_s23 + $0x428] sm:$0xff]   ;;  %v585_v7 = vld [vmem:[%s14886_s23 + $0x430] sm:$0xff]  }
  0x37   : > { %578 = vst [vmem:[%s14891_s24 + $0x220] sm:$0xff] %v577_v5   ;;  %v589_v8 = vld [vmem:[%s14886_s23 + $0x438] sm:$0xff]   ;;  %582 = vst [vmem:[%s14891_s24 + $0x228] sm:$0xff] %v581_v6   ;;  %v593_v9 = vld [vmem:[%s14886_s23 + $0x440] sm:$0xff]  }
  0x38   : > { %586 = vst [vmem:[%s14891_s24 + $0x230] sm:$0xff] %v585_v7   ;;  %590 = vst [vmem:[%s14891_s24 + $0x238] sm:$0xff] %v589_v8   ;;  %v597_v10 = vld [vmem:[%s14886_s23 + $0x448] sm:$0xff]   ;;  %v601_v11 = vld [vmem:[%s14886_s23 + $0x450] sm:$0xff]  }
  0x39   : > { %594 = vst [vmem:[%s14891_s24 + $0x240] sm:$0xff] %v593_v9   ;;  %598 = vst [vmem:[%s14891_s24 + $0x248] sm:$0xff] %v597_v10   ;;  %v605_v12 = vld [vmem:[%s14886_s23 + $0x458] sm:$0xff]   ;;  %v609_v13 = vld [vmem:[%s14886_s23 + $0x460] sm:$0xff]  }
  0x3a   : > { %602 = vst [vmem:[%s14891_s24 + $0x250] sm:$0xff] %v601_v11   ;;  %v613_v14 = vld [vmem:[%s14886_s23 + $0x468] sm:$0xff]   ;;  %606 = vst [vmem:[%s14891_s24 + $0x258] sm:$0xff] %v605_v12   ;;  %v617_v15 = vld [vmem:[%s14886_s23 + $0x470] sm:$0xff]  }
  0x3b   : > { %610 = vst [vmem:[%s14891_s24 + $0x260] sm:$0xff] %v609_v13   ;;  %614 = vst [vmem:[%s14891_s24 + $0x268] sm:$0xff] %v613_v14   ;;  %v621_v16 = vld [vmem:[%s14886_s23 + $0x478] sm:$0xff]   ;;  %v625_v17 = vld [vmem:[%s14886_s23 + $0x480] sm:$0xff]  }
  0x3c   : > { %618 = vst [vmem:[%s14891_s24 + $0x270] sm:$0xff] %v617_v15   ;;  %622 = vst [vmem:[%s14891_s24 + $0x278] sm:$0xff] %v621_v16   ;;  %v629_v18 = vld [vmem:[%s14886_s23 + $0x488] sm:$0xff]   ;;  %v633_v19 = vld [vmem:[%s14886_s23 + $0x490] sm:$0xff]  }
  0x3d   : > { %626 = vst [vmem:[%s14891_s24 + $0x280] sm:$0xff] %v625_v17   ;;  %v637_v20 = vld [vmem:[%s14886_s23 + $0x498] sm:$0xff]   ;;  %630 = vst [vmem:[%s14891_s24 + $0x288] sm:$0xff] %v629_v18   ;;  %v641_v21 = vld [vmem:[%s14886_s23 + $0x4a0] sm:$0xff]  }
  0x3e   : > { %634 = vst [vmem:[%s14891_s24 + $0x290] sm:$0xff] %v633_v19   ;;  %638 = vst [vmem:[%s14891_s24 + $0x298] sm:$0xff] %v637_v20   ;;  %v645_v22 = vld [vmem:[%s14886_s23 + $0x4a8] sm:$0xff]   ;;  %v649_v23 = vld [vmem:[%s14886_s23 + $0x4b0] sm:$0xff]  }
  0x3f   : > { %642 = vst [vmem:[%s14891_s24 + $0x2a0] sm:$0xff] %v641_v21   ;;  %646 = vst [vmem:[%s14891_s24 + $0x2a8] sm:$0xff] %v645_v22   ;;  %v653_v24 = vld [vmem:[%s14886_s23 + $0x4b8] sm:$0xff]   ;;  %v657_v25 = vld [vmem:[%s14886_s23 + $0x4c0] sm:$0xff]  }
  0x40   : > { %650 = vst [vmem:[%s14891_s24 + $0x2b0] sm:$0xff] %v649_v23   ;;  %v661_v26 = vld [vmem:[%s14886_s23 + $0x4c8] sm:$0xff]   ;;  %654 = vst [vmem:[%s14891_s24 + $0x2b8] sm:$0xff] %v653_v24   ;;  %v665_v27 = vld [vmem:[%s14886_s23 + $0x4d0] sm:$0xff]  }
  0x41   : > { %658 = vst [vmem:[%s14891_s24 + $0x2c0] sm:$0xff] %v657_v25   ;;  %662 = vst [vmem:[%s14891_s24 + $0x2c8] sm:$0xff] %v661_v26   ;;  %v669_v28 = vld [vmem:[%s14886_s23 + $0x4d8] sm:$0xff]   ;;  %v673_v29 = vld [vmem:[%s14886_s23 + $0x4e0] sm:$0xff]  }
  0x42   : > { %666 = vst [vmem:[%s14891_s24 + $0x2d0] sm:$0xff] %v665_v27   ;;  %670 = vst [vmem:[%s14891_s24 + $0x2d8] sm:$0xff] %v669_v28   ;;  %v677_v30 = vld [vmem:[%s14886_s23 + $0x4e8] sm:$0xff]   ;;  %v681_v31 = vld [vmem:[%s14886_s23 + $0x4f0] sm:$0xff]  }
  0x43   : > { %674 = vst [vmem:[%s14891_s24 + $0x2e0] sm:$0xff] %v673_v29   ;;  %v685_v32 = vld [vmem:[%s14886_s23 + $0x4f8] sm:$0xff]   ;;  %678 = vst [vmem:[%s14891_s24 + $0x2e8] sm:$0xff] %v677_v30   ;;  %v689_v33 = vld [vmem:[%s14886_s23 + $0x600] sm:$0xff]  }
  0x44   : > { %682 = vst [vmem:[%s14891_s24 + $0x2f0] sm:$0xff] %v681_v31   ;;  %686 = vst [vmem:[%s14891_s24 + $0x2f8] sm:$0xff] %v685_v32   ;;  %v693_v34 = vld [vmem:[%s14886_s23 + $0x608] sm:$0xff]   ;;  %v697_v35 = vld [vmem:[%s14886_s23 + $0x610] sm:$0xff]  }
  0x45   : > { %690 = vst [vmem:[%s14891_s24 + $0x300] sm:$0xff] %v689_v33   ;;  %694 = vst [vmem:[%s14891_s24 + $0x308] sm:$0xff] %v693_v34   ;;  %v701_v36 = vld [vmem:[%s14886_s23 + $0x618] sm:$0xff]   ;;  %v705_v37 = vld [vmem:[%s14886_s23 + $0x620] sm:$0xff]  }
  0x46   : > { %698 = vst [vmem:[%s14891_s24 + $0x310] sm:$0xff] %v697_v35   ;;  %v709_v38 = vld [vmem:[%s14886_s23 + $0x628] sm:$0xff]   ;;  %702 = vst [vmem:[%s14891_s24 + $0x318] sm:$0xff] %v701_v36   ;;  %v713_v39 = vld [vmem:[%s14886_s23 + $0x630] sm:$0xff]  }
  0x47   : > { %706 = vst [vmem:[%s14891_s24 + $0x320] sm:$0xff] %v705_v37   ;;  %710 = vst [vmem:[%s14891_s24 + $0x328] sm:$0xff] %v709_v38   ;;  %v717_v40 = vld [vmem:[%s14886_s23 + $0x638] sm:$0xff]   ;;  %v721_v41 = vld [vmem:[%s14886_s23 + $0x640] sm:$0xff]  }
  0x48   : > { %714 = vst [vmem:[%s14891_s24 + $0x330] sm:$0xff] %v713_v39   ;;  %718 = vst [vmem:[%s14891_s24 + $0x338] sm:$0xff] %v717_v40   ;;  %v725_v42 = vld [vmem:[%s14886_s23 + $0x648] sm:$0xff]   ;;  %v729_v43 = vld [vmem:[%s14886_s23 + $0x650] sm:$0xff]  }
  0x49   : > { %722 = vst [vmem:[%s14891_s24 + $0x340] sm:$0xff] %v721_v41   ;;  %v733_v44 = vld [vmem:[%s14886_s23 + $0x658] sm:$0xff]   ;;  %726 = vst [vmem:[%s14891_s24 + $0x348] sm:$0xff] %v725_v42   ;;  %v737_v45 = vld [vmem:[%s14886_s23 + $0x660] sm:$0xff]  }
  0x4a   : > { %730 = vst [vmem:[%s14891_s24 + $0x350] sm:$0xff] %v729_v43   ;;  %734 = vst [vmem:[%s14891_s24 + $0x358] sm:$0xff] %v733_v44   ;;  %v741_v46 = vld [vmem:[%s14886_s23 + $0x668] sm:$0xff]   ;;  %v745_v47 = vld [vmem:[%s14886_s23 + $0x670] sm:$0xff]  }
  0x4b   : > { %738 = vst [vmem:[%s14891_s24 + $0x360] sm:$0xff] %v737_v45   ;;  %742 = vst [vmem:[%s14891_s24 + $0x368] sm:$0xff] %v741_v46   ;;  %v749_v48 = vld [vmem:[%s14886_s23 + $0x678] sm:$0xff]   ;;  %v753_v49 = vld [vmem:[%s14886_s23 + $0x680] sm:$0xff]  }
  0x4c   : > { %746 = vst [vmem:[%s14891_s24 + $0x370] sm:$0xff] %v745_v47   ;;  %v757_v50 = vld [vmem:[%s14886_s23 + $0x688] sm:$0xff]   ;;  %750 = vst [vmem:[%s14891_s24 + $0x378] sm:$0xff] %v749_v48   ;;  %v761_v51 = vld [vmem:[%s14886_s23 + $0x690] sm:$0xff]  }
  0x4d   : > { %754 = vst [vmem:[%s14891_s24 + $0x380] sm:$0xff] %v753_v49   ;;  %758 = vst [vmem:[%s14891_s24 + $0x388] sm:$0xff] %v757_v50   ;;  %v765_v52 = vld [vmem:[%s14886_s23 + $0x698] sm:$0xff]   ;;  %v769_v53 = vld [vmem:[%s14886_s23 + $0x6a0] sm:$0xff]  }
  0x4e   : > { %762 = vst [vmem:[%s14891_s24 + $0x390] sm:$0xff] %v761_v51   ;;  %766 = vst [vmem:[%s14891_s24 + $0x398] sm:$0xff] %v765_v52   ;;  %v773_v54 = vld [vmem:[%s14886_s23 + $0x6a8] sm:$0xff]   ;;  %v777_v55 = vld [vmem:[%s14886_s23 + $0x6b0] sm:$0xff]  }
  0x4f   : > { %770 = vst [vmem:[%s14891_s24 + $0x3a0] sm:$0xff] %v769_v53   ;;  %v781_v56 = vld [vmem:[%s14886_s23 + $0x6b8] sm:$0xff]   ;;  %774 = vst [vmem:[%s14891_s24 + $0x3a8] sm:$0xff] %v773_v54   ;;  %v785_v57 = vld [vmem:[%s14886_s23 + $0x6c0] sm:$0xff]  }
  0x50   : > { %778 = vst [vmem:[%s14891_s24 + $0x3b0] sm:$0xff] %v777_v55   ;;  %782 = vst [vmem:[%s14891_s24 + $0x3b8] sm:$0xff] %v781_v56   ;;  %v789_v58 = vld [vmem:[%s14886_s23 + $0x6c8] sm:$0xff]   ;;  %v793_v59 = vld [vmem:[%s14886_s23 + $0x6d0] sm:$0xff]  }
  0x51   : > { %786 = vst [vmem:[%s14891_s24 + $0x3c0] sm:$0xff] %v785_v57   ;;  %790 = vst [vmem:[%s14891_s24 + $0x3c8] sm:$0xff] %v789_v58   ;;  %v797_v60 = vld [vmem:[%s14886_s23 + $0x6d8] sm:$0xff]   ;;  %v801_v61 = vld [vmem:[%s14886_s23 + $0x6e0] sm:$0xff]  }
  0x52   : > { %794 = vst [vmem:[%s14891_s24 + $0x3d0] sm:$0xff] %v793_v59   ;;  %v805_v62 = vld [vmem:[%s14886_s23 + $0x6e8] sm:$0xff]   ;;  %798 = vst [vmem:[%s14891_s24 + $0x3d8] sm:$0xff] %v797_v60   ;;  %v809_v63 = vld [vmem:[%s14886_s23 + $0x6f0] sm:$0xff]  }
  0x53   : > { %802 = vst [vmem:[%s14891_s24 + $0x3e0] sm:$0xff] %v801_v61   ;;  %806 = vst [vmem:[%s14891_s24 + $0x3e8] sm:$0xff] %v805_v62   ;;  %v813_v0 = vld [vmem:[%s14886_s23 + $0x6f8] sm:$0xff]   ;;  %v817_v1 = vld [vmem:[%s14886_s23 + $0x800] sm:$0xff]  }
  0x54   : > { %810 = vst [vmem:[%s14891_s24 + $0x3f0] sm:$0xff] %v809_v63   ;;  %814 = vst [vmem:[%s14891_s24 + $0x3f8] sm:$0xff] %v813_v0   ;;  %v821_v2 = vld [vmem:[%s14886_s23 + $0x808] sm:$0xff]   ;;  %v825_v3 = vld [vmem:[%s14886_s23 + $0x810] sm:$0xff]  }
  0x55   : > { %818 = vst [vmem:[%s14891_s24 + $0x400] sm:$0xff] %v817_v1   ;;  %v829_v4 = vld [vmem:[%s14886_s23 + $0x818] sm:$0xff]   ;;  %822 = vst [vmem:[%s14891_s24 + $0x408] sm:$0xff] %v821_v2   ;;  %v833_v5 = vld [vmem:[%s14886_s23 + $0x820] sm:$0xff]  }
  0x56   : > { %826 = vst [vmem:[%s14891_s24 + $0x410] sm:$0xff] %v825_v3   ;;  %830 = vst [vmem:[%s14891_s24 + $0x418] sm:$0xff] %v829_v4   ;;  %v837_v6 = vld [vmem:[%s14886_s23 + $0x828] sm:$0xff]   ;;  %v841_v7 = vld [vmem:[%s14886_s23 + $0x830] sm:$0xff]  }
  0x57   : > { %834 = vst [vmem:[%s14891_s24 + $0x420] sm:$0xff] %v833_v5   ;;  %838 = vst [vmem:[%s14891_s24 + $0x428] sm:$0xff] %v837_v6   ;;  %v845_v8 = vld [vmem:[%s14886_s23 + $0x838] sm:$0xff]   ;;  %v849_v9 = vld [vmem:[%s14886_s23 + $0x840] sm:$0xff]  }
  0x58   : > { %842 = vst [vmem:[%s14891_s24 + $0x430] sm:$0xff] %v841_v7   ;;  %v853_v10 = vld [vmem:[%s14886_s23 + $0x848] sm:$0xff]   ;;  %846 = vst [vmem:[%s14891_s24 + $0x438] sm:$0xff] %v845_v8   ;;  %v857_v11 = vld [vmem:[%s14886_s23 + $0x850] sm:$0xff]  }
  0x59   : > { %850 = vst [vmem:[%s14891_s24 + $0x440] sm:$0xff] %v849_v9   ;;  %854 = vst [vmem:[%s14891_s24 + $0x448] sm:$0xff] %v853_v10   ;;  %v861_v12 = vld [vmem:[%s14886_s23 + $0x858] sm:$0xff]   ;;  %v865_v13 = vld [vmem:[%s14886_s23 + $0x860] sm:$0xff]  }
  0x5a   : > { %858 = vst [vmem:[%s14891_s24 + $0x450] sm:$0xff] %v857_v11   ;;  %862 = vst [vmem:[%s14891_s24 + $0x458] sm:$0xff] %v861_v12   ;;  %v869_v14 = vld [vmem:[%s14886_s23 + $0x868] sm:$0xff]   ;;  %v873_v15 = vld [vmem:[%s14886_s23 + $0x870] sm:$0xff]  }
  0x5b   : > { %866 = vst [vmem:[%s14891_s24 + $0x460] sm:$0xff] %v865_v13   ;;  %v877_v16 = vld [vmem:[%s14886_s23 + $0x878] sm:$0xff]   ;;  %870 = vst [vmem:[%s14891_s24 + $0x468] sm:$0xff] %v869_v14   ;;  %v881_v17 = vld [vmem:[%s14886_s23 + $0x880] sm:$0xff]  }
  0x5c   : > { %874 = vst [vmem:[%s14891_s24 + $0x470] sm:$0xff] %v873_v15   ;;  %878 = vst [vmem:[%s14891_s24 + $0x478] sm:$0xff] %v877_v16   ;;  %v885_v18 = vld [vmem:[%s14886_s23 + $0x888] sm:$0xff]   ;;  %v889_v19 = vld [vmem:[%s14886_s23 + $0x890] sm:$0xff]  }
  0x5d   : > { %882 = vst [vmem:[%s14891_s24 + $0x480] sm:$0xff] %v881_v17   ;;  %886 = vst [vmem:[%s14891_s24 + $0x488] sm:$0xff] %v885_v18   ;;  %v893_v20 = vld [vmem:[%s14886_s23 + $0x898] sm:$0xff]   ;;  %v897_v21 = vld [vmem:[%s14886_s23 + $0x8a0] sm:$0xff]  }
  0x5e   : > { %890 = vst [vmem:[%s14891_s24 + $0x490] sm:$0xff] %v889_v19   ;;  %v901_v22 = vld [vmem:[%s14886_s23 + $0x8a8] sm:$0xff]   ;;  %894 = vst [vmem:[%s14891_s24 + $0x498] sm:$0xff] %v893_v20   ;;  %v905_v23 = vld [vmem:[%s14886_s23 + $0x8b0] sm:$0xff]  }
  0x5f   : > { %898 = vst [vmem:[%s14891_s24 + $0x4a0] sm:$0xff] %v897_v21   ;;  %902 = vst [vmem:[%s14891_s24 + $0x4a8] sm:$0xff] %v901_v22   ;;  %v909_v24 = vld [vmem:[%s14886_s23 + $0x8b8] sm:$0xff]   ;;  %v913_v25 = vld [vmem:[%s14886_s23 + $0x8c0] sm:$0xff]  }
  0x60   : > { %906 = vst [vmem:[%s14891_s24 + $0x4b0] sm:$0xff] %v905_v23   ;;  %910 = vst [vmem:[%s14891_s24 + $0x4b8] sm:$0xff] %v909_v24   ;;  %v917_v26 = vld [vmem:[%s14886_s23 + $0x8c8] sm:$0xff]   ;;  %v921_v27 = vld [vmem:[%s14886_s23 + $0x8d0] sm:$0xff]  }
  0x61   : > { %914 = vst [vmem:[%s14891_s24 + $0x4c0] sm:$0xff] %v913_v25   ;;  %v925_v28 = vld [vmem:[%s14886_s23 + $0x8d8] sm:$0xff]   ;;  %918 = vst [vmem:[%s14891_s24 + $0x4c8] sm:$0xff] %v917_v26   ;;  %v929_v29 = vld [vmem:[%s14886_s23 + $0x8e0] sm:$0xff]  }
  0x62   : > { %922 = vst [vmem:[%s14891_s24 + $0x4d0] sm:$0xff] %v921_v27   ;;  %926 = vst [vmem:[%s14891_s24 + $0x4d8] sm:$0xff] %v925_v28   ;;  %v933_v30 = vld [vmem:[%s14886_s23 + $0x8e8] sm:$0xff]   ;;  %v937_v31 = vld [vmem:[%s14886_s23 + $0x8f0] sm:$0xff]  }
  0x63   : > { %930 = vst [vmem:[%s14891_s24 + $0x4e0] sm:$0xff] %v929_v29   ;;  %934 = vst [vmem:[%s14891_s24 + $0x4e8] sm:$0xff] %v933_v30   ;;  %v941_v32 = vld [vmem:[%s14886_s23 + $0x8f8] sm:$0xff]   ;;  %v945_v33 = vld [vmem:[%s14886_s23 + $0xa00] sm:$0xff]  }
  0x64   : > { %938 = vst [vmem:[%s14891_s24 + $0x4f0] sm:$0xff] %v937_v31   ;;  %v949_v34 = vld [vmem:[%s14886_s23 + $0xa08] sm:$0xff]   ;;  %942 = vst [vmem:[%s14891_s24 + $0x4f8] sm:$0xff] %v941_v32   ;;  %v953_v35 = vld [vmem:[%s14886_s23 + $0xa10] sm:$0xff]  }
  0x65   : > { %946 = vst [vmem:[%s14891_s24 + $0x500] sm:$0xff] %v945_v33   ;;  %950 = vst [vmem:[%s14891_s24 + $0x508] sm:$0xff] %v949_v34   ;;  %v957_v36 = vld [vmem:[%s14886_s23 + $0xa18] sm:$0xff]   ;;  %v961_v37 = vld [vmem:[%s14886_s23 + $0xa20] sm:$0xff]  }
  0x66   : > { %954 = vst [vmem:[%s14891_s24 + $0x510] sm:$0xff] %v953_v35   ;;  %958 = vst [vmem:[%s14891_s24 + $0x518] sm:$0xff] %v957_v36   ;;  %v965_v38 = vld [vmem:[%s14886_s23 + $0xa28] sm:$0xff]   ;;  %v969_v39 = vld [vmem:[%s14886_s23 + $0xa30] sm:$0xff]  }
  0x67   : > { %962 = vst [vmem:[%s14891_s24 + $0x520] sm:$0xff] %v961_v37   ;;  %v973_v40 = vld [vmem:[%s14886_s23 + $0xa38] sm:$0xff]   ;;  %966 = vst [vmem:[%s14891_s24 + $0x528] sm:$0xff] %v965_v38   ;;  %v977_v41 = vld [vmem:[%s14886_s23 + $0xa40] sm:$0xff]  }
  0x68   : > { %970 = vst [vmem:[%s14891_s24 + $0x530] sm:$0xff] %v969_v39   ;;  %974 = vst [vmem:[%s14891_s24 + $0x538] sm:$0xff] %v973_v40   ;;  %v981_v42 = vld [vmem:[%s14886_s23 + $0xa48] sm:$0xff]   ;;  %v985_v43 = vld [vmem:[%s14886_s23 + $0xa50] sm:$0xff]  }
  0x69   : > { %978 = vst [vmem:[%s14891_s24 + $0x540] sm:$0xff] %v977_v41   ;;  %982 = vst [vmem:[%s14891_s24 + $0x548] sm:$0xff] %v981_v42   ;;  %v989_v44 = vld [vmem:[%s14886_s23 + $0xa58] sm:$0xff]   ;;  %v993_v45 = vld [vmem:[%s14886_s23 + $0xa60] sm:$0xff]  }
  0x6a   : > { %986 = vst [vmem:[%s14891_s24 + $0x550] sm:$0xff] %v985_v43   ;;  %v997_v46 = vld [vmem:[%s14886_s23 + $0xa68] sm:$0xff]   ;;  %990 = vst [vmem:[%s14891_s24 + $0x558] sm:$0xff] %v989_v44   ;;  %v1001_v47 = vld [vmem:[%s14886_s23 + $0xa70] sm:$0xff]  }
  0x6b   : > { %994 = vst [vmem:[%s14891_s24 + $0x560] sm:$0xff] %v993_v45   ;;  %998 = vst [vmem:[%s14891_s24 + $0x568] sm:$0xff] %v997_v46   ;;  %v1005_v48 = vld [vmem:[%s14886_s23 + $0xa78] sm:$0xff]   ;;  %v1009_v49 = vld [vmem:[%s14886_s23 + $0xa80] sm:$0xff]  }
  0x6c   : > { %1002 = vst [vmem:[%s14891_s24 + $0x570] sm:$0xff] %v1001_v47   ;;  %1006 = vst [vmem:[%s14891_s24 + $0x578] sm:$0xff] %v1005_v48   ;;  %v1013_v50 = vld [vmem:[%s14886_s23 + $0xa88] sm:$0xff]   ;;  %v1017_v51 = vld [vmem:[%s14886_s23 + $0xa90] sm:$0xff]  }
  0x6d   : > { %1010 = vst [vmem:[%s14891_s24 + $0x580] sm:$0xff] %v1009_v49   ;;  %v1021_v52 = vld [vmem:[%s14886_s23 + $0xa98] sm:$0xff]   ;;  %1014 = vst [vmem:[%s14891_s24 + $0x588] sm:$0xff] %v1013_v50   ;;  %v1025_v53 = vld [vmem:[%s14886_s23 + $0xaa0] sm:$0xff]  }
  0x6e   : > { %1018 = vst [vmem:[%s14891_s24 + $0x590] sm:$0xff] %v1017_v51   ;;  %1022 = vst [vmem:[%s14891_s24 + $0x598] sm:$0xff] %v1021_v52   ;;  %v1029_v54 = vld [vmem:[%s14886_s23 + $0xaa8] sm:$0xff]   ;;  %v1033_v55 = vld [vmem:[%s14886_s23 + $0xab0] sm:$0xff]  }
  0x6f   : > { %1026 = vst [vmem:[%s14891_s24 + $0x5a0] sm:$0xff] %v1025_v53   ;;  %1030 = vst [vmem:[%s14891_s24 + $0x5a8] sm:$0xff] %v1029_v54   ;;  %v1037_v56 = vld [vmem:[%s14886_s23 + $0xab8] sm:$0xff]   ;;  %v1041_v57 = vld [vmem:[%s14886_s23 + $0xac0] sm:$0xff]  }
  0x70   : > { %1034 = vst [vmem:[%s14891_s24 + $0x5b0] sm:$0xff] %v1033_v55   ;;  %v1045_v58 = vld [vmem:[%s14886_s23 + $0xac8] sm:$0xff]   ;;  %1038 = vst [vmem:[%s14891_s24 + $0x5b8] sm:$0xff] %v1037_v56   ;;  %v1049_v59 = vld [vmem:[%s14886_s23 + $0xad0] sm:$0xff]  }
  0x71   : > { %1042 = vst [vmem:[%s14891_s24 + $0x5c0] sm:$0xff] %v1041_v57   ;;  %1046 = vst [vmem:[%s14891_s24 + $0x5c8] sm:$0xff] %v1045_v58   ;;  %v1053_v60 = vld [vmem:[%s14886_s23 + $0xad8] sm:$0xff]   ;;  %v1057_v61 = vld [vmem:[%s14886_s23 + $0xae0] sm:$0xff]  }
  0x72   : > { %1050 = vst [vmem:[%s14891_s24 + $0x5d0] sm:$0xff] %v1049_v59   ;;  %1054 = vst [vmem:[%s14891_s24 + $0x5d8] sm:$0xff] %v1053_v60   ;;  %v1061_v62 = vld [vmem:[%s14886_s23 + $0xae8] sm:$0xff]   ;;  %v1065_v63 = vld [vmem:[%s14886_s23 + $0xaf0] sm:$0xff]  }
  0x73   : > { %1058 = vst [vmem:[%s14891_s24 + $0x5e0] sm:$0xff] %v1057_v61   ;;  %v1069_v0 = vld [vmem:[%s14886_s23 + $0xaf8] sm:$0xff]   ;;  %1062 = vst [vmem:[%s14891_s24 + $0x5e8] sm:$0xff] %v1061_v62   ;;  %v1073_v1 = vld [vmem:[%s14886_s23 + $0xc00] sm:$0xff]  }
  0x74   : > { %1066 = vst [vmem:[%s14891_s24 + $0x5f0] sm:$0xff] %v1065_v63   ;;  %1070 = vst [vmem:[%s14891_s24 + $0x5f8] sm:$0xff] %v1069_v0   ;;  %v1077_v2 = vld [vmem:[%s14886_s23 + $0xc08] sm:$0xff]   ;;  %v1081_v3 = vld [vmem:[%s14886_s23 + $0xc10] sm:$0xff]  }
  0x75   : > { %1074 = vst [vmem:[%s14891_s24 + $0x600] sm:$0xff] %v1073_v1   ;;  %1078 = vst [vmem:[%s14891_s24 + $0x608] sm:$0xff] %v1077_v2   ;;  %v1085_v4 = vld [vmem:[%s14886_s23 + $0xc18] sm:$0xff]   ;;  %v1089_v5 = vld [vmem:[%s14886_s23 + $0xc20] sm:$0xff]  }
  0x76   : > { %1082 = vst [vmem:[%s14891_s24 + $0x610] sm:$0xff] %v1081_v3   ;;  %v1093_v6 = vld [vmem:[%s14886_s23 + $0xc28] sm:$0xff]   ;;  %1086 = vst [vmem:[%s14891_s24 + $0x618] sm:$0xff] %v1085_v4   ;;  %v1097_v7 = vld [vmem:[%s14886_s23 + $0xc30] sm:$0xff]  }
  0x77   : > { %1090 = vst [vmem:[%s14891_s24 + $0x620] sm:$0xff] %v1089_v5   ;;  %1094 = vst [vmem:[%s14891_s24 + $0x628] sm:$0xff] %v1093_v6   ;;  %v1101_v8 = vld [vmem:[%s14886_s23 + $0xc38] sm:$0xff]   ;;  %v1105_v9 = vld [vmem:[%s14886_s23 + $0xc40] sm:$0xff]  }
  0x78   : > { %1098 = vst [vmem:[%s14891_s24 + $0x630] sm:$0xff] %v1097_v7   ;;  %1102 = vst [vmem:[%s14891_s24 + $0x638] sm:$0xff] %v1101_v8   ;;  %v1109_v10 = vld [vmem:[%s14886_s23 + $0xc48] sm:$0xff]   ;;  %v1113_v11 = vld [vmem:[%s14886_s23 + $0xc50] sm:$0xff]  }
  0x79   : > { %1106 = vst [vmem:[%s14891_s24 + $0x640] sm:$0xff] %v1105_v9   ;;  %v1117_v12 = vld [vmem:[%s14886_s23 + $0xc58] sm:$0xff]   ;;  %1110 = vst [vmem:[%s14891_s24 + $0x648] sm:$0xff] %v1109_v10   ;;  %v1121_v13 = vld [vmem:[%s14886_s23 + $0xc60] sm:$0xff]  }
  0x7a   : > { %1114 = vst [vmem:[%s14891_s24 + $0x650] sm:$0xff] %v1113_v11   ;;  %1118 = vst [vmem:[%s14891_s24 + $0x658] sm:$0xff] %v1117_v12   ;;  %v1125_v14 = vld [vmem:[%s14886_s23 + $0xc68] sm:$0xff]   ;;  %v1129_v15 = vld [vmem:[%s14886_s23 + $0xc70] sm:$0xff]  }
  0x7b   : > { %1122 = vst [vmem:[%s14891_s24 + $0x660] sm:$0xff] %v1121_v13   ;;  %1126 = vst [vmem:[%s14891_s24 + $0x668] sm:$0xff] %v1125_v14   ;;  %v1133_v16 = vld [vmem:[%s14886_s23 + $0xc78] sm:$0xff]   ;;  %v1137_v17 = vld [vmem:[%s14886_s23 + $0xc80] sm:$0xff]  }
  0x7c   : > { %1130 = vst [vmem:[%s14891_s24 + $0x670] sm:$0xff] %v1129_v15   ;;  %v1141_v18 = vld [vmem:[%s14886_s23 + $0xc88] sm:$0xff]   ;;  %1134 = vst [vmem:[%s14891_s24 + $0x678] sm:$0xff] %v1133_v16   ;;  %v1145_v19 = vld [vmem:[%s14886_s23 + $0xc90] sm:$0xff]  }
  0x7d   : > { %1138 = vst [vmem:[%s14891_s24 + $0x680] sm:$0xff] %v1137_v17   ;;  %1142 = vst [vmem:[%s14891_s24 + $0x688] sm:$0xff] %v1141_v18   ;;  %v1149_v20 = vld [vmem:[%s14886_s23 + $0xc98] sm:$0xff]   ;;  %v1153_v21 = vld [vmem:[%s14886_s23 + $0xca0] sm:$0xff]  }
  0x7e   : > { %1146 = vst [vmem:[%s14891_s24 + $0x690] sm:$0xff] %v1145_v19   ;;  %1150 = vst [vmem:[%s14891_s24 + $0x698] sm:$0xff] %v1149_v20   ;;  %v1157_v22 = vld [vmem:[%s14886_s23 + $0xca8] sm:$0xff]   ;;  %v1161_v23 = vld [vmem:[%s14886_s23 + $0xcb0] sm:$0xff]  }
  0x7f   : > { %1154 = vst [vmem:[%s14891_s24 + $0x6a0] sm:$0xff] %v1153_v21   ;;  %v1165_v24 = vld [vmem:[%s14886_s23 + $0xcb8] sm:$0xff]   ;;  %1158 = vst [vmem:[%s14891_s24 + $0x6a8] sm:$0xff] %v1157_v22   ;;  %v1169_v25 = vld [vmem:[%s14886_s23 + $0xcc0] sm:$0xff]  }
  0x80   : > { %1162 = vst [vmem:[%s14891_s24 + $0x6b0] sm:$0xff] %v1161_v23   ;;  %1166 = vst [vmem:[%s14891_s24 + $0x6b8] sm:$0xff] %v1165_v24   ;;  %v1173_v26 = vld [vmem:[%s14886_s23 + $0xcc8] sm:$0xff]   ;;  %v1177_v27 = vld [vmem:[%s14886_s23 + $0xcd0] sm:$0xff]  }
  0x81   : > { %1170 = vst [vmem:[%s14891_s24 + $0x6c0] sm:$0xff] %v1169_v25   ;;  %1174 = vst [vmem:[%s14891_s24 + $0x6c8] sm:$0xff] %v1173_v26   ;;  %v1181_v28 = vld [vmem:[%s14886_s23 + $0xcd8] sm:$0xff]   ;;  %v1185_v29 = vld [vmem:[%s14886_s23 + $0xce0] sm:$0xff]  }
  0x82   : > { %1178 = vst [vmem:[%s14891_s24 + $0x6d0] sm:$0xff] %v1177_v27   ;;  %v1189_v30 = vld [vmem:[%s14886_s23 + $0xce8] sm:$0xff]   ;;  %1182 = vst [vmem:[%s14891_s24 + $0x6d8] sm:$0xff] %v1181_v28   ;;  %v1193_v31 = vld [vmem:[%s14886_s23 + $0xcf0] sm:$0xff]  }
  0x83   : > { %1186 = vst [vmem:[%s14891_s24 + $0x6e0] sm:$0xff] %v1185_v29   ;;  %1190 = vst [vmem:[%s14891_s24 + $0x6e8] sm:$0xff] %v1189_v30   ;;  %v1197_v32 = vld [vmem:[%s14886_s23 + $0xcf8] sm:$0xff]   ;;  %v1201_v33 = vld [vmem:[%s14886_s23 + $0xe00] sm:$0xff]  }
  0x84   : > { %1194 = vst [vmem:[%s14891_s24 + $0x6f0] sm:$0xff] %v1193_v31   ;;  %1198 = vst [vmem:[%s14891_s24 + $0x6f8] sm:$0xff] %v1197_v32   ;;  %v1205_v34 = vld [vmem:[%s14886_s23 + $0xe08] sm:$0xff]   ;;  %v1209_v35 = vld [vmem:[%s14886_s23 + $0xe10] sm:$0xff]  }
  0x85   : > { %1202 = vst [vmem:[%s14891_s24 + $0x700] sm:$0xff] %v1201_v33   ;;  %v1213_v36 = vld [vmem:[%s14886_s23 + $0xe18] sm:$0xff]   ;;  %1206 = vst [vmem:[%s14891_s24 + $0x708] sm:$0xff] %v1205_v34   ;;  %v1217_v37 = vld [vmem:[%s14886_s23 + $0xe20] sm:$0xff]  }
  0x86   : > { %1210 = vst [vmem:[%s14891_s24 + $0x710] sm:$0xff] %v1209_v35   ;;  %1214 = vst [vmem:[%s14891_s24 + $0x718] sm:$0xff] %v1213_v36   ;;  %v1221_v38 = vld [vmem:[%s14886_s23 + $0xe28] sm:$0xff]   ;;  %v1225_v39 = vld [vmem:[%s14886_s23 + $0xe30] sm:$0xff]  }
  0x87   : > { %1218 = vst [vmem:[%s14891_s24 + $0x720] sm:$0xff] %v1217_v37   ;;  %1222 = vst [vmem:[%s14891_s24 + $0x728] sm:$0xff] %v1221_v38   ;;  %v1229_v40 = vld [vmem:[%s14886_s23 + $0xe38] sm:$0xff]   ;;  %v1233_v41 = vld [vmem:[%s14886_s23 + $0xe40] sm:$0xff]  }
  0x88   : > { %1226 = vst [vmem:[%s14891_s24 + $0x730] sm:$0xff] %v1225_v39   ;;  %v1237_v42 = vld [vmem:[%s14886_s23 + $0xe48] sm:$0xff]   ;;  %1230 = vst [vmem:[%s14891_s24 + $0x738] sm:$0xff] %v1229_v40   ;;  %v1241_v43 = vld [vmem:[%s14886_s23 + $0xe50] sm:$0xff]  }
  0x89   : > { %1234 = vst [vmem:[%s14891_s24 + $0x740] sm:$0xff] %v1233_v41   ;;  %1238 = vst [vmem:[%s14891_s24 + $0x748] sm:$0xff] %v1237_v42   ;;  %v1245_v44 = vld [vmem:[%s14886_s23 + $0xe58] sm:$0xff]   ;;  %v1249_v45 = vld [vmem:[%s14886_s23 + $0xe60] sm:$0xff]  }
  0x8a   : > { %1242 = vst [vmem:[%s14891_s24 + $0x750] sm:$0xff] %v1241_v43   ;;  %1246 = vst [vmem:[%s14891_s24 + $0x758] sm:$0xff] %v1245_v44   ;;  %v1253_v46 = vld [vmem:[%s14886_s23 + $0xe68] sm:$0xff]   ;;  %v1257_v47 = vld [vmem:[%s14886_s23 + $0xe70] sm:$0xff]  }
  0x8b   : > { %1250 = vst [vmem:[%s14891_s24 + $0x760] sm:$0xff] %v1249_v45   ;;  %v1261_v48 = vld [vmem:[%s14886_s23 + $0xe78] sm:$0xff]   ;;  %1254 = vst [vmem:[%s14891_s24 + $0x768] sm:$0xff] %v1253_v46   ;;  %v1265_v49 = vld [vmem:[%s14886_s23 + $0xe80] sm:$0xff]  }
  0x8c   : > { %1258 = vst [vmem:[%s14891_s24 + $0x770] sm:$0xff] %v1257_v47   ;;  %1262 = vst [vmem:[%s14891_s24 + $0x778] sm:$0xff] %v1261_v48   ;;  %v1269_v50 = vld [vmem:[%s14886_s23 + $0xe88] sm:$0xff]   ;;  %v1273_v51 = vld [vmem:[%s14886_s23 + $0xe90] sm:$0xff]  }
  0x8d   : > { %1266 = vst [vmem:[%s14891_s24 + $0x780] sm:$0xff] %v1265_v49   ;;  %1270 = vst [vmem:[%s14891_s24 + $0x788] sm:$0xff] %v1269_v50   ;;  %v1277_v52 = vld [vmem:[%s14886_s23 + $0xe98] sm:$0xff]   ;;  %v1281_v53 = vld [vmem:[%s14886_s23 + $0xea0] sm:$0xff]  }
  0x8e   : > { %1274 = vst [vmem:[%s14891_s24 + $0x790] sm:$0xff] %v1273_v51   ;;  %v1285_v54 = vld [vmem:[%s14886_s23 + $0xea8] sm:$0xff]   ;;  %1278 = vst [vmem:[%s14891_s24 + $0x798] sm:$0xff] %v1277_v52   ;;  %v1289_v55 = vld [vmem:[%s14886_s23 + $0xeb0] sm:$0xff]  }
  0x8f   : > { %1282 = vst [vmem:[%s14891_s24 + $0x7a0] sm:$0xff] %v1281_v53   ;;  %1286 = vst [vmem:[%s14891_s24 + $0x7a8] sm:$0xff] %v1285_v54   ;;  %v1293_v56 = vld [vmem:[%s14886_s23 + $0xeb8] sm:$0xff]   ;;  %v1297_v57 = vld [vmem:[%s14886_s23 + $0xec0] sm:$0xff]  }
  0x90   : > { %1290 = vst [vmem:[%s14891_s24 + $0x7b0] sm:$0xff] %v1289_v55   ;;  %1294 = vst [vmem:[%s14891_s24 + $0x7b8] sm:$0xff] %v1293_v56   ;;  %v1301_v58 = vld [vmem:[%s14886_s23 + $0xec8] sm:$0xff]   ;;  %v1305_v59 = vld [vmem:[%s14886_s23 + $0xed0] sm:$0xff]  }
  0x91   : > { %1298 = vst [vmem:[%s14891_s24 + $0x7c0] sm:$0xff] %v1297_v57   ;;  %v1309_v60 = vld [vmem:[%s14886_s23 + $0xed8] sm:$0xff]   ;;  %1302 = vst [vmem:[%s14891_s24 + $0x7c8] sm:$0xff] %v1301_v58   ;;  %v1313_v61 = vld [vmem:[%s14886_s23 + $0xee0] sm:$0xff]  }
  0x92   : > { %1306 = vst [vmem:[%s14891_s24 + $0x7d0] sm:$0xff] %v1305_v59   ;;  %1310 = vst [vmem:[%s14891_s24 + $0x7d8] sm:$0xff] %v1309_v60   ;;  %v1317_v62 = vld [vmem:[%s14886_s23 + $0xee8] sm:$0xff]   ;;  %v1321_v63 = vld [vmem:[%s14886_s23 + $0xef0] sm:$0xff]  }
  0x93   : > { %1314 = vst [vmem:[%s14891_s24 + $0x7e0] sm:$0xff] %v1313_v61   ;;  %1318 = vst [vmem:[%s14891_s24 + $0x7e8] sm:$0xff] %v1317_v62   ;;  %v1325_v0 = vld [vmem:[%s14886_s23 + $0xef8] sm:$0xff]  }
  0x94   : > { %1322 = vst [vmem:[%s14891_s24 + $0x7f0] sm:$0xff] %v1321_v63   ;;  %1326 = vst [vmem:[%s14891_s24 + $0x7f8] sm:$0xff] %v1325_v0  }
  0x95 PF: > { %p12126_p5 = scmp.ge.s32.totalorder %s14797_s13, 1  ;;  %p4452_p6 = scmp.lt.s32.totalorder %s14797_s13, 3 }
  0x97   : > { %p4453_p7 = pnand %p12126_p5, %p4452_p6 }
  0x99   : > { %4456 = sbr.rel (%p4453_p7) target bundleno = 1518 (0x5ee), region = 104 }
  0xa0   : > { %v15407_v1 = vld [vmem:[%s17534_s1] sm:$0xf]  ;;  %vm4831_vm0 = vcmask 1043456   ;;  %s4459_s27 = sand.u32 1, %s14789_s11   ;;  %vm4734_vm1 = vcmask 64512   ;;  %vm11984_vm2 = vcmask 7168  }
  0xa1   : > { %14210 = vmatprep.subr.msk.bf16.mxu0 %vm4831_vm0, %v15407_v1  ;;  %v15414_v2 = vsel %vm4831_vm0, %v15407_v1, 0  ;;  %14211 = vmatprep.subr.msk.bf16.mxu1 %vm4831_vm0, %v15407_v1  ;;  %s12127_s28 = sshll.u32 %s4459_s27, 11  ;;  %s12128_s27 = sshll.u32 %s12119_s8, 6 }
  0xa2   : > { %13523 = vmatpush3.bf16.msra.mxu0 %v15414_v2  ;;  %13589 = vmatpush3.bf16.msra.mxu1 %v15414_v2  ;;  %s15420_s29 = scalar_lea.vmem [#allocation3], %s12127_s28  ;;  %p4496_p8 = scmp.lt.s32.totalorder %s12128_s27, 127 }
  0xa3   : > { %v14242_v3 = vld [vmem:[%s15420_s29] sm:$0xff]   ;;  %14212 = vmatprep.subr.msk.bf16.mxu0 %vm4831_vm0, %v15407_v1  ;;  %14213 = vmatprep.subr.msk.bf16.mxu1 %vm4831_vm0, %v15407_v1  ;;  %v14244_v5 = vld [vmem:[%s15420_s29 + $0x8] sm:$0xff]   ;;  %v14246_v7 = vld [vmem:[%s15420_s29 + $0x10] sm:$0xff]  }
  0xa4   : > { %v14243_v4 = vld [vmem:[%s15420_s29 + $0x100] sm:$0xff]   ;;  %13524 = vmatprep.mubr.msk.bf16.mxu0 %vm4734_vm1, %v14242_v3  ;;  %v14245_v6 = vld [vmem:[%s15420_s29 + $0x108] sm:$0xff]   ;;  %v14247_v8 = vld [vmem:[%s15420_s29 + $0x110] sm:$0xff]   ;;  %s17687_s27 = smov (!%p4496_p8, %s12128_s27), 127 }
  0xa5   : > { %13590 = vmatprep.mubr.msk.bf16.mxu1 %vm4734_vm1, %v14243_v4  ;;  %13525 = vmatmul.mubr.msk.bf16.vlgmr.msra.gmra.mrb[0].mxu0 %vm4734_vm1, %v14244_v5  ;;  %v14248_v9 = vld [vmem:[%s15420_s29 + $0x18] sm:$0xff]   ;;  %v14250_v11 = vld [vmem:[%s15420_s29 + $0x20] sm:$0xff]   ;;  %v14252_v13 = vld [vmem:[%s15420_s29 + $0x28] sm:$0xff]   ;;  %s12129_s13 = sshll.u32 %s17687_s27, 3 }
  0xa6   : > { %13591 = vmatmul.mubr.msk.bf16.vlgmr.msra.gmra.mrb[0].mxu1 %vm4734_vm1, %v14245_v6  ;;  %13655 = vmatpush3.bf16.msra.mxu0 %v15414_v2  ;;  %v14249_v10 = vld [vmem:[%s15420_s29 + $0x118] sm:$0xff]   ;;  %v14251_v12 = vld [vmem:[%s15420_s29 + $0x120] sm:$0xff]   ;;  %v14253_v14 = vld [vmem:[%s15420_s29 + $0x128] sm:$0xff]   ;;  %s17343_s30 = scalar_lea.vmem %s17542_s9, %s12129_s13 }
  0xa7   : > { %13721 = vmatpush3.bf16.msra.mxu1 %v15414_v2  ;;  %13528 = vmatprep.mubr.msk.bf16.mxu0 %vm4734_vm1, %v14246_v7  ;;  %v14254_v15 = vld [vmem:[%s15420_s29 + $0x30] sm:$0xff]   ;;  %v14256_v17 = vld [vmem:[%s15420_s29 + $0x38] sm:$0xff]   ;;  %v14258_v19 = vld [vmem:[%s15420_s29 + $0x40] sm:$0xff]  }
  0xa8   : > { %13594 = vmatprep.mubr.msk.bf16.mxu1 %vm4734_vm1, %v14247_v8  ;;  %14214 = vmatprep.subr.msk.bf16.mxu0 %vm4831_vm0, %v15407_v1  ;;  %v14255_v16 = vld [vmem:[%s15420_s29 + $0x130] sm:$0xff]   ;;  %v14257_v18 = vld [vmem:[%s15420_s29 + $0x138] sm:$0xff]   ;;  %v14259_v20 = vld [vmem:[%s15420_s29 + $0x140] sm:$0xff]  }
  0xa9   : > { %14215 = vmatprep.subr.msk.bf16.mxu1 %vm4831_vm0, %v15407_v1  ;;  %v14260_v21 = vld [vmem:[%s15420_s29 + $0x48] sm:$0xff]   ;;  %v14262_v23 = vld [vmem:[%s15420_s29 + $0x50] sm:$0xff]   ;;  %v14264_v25 = vld [vmem:[%s15420_s29 + $0x58] sm:$0xff]  }
  0xaa   : > { %v14261_v22 = vld [vmem:[%s15420_s29 + $0x148] sm:$0xff]   ;;  %v14263_v24 = vld [vmem:[%s15420_s29 + $0x150] sm:$0xff]   ;;  %v14265_v26 = vld [vmem:[%s15420_s29 + $0x158] sm:$0xff]  }
  0xab   : > { %v14266_v27 = vld [vmem:[%s15420_s29 + $0x60] sm:$0xff]   ;;  %v14268_v29 = vld [vmem:[%s15420_s29 + $0x68] sm:$0xff]   ;;  %v14270_v31 = vld [vmem:[%s15420_s29 + $0x70] sm:$0xff]  }
  0xac   : > { %v14267_v28 = vld [vmem:[%s15420_s29 + $0x160] sm:$0xff]   ;;  %v14269_v30 = vld [vmem:[%s15420_s29 + $0x168] sm:$0xff]   ;;  %v14271_v32 = vld [vmem:[%s15420_s29 + $0x170] sm:$0xff]  }
  0xad   : > { %13529 = vmatmul.mubr.msk.bf16.gmra.mrb[4].mxu0 %vm4734_vm1, %v14248_v9  ;;  %v14272_v33 = vld [vmem:[%s15420_s29 + $0x78] sm:$0xff]   ;;  %v14274_v35 = vld [vmem:[%s15420_s29 + $0x80] sm:$0xff]   ;;  %v14276_v37 = vld [vmem:[%s15420_s29 + $0x88] sm:$0xff]  }
  0xae   : > { %13595 = vmatmul.mubr.msk.bf16.gmra.mrb[4].mxu1 %vm4734_vm1, %v14249_v10  ;;  %13532 = vmatprep.mubr.msk.bf16.mxu0 %vm4734_vm1, %v14250_v11  ;;  %v14273_v34 = vld [vmem:[%s15420_s29 + $0x178] sm:$0xff]   ;;  %v14275_v36 = vld [vmem:[%s15420_s29 + $0x180] sm:$0xff]   ;;  %v14277_v38 = vld [vmem:[%s15420_s29 + $0x188] sm:$0xff]  }
  0xaf   : > { %13598 = vmatprep.mubr.msk.bf16.mxu1 %vm4734_vm1, %v14251_v12  ;;  %v14278_v39 = vld [vmem:[%s15420_s29 + $0x90] sm:$0xff]   ;;  %v14280_v41 = vld [vmem:[%s15420_s29 + $0x98] sm:$0xff]   ;;  %v14282_v43 = vld [vmem:[%s15420_s29 + $0xa0] sm:$0xff]  }
  0xb0   : > { %v14279_v40 = vld [vmem:[%s15420_s29 + $0x190] sm:$0xff]   ;;  %v14281_v42 = vld [vmem:[%s15420_s29 + $0x198] sm:$0xff]   ;;  %v14283_v44 = vld [vmem:[%s15420_s29 + $0x1a0] sm:$0xff]  }
  0xb1   : > { %v14284_v45 = vld [vmem:[%s15420_s29 + $0xa8] sm:$0xff]   ;;  %v14286_v47 = vld [vmem:[%s15420_s29 + $0xb0] sm:$0xff]   ;;  %v14288_v49 = vld [vmem:[%s15420_s29 + $0xb8] sm:$0xff]  }
  0xb2   : > { %v14285_v46 = vld [vmem:[%s15420_s29 + $0x1a8] sm:$0xff]   ;;  %v14287_v48 = vld [vmem:[%s15420_s29 + $0x1b0] sm:$0xff]   ;;  %v14289_v50 = vld [vmem:[%s15420_s29 + $0x1b8] sm:$0xff]  }
  0xb3   : > { %v14290_v51 = vld [vmem:[%s15420_s29 + $0xc0] sm:$0xff]   ;;  %v14292_v53 = vld [vmem:[%s15420_s29 + $0xc8] sm:$0xff]   ;;  %v14294_v55 = vld [vmem:[%s15420_s29 + $0xd0] sm:$0xff]  }
  0xb4   : > { %v14291_v52 = vld [vmem:[%s15420_s29 + $0x1c0] sm:$0xff]   ;;  %v14293_v54 = vld [vmem:[%s15420_s29 + $0x1c8] sm:$0xff]   ;;  %v14295_v56 = vld [vmem:[%s15420_s29 + $0x1d0] sm:$0xff]  }
  0xb5   : > { %13533 = vmatmul.mubr.msk.bf16.gmra.mrb[8].mxu0 %vm4734_vm1, %v14252_v13  ;;  %v14296_v57 = vld [vmem:[%s15420_s29 + $0xd8] sm:$0xff]   ;;  %v14298_v59 = vld [vmem:[%s15420_s29 + $0xe0] sm:$0xff]   ;;  %v14300_v61 = vld [vmem:[%s15420_s29 + $0xe8] sm:$0xff]  }
  0xb6   : > { %13599 = vmatmul.mubr.msk.bf16.gmra.mrb[8].mxu1 %vm4734_vm1, %v14253_v14  ;;  %13536 = vmatprep.mubr.msk.bf16.mxu0 %vm4734_vm1, %v14254_v15  ;;  %v14297_v58 = vld [vmem:[%s15420_s29 + $0x1d8] sm:$0xff]   ;;  %v14299_v60 = vld [vmem:[%s15420_s29 + $0x1e0] sm:$0xff]   ;;  %v14301_v62 = vld [vmem:[%s15420_s29 + $0x1e8] sm:$0xff]  }
  0xb7   : > { %13602 = vmatprep.mubr.msk.bf16.mxu1 %vm4734_vm1, %v14255_v16  ;;  %v14302_v63 = vld [vmem:[%s15420_s29 + $0xf0] sm:$0xff]   ;;  %v14304_v3 = vld [vmem:[%s15420_s29 + $0xf8] sm:$0xff]   ;;  %v14306_v5 = vld [vmem:[%s15420_s29 + $0x200] sm:$0xff]  }
  0xb8   : > { %v14303_v0 = vld [vmem:[%s15420_s29 + $0x1f0] sm:$0xff]   ;;  %v14305_v4 = vld [vmem:[%s15420_s29 + $0x1f8] sm:$0xff]   ;;  %v14307_v6 = vld [vmem:[%s15420_s29 + $0x300] sm:$0xff]  }
  0xb9   : > { %v14308_v7 = vld [vmem:[%s15420_s29 + $0x208] sm:$0xff]   ;;  %v14310_v9 = vld [vmem:[%s15420_s29 + $0x210] sm:$0xff]   ;;  %v14312_v11 = vld [vmem:[%s15420_s29 + $0x218] sm:$0xff]  }
  0xba   : > { %v14309_v8 = vld [vmem:[%s15420_s29 + $0x308] sm:$0xff]   ;;  %v14311_v10 = vld [vmem:[%s15420_s29 + $0x310] sm:$0xff]   ;;  %v14313_v12 = vld [vmem:[%s15420_s29 + $0x318] sm:$0xff]  }
  0xbb   : > { %v14314_v13 = vld [vmem:[%s15420_s29 + $0x220] sm:$0xff]   ;;  %v14316_v15 = vld [vmem:[%s15420_s29 + $0x228] sm:$0xff]  }
  0xbc   : > { %v14315_v14 = vld [vmem:[%s15420_s29 + $0x320] sm:$0xff]   ;;  %v14317_v16 = vld [vmem:[%s15420_s29 + $0x328] sm:$0xff]  }
  0xbd   : > { %13537 = vmatmul.mubr.msk.bf16.gmra.mrb[12].mxu0 %vm4734_vm1, %v14256_v17  ;;  %v14318_v17 = vld [vmem:[%s15420_s29 + $0x230] sm:$0xff]  }
  0xbe   : > { %13603 = vmatmul.mubr.msk.bf16.gmra.mrb[12].mxu1 %vm4734_vm1, %v14257_v18  ;;  %13540 = vmatprep.mubr.msk.bf16.mxu0 %vm4734_vm1, %v14258_v19  ;;  %v14319_v18 = vld [vmem:[%s15420_s29 + $0x330] sm:$0xff]   ;;  %v14321_v19 = vld [vmem:[%s15420_s29 + $0x338] sm:$0xff]  }
  0xbf   : > { %13606 = vmatprep.mubr.msk.bf16.mxu1 %vm4734_vm1, %v14259_v20  ;;  %v14322_v20 = vld [vmem:[%s15420_s29 + $0x240] sm:$0xff]  }
  0xc5   : > { %13541 = vmatmul.mubr.msk.bf16.gmra.mrb[16].mxu0 %vm4734_vm1, %v14260_v21  ;;  %v14323_v21 = vld [vmem:[%s15420_s29 + $0x340] sm:$0xff]  }
  0xc6   : > { %13607 = vmatmul.mubr.msk.bf16.gmra.mrb[16].mxu1 %vm4734_vm1, %v14261_v22  ;;  %13544 = vmatprep.mubr.msk.bf16.mxu0 %vm4734_vm1, %v14262_v23  ;;  %v14324_v22 = vld [vmem:[%s15420_s29 + $0x248] sm:$0xff]  }
  0xc7   : > { %13610 = vmatprep.mubr.msk.bf16.mxu1 %vm4734_vm1, %v14263_v24  ;;  %v14325_v23 = vld [vmem:[%s15420_s29 + $0x348] sm:$0xff]   ;;  %v14326_v24 = vld [vmem:[%s15420_s29 + $0x250] sm:$0xff]  }
  0xcd   : > { %13545 = vmatmul.mubr.msk.bf16.gmra.mrb[20].mxu0 %vm4734_vm1, %v14264_v25  ;;  %v14327_v25 = vld [vmem:[%s15420_s29 + $0x350] sm:$0xff]  }
  0xce   : > { %13611 = vmatmul.mubr.msk.bf16.gmra.mrb[20].mxu1 %vm4734_vm1, %v14265_v26  ;;  %13548 = vmatprep.mubr.msk.bf16.mxu0 %vm4734_vm1, %v14266_v27  ;;  %v14328_v26 = vld [vmem:[%s15420_s29 + $0x258] sm:$0xff]  }
  0xcf   : > { %13614 = vmatprep.mubr.msk.bf16.mxu1 %vm4734_vm1, %v14267_v28  ;;  %v14329_v27 = vld [vmem:[%s15420_s29 + $0x358] sm:$0xff]   ;;  %v14330_v28 = vld [vmem:[%s15420_s29 + $0x260] sm:$0xff]  }
  0xd5   : > { %13549 = vmatmul.mubr.msk.bf16.gmra.mrb[24].mxu0 %vm4734_vm1, %v14268_v29  ;;  %v14331_v29 = vld [vmem:[%s15420_s29 + $0x360] sm:$0xff]  }
  0xd6   : > { %13615 = vmatmul.mubr.msk.bf16.gmra.mrb[24].mxu1 %vm4734_vm1, %v14269_v30  ;;  %13552 = vmatprep.mubr.msk.bf16.mxu0 %vm4734_vm1, %v14270_v31  ;;  %v14332_v30 = vld [vmem:[%s15420_s29 + $0x268] sm:$0xff]  }
  0xd7   : > { %13618 = vmatprep.mubr.msk.bf16.mxu1 %vm4734_vm1, %v14271_v32  ;;  %v14333_v31 = vld [vmem:[%s15420_s29 + $0x368] sm:$0xff]   ;;  %v14334_v32 = vld [vmem:[%s15420_s29 + $0x270] sm:$0xff]  }
  0xdd   : > { %13553 = vmatmul.mubr.msk.bf16.gmra.mrb[28].mxu0 %vm4734_vm1, %v14272_v33  ;;  %v14335_v33 = vld [vmem:[%s15420_s29 + $0x370] sm:$0xff]  }
  0xde   : > { %13619 = vmatmul.mubr.msk.bf16.gmra.mrb[28].mxu1 %vm4734_vm1, %v14273_v34  ;;  %13556 = vmatprep.mubr.msk.bf16.mxu0 %vm4734_vm1, %v14274_v35  ;;  %v14336_v34 = vld [vmem:[%s15420_s29 + $0x278] sm:$0xff]  }
  0xdf   : > { %13622 = vmatprep.mubr.msk.bf16.mxu1 %vm4734_vm1, %v14275_v36  ;;  %v14337_v35 = vld [vmem:[%s15420_s29 + $0x378] sm:$0xff]   ;;  %v14338_v36 = vld [vmem:[%s15420_s29 + $0x280] sm:$0xff]  }
  0xe5   : > { %13557 = vmatmul.mubr.msk.bf16.gmra.mrb[32].mxu0 %vm4734_vm1, %v14276_v37  ;;  %v14339_v37 = vld [vmem:[%s15420_s29 + $0x380] sm:$0xff]  }
  0xe6   : > { %13623 = vmatmul.mubr.msk.bf16.gmra.mrb[32].mxu1 %vm4734_vm1, %v14277_v38  ;;  %13560 = vmatprep.mubr.msk.bf16.mxu0 %vm4734_vm1, %v14278_v39  ;;  %v14340_v38 = vld [vmem:[%s15420_s29 + $0x288] sm:$0xff]  }
  0xe7   : > { %13626 = vmatprep.mubr.msk.bf16.mxu1 %vm4734_vm1, %v14279_v40  ;;  %v14341_v39 = vld [vmem:[%s15420_s29 + $0x388] sm:$0xff]   ;;  %v14342_v40 = vld [vmem:[%s15420_s29 + $0x290] sm:$0xff]  }
  0xed   : > { %13561 = vmatmul.mubr.msk.bf16.gmra.mrb[36].mxu0 %vm4734_vm1, %v14280_v41  ;;  %v14343_v41 = vld [vmem:[%s15420_s29 + $0x390] sm:$0xff]  }
  0xee   : > { %13627 = vmatmul.mubr.msk.bf16.gmra.mrb[36].mxu1 %vm4734_vm1, %v14281_v42  ;;  %13564 = vmatprep.mubr.msk.bf16.mxu0 %vm4734_vm1, %v14282_v43  ;;  %v14344_v42 = vld [vmem:[%s15420_s29 + $0x298] sm:$0xff]  }
  0xef   : > { %13630 = vmatprep.mubr.msk.bf16.mxu1 %vm4734_vm1, %v14283_v44  ;;  %v14345_v43 = vld [vmem:[%s15420_s29 + $0x398] sm:$0xff]   ;;  %v14346_v44 = vld [vmem:[%s15420_s29 + $0x2a0] sm:$0xff]  }
  0xf5   : > { %13565 = vmatmul.mubr.msk.bf16.gmra.mrb[40].mxu0 %vm4734_vm1, %v14284_v45  ;;  %v14347_v45 = vld [vmem:[%s15420_s29 + $0x3a0] sm:$0xff]  }
  0xf6   : > { %13631 = vmatmul.mubr.msk.bf16.gmra.mrb[40].mxu1 %vm4734_vm1, %v14285_v46  ;;  %13568 = vmatprep.mubr.msk.bf16.mxu0 %vm4734_vm1, %v14286_v47  ;;  %v14348_v46 = vld [vmem:[%s15420_s29 + $0x2a8] sm:$0xff]  }
  0xf7   : > { %13634 = vmatprep.mubr.msk.bf16.mxu1 %vm4734_vm1, %v14287_v48  ;;  %v14349_v47 = vld [vmem:[%s15420_s29 + $0x3a8] sm:$0xff]   ;;  %v14350_v48 = vld [vmem:[%s15420_s29 + $0x2b0] sm:$0xff]  }
  0xfd   : > { %13569 = vmatmul.mubr.msk.bf16.gmra.mrb[44].mxu0 %vm4734_vm1, %v14288_v49  ;;  %v14351_v49 = vld [vmem:[%s15420_s29 + $0x3b0] sm:$0xff]  }
  0xfe   : > { %13635 = vmatmul.mubr.msk.bf16.gmra.mrb[44].mxu1 %vm4734_vm1, %v14289_v50  ;;  %13572 = vmatprep.mubr.msk.bf16.mxu0 %vm4734_vm1, %v14290_v51  ;;  %v15657_v50 = vld [vmem:[%s17535_s2] ss:$0 sm:$0xff] }
  0xff   : > { %13638 = vmatprep.mubr.msk.bf16.mxu1 %vm4734_vm1, %v14291_v52  ;;  %v14352_v51 = vld [vmem:[%s15420_s29 + $0x2b8] sm:$0xff]  }
 0x105   : > { %13573 = vmatmul.mubr.msk.bf16.gmra.mrb[48].mxu0 %vm4734_vm1, %v14292_v53  ;;  %v14353_v53 = vld [vmem:[%s15420_s29 + $0x3b8] sm:$0xff]  }
 0x106   : > { %13639 = vmatmul.mubr.msk.bf16.gmra.mrb[48].mxu1 %vm4734_vm1, %v14293_v54  ;;  %13576 = vmatprep.mubr.msk.bf16.mxu0 %vm4734_vm1, %v14294_v55  ;;  %v14354_v54 = vld [vmem:[%s15420_s29 + $0x2c0] sm:$0xff]  }
 0x107   : > { %13642 = vmatprep.mubr.msk.bf16.mxu1 %vm4734_vm1, %v14295_v56 }
 0x10d   : > { %13577 = vmatmul.mubr.msk.bf16.gmra.mrb[52].mxu0 %vm4734_vm1, %v14296_v57 }
 0x10e   : > { %13643 = vmatmul.mubr.msk.bf16.gmra.mrb[52].mxu1 %vm4734_vm1, %v14297_v58  ;;  %13580 = vmatprep.mubr.msk.bf16.mxu0 %vm4734_vm1, %v14298_v59 }
 0x10f   : > { %13646 = vmatprep.mubr.msk.bf16.mxu1 %vm4734_vm1, %v14299_v60 }
 0x115   : > { %13581 = vmatmul.mubr.msk.bf16.gmra.mrb[56].mxu0 %vm4734_vm1, %v14300_v61 }
 0x116   : > { %13647 = vmatmul.mubr.msk.bf16.gmra.mrb[56].mxu1 %vm4734_vm1, %v14301_v62  ;;  %13584 = vmatprep.mubr.msk.bf16.mxu0 %vm4734_vm1, %v14302_v63 }
 0x117   : > { %13650 = vmatprep.mubr.msk.bf16.mxu1 %vm4734_vm1, %v14303_v0 }
 0x11d   : > { %13585 = vmatmul.mubr.msk.bf16.gmra.mrb[60].mxu0 %vm4734_vm1, %v14304_v3 }
 0x11e   : > { %13651 = vmatmul.mubr.msk.bf16.gmra.mrb[60].mxu1 %vm4734_vm1, %v14305_v4  ;;  %13656 = vmatprep.mubr.msk.bf16.mxu0 %vm4734_vm1, %v14306_v5  ;;  %v14355_v5 = vld [vmem:[%s15420_s29 + $0x3c0] sm:$0xff]  }
 0x11f   : > { %13722 = vmatprep.mubr.msk.bf16.mxu1 %vm4734_vm1, %v14307_v6 }
 0x125   : > { %13657 = vmatmul.mubr.msk.bf16.vlgmr.msra.gmra.mrb[64].mxu0 %vm4734_vm1, %v14308_v7 }
 0x126   : > { %13723 = vmatmul.mubr.msk.bf16.vlgmr.msra.gmra.mrb[64].mxu1 %vm4734_vm1, %v14309_v8  ;;  %13787 = vmatpush3.bf16.msra.mxu0 %v15414_v2 }
 0x127   : > { %13853 = vmatpush3.bf16.msra.mxu1 %v15414_v2  ;;  %13660 = vmatprep.mubr.msk.bf16.mxu0 %vm4734_vm1, %v14310_v9 }
 0x128   : > { %13726 = vmatprep.mubr.msk.bf16.mxu1 %vm4734_vm1, %v14311_v10  ;;  %14216 = vmatprep.subr.msk.bf16.mxu0 %vm4831_vm0, %v15407_v1 }
 0x129   : > { %14217 = vmatprep.subr.msk.bf16.mxu1 %vm4831_vm0, %v15407_v1  ;;  %v14320_v1 = vld [vmem:[%s15420_s29 + $0x238] sm:$0xff]  }
 0x12d   : > { %13661 = vmatmul.mubr.msk.bf16.gmra.mrb[68].mxu0 %vm4734_vm1, %v14312_v11 }
 0x12e   : > { %13727 = vmatmul.mubr.msk.bf16.gmra.mrb[68].mxu1 %vm4734_vm1, %v14313_v12  ;;  %13664 = vmatprep.mubr.msk.bf16.mxu0 %vm4734_vm1, %v14314_v13 }
 0x12f   : > { %13730 = vmatprep.mubr.msk.bf16.mxu1 %vm4734_vm1, %v14315_v14 }
 0x135   : > { %13665 = vmatmul.mubr.msk.bf16.gmra.mrb[72].mxu0 %vm4734_vm1, %v14316_v15 }
 0x136   : > { %13731 = vmatmul.mubr.msk.bf16.gmra.mrb[72].mxu1 %vm4734_vm1, %v14317_v16  ;;  %13668 = vmatprep.mubr.msk.bf16.mxu0 %vm4734_vm1, %v14318_v17 }
 0x137   : > { %13734 = vmatprep.mubr.msk.bf16.mxu1 %vm4734_vm1, %v14319_v18  ;;  %v14356_v18 = vld [vmem:[%s15420_s29 + $0x2c8] sm:$0xff]  }
 0x13d   : > { %13669 = vmatmul.mubr.msk.bf16.gmra.mrb[76].mxu0 %vm4734_vm1, %v14320_v1 }
 0x13e   : > { %13735 = vmatmul.mubr.msk.bf16.gmra.mrb[76].mxu1 %vm4734_vm1, %v14321_v19  ;;  %13672 = vmatprep.mubr.msk.bf16.mxu0 %vm4734_vm1, %v14322_v20  ;;  %v14357_v20 = vld [vmem:[%s15420_s29 + $0x3c8] sm:$0xff]  }
 0x13f   : > { %13738 = vmatprep.mubr.msk.bf16.mxu1 %vm4734_vm1, %v14323_v21  ;;  %v14358_v21 = vld [vmem:[%s15420_s29 + $0x2d0] sm:$0xff]  }
 0x145   : > { %13673 = vmatmul.mubr.msk.bf16.gmra.mrb[80].mxu0 %vm4734_vm1, %v14324_v22 }
 0x146   : > { %13739 = vmatmul.mubr.msk.bf16.gmra.mrb[80].mxu1 %vm4734_vm1, %v14325_v23  ;;  %13676 = vmatprep.mubr.msk.bf16.mxu0 %vm4734_vm1, %v14326_v24 }
 0x147   : > { %13742 = vmatprep.mubr.msk.bf16.mxu1 %vm4734_vm1, %v14327_v25 }
 0x14d   : > { %13677 = vmatmul.mubr.msk.bf16.gmra.mrb[84].mxu0 %vm4734_vm1, %v14328_v26 }
 0x14e   : > { %13743 = vmatmul.mubr.msk.bf16.gmra.mrb[84].mxu1 %vm4734_vm1, %v14329_v27  ;;  %13680 = vmatprep.mubr.msk.bf16.mxu0 %vm4734_vm1, %v14330_v28 }
 0x14f   : > { %13746 = vmatprep.mubr.msk.bf16.mxu1 %vm4734_vm1, %v14331_v29 }
 0x155   : > { %13681 = vmatmul.mubr.msk.bf16.gmra.mrb[88].mxu0 %vm4734_vm1, %v14332_v30 }
 0x156   : > { %13747 = vmatmul.mubr.msk.bf16.gmra.mrb[88].mxu1 %vm4734_vm1, %v14333_v31  ;;  %13684 = vmatprep.mubr.msk.bf16.mxu0 %vm4734_vm1, %v14334_v32 }
 0x157   : > { %13750 = vmatprep.mubr.msk.bf16.mxu1 %vm4734_vm1, %v14335_v33 }
 0x15d   : > { %13685 = vmatmul.mubr.msk.bf16.gmra.mrb[92].mxu0 %vm4734_vm1, %v14336_v34 }
 0x15e   : > { %13751 = vmatmul.mubr.msk.bf16.gmra.mrb[92].mxu1 %vm4734_vm1, %v14337_v35  ;;  %13688 = vmatprep.mubr.msk.bf16.mxu0 %vm4734_vm1, %v14338_v36  ;;  %v14359_v36 = vld [vmem:[%s15420_s29 + $0x3d0] sm:$0xff]  }
 0x15f   : > { %13754 = vmatprep.mubr.msk.bf16.mxu1 %vm4734_vm1, %v14339_v37 }
 0x165   : > { %13689 = vmatmul.mubr.msk.bf16.gmra.mrb[96].mxu0 %vm4734_vm1, %v14340_v38 }
 0x166   : > { %13755 = vmatmul.mubr.msk.bf16.gmra.mrb[96].mxu1 %vm4734_vm1, %v14341_v39  ;;  %13692 = vmatprep.mubr.msk.bf16.mxu0 %vm4734_vm1, %v14342_v40 }
 0x167   : > { %13758 = vmatprep.mubr.msk.bf16.mxu1 %vm4734_vm1, %v14343_v41 }
 0x16d   : > { %13693 = vmatmul.mubr.msk.bf16.gmra.mrb[100].mxu0 %vm4734_vm1, %v14344_v42 }
 0x16e   : > { %13759 = vmatmul.mubr.msk.bf16.gmra.mrb[100].mxu1 %vm4734_vm1, %v14345_v43  ;;  %13696 = vmatprep.mubr.msk.bf16.mxu0 %vm4734_vm1, %v14346_v44 }
 0x16f   : > { %13762 = vmatprep.mubr.msk.bf16.mxu1 %vm4734_vm1, %v14347_v45 }
 0x175   : > { %13697 = vmatmul.mubr.msk.bf16.gmra.mrb[104].mxu0 %vm4734_vm1, %v14348_v46 }
 0x176   : > { %13763 = vmatmul.mubr.msk.bf16.gmra.mrb[104].mxu1 %vm4734_vm1, %v14349_v47  ;;  %13700 = vmatprep.mubr.msk.bf16.mxu0 %vm4734_vm1, %v14350_v48 }
 0x177   : > { %13766 = vmatprep.mubr.msk.bf16.mxu1 %vm4734_vm1, %v14351_v49  ;;  %v14360_v49 = vld [vmem:[%s15420_s29 + $0x2d8] sm:$0xff]  }
 0x178   : > { %v13526_v52 = vpop.f32.mrb[0].mxu0 }
 0x179   : > { %v4878_v55 = vadd.f32 %v13526_v52, %v15657_v50  ;;  %v13592_v56 = vpop.f32.mrb[0].mxu1  ;;  %v4869_v57 = vpop.f32.mrb[1].mxu0 }
 0x17a   : > { %v5552_v58 = vadd.f32 %v13592_v56, %v15657_v50  ;;  %v4870_v59 = vadd.f32 %v15657_v50, %v4869_v57  ;;  %v5543_v60 = vpop.f32.mrb[1].mxu1  ;;  %v13527_v61 = vpop.f32.mrb[2].mxu0 }
 0x17b   : > { %v5126_v62 = vmax.f32 %v4878_v55, 0.0  ;;  %v5544_v63 = vadd.f32 %v15657_v50, %v5543_v60  ;;  %v4881_v0 = vadd.f32 %v13527_v61, %v15657_v50  ;;  %v13593_v3 = vpop.f32.mrb[2].mxu1  ;;  %v4872_v4 = vpop.f32.mrb[3].mxu0 }
 0x17c   : > { %v5800_v6 = vmax.f32 %v5552_v58, 0.0  ;;  %v5124_v7 = vmax.f32 %v4870_v59, 0.0  ;;  %v5555_v8 = vadd.f32 %v13593_v3, %v15657_v50  ;;  %v4873_v9 = vadd.f32 %v15657_v50, %v4872_v4  ;;  %v5546_v10 = vpop.f32.mrb[3].mxu1 }
 0x17d   : > { %v5798_v11 = vmax.f32 %v5544_v63, 0.0  ;;  %v5127_v12 = vmax.f32 %v4881_v0, 0.0  ;;  %v5547_v13 = vadd.f32 %v15657_v50, %v5546_v10  ;;  %13701 = vmatmul.mubr.msk.bf16.gmra.mrb[108].mxu0 %vm4734_vm1, %v14352_v51 }
 0x17e   : > { %v5801_v14 = vmax.f32 %v5555_v8, 0.0  ;;  %v5125_v15 = vmax.f32 %v4873_v9, 0.0  ;;  %13767 = vmatmul.mubr.msk.bf16.gmra.mrb[108].mxu1 %vm4734_vm1, %v14353_v53  ;;  %13704 = vmatprep.mubr.msk.bf16.mxu0 %vm4734_vm1, %v14354_v54  ;;  %v15678_v16 = vadd.f32 %v5800_v6, %v5126_v62  ;;  %v14361_v53 = vld [vmem:[%s15420_s29 + $0x3d8] sm:$0xff]   ;;  %v14362_v54 = vld [vmem:[%s15420_s29 + $0x2e0] sm:$0xff]  }
 0x17f   : > { %v5799_v17 = vmax.f32 %v5547_v13, 0.0  ;;  %13770 = vmatprep.mubr.msk.bf16.mxu1 %vm4734_vm1, %v14355_v5  ;;  %v15682_v1 = vadd.f32 %v5798_v11, %v5124_v7  ;;  %v14363_v7 = vld [vmem:[%s15420_s29 + $0x3e0] sm:$0xff]  }
 0x180   : > { %v13530_v19 = vpop.f32.mrb[4].mxu0  ;;  %v15686_v22 = vadd.f32 %v5801_v14, %v5127_v12 }
 0x181   : > { %v4894_v23 = vadd.f32 %v13530_v19, %v15657_v50  ;;  %v13596_v24 = vpop.f32.mrb[4].mxu1  ;;  %v4885_v25 = vpop.f32.mrb[5].mxu0  ;;  %v15689_v26 = vadd.f32 %v5799_v17, %v5125_v15 }
 0x182   : > { %v5568_v27 = vadd.f32 %v13596_v24, %v15657_v50  ;;  %v4886_v28 = vadd.f32 %v15657_v50, %v4885_v25  ;;  %v5559_v29 = vpop.f32.mrb[5].mxu1  ;;  %v13531_v30 = vpop.f32.mrb[6].mxu0  ;;  %v14365_v25 = vld [vmem:[%s15420_s29 + $0x3e8] sm:$0xff]  }
 0x183   : > { %v5130_v31 = vmax.f32 %v4894_v23, 0.0  ;;  %v5560_v32 = vadd.f32 %v15657_v50, %v5559_v29  ;;  %v4897_v33 = vadd.f32 %v13531_v30, %v15657_v50  ;;  %v13597_v34 = vpop.f32.mrb[6].mxu1  ;;  %v4888_v35 = vpop.f32.mrb[7].mxu0 }
 0x184   : > { %v5804_v37 = vmax.f32 %v5568_v27, 0.0  ;;  %v5128_v38 = vmax.f32 %v4886_v28, 0.0  ;;  %v5571_v39 = vadd.f32 %v13597_v34, %v15657_v50  ;;  %v4889_v40 = vadd.f32 %v15657_v50, %v4888_v35  ;;  %v5562_v41 = vpop.f32.mrb[7].mxu1  ;;  %v14366_v27 = vld [vmem:[%s15420_s29 + $0x2f0] sm:$0xff]  }
 0x185   : > { %v5802_v42 = vmax.f32 %v5560_v32, 0.0  ;;  %v5131_v43 = vmax.f32 %v4897_v33, 0.0  ;;  %v5563_v44 = vadd.f32 %v15657_v50, %v5562_v41  ;;  %13705 = vmatmul.mubr.msk.bf16.gmra.mrb[112].mxu0 %vm4734_vm1, %v14356_v18 }
 0x186   : > { %v5805_v45 = vmax.f32 %v5571_v39, 0.0  ;;  %v5129_v46 = vmax.f32 %v4889_v40, 0.0  ;;  %13771 = vmatmul.mubr.msk.bf16.gmra.mrb[112].mxu1 %vm4734_vm1, %v14357_v20  ;;  %13708 = vmatprep.mubr.msk.bf16.mxu0 %vm4734_vm1, %v14358_v21  ;;  %v15702_v47 = vadd.f32 %v5804_v37, %v5130_v31  ;;  %v14364_v21 = vld [vmem:[%s15420_s29 + $0x2e8] sm:$0xff]  }
 0x187   : > { %v5803_v48 = vmax.f32 %v5563_v44, 0.0  ;;  %13774 = vmatprep.mubr.msk.bf16.mxu1 %vm4734_vm1, %v14359_v36  ;;  %v15706_v51 = vadd.f32 %v5802_v42, %v5128_v38  ;;  %v14367_v42 = vld [vmem:[%s15420_s29 + $0x3f0] sm:$0xff]  }
 0x188   : > { %v13534_v52 = vpop.f32.mrb[8].mxu0  ;;  %v15710_v55 = vadd.f32 %v5805_v45, %v5131_v43 }
 0x189   : > { %v4910_v56 = vadd.f32 %v13534_v52, %v15657_v50  ;;  %v13600_v57 = vpop.f32.mrb[8].mxu1  ;;  %v4901_v58 = vpop.f32.mrb[9].mxu0  ;;  %v15713_v59 = vadd.f32 %v5803_v48, %v5129_v46 }
 0x18a   : > { %v5584_v60 = vadd.f32 %v13600_v57, %v15657_v50  ;;  %v4902_v61 = vadd.f32 %v15657_v50, %v4901_v58  ;;  %v5575_v62 = vpop.f32.mrb[9].mxu1  ;;  %v13535_v63 = vpop.f32.mrb[10].mxu0 }
 0x18b   : > { %v5134_v0 = vmax.f32 %v4910_v56, 0.0  ;;  %v5576_v3 = vadd.f32 %v15657_v50, %v5575_v62  ;;  %v4913_v4 = vadd.f32 %v13535_v63, %v15657_v50  ;;  %v13601_v5 = vpop.f32.mrb[10].mxu1  ;;  %v4904_v6 = vpop.f32.mrb[11].mxu0  ;;  %v14369_v63 = vld [vmem:[%s15420_s29 + $0x3f8] sm:$0xff]  }
 0x18c   : > { %v5808_v8 = vmax.f32 %v5584_v60, 0.0  ;;  %v5132_v9 = vmax.f32 %v4902_v61, 0.0  ;;  %v5587_v10 = vadd.f32 %v13601_v5, %v15657_v50  ;;  %v4905_v11 = vadd.f32 %v15657_v50, %v4904_v6  ;;  %v5578_v12 = vpop.f32.mrb[11].mxu1  ;;  %v14368_v60 = vld [vmem:[%s15420_s29 + $0x2f8] sm:$0xff]  }
 0x18d   : > { %v5806_v13 = vmax.f32 %v5576_v3, 0.0  ;;  %v5135_v14 = vmax.f32 %v4913_v4, 0.0  ;;  %v5579_v15 = vadd.f32 %v15657_v50, %v5578_v12  ;;  %13709 = vmatmul.mubr.msk.bf16.gmra.mrb[116].mxu0 %vm4734_vm1, %v14360_v49 }
 0x18e   : > { %v5809_v17 = vmax.f32 %v5587_v10, 0.0  ;;  %v5133_v18 = vmax.f32 %v4905_v11, 0.0  ;;  %13775 = vmatmul.mubr.msk.bf16.gmra.mrb[116].mxu1 %vm4734_vm1, %v14361_v53  ;;  %13712 = vmatprep.mubr.msk.bf16.mxu0 %vm4734_vm1, %v14362_v54  ;;  %v15726_v19 = vadd.f32 %v5808_v8, %v5134_v0  ;;  %v14370_v0 = vld [vmem:[%s15420_s29 + $0x400] sm:$0xff]  }
 0x18f   : > { %v5807_v20 = vmax.f32 %v5579_v15, 0.0  ;;  %13778 = vmatprep.mubr.msk.bf16.mxu1 %vm4734_vm1, %v14363_v7  ;;  %v15730_v23 = vadd.f32 %v5806_v13, %v5132_v9 }
 0x190   : > { %v13538_v24 = vpop.f32.mrb[12].mxu0  ;;  %v15734_v28 = vadd.f32 %v5809_v17, %v5135_v14 }
 0x191   : > { %v4926_v29 = vadd.f32 %v13538_v24, %v15657_v50  ;;  %v13604_v30 = vpop.f32.mrb[12].mxu1  ;;  %v4917_v31 = vpop.f32.mrb[13].mxu0  ;;  %v15737_v32 = vadd.f32 %v5807_v20, %v5133_v18  ;;  %v14371_v18 = vld [vmem:[%s15420_s29 + $0x500] sm:$0xff]  }
 0x192   : > { %v5600_v33 = vadd.f32 %v13604_v30, %v15657_v50  ;;  %v4918_v34 = vadd.f32 %v15657_v50, %v4917_v31  ;;  %v5591_v35 = vpop.f32.mrb[13].mxu1  ;;  %v13539_v36 = vpop.f32.mrb[14].mxu0 }
 0x193   : > { %v5138_v37 = vmax.f32 %v4926_v29, 0.0  ;;  %v5592_v38 = vadd.f32 %v15657_v50, %v5591_v35  ;;  %v4929_v39 = vadd.f32 %v13539_v36, %v15657_v50  ;;  %v13605_v40 = vpop.f32.mrb[14].mxu1  ;;  %v4920_v41 = vpop.f32.mrb[15].mxu0 }
 0x194   : > { %v5812_v43 = vmax.f32 %v5600_v33, 0.0  ;;  %v5136_v44 = vmax.f32 %v4918_v34, 0.0  ;;  %v5603_v45 = vadd.f32 %v13605_v40, %v15657_v50  ;;  %v4921_v46 = vadd.f32 %v15657_v50, %v4920_v41  ;;  %v5594_v48 = vpop.f32.mrb[15].mxu1  ;;  %v14373_v40 = vld [vmem:[%s15420_s29 + $0x508] sm:$0xff]  }
 0x195   : > { %v5810_v49 = vmax.f32 %v5592_v38, 0.0  ;;  %v5139_v52 = vmax.f32 %v4929_v39, 0.0  ;;  %v5595_v53 = vadd.f32 %v15657_v50, %v5594_v48  ;;  %13713 = vmatmul.mubr.msk.bf16.gmra.mrb[120].mxu0 %vm4734_vm1, %v14364_v21 }
 0x196   : > { %v5813_v54 = vmax.f32 %v5603_v45, 0.0  ;;  %v5137_v56 = vmax.f32 %v4921_v46, 0.0  ;;  %13779 = vmatmul.mubr.msk.bf16.gmra.mrb[120].mxu1 %vm4734_vm1, %v14365_v25  ;;  %13716 = vmatprep.mubr.msk.bf16.mxu0 %vm4734_vm1, %v14366_v27  ;;  %v15750_v57 = vadd.f32 %v5812_v43, %v5138_v37  ;;  %v14372_v37 = vld [vmem:[%s15420_s29 + $0x408] sm:$0xff]  }
 0x197   : > { %v5811_v58 = vmax.f32 %v5595_v53, 0.0  ;;  %13782 = vmatprep.mubr.msk.bf16.mxu1 %vm4734_vm1, %v14367_v42  ;;  %v15754_v61 = vadd.f32 %v5810_v49, %v5136_v44 }
 0x198   : > { %v13542_v62 = vpop.f32.mrb[16].mxu0  ;;  %v15758_v3 = vadd.f32 %v5813_v54, %v5139_v52 }
 0x199   : > { %v4942_v4 = vadd.f32 %v13542_v62, %v15657_v50  ;;  %v13608_v5 = vpop.f32.mrb[16].mxu1  ;;  %v4933_v6 = vpop.f32.mrb[17].mxu0  ;;  %v15761_v7 = vadd.f32 %v5811_v58, %v5137_v56  ;;  %v14374_v62 = vld [vmem:[%s15420_s29 + $0x410] sm:$0xff]  }
 0x19a   : > { %v5616_v8 = vadd.f32 %v13608_v5, %v15657_v50  ;;  %v4934_v9 = vadd.f32 %v15657_v50, %v4933_v6  ;;  %v5607_v10 = vpop.f32.mrb[17].mxu1  ;;  %v13543_v11 = vpop.f32.mrb[18].mxu0 }
 0x19b   : > { %v5142_v12 = vmax.f32 %v4942_v4, 0.0  ;;  %v5608_v13 = vadd.f32 %v15657_v50, %v5607_v10  ;;  %v4945_v14 = vadd.f32 %v13543_v11, %v15657_v50  ;;  %v13609_v15 = vpop.f32.mrb[18].mxu1  ;;  %v4936_v17 = vpop.f32.mrb[19].mxu0 }
 0x19c   : > { %v5816_v20 = vmax.f32 %v5616_v8, 0.0  ;;  %v5140_v21 = vmax.f32 %v4934_v9, 0.0  ;;  %v5619_v24 = vadd.f32 %v13609_v15, %v15657_v50  ;;  %v4937_v25 = vadd.f32 %v15657_v50, %v4936_v17  ;;  %v5610_v27 = vpop.f32.mrb[19].mxu1  ;;  %v14375_v8 = vld [vmem:[%s15420_s29 + $0x510] sm:$0xff]  }
 0x19d   : > { %v5814_v29 = vmax.f32 %v5608_v13, 0.0  ;;  %v5143_v30 = vmax.f32 %v4945_v14, 0.0  ;;  %v5611_v31 = vadd.f32 %v15657_v50, %v5610_v27  ;;  %13717 = vmatmul.mubr.msk.bf16.gmra.mrb[124].mxu0 %vm4734_vm1, %v14368_v60  ;;  %v14376_v27 = vld [vmem:[%s15420_s29 + $0x418] sm:$0xff]  }
 0x19e   : > { %v5817_v33 = vmax.f32 %v5619_v24, 0.0  ;;  %v5141_v34 = vmax.f32 %v4937_v25, 0.0  ;;  %13783 = vmatmul.mubr.msk.bf16.gmra.mrb[124].mxu1 %vm4734_vm1, %v14369_v63  ;;  %13788 = vmatprep.mubr.msk.bf16.mxu0 %vm4734_vm1, %v14370_v0  ;;  %v15774_v35 = vadd.f32 %v5816_v20, %v5142_v12 }
 0x19f   : > { %v5815_v36 = vmax.f32 %v5611_v31, 0.0  ;;  %13854 = vmatprep.mubr.msk.bf16.mxu1 %vm4734_vm1, %v14371_v18  ;;  %v15778_v38 = vadd.f32 %v5814_v29, %v5140_v21 }
 0x1a0   : > { %v13546_v39 = vpop.f32.mrb[20].mxu0  ;;  %v15781_v41 = vadd.f32 %v5817_v33, %v5143_v30 }
 0x1a1   : > { %v4958_v42 = vadd.f32 %v13546_v39, %v15657_v50  ;;  %v13612_v43 = vpop.f32.mrb[20].mxu1  ;;  %v4949_v44 = vpop.f32.mrb[21].mxu0  ;;  %v15784_v45 = vadd.f32 %v5815_v36, %v5141_v34  ;;  %v14377_v34 = vld [vmem:[%s15420_s29 + $0x518] sm:$0xff]   ;;  %v14378_v36 = vld [vmem:[%s15420_s29 + $0x420] sm:$0xff]  }
 0x1a2   : > { %v5632_v46 = vadd.f32 %v13612_v43, %v15657_v50  ;;  %v4950_v48 = vadd.f32 %v15657_v50, %v4949_v44  ;;  %v5623_v49 = vpop.f32.mrb[21].mxu1  ;;  %v13547_v52 = vpop.f32.mrb[22].mxu0  ;;  %v14379_v44 = vld [vmem:[%s15420_s29 + $0x520] sm:$0xff]  }
 0x1a3   : > { %v5146_v53 = vmax.f32 %v4958_v42, 0.0  ;;  %v5624_v54 = vadd.f32 %v15657_v50, %v5623_v49  ;;  %v4961_v56 = vadd.f32 %v13547_v52, %v15657_v50  ;;  %v13613_v58 = vpop.f32.mrb[22].mxu1  ;;  %v4952_v60 = vpop.f32.mrb[23].mxu0 }
 0x1a4   : > { %v5820_v63 = vmax.f32 %v5632_v46, 0.0  ;;  %v5144_v0 = vmax.f32 %v4950_v48, 0.0  ;;  %v5635_v4 = vadd.f32 %v13613_v58, %v15657_v50  ;;  %v4953_v5 = vadd.f32 %v15657_v50, %v4952_v60  ;;  %v5626_v6 = vpop.f32.mrb[23].mxu1 }
 0x1a5   : > { %v5818_v9 = vmax.f32 %v5624_v54, 0.0  ;;  %v5147_v10 = vmax.f32 %v4961_v56, 0.0  ;;  %v5627_v11 = vadd.f32 %v15657_v50, %v5626_v6  ;;  %13789 = vmatmul.mubr.msk.bf16.vlgmr.msra.gmra.mrb[128].mxu0 %vm4734_vm1, %v14372_v37 }
 0x1a6   : > { %v5821_v12 = vmax.f32 %v5635_v4, 0.0  ;;  %v5145_v13 = vmax.f32 %v4953_v5, 0.0  ;;  %13855 = vmatmul.mubr.msk.bf16.vlgmr.msra.gmra.mrb[128].mxu1 %vm4734_vm1, %v14373_v40  ;;  %13919 = vmatpush3.bf16.msra.mxu0 %v15414_v2  ;;  %v15798_v14 = vadd.f32 %v5820_v63, %v5146_v53 }
 0x1a7   : > { %v5819_v15 = vmax.f32 %v5627_v11, 0.0  ;;  %13985 = vmatpush3.bf16.msra.mxu1 %v15414_v2  ;;  %13792 = vmatprep.mubr.msk.bf16.mxu0 %vm4734_vm1, %v14374_v62  ;;  %v15802_v17 = vadd.f32 %v5818_v9, %v5144_v0  ;;  %v14380_v11 = vld [vmem:[%s15420_s29 + $0x428] sm:$0xff]  }
 0x1a8   : > { %v13550_v18 = vpop.f32.mrb[24].mxu0  ;;  %13858 = vmatprep.mubr.msk.bf16.mxu1 %vm4734_vm1, %v14375_v8  ;;  %v15805_v20 = vadd.f32 %v5821_v12, %v5147_v10 }
 0x1a9   : > { %v4974_v21 = vadd.f32 %v13550_v18, %v15657_v50  ;;  %v13616_v24 = vpop.f32.mrb[24].mxu1  ;;  %v4965_v25 = vpop.f32.mrb[25].mxu0  ;;  %v15809_v29 = vadd.f32 %v5819_v15, %v5145_v13 }
 0x1aa   : > { %v5648_v2 = vadd.f32 %v13616_v24, %v15657_v50  ;;  %v4966_v30 = vadd.f32 %v15657_v50, %v4965_v25  ;;  %v5639_v31 = vpop.f32.mrb[25].mxu1  ;;  %v13551_v33 = vpop.f32.mrb[26].mxu0  ;;  %v14381_v24 = vld [vmem:[%s15420_s29 + $0x528] sm:$0xff]   ;;  %v14382_v25 = vld [vmem:[%s15420_s29 + $0x430] sm:$0xff]  }
 0x1ab   : > { %v5150_v37 = vmax.f32 %v4974_v21, 0.0  ;;  %v5640_v39 = vadd.f32 %v15657_v50, %v5639_v31  ;;  %v4977_v40 = vadd.f32 %v13551_v33, %v15657_v50  ;;  %v13617_v42 = vpop.f32.mrb[26].mxu1  ;;  %v4968_v43 = vpop.f32.mrb[27].mxu0 }
 0x1ac   : > { %v5824_v46 = vmax.f32 %v5648_v2, 0.0  ;;  %v5148_v48 = vmax.f32 %v4966_v30, 0.0  ;;  %v5651_v49 = vadd.f32 %v13617_v42, %v15657_v50  ;;  %v4969_v52 = vadd.f32 %v15657_v50, %v4968_v43  ;;  %v5642_v53 = vpop.f32.mrb[27].mxu1 }
 0x1ad   : > { %v5822_v54 = vmax.f32 %v5640_v39, 0.0  ;;  %v5151_v56 = vmax.f32 %v4977_v40, 0.0  ;;  %v5643_v58 = vadd.f32 %v15657_v50, %v5642_v53  ;;  %13793 = vmatmul.mubr.msk.bf16.gmra.mrb[132].mxu0 %vm4734_vm1, %v14376_v27 }
 0x1ae   : > { %v5825_v60 = vmax.f32 %v5651_v49, 0.0  ;;  %v5149_v62 = vmax.f32 %v4969_v52, 0.0  ;;  %13859 = vmatmul.mubr.msk.bf16.gmra.mrb[132].mxu1 %vm4734_vm1, %v14377_v34  ;;  %13796 = vmatprep.mubr.msk.bf16.mxu0 %vm4734_vm1, %v14378_v36  ;;  %v15824_v63 = vadd.f32 %v5824_v46, %v5150_v37  ;;  %v14383_v34 = vld [vmem:[%s15420_s29 + $0x530] sm:$0xff]  }
 0x1af   : > { %v5823_v0 = vmax.f32 %v5643_v58, 0.0  ;;  %13862 = vmatprep.mubr.msk.bf16.mxu1 %vm4734_vm1, %v14379_v44  ;;  %v15827_v4 = vadd.f32 %v5822_v54, %v5148_v48 }
 0x1b0   : > { %v13554_v5 = vpop.f32.mrb[28].mxu0  ;;  %v15829_v6 = vadd.f32 %v5825_v60, %v5151_v56 }
 0x1b1   : > { %v4990_v8 = vadd.f32 %v13554_v5, %v15657_v50  ;;  %v13620_v9 = vpop.f32.mrb[28].mxu1  ;;  %v4981_v10 = vpop.f32.mrb[29].mxu0  ;;  %v15833_v12 = vadd.f32 %v5823_v0, %v5149_v62  ;;  %v14384_v5 = vld [vmem:[%s15420_s29 + $0x438] sm:$0xff]  }
 0x1b2   : > { %v5664_v13 = vadd.f32 %v13620_v9, %v15657_v50  ;;  %v4982_v15 = vadd.f32 %v15657_v50, %v4981_v10  ;;  %v5655_v18 = vpop.f32.mrb[29].mxu1  ;;  %v13555_v21 = vpop.f32.mrb[30].mxu0 }
 0x1b3   : > { %v5154_v27 = vmax.f32 %v4990_v8, 0.0  ;;  %v5656_v2 = vadd.f32 %v15657_v50, %v5655_v18  ;;  %v4993_v30 = vadd.f32 %v13555_v21, %v15657_v50  ;;  %v13621_v31 = vpop.f32.mrb[30].mxu1  ;;  %v4984_v33 = vpop.f32.mrb[31].mxu0  ;;  %v14386_v18 = vld [vmem:[%s15420_s29 + $0x440] sm:$0xff]  }
 0x1b4   : > { %v5828_v36 = vmax.f32 %v5664_v13, 0.0  ;;  %v5152_v37 = vmax.f32 %v4982_v15, 0.0  ;;  %v5667_v39 = vadd.f32 %v13621_v31, %v15657_v50  ;;  %v4985_v40 = vadd.f32 %v15657_v50, %v4984_v33  ;;  %v5658_v42 = vpop.f32.mrb[31].mxu1  ;;  %v14385_v15 = vld [vmem:[%s15420_s29 + $0x538] sm:$0xff]  }
 0x1b5   : > { %v5826_v43 = vmax.f32 %v5656_v2, 0.0  ;;  %v5155_v44 = vmax.f32 %v4993_v30, 0.0  ;;  %v5659_v46 = vadd.f32 %v15657_v50, %v5658_v42  ;;  %13797 = vmatmul.mubr.msk.bf16.gmra.mrb[136].mxu0 %vm4734_vm1, %v14380_v11  ;;  %v14387_v30 = vld [vmem:[%s15420_s29 + $0x540] sm:$0xff]  }
 0x1b6   : > { %v5829_v48 = vmax.f32 %v5667_v39, 0.0  ;;  %v5153_v49 = vmax.f32 %v4985_v40, 0.0  ;;  %13863 = vmatmul.mubr.msk.bf16.gmra.mrb[136].mxu1 %vm4734_vm1, %v14381_v24  ;;  %13800 = vmatprep.mubr.msk.bf16.mxu0 %vm4734_vm1, %v14382_v25  ;;  %v15848_v52 = vadd.f32 %v5828_v36, %v5154_v27 }
 0x1b7   : > { %v5827_v53 = vmax.f32 %v5659_v46, 0.0  ;;  %13866 = vmatprep.mubr.msk.bf16.mxu1 %vm4734_vm1, %v14383_v34  ;;  %v15851_v54 = vadd.f32 %v5826_v43, %v5152_v37 }
 0x1b8   : > { %v13558_v56 = vpop.f32.mrb[32].mxu0  ;;  %v15853_v58 = vadd.f32 %v5829_v48, %v5155_v44 }
 0x1b9   : > { %v5006_v60 = vadd.f32 %v13558_v56, %v15657_v50  ;;  %v13624_v62 = vpop.f32.mrb[32].mxu1  ;;  %v4997_v0 = vpop.f32.mrb[33].mxu0  ;;  %v15857_v8 = vadd.f32 %v5827_v53, %v5153_v49 }
 0x1ba   : > { %v5680_v9 = vadd.f32 %v13624_v62, %v15657_v50  ;;  %v4998_v10 = vadd.f32 %v15657_v50, %v4997_v0  ;;  %v5671_v11 = vpop.f32.mrb[33].mxu1  ;;  %v13559_v13 = vpop.f32.mrb[34].mxu0 }
 0x1bb   : > { %v5158_v21 = vmax.f32 %v5006_v60, 0.0  ;;  %v5672_v24 = vadd.f32 %v15657_v50, %v5671_v11  ;;  %v5009_v25 = vadd.f32 %v13559_v13, %v15657_v50  ;;  %v13625_v27 = vpop.f32.mrb[34].mxu1  ;;  %v5000_v2 = vpop.f32.mrb[35].mxu0 }
 0x1bc   : > { %v5832_v31 = vmax.f32 %v5680_v9, 0.0  ;;  %v5156_v33 = vmax.f32 %v4998_v10, 0.0  ;;  %v5683_v34 = vadd.f32 %v13625_v27, %v15657_v50  ;;  %v5001_v36 = vadd.f32 %v15657_v50, %v5000_v2  ;;  %v5674_v37 = vpop.f32.mrb[35].mxu1 }
 0x1bd   : > { %v5830_v39 = vmax.f32 %v5672_v24, 0.0  ;;  %v5159_v40 = vmax.f32 %v5009_v25, 0.0  ;;  %v5675_v42 = vadd.f32 %v15657_v50, %v5674_v37  ;;  %13801 = vmatmul.mubr.msk.bf16.gmra.mrb[140].mxu0 %vm4734_vm1, %v14384_v5  ;;  %v14388_v5 = vld [vmem:[%s15420_s29 + $0x448] sm:$0xff]  }
 0x1be   : > { %v5833_v43 = vmax.f32 %v5683_v34, 0.0  ;;  %v5157_v44 = vmax.f32 %v5001_v36, 0.0  ;;  %13867 = vmatmul.mubr.msk.bf16.gmra.mrb[140].mxu1 %vm4734_vm1, %v14385_v15  ;;  %13804 = vmatprep.mubr.msk.bf16.mxu0 %vm4734_vm1, %v14386_v18  ;;  %v15872_v46 = vadd.f32 %v5832_v31, %v5158_v21  ;;  %v14389_v18 = vld [vmem:[%s15420_s29 + $0x548] sm:$0xff]   ;;  %v14390_v21 = vld [vmem:[%s15420_s29 + $0x450] sm:$0xff]  }
 0x1bf   : > { %v5831_v48 = vmax.f32 %v5675_v42, 0.0  ;;  %13870 = vmatprep.mubr.msk.bf16.mxu1 %vm4734_vm1, %v14387_v30  ;;  %v15875_v49 = vadd.f32 %v5830_v39, %v5156_v33  ;;  %v14391_v31 = vld [vmem:[%s15420_s29 + $0x550] sm:$0xff]  }
 0x1c0   : > { %v13562_v53 = vpop.f32.mrb[36].mxu0  ;;  %v15877_v56 = vadd.f32 %v5833_v43, %v5159_v40 }
 0x1c1   : > { %v5022_v60 = vadd.f32 %v13562_v53, %v15657_v50  ;;  %v13628_v62 = vpop.f32.mrb[36].mxu1  ;;  %v5013_v0 = vpop.f32.mrb[37].mxu0  ;;  %v15881_v9 = vadd.f32 %v5831_v48, %v5157_v44 }
 0x1c2   : > { %v5696_v10 = vadd.f32 %v13628_v62, %v15657_v50  ;;  %v5014_v11 = vadd.f32 %v15657_v50, %v5013_v0  ;;  %v5687_v13 = vpop.f32.mrb[37].mxu1  ;;  %v13563_v15 = vpop.f32.mrb[38].mxu0 }
 0x1c3   : > { %v5162_v24 = vmax.f32 %v5022_v60, 0.0  ;;  %v5688_v25 = vadd.f32 %v15657_v50, %v5687_v13  ;;  %v5025_v27 = vadd.f32 %v13563_v15, %v15657_v50  ;;  %v13629_v2 = vpop.f32.mrb[38].mxu1  ;;  %v5016_v30 = vpop.f32.mrb[39].mxu0  ;;  %v14392_v15 = vld [vmem:[%s15420_s29 + $0x458] sm:$0xff]  }
 0x1c4   : > { %v5836_v33 = vmax.f32 %v5696_v10, 0.0  ;;  %v5160_v34 = vmax.f32 %v5014_v11, 0.0  ;;  %v5699_v36 = vadd.f32 %v13629_v2, %v15657_v50  ;;  %v5017_v37 = vadd.f32 %v15657_v50, %v5016_v30  ;;  %v5690_v39 = vpop.f32.mrb[39].mxu1  ;;  %v14393_v2 = vld [vmem:[%s15420_s29 + $0x558] sm:$0xff]   ;;  %v14394_v30 = vld [vmem:[%s15420_s29 + $0x460] sm:$0xff]  }
 0x1c5   : > { %v5834_v40 = vmax.f32 %v5688_v25, 0.0  ;;  %v5163_v42 = vmax.f32 %v5025_v27, 0.0  ;;  %v5691_v43 = vadd.f32 %v15657_v50, %v5690_v39  ;;  %13805 = vmatmul.mubr.msk.bf16.gmra.mrb[144].mxu0 %vm4734_vm1, %v14388_v5  ;;  %v14395_v39 = vld [vmem:[%s15420_s29 + $0x560] sm:$0xff]  }
 0x1c6   : > { %v5837_v44 = vmax.f32 %v5699_v36, 0.0  ;;  %v5161_v48 = vmax.f32 %v5017_v37, 0.0  ;;  %13871 = vmatmul.mubr.msk.bf16.gmra.mrb[144].mxu1 %vm4734_vm1, %v14389_v18  ;;  %13808 = vmatprep.mubr.msk.bf16.mxu0 %vm4734_vm1, %v14390_v21  ;;  %v15896_v53 = vadd.f32 %v5836_v33, %v5162_v24 }
 0x1c7   : > { %v5835_v60 = vmax.f32 %v5691_v43, 0.0  ;;  %13874 = vmatprep.mubr.msk.bf16.mxu1 %vm4734_vm1, %v14391_v31  ;;  %v15899_v62 = vadd.f32 %v5834_v40, %v5160_v34 }
 0x1c8   : > { %v13566_v0 = vpop.f32.mrb[40].mxu0  ;;  %v15901_v10 = vadd.f32 %v5837_v44, %v5163_v42 }
 0x1c9   : > { %v5038_v5 = vadd.f32 %v13566_v0, %v15657_v50  ;;  %v13632_v11 = vpop.f32.mrb[40].mxu1  ;;  %v5029_v13 = vpop.f32.mrb[41].mxu0  ;;  %v15905_v18 = vadd.f32 %v5835_v60, %v5161_v48 }
 0x1ca   : > { %v5712_v21 = vadd.f32 %v13632_v11, %v15657_v50  ;;  %v5030_v24 = vadd.f32 %v15657_v50, %v5029_v13  ;;  %v5703_v25 = vpop.f32.mrb[41].mxu1  ;;  %v13567_v27 = vpop.f32.mrb[42].mxu0 }
 0x1cb   : > { %v5166_v31 = vmax.f32 %v5038_v5, 0.0  ;;  %v5704_v33 = vadd.f32 %v15657_v50, %v5703_v25  ;;  %v5041_v34 = vadd.f32 %v13567_v27, %v15657_v50  ;;  %v13633_v36 = vpop.f32.mrb[42].mxu1  ;;  %v5032_v37 = vpop.f32.mrb[43].mxu0 }
 0x1cc   : > { %v5840_v40 = vmax.f32 %v5712_v21, 0.0  ;;  %v5164_v42 = vmax.f32 %v5030_v24, 0.0  ;;  %v5715_v43 = vadd.f32 %v13633_v36, %v15657_v50  ;;  %v5033_v44 = vadd.f32 %v15657_v50, %v5032_v37  ;;  %v5706_v48 = vpop.f32.mrb[43].mxu1 }
 0x1cd   : > { %v5838_v60 = vmax.f32 %v5704_v33, 0.0  ;;  %v5167_v0 = vmax.f32 %v5041_v34, 0.0  ;;  %v5707_v11 = vadd.f32 %v15657_v50, %v5706_v48  ;;  %13809 = vmatmul.mubr.msk.bf16.gmra.mrb[148].mxu0 %vm4734_vm1, %v14392_v15 }
 0x1ce   : > { %v5841_v5 = vmax.f32 %v5715_v43, 0.0  ;;  %v5165_v13 = vmax.f32 %v5033_v44, 0.0  ;;  %13875 = vmatmul.mubr.msk.bf16.gmra.mrb[148].mxu1 %vm4734_vm1, %v14393_v2  ;;  %13812 = vmatprep.mubr.msk.bf16.mxu0 %vm4734_vm1, %v14394_v30  ;;  %v15920_v21 = vadd.f32 %v5840_v40, %v5166_v31  ;;  %v14396_v2 = vld [vmem:[%s15420_s29 + $0x468] sm:$0xff]  }
 0x1cf   : > { %v5839_v24 = vmax.f32 %v5707_v11, 0.0  ;;  %13878 = vmatprep.mubr.msk.bf16.mxu1 %vm4734_vm1, %v14395_v39  ;;  %v15923_v25 = vadd.f32 %v5838_v60, %v5164_v42  ;;  %v14397_v39 = vld [vmem:[%s15420_s29 + $0x568] sm:$0xff]   ;;  %v14398_v42 = vld [vmem:[%s15420_s29 + $0x470] sm:$0xff]  }
 0x1d0   : > { %v13570_v27 = vpop.f32.mrb[44].mxu0  ;;  %v15925_v33 = vadd.f32 %v5841_v5, %v5167_v0  ;;  %v14399_v5 = vld [vmem:[%s15420_s29 + $0x570] sm:$0xff]  }
 0x1d1   : > { %17543 = vst [vmem:[#allocation4_spill] sm:$0xff] %v15923_v25  ;;  %v5054_v15 = vadd.f32 %v13570_v27, %v15657_v50  ;;  %v13636_v34 = vpop.f32.mrb[44].mxu1  ;;  %v5045_v36 = vpop.f32.mrb[45].mxu0  ;;  %v15929_v37 = vadd.f32 %v5839_v24, %v5165_v13 }
 0x1d2   : > { %17544 = vst [vmem:[#allocation5_spill] sm:$0xff] %v15925_v33  ;;  %v5728_v30 = vadd.f32 %v13636_v34, %v15657_v50  ;;  %v5046_v31 = vadd.f32 %v15657_v50, %v5045_v36  ;;  %v5719_v40 = vpop.f32.mrb[45].mxu1  ;;  %v13571_v43 = vpop.f32.mrb[46].mxu0 }
 0x1d3   : > { %17545 = vst [vmem:[#allocation6_spill] sm:$0xff] %v15929_v37  ;;  %v5170_v44 = vmax.f32 %v5054_v15, 0.0  ;;  %v5720_v48 = vadd.f32 %v15657_v50, %v5719_v40  ;;  %v5057_v60 = vadd.f32 %v13571_v43, %v15657_v50  ;;  %v13637_v0 = vpop.f32.mrb[46].mxu1  ;;  %v5048_v11 = vpop.f32.mrb[47].mxu0 }
 0x1d4   : > { %v5844_v27 = vmax.f32 %v5728_v30, 0.0  ;;  %v5168_v33 = vmax.f32 %v5046_v31, 0.0  ;;  %v5731_v13 = vadd.f32 %v13637_v0, %v15657_v50  ;;  %v5049_v24 = vadd.f32 %v15657_v50, %v5048_v11  ;;  %v5722_v34 = vpop.f32.mrb[47].mxu1 }
 0x1d5   : > { %v5842_v36 = vmax.f32 %v5720_v48, 0.0  ;;  %v5171_v37 = vmax.f32 %v5057_v60, 0.0  ;;  %v5723_v25 = vadd.f32 %v15657_v50, %v5722_v34  ;;  %13813 = vmatmul.mubr.msk.bf16.gmra.mrb[152].mxu0 %vm4734_vm1, %v14396_v2  ;;  %v15954_v2 = vld [vmem:[%s17535_s2] ss:$0 sm:$0xff] }
 0x1d6   : > { %v5845_v15 = vmax.f32 %v5731_v13, 0.0  ;;  %v5169_v40 = vmax.f32 %v5049_v24, 0.0  ;;  %13879 = vmatmul.mubr.msk.bf16.gmra.mrb[152].mxu1 %vm4734_vm1, %v14397_v39  ;;  %13816 = vmatprep.mubr.msk.bf16.mxu0 %vm4734_vm1, %v14398_v42  ;;  %v15944_v30 = vadd.f32 %v5844_v27, %v5170_v44  ;;  %v14400_v60 = vld [vmem:[%s15420_s29 + $0x478] sm:$0xff]   ;;  %v14402_v27 = vld [vmem:[%s15420_s29 + $0x480] sm:$0xff]  }
 0x1d7   : > { %v5843_v31 = vmax.f32 %v5723_v25, 0.0  ;;  %13882 = vmatprep.mubr.msk.bf16.mxu1 %vm4734_vm1, %v14399_v5  ;;  %v15947_v43 = vadd.f32 %v5842_v36, %v5168_v33  ;;  %v14401_v5 = vld [vmem:[%s15420_s29 + $0x578] sm:$0xff]  }
 0x1d8   : > { %17546 = vst [vmem:[#allocation7_spill] sm:$0xff] %v15944_v30  ;;  %v13574_v48 = vpop.f32.mrb[48].mxu0  ;;  %v15949_v50 = vadd.f32 %v5845_v15, %v5171_v37 }
 0x1d9   : > { %17547 = vst [vmem:[#allocation8_spill] sm:$0xff] %v15947_v43  ;;  %v5070_v39 = vadd.f32 %v15954_v2, %v13574_v48  ;;  %v13640_v42 = vpop.f32.mrb[48].mxu1  ;;  %v5061_v44 = vpop.f32.mrb[49].mxu0  ;;  %v15958_v25 = vadd.f32 %v5843_v31, %v5169_v40  ;;  %v14403_v48 = vld [vmem:[%s15420_s29 + $0x580] sm:$0xff]  }
 0x1da   : > { %17548 = vst [vmem:[#allocation9_spill] sm:$0xff] %v15949_v50  ;;  %v5744_v0 = vadd.f32 %v15954_v2, %v13640_v42  ;;  %v5062_v33 = vadd.f32 %v15954_v2, %v5061_v44  ;;  %v5735_v11 = vpop.f32.mrb[49].mxu1  ;;  %v13575_v37 = vpop.f32.mrb[50].mxu0 }
 0x1db   : > { %17549 = vst [vmem:[#allocation10_spill] sm:$0xff] %v15958_v25  ;;  %v5174_v13 = vmax.f32 %v5070_v39, 0.0  ;;  %v5736_v24 = vadd.f32 %v15954_v2, %v5735_v11  ;;  %v5073_v34 = vadd.f32 %v15954_v2, %v13575_v37  ;;  %v13641_v36 = vpop.f32.mrb[50].mxu1  ;;  %v5064_v15 = vpop.f32.mrb[51].mxu0 }
 0x1dc   : > { %v5848_v50 = vmax.f32 %v5744_v0, 0.0  ;;  %v5172_v43 = vmax.f32 %v5062_v33, 0.0  ;;  %v5747_v40 = vadd.f32 %v15954_v2, %v13641_v36  ;;  %v5065_v31 = vadd.f32 %v15954_v2, %v5064_v15  ;;  %v5738_v42 = vpop.f32.mrb[51].mxu1 }
 0x1dd   : > { %v5846_v44 = vmax.f32 %v5736_v24, 0.0  ;;  %v5175_v25 = vmax.f32 %v5073_v34, 0.0  ;;  %v5739_v30 = vadd.f32 %v15954_v2, %v5738_v42  ;;  %13817 = vmatmul.mubr.msk.bf16.gmra.mrb[156].mxu0 %vm4734_vm1, %v14400_v60 }
 0x1de   : > { %v5849_v39 = vmax.f32 %v5747_v40, 0.0  ;;  %v5173_v11 = vmax.f32 %v5065_v31, 0.0  ;;  %13883 = vmatmul.mubr.msk.bf16.gmra.mrb[156].mxu1 %vm4734_vm1, %v14401_v5  ;;  %13820 = vmatprep.mubr.msk.bf16.mxu0 %vm4734_vm1, %v14402_v27  ;;  %v15973_v0 = vadd.f32 %v5848_v50, %v5174_v13  ;;  %v14404_v5 = vld [vmem:[%s15420_s29 + $0x488] sm:$0xff]  }
 0x1df   : > { %v5847_v33 = vmax.f32 %v5739_v30, 0.0  ;;  %13886 = vmatprep.mubr.msk.bf16.mxu1 %vm4734_vm1, %v14403_v48  ;;  %v15976_v37 = vadd.f32 %v5846_v44, %v5172_v43  ;;  %v14405_v48 = vld [vmem:[%s15420_s29 + $0x588] sm:$0xff]   ;;  %v14406_v43 = vld [vmem:[%s15420_s29 + $0x490] sm:$0xff]  }
 0x1e0   : > { %17550 = vst [vmem:[#allocation11_spill] sm:$0xff] %v15973_v0  ;;  %v13578_v24 = vpop.f32.mrb[52].mxu0  ;;  %v15978_v34 = vadd.f32 %v5849_v39, %v5175_v25 }
 0x1e1   : > { %17551 = vst [vmem:[#allocation12_spill] sm:$0xff] %v15976_v37  ;;  %v5086_v60 = vadd.f32 %v15954_v2, %v13578_v24  ;;  %v13644_v36 = vpop.f32.mrb[52].mxu1  ;;  %v5077_v15 = vpop.f32.mrb[53].mxu0  ;;  %v15982_v40 = vadd.f32 %v5847_v33, %v5173_v11  ;;  %v14407_v24 = vld [vmem:[%s15420_s29 + $0x590] sm:$0xff]  }
 0x1e2   : > { %17552 = vst [vmem:[#allocation13_spill] sm:$0xff] %v15978_v34  ;;  %v5760_v50 = vadd.f32 %v15954_v2, %v13644_v36  ;;  %v5078_v27 = vadd.f32 %v15954_v2, %v5077_v15  ;;  %v5751_v30 = vpop.f32.mrb[53].mxu1  ;;  %v13579_v13 = vpop.f32.mrb[54].mxu0 }
 0x1e3   : > { %17553 = vst [vmem:[#allocation14_spill] sm:$0xff] %v15982_v40  ;;  %v5178_v31 = vmax.f32 %v5086_v60, 0.0  ;;  %v5752_v25 = vadd.f32 %v15954_v2, %v5751_v30  ;;  %v5089_v42 = vadd.f32 %v15954_v2, %v13579_v13  ;;  %v13645_v44 = vpop.f32.mrb[54].mxu1  ;;  %v5080_v39 = vpop.f32.mrb[55].mxu0 }
 0x1e4   : > { %v5852_v34 = vmax.f32 %v5760_v50, 0.0  ;;  %v5176_v37 = vmax.f32 %v5078_v27, 0.0  ;;  %v5763_v11 = vadd.f32 %v15954_v2, %v13645_v44  ;;  %v5081_v33 = vadd.f32 %v15954_v2, %v5080_v39  ;;  %v5754_v36 = vpop.f32.mrb[55].mxu1 }
 0x1e5   : > { %v5850_v15 = vmax.f32 %v5752_v25, 0.0  ;;  %v5179_v40 = vmax.f32 %v5089_v42, 0.0  ;;  %v5755_v0 = vadd.f32 %v15954_v2, %v5754_v36  ;;  %13821 = vmatmul.mubr.msk.bf16.gmra.mrb[160].mxu0 %vm4734_vm1, %v14404_v5 }
 0x1e6   : > { %v5853_v60 = vmax.f32 %v5763_v11, 0.0  ;;  %v5177_v30 = vmax.f32 %v5081_v33, 0.0  ;;  %13887 = vmatmul.mubr.msk.bf16.gmra.mrb[160].mxu1 %vm4734_vm1, %v14405_v48  ;;  %13824 = vmatprep.mubr.msk.bf16.mxu0 %vm4734_vm1, %v14406_v43  ;;  %v15997_v50 = vadd.f32 %v5852_v34, %v5178_v31  ;;  %v14408_v48 = vld [vmem:[%s15420_s29 + $0x498] sm:$0xff]  }
 0x1e7   : > { %v5851_v27 = vmax.f32 %v5755_v0, 0.0  ;;  %13890 = vmatprep.mubr.msk.bf16.mxu1 %vm4734_vm1, %v14407_v24  ;;  %v16000_v13 = vadd.f32 %v5850_v15, %v5176_v37  ;;  %v14409_v24 = vld [vmem:[%s15420_s29 + $0x598] sm:$0xff]   ;;  %v14410_v37 = vld [vmem:[%s15420_s29 + $0x4a0] sm:$0xff]  }
 0x1e8   : > { %17554 = vst [vmem:[#allocation15_spill] sm:$0xff] %v15997_v50  ;;  %v13582_v25 = vpop.f32.mrb[56].mxu0  ;;  %v16002_v42 = vadd.f32 %v5853_v60, %v5179_v40 }
 0x1e9   : > { %17555 = vst [vmem:[#allocation16_spill] sm:$0xff] %v16000_v13  ;;  %v5102_v5 = vadd.f32 %v15954_v2, %v13582_v25  ;;  %v13648_v44 = vpop.f32.mrb[56].mxu1  ;;  %v5093_v39 = vpop.f32.mrb[57].mxu0  ;;  %v16006_v11 = vadd.f32 %v5851_v27, %v5177_v30  ;;  %v14411_v25 = vld [vmem:[%s15420_s29 + $0x5a0] sm:$0xff]  }
 0x1ea   : > { %17556 = vst [vmem:[#allocation17_spill] sm:$0xff] %v16002_v42  ;;  %v5776_v34 = vadd.f32 %v15954_v2, %v13648_v44  ;;  %v5094_v43 = vadd.f32 %v15954_v2, %v5093_v39  ;;  %v5767_v0 = vpop.f32.mrb[57].mxu1  ;;  %v13583_v31 = vpop.f32.mrb[58].mxu0 }
 0x1eb   : > { %17557 = vst [vmem:[#allocation18_spill] sm:$0xff] %v16006_v11  ;;  %v5182_v33 = vmax.f32 %v5102_v5, 0.0  ;;  %v5768_v40 = vadd.f32 %v15954_v2, %v5767_v0  ;;  %v5105_v36 = vadd.f32 %v15954_v2, %v13583_v31  ;;  %v13649_v15 = vpop.f32.mrb[58].mxu1  ;;  %v5096_v60 = vpop.f32.mrb[59].mxu0 }
 0x1ec   : > { %v5856_v42 = vmax.f32 %v5776_v34, 0.0  ;;  %v5180_v13 = vmax.f32 %v5094_v43, 0.0  ;;  %v5779_v30 = vadd.f32 %v15954_v2, %v13649_v15  ;;  %v5097_v27 = vadd.f32 %v15954_v2, %v5096_v60  ;;  %v5770_v44 = vpop.f32.mrb[59].mxu1 }
 0x1ed   : > { %v5854_v39 = vmax.f32 %v5768_v40, 0.0  ;;  %v5183_v11 = vmax.f32 %v5105_v36, 0.0  ;;  %v5771_v50 = vadd.f32 %v15954_v2, %v5770_v44  ;;  %13825 = vmatmul.mubr.msk.bf16.gmra.mrb[164].mxu0 %vm4734_vm1, %v14408_v48 }
 0x1ee   : > { %v5857_v5 = vmax.f32 %v5779_v30, 0.0  ;;  %v5181_v0 = vmax.f32 %v5097_v27, 0.0  ;;  %13891 = vmatmul.mubr.msk.bf16.gmra.mrb[164].mxu1 %vm4734_vm1, %v14409_v24  ;;  %13828 = vmatprep.mubr.msk.bf16.mxu0 %vm4734_vm1, %v14410_v37  ;;  %v16021_v34 = vadd.f32 %v5856_v42, %v5182_v33  ;;  %v14412_v24 = vld [vmem:[%s15420_s29 + $0x4a8] sm:$0xff]  }
 0x1ef   : > { %v5855_v43 = vmax.f32 %v5771_v50, 0.0  ;;  %13894 = vmatprep.mubr.msk.bf16.mxu1 %vm4734_vm1, %v14411_v25  ;;  %v16024_v31 = vadd.f32 %v5854_v39, %v5180_v13  ;;  %v14413_v25 = vld [vmem:[%s15420_s29 + $0x5a8] sm:$0xff]   ;;  %v14414_v13 = vld [vmem:[%s15420_s29 + $0x4b0] sm:$0xff]  }
 0x1f0   : > { %17558 = vst [vmem:[#allocation19_spill] sm:$0xff] %v16021_v34  ;;  %v13586_v40 = vpop.f32.mrb[60].mxu0  ;;  %v16026_v36 = vadd.f32 %v5857_v5, %v5183_v11 }
 0x1f1   : > { %17559 = vst [vmem:[#allocation20_spill] sm:$0xff] %v16024_v31  ;;  %v5118_v48 = vadd.f32 %v15954_v2, %v13586_v40  ;;  %v13652_v15 = vpop.f32.mrb[60].mxu1  ;;  %v5109_v60 = vpop.f32.mrb[61].mxu0  ;;  %v16030_v30 = vadd.f32 %v5855_v43, %v5181_v0  ;;  %v14415_v40 = vld [vmem:[%s15420_s29 + $0x5b0] sm:$0xff]  }
 0x1f2   : > { %17560 = vst [vmem:[#allocation21_spill] sm:$0xff] %v16026_v36  ;;  %v5792_v42 = vadd.f32 %v15954_v2, %v13652_v15  ;;  %v5110_v37 = vadd.f32 %v15954_v2, %v5109_v60  ;;  %v5783_v50 = vpop.f32.mrb[61].mxu1  ;;  %v13587_v33 = vpop.f32.mrb[62].mxu0 }
 0x1f3   : > { %17561 = vst [vmem:[#allocation22_spill] sm:$0xff] %v16030_v30  ;;  %v5186_v27 = vmax.f32 %v5118_v48, 0.0  ;;  %v5784_v11 = vadd.f32 %v15954_v2, %v5783_v50  ;;  %v5121_v44 = vadd.f32 %v15954_v2, %v13587_v33  ;;  %v13653_v39 = vpop.f32.mrb[62].mxu1  ;;  %v5112_v5 = vpop.f32.mrb[63].mxu0 }
 0x1f4   : > { %v5860_v36 = vmax.f32 %v5792_v42, 0.0  ;;  %v5184_v31 = vmax.f32 %v5110_v37, 0.0  ;;  %v5795_v0 = vadd.f32 %v15954_v2, %v13653_v39  ;;  %v5113_v43 = vadd.f32 %v15954_v2, %v5112_v5  ;;  %v5786_v15 = vpop.f32.mrb[63].mxu1 }
 0x1f5   : > { %v5858_v60 = vmax.f32 %v5784_v11, 0.0  ;;  %v5187_v30 = vmax.f32 %v5121_v44, 0.0  ;;  %v5787_v34 = vadd.f32 %v15954_v2, %v5786_v15  ;;  %13829 = vmatmul.mubr.msk.bf16.gmra.mrb[168].mxu0 %vm4734_vm1, %v14412_v24 }
 0x1f6   : > { %v5861_v48 = vmax.f32 %v5795_v0, 0.0  ;;  %v5185_v50 = vmax.f32 %v5113_v43, 0.0  ;;  %13895 = vmatmul.mubr.msk.bf16.gmra.mrb[168].mxu1 %vm4734_vm1, %v14413_v25  ;;  %13832 = vmatprep.mubr.msk.bf16.mxu0 %vm4734_vm1, %v14414_v13  ;;  %v16045_v42 = vadd.f32 %v5860_v36, %v5186_v27  ;;  %v14416_v25 = vld [vmem:[%s15420_s29 + $0x4b8] sm:$0xff]  }
 0x1f7   : > { %v5859_v37 = vmax.f32 %v5787_v34, 0.0  ;;  %13898 = vmatprep.mubr.msk.bf16.mxu1 %vm4734_vm1, %v14415_v40  ;;  %v16048_v33 = vadd.f32 %v5858_v60, %v5184_v31  ;;  %v14417_v40 = vld [vmem:[%s15420_s29 + $0x5b8] sm:$0xff]   ;;  %v14418_v31 = vld [vmem:[%s15420_s29 + $0x4c0] sm:$0xff]  }
 0x1f8   : > { %17562 = vst [vmem:[#allocation23_spill] sm:$0xff] %v16045_v42  ;;  %v13658_v11 = vpop.f32.mrb[64].mxu0  ;;  %v16050_v44 = vadd.f32 %v5861_v48, %v5187_v30 }
 0x1f9   : > { %17563 = vst [vmem:[#allocation24_spill] sm:$0xff] %v16048_v33  ;;  %v6290_v24 = vadd.f32 %v15954_v2, %v13658_v11  ;;  %v13724_v39 = vpop.f32.mrb[64].mxu1  ;;  %v6281_v5 = vpop.f32.mrb[65].mxu0  ;;  %v16054_v0 = vadd.f32 %v5859_v37, %v5185_v50  ;;  %v14419_v11 = vld [vmem:[%s15420_s29 + $0x5c0] sm:$0xff]  }
 0x1fa   : > { %17564 = vst [vmem:[#allocation25_spill] sm:$0xff] %v16050_v44  ;;  %v7028_v36 = vadd.f32 %v15954_v2, %v13724_v39  ;;  %v6282_v13 = vadd.f32 %v15954_v2, %v6281_v5  ;;  %v7019_v34 = vpop.f32.mrb[65].mxu1  ;;  %v13659_v27 = vpop.f32.mrb[66].mxu0 }
 0x1fb   : > { %17565 = vst [vmem:[#allocation26_spill] sm:$0xff] %v16054_v0  ;;  %v6538_v43 = vmax.f32 %v6290_v24, 0.0  ;;  %v7020_v30 = vadd.f32 %v15954_v2, %v7019_v34  ;;  %v6293_v15 = vadd.f32 %v15954_v2, %v13659_v27  ;;  %v13725_v60 = vpop.f32.mrb[66].mxu1  ;;  %v6284_v48 = vpop.f32.mrb[67].mxu0 }
 0x1fc   : > { %v7276_v44 = vmax.f32 %v7028_v36, 0.0  ;;  %v6536_v33 = vmax.f32 %v6282_v13, 0.0  ;;  %v7031_v50 = vadd.f32 %v15954_v2, %v13725_v60  ;;  %v6285_v37 = vadd.f32 %v15954_v2, %v6284_v48  ;;  %v7022_v39 = vpop.f32.mrb[67].mxu1 }
 0x1fd   : > { %v6602_v5 = vadd.f32 %v6538_v43, %v15678_v16  ;;  %v7274_v0 = vmax.f32 %v7020_v30, 0.0  ;;  %v6539_v42 = vmax.f32 %v6293_v15, 0.0  ;;  %v7023_v24 = vadd.f32 %v15954_v2, %v7022_v39  ;;  %13833 = vmatmul.mubr.msk.bf16.gmra.mrb[172].mxu0 %vm4734_vm1, %v14416_v25  ;;  %v14420_v30 = vld [vmem:[%s15420_s29 + $0x4c8] sm:$0xff]  }
 0x1fe   : > { %v6600_v34 = vadd.f32 %v6536_v33, %v15682_v1  ;;  %v6537_v27 = vmax.f32 %v6285_v37, 0.0  ;;  %13899 = vmatmul.mubr.msk.bf16.gmra.mrb[172].mxu1 %vm4734_vm1, %v14417_v40  ;;  %13836 = vmatprep.mubr.msk.bf16.mxu0 %vm4734_vm1, %v14418_v31  ;;  %v7277_v60 = vmax.f32 %v7031_v50, 0.0 }
 0x1ff   : > { %v16071_v36 = vadd.f32 %v7276_v44, %v6602_v5  ;;  %v6603_v13 = vadd.f32 %v6539_v42, %v15686_v22  ;;  %13902 = vmatprep.mubr.msk.bf16.mxu1 %vm4734_vm1, %v14419_v11  ;;  %v7275_v1 = vmax.f32 %v7023_v24, 0.0  ;;  %v14421_v11 = vld [vmem:[%s15420_s29 + $0x5c8] sm:$0xff]  }
 0x200   : > { %v16075_v16 = vadd.f32 %v7274_v0, %v6600_v34  ;;  %v6601_v25 = vadd.f32 %v6537_v27, %v15689_v26  ;;  %v13662_v33 = vpop.f32.mrb[68].mxu0  ;;  %v14422_v26 = vld [vmem:[%s15420_s29 + $0x4d0] sm:$0xff]  }
 0x201   : > { %v16078_v43 = vadd.f32 %v7277_v60, %v6603_v13  ;;  %v6306_v40 = vadd.f32 %v15954_v2, %v13662_v33  ;;  %v13728_v44 = vpop.f32.mrb[68].mxu1  ;;  %v6297_v31 = vpop.f32.mrb[69].mxu0  ;;  %v14423_v34 = vld [vmem:[%s15420_s29 + $0x5d0] sm:$0xff]  }
 0x202   : > { %v16082_v22 = vadd.f32 %v7275_v1, %v6601_v25  ;;  %v7044_v42 = vadd.f32 %v15954_v2, %v13728_v44  ;;  %v6298_v15 = vadd.f32 %v15954_v2, %v6297_v31  ;;  %v7035_v0 = vpop.f32.mrb[69].mxu1  ;;  %v13663_v48 = vpop.f32.mrb[70].mxu0 }
 0x203   : > { %v6542_v50 = vmax.f32 %v6306_v40, 0.0  ;;  %v7036_v37 = vadd.f32 %v15954_v2, %v7035_v0  ;;  %v6309_v39 = vadd.f32 %v15954_v2, %v13663_v48  ;;  %v13729_v5 = vpop.f32.mrb[70].mxu1  ;;  %v6300_v24 = vpop.f32.mrb[71].mxu0 }
 0x204   : > { %v7280_v27 = vmax.f32 %v7044_v42, 0.0  ;;  %v6540_v13 = vmax.f32 %v6298_v15, 0.0  ;;  %v7047_v60 = vadd.f32 %v15954_v2, %v13729_v5  ;;  %v6301_v25 = vadd.f32 %v15954_v2, %v6300_v24  ;;  %v7038_v1 = vpop.f32.mrb[71].mxu1  ;;  %v14424_v24 = vld [vmem:[%s15420_s29 + $0x4d8] sm:$0xff]  }
 0x205   : > { %v6606_v33 = vadd.f32 %v6542_v50, %v15702_v47  ;;  %v7278_v44 = vmax.f32 %v7036_v37, 0.0  ;;  %v6543_v31 = vmax.f32 %v6309_v39, 0.0  ;;  %v7039_v40 = vadd.f32 %v15954_v2, %v7038_v1  ;;  %13837 = vmatmul.mubr.msk.bf16.gmra.mrb[176].mxu0 %vm4734_vm1, %v14420_v30 }
 0x206   : > { %v6604_v0 = vadd.f32 %v6540_v13, %v15706_v51  ;;  %v6541_v48 = vmax.f32 %v6301_v25, 0.0  ;;  %13903 = vmatmul.mubr.msk.bf16.gmra.mrb[176].mxu1 %vm4734_vm1, %v14421_v11  ;;  %13840 = vmatprep.mubr.msk.bf16.mxu0 %vm4734_vm1, %v14422_v26  ;;  %v7281_v5 = vmax.f32 %v7047_v60, 0.0  ;;  %v14425_v25 = vld [vmem:[%s15420_s29 + $0x5d8] sm:$0xff]  }
 0x207   : > { %v16099_v42 = vadd.f32 %v7280_v27, %v6606_v33  ;;  %v6607_v15 = vadd.f32 %v6543_v31, %v15710_v55  ;;  %13906 = vmatprep.mubr.msk.bf16.mxu1 %vm4734_vm1, %v14423_v34  ;;  %v7279_v51 = vmax.f32 %v7039_v40, 0.0 }
 0x208   : > { %v16103_v47 = vadd.f32 %v7278_v44, %v6604_v0  ;;  %v6605_v30 = vadd.f32 %v6541_v48, %v15713_v59  ;;  %v13666_v50 = vpop.f32.mrb[72].mxu0  ;;  %v14426_v59 = vld [vmem:[%s15420_s29 + $0x4e0] sm:$0xff]  }
 0x209   : > { %v16106_v37 = vadd.f32 %v7281_v5, %v6607_v15  ;;  %v6322_v11 = vadd.f32 %v15954_v2, %v13666_v50  ;;  %v13732_v26 = vpop.f32.mrb[72].mxu1  ;;  %v6313_v39 = vpop.f32.mrb[73].mxu0  ;;  %v14427_v0 = vld [vmem:[%s15420_s29 + $0x5e0] sm:$0xff]  }
 0x20a   : > { %v16110_v55 = vadd.f32 %v7279_v51, %v6605_v30  ;;  %v7060_v27 = vadd.f32 %v15954_v2, %v13732_v26  ;;  %v6314_v34 = vadd.f32 %v15954_v2, %v6313_v39  ;;  %v7051_v13 = vpop.f32.mrb[73].mxu1  ;;  %v13667_v60 = vpop.f32.mrb[74].mxu0 }
 0x20b   : > { %v6546_v1 = vmax.f32 %v6322_v11, 0.0  ;;  %v7052_v33 = vadd.f32 %v15954_v2, %v7051_v13  ;;  %v6325_v44 = vadd.f32 %v15954_v2, %v13667_v60  ;;  %v13733_v31 = vpop.f32.mrb[74].mxu1  ;;  %v6316_v40 = vpop.f32.mrb[75].mxu0 }
 0x20c   : > { %v7284_v48 = vmax.f32 %v7060_v27, 0.0  ;;  %v6544_v15 = vmax.f32 %v6314_v34, 0.0  ;;  %v7063_v5 = vadd.f32 %v15954_v2, %v13733_v31  ;;  %v6317_v30 = vadd.f32 %v15954_v2, %v6316_v40  ;;  %v7054_v51 = vpop.f32.mrb[75].mxu1  ;;  %v14428_v40 = vld [vmem:[%s15420_s29 + $0x4e8] sm:$0xff]  }
 0x20d   : > { %v6610_v50 = vadd.f32 %v6546_v1, %v15726_v19  ;;  %v7282_v26 = vmax.f32 %v7052_v33, 0.0  ;;  %v6547_v39 = vmax.f32 %v6325_v44, 0.0  ;;  %v7055_v11 = vadd.f32 %v15954_v2, %v7054_v51  ;;  %13841 = vmatmul.mubr.msk.bf16.gmra.mrb[180].mxu0 %vm4734_vm1, %v14424_v24  ;;  %v16134_v19 = vld [vmem:[%s17536_s3] sm:$0xff]   ;;  %v14430_v51 = vld [vmem:[%s15420_s29 + $0x4f0] sm:$0xff]  }
 0x20e   : > { %v6608_v13 = vadd.f32 %v6544_v15, %v15730_v23  ;;  %v6545_v60 = vmax.f32 %v6317_v30, 0.0  ;;  %13907 = vmatmul.mubr.msk.bf16.gmra.mrb[180].mxu1 %vm4734_vm1, %v14425_v25  ;;  %13844 = vmatprep.mubr.msk.bf16.mxu0 %vm4734_vm1, %v14426_v59  ;;  %v7285_v31 = vmax.f32 %v7063_v5, 0.0  ;;  %v14429_v30 = vld [vmem:[%s15420_s29 + $0x5e8] sm:$0xff]  }
 0x20f   : > { %v16127_v27 = vadd.f32 %v7284_v48, %v6610_v50  ;;  %v6611_v34 = vadd.f32 %v6547_v39, %v15734_v28  ;;  %13910 = vmatprep.mubr.msk.bf16.mxu1 %vm4734_vm1, %v14427_v0  ;;  %v7283_v25 = vmax.f32 %v7055_v11, 0.0  ;;  %14050 = vmatprep.subr.bf16.mxu0 %v16134_v19 }
 0x210   : > { %v16136_v23 = vadd.f32 %v7282_v26, %v6608_v13  ;;  %v6609_v24 = vadd.f32 %v6545_v60, %v15737_v32  ;;  %v13670_v59 = vpop.f32.mrb[76].mxu0  ;;  %v14431_v60 = vld [vmem:[%s15420_s29 + $0x5f0] sm:$0xff]  }
 0x211   : > { %v16139_v1 = vadd.f32 %v7285_v31, %v6611_v34  ;;  %v6338_v28 = vadd.f32 %v15954_v2, %v13670_v59  ;;  %v13736_v33 = vpop.f32.mrb[76].mxu1  ;;  %v6329_v44 = vpop.f32.mrb[77].mxu0 }
 0x212   : > { %v16144_v0 = vadd.f32 %v7283_v25, %v6609_v24  ;;  %v7076_v48 = vadd.f32 %v15954_v2, %v13736_v33  ;;  %v6330_v15 = vadd.f32 %v15954_v2, %v6329_v44  ;;  %v7067_v5 = vpop.f32.mrb[77].mxu1  ;;  %v13671_v32 = vpop.f32.mrb[78].mxu0 }
 0x213   : > { %v6550_v50 = vmax.f32 %v6338_v28, 0.0  ;;  %v7068_v26 = vadd.f32 %v15954_v2, %v7067_v5  ;;  %v6341_v39 = vadd.f32 %v15954_v2, %v13671_v32  ;;  %v13737_v11 = vpop.f32.mrb[78].mxu1  ;;  %v6332_v13 = vpop.f32.mrb[79].mxu0 }
 0x214   : > { %17566 = vst [vmem:[#allocation27_spill] sm:$0xff] %v16144_v0  ;;  %v7288_v34 = vmax.f32 %v7076_v48, 0.0  ;;  %v6548_v31 = vmax.f32 %v6330_v15, 0.0  ;;  %v7079_v24 = vadd.f32 %v15954_v2, %v13737_v11  ;;  %v6333_v25 = vadd.f32 %v15954_v2, %v6332_v13  ;;  %v7070_v59 = vpop.f32.mrb[79].mxu1  ;;  %v14432_v13 = vld [vmem:[%s15420_s29 + $0x4f8] sm:$0xff]  }
 0x215   : > { %v6614_v33 = vadd.f32 %v6550_v50, %v15750_v57  ;;  %v7286_v44 = vmax.f32 %v7068_v26, 0.0  ;;  %v6551_v0 = vmax.f32 %v6341_v39, 0.0  ;;  %v7071_v28 = vadd.f32 %v15954_v2, %v7070_v59  ;;  %13845 = vmatmul.mubr.msk.bf16.gmra.mrb[184].mxu0 %vm4734_vm1, %v14428_v40 }
 0x216   : > { %v6612_v5 = vadd.f32 %v6548_v31, %v15754_v61  ;;  %v6549_v32 = vmax.f32 %v6333_v25, 0.0  ;;  %13911 = vmatmul.mubr.msk.bf16.gmra.mrb[184].mxu1 %vm4734_vm1, %v14429_v30  ;;  %13848 = vmatprep.mubr.msk.bf16.mxu0 %vm4734_vm1, %v14430_v51  ;;  %v7289_v11 = vmax.f32 %v7079_v24, 0.0  ;;  %v14433_v24 = vld [vmem:[%s15420_s29 + $0x5f8] sm:$0xff]  }
 0x217   : > { %v16161_v48 = vadd.f32 %v7288_v34, %v6614_v33  ;;  %v6615_v15 = vadd.f32 %v6551_v0, %v15758_v3  ;;  %13914 = vmatprep.mubr.msk.bf16.mxu1 %vm4734_vm1, %v14431_v60  ;;  %v7287_v61 = vmax.f32 %v7071_v28, 0.0 }
 0x218   : > { %v16165_v57 = vadd.f32 %v7286_v44, %v6612_v5  ;;  %v6613_v40 = vadd.f32 %v6549_v32, %v15761_v7  ;;  %v13674_v50 = vpop.f32.mrb[80].mxu0  ;;  %v14434_v7 = vld [vmem:[%s15420_s29 + $0x600] sm:$0xff]  }
 0x219   : > { %v16168_v26 = vadd.f32 %v7289_v11, %v6615_v15  ;;  %v6354_v30 = vadd.f32 %v15954_v2, %v13674_v50  ;;  %v13740_v51 = vpop.f32.mrb[80].mxu1  ;;  %v6345_v39 = vpop.f32.mrb[81].mxu0  ;;  %v14435_v5 = vld [vmem:[%s15420_s29 + $0x700] sm:$0xff]  }
 0x21a   : > { %v16172_v3 = vadd.f32 %v7287_v61, %v6613_v40  ;;  %v7092_v0 = vadd.f32 %v15954_v2, %v13740_v51  ;;  %v6346_v60 = vadd.f32 %v15954_v2, %v6345_v39  ;;  %v7083_v34 = vpop.f32.mrb[81].mxu1  ;;  %v13675_v31 = vpop.f32.mrb[82].mxu0 }
 0x21b   : > { %v6554_v25 = vmax.f32 %v6354_v30, 0.0  ;;  %v7084_v59 = vadd.f32 %v15954_v2, %v7083_v34  ;;  %v6357_v33 = vadd.f32 %v15954_v2, %v13675_v31  ;;  %v13741_v44 = vpop.f32.mrb[82].mxu1  ;;  %v6348_v28 = vpop.f32.mrb[83].mxu0 }
 0x21c   : > { %v7292_v32 = vmax.f32 %v7092_v0, 0.0  ;;  %v6552_v15 = vmax.f32 %v6346_v60, 0.0  ;;  %v7095_v11 = vadd.f32 %v15954_v2, %v13741_v44  ;;  %v6349_v40 = vadd.f32 %v15954_v2, %v6348_v28  ;;  %v7086_v61 = vpop.f32.mrb[83].mxu1  ;;  %v14436_v28 = vld [vmem:[%s15420_s29 + $0x608] sm:$0xff]  }
 0x21d   : > { %v6618_v50 = vadd.f32 %v6554_v25, %v15774_v35  ;;  %v7290_v51 = vmax.f32 %v7084_v59, 0.0  ;;  %v6555_v39 = vmax.f32 %v6357_v33, 0.0  ;;  %v7087_v30 = vadd.f32 %v15954_v2, %v7086_v61  ;;  %13849 = vmatmul.mubr.msk.bf16.gmra.mrb[188].mxu0 %vm4734_vm1, %v14432_v13 }
 0x21e   : > { %v6616_v34 = vadd.f32 %v6552_v15, %v15778_v38  ;;  %v6553_v31 = vmax.f32 %v6349_v40, 0.0  ;;  %13915 = vmatmul.mubr.msk.bf16.gmra.mrb[188].mxu1 %vm4734_vm1, %v14433_v24  ;;  %13920 = vmatprep.mubr.msk.bf16.mxu0 %vm4734_vm1, %v14434_v7  ;;  %v7293_v44 = vmax.f32 %v7095_v11, 0.0  ;;  %v14437_v40 = vld [vmem:[%s15420_s29 + $0x708] sm:$0xff]  }
 0x21f   : > { %v16189_v0 = vadd.f32 %v7292_v32, %v6618_v50  ;;  %v6619_v60 = vadd.f32 %v6555_v39, %v15781_v41  ;;  %13986 = vmatprep.mubr.msk.bf16.mxu1 %vm4734_vm1, %v14435_v5  ;;  %v7291_v38 = vmax.f32 %v7087_v30, 0.0 }
 0x220   : > { %v16193_v35 = vadd.f32 %v7290_v51, %v6616_v34  ;;  %v6617_v13 = vadd.f32 %v6553_v31, %v15784_v45  ;;  %v13678_v25 = vpop.f32.mrb[84].mxu0  ;;  %v14438_v45 = vld [vmem:[%s15420_s29 + $0x610] sm:$0xff]  }
 0x221   : > { %v16196_v59 = vadd.f32 %v7293_v44, %v6619_v60  ;;  %v6370_v24 = vadd.f32 %v15954_v2, %v13678_v25  ;;  %v13744_v7 = vpop.f32.mrb[84].mxu1  ;;  %v6361_v33 = vpop.f32.mrb[85].mxu0  ;;  %v14439_v34 = vld [vmem:[%s15420_s29 + $0x710] sm:$0xff]   ;;  %v14495_v25 = vld [vmem:[%s17536_s3 + $0x8] sm:$0xff]  }
 0x222   : > { %v16200_v41 = vadd.f32 %v7291_v38, %v6617_v13  ;;  %v7108_v32 = vadd.f32 %v15954_v2, %v13744_v7  ;;  %v6362_v5 = vadd.f32 %v15954_v2, %v6361_v33  ;;  %v7099_v15 = vpop.f32.mrb[85].mxu1  ;;  %v13679_v11 = vpop.f32.mrb[86].mxu0 }
 0x223   : > { %v6558_v61 = vmax.f32 %v6370_v24, 0.0  ;;  %v7100_v50 = vadd.f32 %v15954_v2, %v7099_v15  ;;  %v6373_v51 = vadd.f32 %v15954_v2, %v13679_v11  ;;  %v13745_v39 = vpop.f32.mrb[86].mxu1  ;;  %v6364_v30 = vpop.f32.mrb[87].mxu0 }
 0x224   : > { %v7296_v31 = vmax.f32 %v7108_v32, 0.0  ;;  %v6556_v60 = vmax.f32 %v6362_v5, 0.0  ;;  %v7111_v44 = vadd.f32 %v15954_v2, %v13745_v39  ;;  %v6365_v13 = vadd.f32 %v15954_v2, %v6364_v30  ;;  %v7102_v38 = vpop.f32.mrb[87].mxu1 }
 0x225   : > { %v6622_v24 = vadd.f32 %v6558_v61, %v15798_v14  ;;  %v7294_v7 = vmax.f32 %v7100_v50, 0.0  ;;  %v6559_v33 = vmax.f32 %v6373_v51, 0.0  ;;  %v7103_v15 = vadd.f32 %v15954_v2, %v7102_v38  ;;  %13921 = vmatmul.mubr.msk.bf16.vlgmr.msra.gmra.mrb[192].mxu0 %vm4734_vm1, %v14436_v28  ;;  %v14440_v51 = vld [vmem:[%s15420_s29 + $0x618] sm:$0xff]  }
 0x226   : > { %v6620_v32 = vadd.f32 %v6556_v60, %v15802_v17  ;;  %v6557_v5 = vmax.f32 %v6365_v13, 0.0  ;;  %13987 = vmatmul.mubr.msk.bf16.vlgmr.msra.gmra.mrb[192].mxu1 %vm4734_vm1, %v14437_v40  ;;  %13924 = vmatprep.mubr.msk.bf16.mxu0 %vm4734_vm1, %v14438_v45  ;;  %v7297_v30 = vmax.f32 %v7111_v44, 0.0  ;;  %v14442_v13 = vld [vmem:[%s15420_s29 + $0x620] sm:$0xff]  }
 0x227   : > { %v16220_v11 = vadd.f32 %v7296_v31, %v6622_v24  ;;  %v6623_v39 = vadd.f32 %v6559_v33, %v15805_v20  ;;  %13990 = vmatprep.mubr.msk.bf16.mxu1 %vm4734_vm1, %v14439_v34  ;;  %14051 = vmatpush3.bf16.msra.mxu0 %v16134_v19  ;;  %v7295_v28 = vmax.f32 %v7103_v15, 0.0 }
 0x228   : > { %v16225_v14 = vadd.f32 %v7294_v7, %v6620_v32  ;;  %v6621_v17 = vadd.f32 %v6557_v5, %v15809_v29  ;;  %v13682_v40 = vpop.f32.mrb[88].mxu0  ;;  %14052 = vmatprep.subr.bf16.mxu0 %v14495_v25  ;;  %v14441_v29 = vld [vmem:[%s15420_s29 + $0x718] sm:$0xff]   ;;  %v14443_v32 = vld [vmem:[%s15420_s29 + $0x720] sm:$0xff]  }
 0x229   : > { %v16228_v61 = vadd.f32 %v7297_v30, %v6623_v39  ;;  %v6386_v45 = vadd.f32 %v15954_v2, %v13682_v40  ;;  %v13748_v20 = vpop.f32.mrb[88].mxu1  ;;  %v6377_v50 = vpop.f32.mrb[89].mxu0 }
 0x22a   : > { %v16232_v34 = vadd.f32 %v7295_v28, %v6621_v17  ;;  %v7124_v19 = vadd.f32 %v15954_v2, %v13748_v20  ;;  %v6378_v31 = vadd.f32 %v15954_v2, %v6377_v50  ;;  %v7115_v60 = vpop.f32.mrb[89].mxu1  ;;  %v13683_v44 = vpop.f32.mrb[90].mxu0 }
 0x22b   : > { %v6562_v38 = vmax.f32 %v6386_v45, 0.0  ;;  %v7116_v24 = vadd.f32 %v15954_v2, %v7115_v60  ;;  %v6389_v7 = vadd.f32 %v15954_v2, %v13683_v44  ;;  %v13749_v33 = vpop.f32.mrb[90].mxu1  ;;  %v6380_v15 = vpop.f32.mrb[91].mxu0  ;;  %14053 = vmatpush3.bf16.msra.mxu0 %v14495_v25 }
 0x22c   : > { %v7300_v5 = vmax.f32 %v7124_v19, 0.0  ;;  %v6560_v39 = vmax.f32 %v6378_v31, 0.0  ;;  %v7127_v30 = vadd.f32 %v15954_v2, %v13749_v33  ;;  %v6381_v17 = vadd.f32 %v15954_v2, %v6380_v15  ;;  %v7118_v28 = vpop.f32.mrb[91].mxu1  ;;  %v14444_v33 = vld [vmem:[%s15420_s29 + $0x628] sm:$0xff]  }
 0x22d   : > { %v6626_v40 = vadd.f32 %v6562_v38, %v15824_v63  ;;  %v7298_v20 = vmax.f32 %v7116_v24, 0.0  ;;  %v6563_v50 = vmax.f32 %v6389_v7, 0.0  ;;  %v7119_v45 = vadd.f32 %v15954_v2, %v7118_v28  ;;  %13925 = vmatmul.mubr.msk.bf16.gmra.mrb[196].mxu0 %vm4734_vm1, %v14440_v51  ;;  %v14500_v63 = vld [vmem:[%s17536_s3 + $0x10] sm:$0xff]  }
 0x22e   : > { %v6624_v60 = vadd.f32 %v6560_v39, %v15827_v4  ;;  %v6561_v44 = vmax.f32 %v6381_v17, 0.0  ;;  %13991 = vmatmul.mubr.msk.bf16.gmra.mrb[196].mxu1 %vm4734_vm1, %v14441_v29  ;;  %13928 = vmatprep.mubr.msk.bf16.mxu0 %vm4734_vm1, %v14442_v13  ;;  %v7301_v31 = vmax.f32 %v7127_v30, 0.0  ;;  %v14446_v17 = vld [vmem:[%s15420_s29 + $0x630] sm:$0xff]  }
 0x22f   : > { %v16249_v25 = vadd.f32 %v7300_v5, %v6626_v40  ;;  %v6627_v19 = vadd.f32 %v6563_v50, %v15829_v6  ;;  %13994 = vmatprep.mubr.msk.bf16.mxu1 %vm4734_vm1, %v14443_v32  ;;  %v7299_v29 = vmax.f32 %v7119_v45, 0.0  ;;  %14054 = vmatprep.subr.bf16.mxu0 %v14500_v63 }
 0x230   : > { %v16256_v51 = vadd.f32 %v7298_v20, %v6624_v60  ;;  %v6625_v4 = vadd.f32 %v6561_v44, %v15833_v12  ;;  %v13686_v38 = vpop.f32.mrb[92].mxu0  ;;  %v14445_v12 = vld [vmem:[%s15420_s29 + $0x728] sm:$0xff]   ;;  %14055 = vmatpush3.bf16.msra.mxu0 %v14500_v63  ;;  %v14447_v60 = vld [vmem:[%s15420_s29 + $0x730] sm:$0xff]  }
 0x231   : > { %v16259_v13 = vadd.f32 %v7301_v31, %v6627_v19  ;;  %v6402_v24 = vadd.f32 %v15954_v2, %v13686_v38  ;;  %v13752_v6 = vpop.f32.mrb[92].mxu1  ;;  %v6393_v7 = vpop.f32.mrb[93].mxu0 }
 0x232   : > { %v16263_v15 = vadd.f32 %v7299_v29, %v6625_v4  ;;  %v7140_v32 = vadd.f32 %v15954_v2, %v13752_v6  ;;  %v6394_v5 = vadd.f32 %v15954_v2, %v6393_v7  ;;  %v7131_v39 = vpop.f32.mrb[93].mxu1  ;;  %v13687_v30 = vpop.f32.mrb[94].mxu0 }
 0x233   : > { %v6566_v28 = vmax.f32 %v6402_v24, 0.0  ;;  %v7132_v40 = vadd.f32 %v15954_v2, %v7131_v39  ;;  %v6405_v20 = vadd.f32 %v15954_v2, %v13687_v30  ;;  %v13753_v50 = vpop.f32.mrb[94].mxu1  ;;  %v6396_v45 = vpop.f32.mrb[95].mxu0 }
 0x234   : > { %v7304_v44 = vmax.f32 %v7140_v32, 0.0  ;;  %v6564_v19 = vmax.f32 %v6394_v5, 0.0  ;;  %v7143_v31 = vadd.f32 %v15954_v2, %v13753_v50  ;;  %v6397_v4 = vadd.f32 %v15954_v2, %v6396_v45  ;;  %v7134_v29 = vpop.f32.mrb[95].mxu1  ;;  %v14448_v50 = vld [vmem:[%s15420_s29 + $0x638] sm:$0xff]  }
 0x235   : > { %v6630_v38 = vadd.f32 %v6566_v28, %v15848_v52  ;;  %v7302_v6 = vmax.f32 %v7132_v40, 0.0  ;;  %v6567_v7 = vmax.f32 %v6405_v20, 0.0  ;;  %v7135_v63 = vadd.f32 %v15954_v2, %v7134_v29  ;;  %13929 = vmatmul.mubr.msk.bf16.gmra.mrb[200].mxu0 %vm4734_vm1, %v14444_v33 }
 0x236   : > { %v6628_v24 = vadd.f32 %v6564_v19, %v15851_v54  ;;  %v6565_v39 = vmax.f32 %v6397_v4, 0.0  ;;  %13995 = vmatmul.mubr.msk.bf16.gmra.mrb[200].mxu1 %vm4734_vm1, %v14445_v12  ;;  %13932 = vmatprep.mubr.msk.bf16.mxu0 %vm4734_vm1, %v14446_v17  ;;  %v7305_v30 = vmax.f32 %v7143_v31, 0.0  ;;  %v14449_v31 = vld [vmem:[%s15420_s29 + $0x738] sm:$0xff]  }
 0x237   : > { %v16280_v32 = vadd.f32 %v7304_v44, %v6630_v38  ;;  %v6631_v5 = vadd.f32 %v6567_v7, %v15853_v58  ;;  %13998 = vmatprep.mubr.msk.bf16.mxu1 %vm4734_vm1, %v14447_v60  ;;  %v7303_v54 = vmax.f32 %v7135_v63, 0.0  ;;  %v14451_v63 = vld [vmem:[%s15420_s29 + $0x740] sm:$0xff]  }
 0x238   : > { %v16284_v52 = vadd.f32 %v7302_v6, %v6628_v24  ;;  %v6629_v33 = vadd.f32 %v6565_v39, %v15857_v8  ;;  %v13690_v28 = vpop.f32.mrb[96].mxu0  ;;  %v14450_v8 = vld [vmem:[%s15420_s29 + $0x640] sm:$0xff]  }
 0x239   : > { %v16287_v40 = vadd.f32 %v7305_v30, %v6631_v5  ;;  %v6418_v12 = vadd.f32 %v15954_v2, %v13690_v28  ;;  %v13756_v17 = vpop.f32.mrb[96].mxu1  ;;  %v6409_v20 = vpop.f32.mrb[97].mxu0 }
 0x23a   : > { %v16291_v58 = vadd.f32 %v7303_v54, %v6629_v33  ;;  %v7156_v45 = vadd.f32 %v15954_v2, %v13756_v17  ;;  %v6410_v60 = vadd.f32 %v15954_v2, %v6409_v20  ;;  %v7147_v44 = vpop.f32.mrb[97].mxu1  ;;  %v13691_v19 = vpop.f32.mrb[98].mxu0 }
 0x23b   : > { %v6570_v4 = vmax.f32 %v6418_v12, 0.0  ;;  %v7148_v29 = vadd.f32 %v15954_v2, %v7147_v44  ;;  %v6421_v38 = vadd.f32 %v15954_v2, %v13691_v19  ;;  %v13757_v6 = vpop.f32.mrb[98].mxu1  ;;  %v6412_v7 = vpop.f32.mrb[99].mxu0 }
 0x23c   : > { %v7308_v24 = vmax.f32 %v7156_v45, 0.0  ;;  %v6568_v39 = vmax.f32 %v6410_v60, 0.0  ;;  %v7159_v5 = vadd.f32 %v15954_v2, %v13757_v6  ;;  %v6413_v30 = vadd.f32 %v15954_v2, %v6412_v7  ;;  %v7150_v33 = vpop.f32.mrb[99].mxu1  ;;  %v14452_v6 = vld [vmem:[%s15420_s29 + $0x648] sm:$0xff]  }
 0x23d   : > { %v6634_v54 = vadd.f32 %v6570_v4, %v15872_v46  ;;  %v7306_v28 = vmax.f32 %v7148_v29, 0.0  ;;  %v6571_v17 = vmax.f32 %v6421_v38, 0.0  ;;  %v7151_v12 = vadd.f32 %v15954_v2, %v7150_v33  ;;  %13933 = vmatmul.mubr.msk.bf16.gmra.mrb[204].mxu0 %vm4734_vm1, %v14448_v50  ;;  %v14501_v46 = vld [vmem:[%s17536_s3 + $0x18] sm:$0xff]  }
 0x23e   : > { %v6632_v20 = vadd.f32 %v6568_v39, %v15875_v49  ;;  %v6569_v44 = vmax.f32 %v6413_v30, 0.0  ;;  %13999 = vmatmul.mubr.msk.bf16.gmra.mrb[204].mxu1 %vm4734_vm1, %v14449_v31  ;;  %13936 = vmatprep.mubr.msk.bf16.mxu0 %vm4734_vm1, %v14450_v8  ;;  %v7309_v19 = vmax.f32 %v7159_v5, 0.0  ;;  %v14453_v5 = vld [vmem:[%s15420_s29 + $0x748] sm:$0xff]   ;;  %v14454_v30 = vld [vmem:[%s15420_s29 + $0x650] sm:$0xff]  }
 0x23f   : > { %v16308_v45 = vadd.f32 %v7308_v24, %v6634_v54  ;;  %v6635_v60 = vadd.f32 %v6571_v17, %v15877_v56  ;;  %14002 = vmatprep.mubr.msk.bf16.mxu1 %vm4734_vm1, %v14451_v63  ;;  %v7307_v50 = vmax.f32 %v7151_v12, 0.0  ;;  %v16323_v56 = vld [vmem:[%s17535_s2] ss:$0 sm:$0xff]  ;;  %14056 = vmatprep.subr.bf16.mxu0 %v14501_v46 }
 0x240   : > { %v16315_v2 = vadd.f32 %v7306_v28, %v6632_v20  ;;  %v6633_v49 = vadd.f32 %v6569_v44, %v15881_v9  ;;  %v13694_v31 = vpop.f32.mrb[100].mxu0  ;;  %14057 = vmatpush3.bf16.msra.mxu0 %v14501_v46  ;;  %v14455_v20 = vld [vmem:[%s15420_s29 + $0x750] sm:$0xff]  }
 0x241   : > { %v16318_v8 = vadd.f32 %v7309_v19, %v6635_v60  ;;  %v6434_v4 = vadd.f32 %v16323_v56, %v13694_v31  ;;  %v13760_v29 = vpop.f32.mrb[100].mxu1  ;;  %v6425_v38 = vpop.f32.mrb[101].mxu0 }
 0x242   : > { %v16327_v7 = vadd.f32 %v7307_v50, %v6633_v49  ;;  %v7172_v9 = vadd.f32 %v16323_v56, %v13760_v29  ;;  %v6426_v63 = vadd.f32 %v16323_v56, %v6425_v38  ;;  %v7163_v24 = vpop.f32.mrb[101].mxu1  ;;  %v13695_v39 = vpop.f32.mrb[102].mxu0 }
 0x243   : > { %v6574_v33 = vmax.f32 %v6434_v4, 0.0  ;;  %v7164_v54 = vadd.f32 %v16323_v56, %v7163_v24  ;;  %v6437_v28 = vadd.f32 %v16323_v56, %v13695_v39  ;;  %v13761_v17 = vpop.f32.mrb[102].mxu1  ;;  %v6428_v12 = vpop.f32.mrb[103].mxu0 }
 0x244   : > { %v7312_v44 = vmax.f32 %v7172_v9, 0.0  ;;  %v6572_v60 = vmax.f32 %v6426_v63, 0.0  ;;  %v7175_v19 = vadd.f32 %v16323_v56, %v13761_v17  ;;  %v6429_v49 = vadd.f32 %v16323_v56, %v6428_v12  ;;  %v7166_v50 = vpop.f32.mrb[103].mxu1  ;;  %v14456_v17 = vld [vmem:[%s15420_s29 + $0x658] sm:$0xff]  }
 0x245   : > { %v6638_v31 = vadd.f32 %v6574_v33, %v15896_v53  ;;  %v7310_v29 = vmax.f32 %v7164_v54, 0.0  ;;  %v6575_v38 = vmax.f32 %v6437_v28, 0.0  ;;  %v7167_v46 = vadd.f32 %v16323_v56, %v7166_v50  ;;  %13937 = vmatmul.mubr.msk.bf16.gmra.mrb[208].mxu0 %vm4734_vm1, %v14452_v6 }
 0x246   : > { %v6636_v4 = vadd.f32 %v6572_v60, %v15899_v62  ;;  %v6573_v24 = vmax.f32 %v6429_v49, 0.0  ;;  %14003 = vmatmul.mubr.msk.bf16.gmra.mrb[208].mxu1 %vm4734_vm1, %v14453_v5  ;;  %13940 = vmatprep.mubr.msk.bf16.mxu0 %vm4734_vm1, %v14454_v30  ;;  %v7313_v39 = vmax.f32 %v7175_v19, 0.0  ;;  %v14457_v19 = vld [vmem:[%s15420_s29 + $0x758] sm:$0xff]  }
 0x247   : > { %v16344_v9 = vadd.f32 %v7312_v44, %v6638_v31  ;;  %v6639_v63 = vadd.f32 %v6575_v38, %v15901_v10  ;;  %14006 = vmatprep.mubr.msk.bf16.mxu1 %vm4734_vm1, %v14455_v20  ;;  %v7311_v62 = vmax.f32 %v7167_v46, 0.0  ;;  %v14459_v46 = vld [vmem:[%s15420_s29 + $0x760] sm:$0xff]  }
 0x248   : > { %v16348_v53 = vadd.f32 %v7310_v29, %v6636_v4  ;;  %v6637_v6 = vadd.f32 %v6573_v24, %v15905_v18  ;;  %v13698_v33 = vpop.f32.mrb[104].mxu0  ;;  %v14458_v18 = vld [vmem:[%s15420_s29 + $0x660] sm:$0xff]  }
 0x249   : > { %v16351_v54 = vadd.f32 %v7313_v39, %v6639_v63  ;;  %v6450_v5 = vadd.f32 %v16323_v56, %v13698_v33  ;;  %v13764_v30 = vpop.f32.mrb[104].mxu1  ;;  %v6441_v28 = vpop.f32.mrb[105].mxu0 }
 0x24a   : > { %v16355_v10 = vadd.f32 %v7311_v62, %v6637_v6  ;;  %v7188_v12 = vadd.f32 %v16323_v56, %v13764_v30  ;;  %v6442_v20 = vadd.f32 %v16323_v56, %v6441_v28  ;;  %v7179_v44 = vpop.f32.mrb[105].mxu1  ;;  %v13699_v60 = vpop.f32.mrb[106].mxu0  ;;  %v17567_v28 = vld [vmem:[#allocation4_spill] sm:$0xff] }
 0x24b   : > { %v6578_v49 = vmax.f32 %v6450_v5, 0.0  ;;  %v7180_v50 = vadd.f32 %v16323_v56, %v7179_v44  ;;  %v6453_v31 = vadd.f32 %v16323_v56, %v13699_v60  ;;  %v13765_v29 = vpop.f32.mrb[106].mxu1  ;;  %v6444_v38 = vpop.f32.mrb[107].mxu0 }
 0x24c   : > { %v7316_v4 = vmax.f32 %v7188_v12, 0.0  ;;  %v6576_v24 = vmax.f32 %v6442_v20, 0.0  ;;  %v7191_v63 = vadd.f32 %v16323_v56, %v13765_v29  ;;  %v6445_v39 = vadd.f32 %v16323_v56, %v6444_v38  ;;  %v7182_v6 = vpop.f32.mrb[107].mxu1  ;;  %v17569_v20 = vld [vmem:[#allocation5_spill] sm:$0xff] }
 0x24d   : > { %v6642_v62 = vadd.f32 %v6578_v49, %v15920_v21  ;;  %v7314_v33 = vmax.f32 %v7180_v50, 0.0  ;;  %v6579_v30 = vmax.f32 %v6453_v31, 0.0  ;;  %v7183_v5 = vadd.f32 %v16323_v56, %v7182_v6  ;;  %13941 = vmatmul.mubr.msk.bf16.gmra.mrb[212].mxu0 %vm4734_vm1, %v14456_v17  ;;  %v14502_v21 = vld [vmem:[%s17536_s3 + $0x20] sm:$0xff]   ;;  %v17571_v49 = vld [vmem:[#allocation6_spill] sm:$0xff] }
 0x24e   : > { %v6640_v44 = vadd.f32 %v6576_v24, %v17567_v28  ;;  %v6577_v60 = vmax.f32 %v6445_v39, 0.0  ;;  %14007 = vmatmul.mubr.msk.bf16.gmra.mrb[212].mxu1 %vm4734_vm1, %v14457_v19  ;;  %13944 = vmatprep.mubr.msk.bf16.mxu0 %vm4734_vm1, %v14458_v18  ;;  %v7317_v38 = vmax.f32 %v7191_v63, 0.0  ;;  %v14461_v28 = vld [vmem:[%s15420_s29 + $0x768] sm:$0xff]  }
 0x24f   : > { %v16372_v12 = vadd.f32 %v7316_v4, %v6642_v62  ;;  %v6643_v29 = vadd.f32 %v6579_v30, %v17569_v20  ;;  %14010 = vmatprep.mubr.msk.bf16.mxu1 %vm4734_vm1, %v14459_v46  ;;  %v7315_v19 = vmax.f32 %v7183_v5, 0.0  ;;  %v14460_v46 = vld [vmem:[%s15420_s29 + $0x668] sm:$0xff]   ;;  %14058 = vmatprep.subr.bf16.mxu0 %v14502_v21  ;;  %v14462_v5 = vld [vmem:[%s15420_s29 + $0x670] sm:$0xff]  }
 0x250   : > { %v16379_v17 = vadd.f32 %v7314_v33, %v6640_v44  ;;  %v6641_v50 = vadd.f32 %v6577_v60, %v17571_v49  ;;  %v13702_v31 = vpop.f32.mrb[108].mxu0  ;;  %14059 = vmatpush3.bf16.msra.mxu0 %v14502_v21  ;;  %v14463_v49 = vld [vmem:[%s15420_s29 + $0x770] sm:$0xff]  }
 0x251   : > { %17568 = vst [vmem:[#allocation4_spill] sm:$0xff] %v16372_v12  ;;  %v16382_v18 = vadd.f32 %v7317_v38, %v6643_v29  ;;  %v6466_v4 = vadd.f32 %v16323_v56, %v13702_v31  ;;  %v13768_v24 = vpop.f32.mrb[108].mxu1  ;;  %v6457_v63 = vpop.f32.mrb[109].mxu0 }
 0x252   : > { %17570 = vst [vmem:[#allocation5_spill] sm:$0xff] %v16379_v17  ;;  %v16386_v39 = vadd.f32 %v7315_v19, %v6641_v50  ;;  %v7204_v6 = vadd.f32 %v16323_v56, %v13768_v24  ;;  %v6458_v62 = vadd.f32 %v16323_v56, %v6457_v63  ;;  %v7195_v33 = vpop.f32.mrb[109].mxu1  ;;  %v13703_v30 = vpop.f32.mrb[110].mxu0 }
 0x253   : > { %17572 = vst [vmem:[#allocation6_spill] sm:$0xff] %v16382_v18  ;;  %v6582_v44 = vmax.f32 %v6466_v4, 0.0  ;;  %v7196_v60 = vadd.f32 %v16323_v56, %v7195_v33  ;;  %v6469_v20 = vadd.f32 %v16323_v56, %v13703_v30  ;;  %v13769_v29 = vpop.f32.mrb[110].mxu1  ;;  %v6460_v38 = vpop.f32.mrb[111].mxu0  ;;  %v17575_v4 = vld [vmem:[#allocation8_spill] sm:$0xff] }
 0x254   : > { %17573 = vst [vmem:[#allocation28_spill] sm:$0xff] %v16386_v39  ;;  %v7320_v31 = vmax.f32 %v7204_v6, 0.0  ;;  %v6580_v50 = vmax.f32 %v6458_v62, 0.0  ;;  %v7207_v19 = vadd.f32 %v16323_v56, %v13769_v29  ;;  %v6461_v24 = vadd.f32 %v16323_v56, %v6460_v38  ;;  %v7198_v63 = vpop.f32.mrb[111].mxu1  ;;  %v17574_v39 = vld [vmem:[#allocation7_spill] sm:$0xff]  ;;  %v17577_v62 = vld [vmem:[#allocation9_spill] sm:$0xff] }
 0x255   : > { %v6646_v18 = vadd.f32 %v6582_v44, %v17574_v39  ;;  %v7318_v17 = vmax.f32 %v7196_v60, 0.0  ;;  %v6583_v12 = vmax.f32 %v6469_v20, 0.0  ;;  %v7199_v21 = vadd.f32 %v16323_v56, %v7198_v63  ;;  %13945 = vmatmul.mubr.msk.bf16.gmra.mrb[216].mxu0 %vm4734_vm1, %v14460_v46  ;;  %v17579_v46 = vld [vmem:[#allocation10_spill] sm:$0xff]  ;;  %v14465_v63 = vld [vmem:[%s15420_s29 + $0x778] sm:$0xff]  }
 0x256   : > { %v6644_v33 = vadd.f32 %v6580_v50, %v17575_v4  ;;  %v6581_v30 = vmax.f32 %v6461_v24, 0.0  ;;  %14011 = vmatmul.mubr.msk.bf16.gmra.mrb[216].mxu1 %vm4734_vm1, %v14461_v28  ;;  %13948 = vmatprep.mubr.msk.bf16.mxu0 %vm4734_vm1, %v14462_v5  ;;  %v7321_v38 = vmax.f32 %v7207_v19, 0.0  ;;  %v14466_v4 = vld [vmem:[%s15420_s29 + $0x680] sm:$0xff]  }
 0x257   : > { %v16403_v6 = vadd.f32 %v7320_v31, %v6646_v18  ;;  %v6647_v29 = vadd.f32 %v6583_v12, %v17577_v62  ;;  %14014 = vmatprep.mubr.msk.bf16.mxu1 %vm4734_vm1, %v14463_v49  ;;  %v7319_v60 = vmax.f32 %v7199_v21, 0.0  ;;  %v14464_v31 = vld [vmem:[%s15420_s29 + $0x678] sm:$0xff]  }
 0x258   : > { %v16407_v39 = vadd.f32 %v7318_v17, %v6644_v33  ;;  %v6645_v44 = vadd.f32 %v6581_v30, %v17579_v46  ;;  %v13706_v20 = vpop.f32.mrb[112].mxu0 }
 0x259   : > { %17576 = vst [vmem:[#allocation7_spill] sm:$0xff] %v16403_v6  ;;  %v16410_v50 = vadd.f32 %v7321_v38, %v6647_v29  ;;  %v6482_v28 = vadd.f32 %v16323_v56, %v13706_v20  ;;  %v13772_v18 = vpop.f32.mrb[112].mxu1  ;;  %v6473_v5 = vpop.f32.mrb[113].mxu0  ;;  %v14467_v38 = vld [vmem:[%s15420_s29 + $0x780] sm:$0xff]  }
 0x25a   : > { %17578 = vst [vmem:[#allocation8_spill] sm:$0xff] %v16407_v39  ;;  %v16414_v12 = vadd.f32 %v7319_v60, %v6645_v44  ;;  %v7220_v19 = vadd.f32 %v16323_v56, %v13772_v18  ;;  %v6474_v49 = vadd.f32 %v16323_v56, %v6473_v5  ;;  %v7211_v17 = vpop.f32.mrb[113].mxu1  ;;  %v13707_v24 = vpop.f32.mrb[114].mxu0  ;;  %v17582_v5 = vld [vmem:[#allocation11_spill] sm:$0xff] }
 0x25b   : > { %17580 = vst [vmem:[#allocation9_spill] sm:$0xff] %v16410_v50  ;;  %v6586_v21 = vmax.f32 %v6482_v28, 0.0  ;;  %v7212_v33 = vadd.f32 %v16323_v56, %v7211_v17  ;;  %v6485_v30 = vadd.f32 %v16323_v56, %v13707_v24  ;;  %v13773_v62 = vpop.f32.mrb[114].mxu1  ;;  %v6476_v29 = vpop.f32.mrb[115].mxu0  ;;  %v17583_v17 = vld [vmem:[#allocation12_spill] sm:$0xff] }
 0x25c   : > { %17581 = vst [vmem:[#allocation10_spill] sm:$0xff] %v16414_v12  ;;  %v7324_v46 = vmax.f32 %v7220_v19, 0.0  ;;  %v6584_v20 = vmax.f32 %v6474_v49, 0.0  ;;  %v7223_v44 = vadd.f32 %v16323_v56, %v13773_v62  ;;  %v6477_v60 = vadd.f32 %v16323_v56, %v6476_v29  ;;  %v7214_v18 = vpop.f32.mrb[115].mxu1  ;;  %v17585_v49 = vld [vmem:[#allocation13_spill] sm:$0xff] }
 0x25d   : > { %v6650_v12 = vadd.f32 %v6586_v21, %v17582_v5  ;;  %v7322_v50 = vmax.f32 %v7212_v33, 0.0  ;;  %v6587_v39 = vmax.f32 %v6485_v30, 0.0  ;;  %v7215_v28 = vadd.f32 %v16323_v56, %v7214_v18  ;;  %13949 = vmatmul.mubr.msk.bf16.gmra.mrb[220].mxu0 %vm4734_vm1, %v14464_v31  ;;  %v14503_v21 = vld [vmem:[%s17536_s3 + $0x28] sm:$0xff]   ;;  %v17587_v33 = vld [vmem:[#allocation14_spill] sm:$0xff] }
 0x25e   : > { %v6648_v24 = vadd.f32 %v6584_v20, %v17583_v17  ;;  %v6585_v6 = vmax.f32 %v6477_v60, 0.0  ;;  %14015 = vmatmul.mubr.msk.bf16.gmra.mrb[220].mxu1 %vm4734_vm1, %v14465_v63  ;;  %13952 = vmatprep.mubr.msk.bf16.mxu0 %vm4734_vm1, %v14466_v4  ;;  %v7325_v29 = vmax.f32 %v7223_v44, 0.0 }
 0x25f   : > { %v16431_v19 = vadd.f32 %v7324_v46, %v6650_v12  ;;  %v6651_v62 = vadd.f32 %v6587_v39, %v17585_v49  ;;  %14018 = vmatprep.mubr.msk.bf16.mxu1 %vm4734_vm1, %v14467_v38  ;;  %v7323_v63 = vmax.f32 %v7215_v28, 0.0  ;;  %v14468_v38 = vld [vmem:[%s15420_s29 + $0x688] sm:$0xff]   ;;  %14060 = vmatprep.subr.bf16.mxu0 %v14503_v21  ;;  %v14470_v28 = vld [vmem:[%s15420_s29 + $0x690] sm:$0xff]  }
 0x260   : > { %v16438_v31 = vadd.f32 %v7322_v50, %v6648_v24  ;;  %v6649_v30 = vadd.f32 %v6585_v6, %v17587_v33  ;;  %v13710_v20 = vpop.f32.mrb[116].mxu0  ;;  %v14469_v6 = vld [vmem:[%s15420_s29 + $0x788] sm:$0xff]   ;;  %14061 = vmatpush3.bf16.msra.mxu0 %v14503_v21  ;;  %v14471_v33 = vld [vmem:[%s15420_s29 + $0x790] sm:$0xff]  }
 0x261   : > { %17584 = vst [vmem:[#allocation11_spill] sm:$0xff] %v16431_v19  ;;  %v16441_v4 = vadd.f32 %v7325_v29, %v6651_v62  ;;  %v6498_v12 = vadd.f32 %v16323_v56, %v13710_v20  ;;  %v13776_v39 = vpop.f32.mrb[116].mxu1  ;;  %v6489_v46 = vpop.f32.mrb[117].mxu0 }
 0x262   : > { %17586 = vst [vmem:[#allocation12_spill] sm:$0xff] %v16438_v31  ;;  %v16445_v44 = vadd.f32 %v7323_v63, %v6649_v30  ;;  %v7236_v60 = vadd.f32 %v16323_v56, %v13776_v39  ;;  %v6490_v50 = vadd.f32 %v16323_v56, %v6489_v46  ;;  %v7227_v18 = vpop.f32.mrb[117].mxu1  ;;  %v13711_v5 = vpop.f32.mrb[118].mxu0 }
 0x263   : > { %17588 = vst [vmem:[#allocation13_spill] sm:$0xff] %v16441_v4  ;;  %v6590_v17 = vmax.f32 %v6498_v12, 0.0  ;;  %v7228_v24 = vadd.f32 %v16323_v56, %v7227_v18  ;;  %v6501_v49 = vadd.f32 %v16323_v56, %v13711_v5  ;;  %v13777_v62 = vpop.f32.mrb[118].mxu1  ;;  %v6492_v29 = vpop.f32.mrb[119].mxu0  ;;  %v17591_v12 = vld [vmem:[#allocation16_spill] sm:$0xff] }
 0x264   : > { %17589 = vst [vmem:[#allocation14_spill] sm:$0xff] %v16445_v44  ;;  %v7328_v20 = vmax.f32 %v7236_v60, 0.0  ;;  %v6588_v30 = vmax.f32 %v6490_v50, 0.0  ;;  %v7239_v63 = vadd.f32 %v16323_v56, %v13777_v62  ;;  %v6493_v39 = vadd.f32 %v16323_v56, %v6492_v29  ;;  %v7230_v46 = vpop.f32.mrb[119].mxu1  ;;  %v17590_v44 = vld [vmem:[#allocation15_spill] sm:$0xff]  ;;  %v17593_v50 = vld [vmem:[#allocation17_spill] sm:$0xff] }
 0x265   : > { %v6654_v4 = vadd.f32 %v6590_v17, %v17590_v44  ;;  %v7326_v31 = vmax.f32 %v7228_v24, 0.0  ;;  %v6591_v19 = vmax.f32 %v6501_v49, 0.0  ;;  %v7231_v21 = vadd.f32 %v16323_v56, %v7230_v46  ;;  %13953 = vmatmul.mubr.msk.bf16.gmra.mrb[224].mxu0 %vm4734_vm1, %v14468_v38  ;;  %v17595_v38 = vld [vmem:[#allocation18_spill] sm:$0xff]  ;;  %v14473_v46 = vld [vmem:[%s15420_s29 + $0x798] sm:$0xff]  }
 0x266   : > { %v6652_v18 = vadd.f32 %v6588_v30, %v17591_v12  ;;  %v6589_v5 = vmax.f32 %v6493_v39, 0.0  ;;  %14019 = vmatmul.mubr.msk.bf16.gmra.mrb[224].mxu1 %vm4734_vm1, %v14469_v6  ;;  %13956 = vmatprep.mubr.msk.bf16.mxu0 %vm4734_vm1, %v14470_v28  ;;  %v7329_v29 = vmax.f32 %v7239_v63, 0.0  ;;  %v14474_v12 = vld [vmem:[%s15420_s29 + $0x6a0] sm:$0xff]  }
 0x267   : > { %v16462_v60 = vadd.f32 %v7328_v20, %v6654_v4  ;;  %v6655_v62 = vadd.f32 %v6591_v19, %v17593_v50  ;;  %14022 = vmatprep.mubr.msk.bf16.mxu1 %vm4734_vm1, %v14471_v33  ;;  %v7327_v24 = vmax.f32 %v7231_v21, 0.0  ;;  %v14472_v20 = vld [vmem:[%s15420_s29 + $0x698] sm:$0xff]  }
 0x268   : > { %v16466_v44 = vadd.f32 %v7326_v31, %v6652_v18  ;;  %v6653_v17 = vadd.f32 %v6589_v5, %v17595_v38  ;;  %v13714_v49 = vpop.f32.mrb[120].mxu0 }
 0x269   : > { %17592 = vst [vmem:[#allocation15_spill] sm:$0xff] %v16462_v60  ;;  %v16469_v30 = vadd.f32 %v7329_v29, %v6655_v62  ;;  %v6514_v6 = vadd.f32 %v16323_v56, %v13714_v49  ;;  %v13780_v4 = vpop.f32.mrb[120].mxu1  ;;  %v6505_v28 = vpop.f32.mrb[121].mxu0  ;;  %v14475_v29 = vld [vmem:[%s15420_s29 + $0x7a0] sm:$0xff]  }
 0x26a   : > { %17594 = vst [vmem:[#allocation16_spill] sm:$0xff] %v16466_v44  ;;  %v16473_v19 = vadd.f32 %v7327_v24, %v6653_v17  ;;  %v7252_v63 = vadd.f32 %v16323_v56, %v13780_v4  ;;  %v6506_v33 = vadd.f32 %v16323_v56, %v6505_v28  ;;  %v7243_v31 = vpop.f32.mrb[121].mxu1  ;;  %v13715_v39 = vpop.f32.mrb[122].mxu0  ;;  %v17598_v28 = vld [vmem:[#allocation19_spill] sm:$0xff] }
 0x26b   : > { %17596 = vst [vmem:[#allocation17_spill] sm:$0xff] %v16469_v30  ;;  %v6594_v21 = vmax.f32 %v6514_v6, 0.0  ;;  %v7244_v18 = vadd.f32 %v16323_v56, %v7243_v31  ;;  %v6517_v5 = vadd.f32 %v16323_v56, %v13715_v39  ;;  %v13781_v50 = vpop.f32.mrb[122].mxu1  ;;  %v6508_v62 = vpop.f32.mrb[123].mxu0  ;;  %v17599_v31 = vld [vmem:[#allocation20_spill] sm:$0xff] }
 0x26c   : > { %17597 = vst [vmem:[#allocation18_spill] sm:$0xff] %v16473_v19  ;;  %v7332_v38 = vmax.f32 %v7252_v63, 0.0  ;;  %v6592_v49 = vmax.f32 %v6506_v33, 0.0  ;;  %v7255_v17 = vadd.f32 %v16323_v56, %v13781_v50  ;;  %v6509_v24 = vadd.f32 %v16323_v56, %v6508_v62  ;;  %v7246_v4 = vpop.f32.mrb[123].mxu1  ;;  %v17601_v33 = vld [vmem:[#allocation21_spill] sm:$0xff] }
 0x26d   : > { %v6658_v19 = vadd.f32 %v6594_v21, %v17598_v28  ;;  %v7330_v30 = vmax.f32 %v7244_v18, 0.0  ;;  %v6595_v44 = vmax.f32 %v6517_v5, 0.0  ;;  %v7247_v6 = vadd.f32 %v16323_v56, %v7246_v4  ;;  %13957 = vmatmul.mubr.msk.bf16.gmra.mrb[228].mxu0 %vm4734_vm1, %v14472_v20  ;;  %v14504_v21 = vld [vmem:[%s17536_s3 + $0x30] sm:$0xff]  }
 0x26e   : > { %v6656_v39 = vadd.f32 %v6592_v49, %v17599_v31  ;;  %v6593_v60 = vmax.f32 %v6509_v24, 0.0  ;;  %14023 = vmatmul.mubr.msk.bf16.gmra.mrb[228].mxu1 %vm4734_vm1, %v14473_v46  ;;  %13960 = vmatprep.mubr.msk.bf16.mxu0 %vm4734_vm1, %v14474_v12  ;;  %v7333_v62 = vmax.f32 %v7255_v17, 0.0  ;;  %v17603_v18 = vld [vmem:[#allocation22_spill] sm:$0xff] }
 0x26f   : > { %v16490_v63 = vadd.f32 %v7332_v38, %v6658_v19  ;;  %v6659_v50 = vadd.f32 %v6595_v44, %v17601_v33  ;;  %14026 = vmatprep.mubr.msk.bf16.mxu1 %vm4734_vm1, %v14475_v29  ;;  %v7331_v46 = vmax.f32 %v7247_v6, 0.0  ;;  %v14476_v29 = vld [vmem:[%s15420_s29 + $0x6a8] sm:$0xff]   ;;  %14062 = vmatprep.subr.bf16.mxu0 %v14504_v21  ;;  %v14478_v6 = vld [vmem:[%s15420_s29 + $0x6b0] sm:$0xff]  }
 0x270   : > { %v16497_v20 = vadd.f32 %v7330_v30, %v6656_v39  ;;  %v6657_v5 = vadd.f32 %v6593_v60, %v17603_v18  ;;  %v13718_v49 = vpop.f32.mrb[124].mxu0  ;;  %v14477_v60 = vld [vmem:[%s15420_s29 + $0x7a8] sm:$0xff]   ;;  %14063 = vmatpush3.bf16.msra.mxu0 %v14504_v21  ;;  %v14479_v18 = vld [vmem:[%s15420_s29 + $0x7b0] sm:$0xff]  }
 0x271   : > { %17600 = vst [vmem:[#allocation19_spill] sm:$0xff] %v16490_v63  ;;  %v16500_v12 = vadd.f32 %v7333_v62, %v6659_v50  ;;  %v6530_v19 = vadd.f32 %v16323_v56, %v13718_v49  ;;  %v13784_v44 = vpop.f32.mrb[124].mxu1  ;;  %v6521_v38 = vpop.f32.mrb[125].mxu0 }
 0x272   : > { %17602 = vst [vmem:[#allocation20_spill] sm:$0xff] %v16497_v20  ;;  %v16504_v17 = vadd.f32 %v7331_v46, %v6657_v5  ;;  %v7268_v24 = vadd.f32 %v16323_v56, %v13784_v44  ;;  %v6522_v30 = vadd.f32 %v16323_v56, %v6521_v38  ;;  %v7259_v4 = vpop.f32.mrb[125].mxu1  ;;  %v13719_v28 = vpop.f32.mrb[126].mxu0 }
 0x273   : > { %17604 = vst [vmem:[#allocation21_spill] sm:$0xff] %v16500_v12  ;;  %v6598_v31 = vmax.f32 %v6530_v19, 0.0  ;;  %v7260_v39 = vadd.f32 %v16323_v56, %v7259_v4  ;;  %v6533_v33 = vadd.f32 %v16323_v56, %v13719_v28  ;;  %v13785_v50 = vpop.f32.mrb[126].mxu1  ;;  %v6524_v62 = vpop.f32.mrb[127].mxu0  ;;  %v17607_v19 = vld [vmem:[#allocation24_spill] sm:$0xff] }
 0x274   : > { %17605 = vst [vmem:[#allocation22_spill] sm:$0xff] %v16504_v17  ;;  %v7336_v49 = vmax.f32 %v7268_v24, 0.0  ;;  %v6596_v5 = vmax.f32 %v6522_v30, 0.0  ;;  %v7271_v46 = vadd.f32 %v16323_v56, %v13785_v50  ;;  %v6525_v44 = vadd.f32 %v16323_v56, %v6524_v62  ;;  %v7262_v38 = vpop.f32.mrb[127].mxu1  ;;  %v17606_v17 = vld [vmem:[#allocation23_spill] sm:$0xff]  ;;  %v17608_v30 = vld [vmem:[#allocation25_spill] sm:$0xff] }
 0x275   : > { %v6662_v12 = vadd.f32 %v6598_v31, %v17606_v17  ;;  %v7334_v20 = vmax.f32 %v7260_v39, 0.0  ;;  %v6599_v63 = vmax.f32 %v6533_v33, 0.0  ;;  %v7263_v21 = vadd.f32 %v16323_v56, %v7262_v38  ;;  %13961 = vmatmul.mubr.msk.bf16.gmra.mrb[232].mxu0 %vm4734_vm1, %v14476_v29  ;;  %v17609_v29 = vld [vmem:[#allocation26_spill] sm:$0xff]  ;;  %v14481_v38 = vld [vmem:[%s15420_s29 + $0x7b8] sm:$0xff]  }
 0x276   : > { %v6660_v4 = vadd.f32 %v6596_v5, %v17607_v19  ;;  %v6597_v28 = vmax.f32 %v6525_v44, 0.0  ;;  %14027 = vmatmul.mubr.msk.bf16.gmra.mrb[232].mxu1 %vm4734_vm1, %v14477_v60  ;;  %13964 = vmatprep.mubr.msk.bf16.mxu0 %vm4734_vm1, %v14478_v6  ;;  %v7337_v62 = vmax.f32 %v7271_v46, 0.0  ;;  %v14482_v19 = vld [vmem:[%s15420_s29 + $0x6c0] sm:$0xff]  }
 0x277   : > { %v16521_v24 = vadd.f32 %v7336_v49, %v6662_v12  ;;  %v6663_v50 = vadd.f32 %v6599_v63, %v17608_v30  ;;  %14030 = vmatprep.mubr.msk.bf16.mxu1 %vm4734_vm1, %v14479_v18  ;;  %v7335_v39 = vmax.f32 %v7263_v21, 0.0  ;;  %v14480_v49 = vld [vmem:[%s15420_s29 + $0x6b8] sm:$0xff]  }
 0x278   : > { %v16525_v17 = vadd.f32 %v7334_v20, %v6660_v4  ;;  %v6661_v31 = vadd.f32 %v6597_v28, %v17609_v29  ;;  %v13790_v33 = vpop.f32.mrb[128].mxu0 }
 0x279   : > { %v16528_v5 = vadd.f32 %v7337_v62, %v6663_v50  ;;  %v7766_v60 = vadd.f32 %v16323_v56, %v13790_v33  ;;  %v13856_v12 = vpop.f32.mrb[128].mxu1  ;;  %v7757_v6 = vpop.f32.mrb[129].mxu0  ;;  %v14483_v62 = vld [vmem:[%s15420_s29 + $0x7c0] sm:$0xff]  }
 0x27a   : > { %v16532_v63 = vadd.f32 %v7335_v39, %v6661_v31  ;;  %v8504_v46 = vadd.f32 %v16323_v56, %v13856_v12  ;;  %v7758_v18 = vadd.f32 %v16323_v56, %v7757_v6  ;;  %v8495_v20 = vpop.f32.mrb[129].mxu1  ;;  %v13791_v44 = vpop.f32.mrb[130].mxu0 }
 0x27b   : > { %17610 = vst [vmem:[#allocation23_spill] sm:$0xff] %v16528_v5  ;;  %v8014_v21 = vmax.f32 %v7766_v60, 0.0  ;;  %v8496_v4 = vadd.f32 %v16323_v56, %v8495_v20  ;;  %v7769_v28 = vadd.f32 %v16323_v56, %v13791_v44  ;;  %v13857_v30 = vpop.f32.mrb[130].mxu1  ;;  %v7760_v50 = vpop.f32.mrb[131].mxu0 }
 0x27c   : > { %17611 = vst [vmem:[#allocation24_spill] sm:$0xff] %v16532_v63  ;;  %v8752_v29 = vmax.f32 %v8504_v46, 0.0  ;;  %v8012_v33 = vmax.f32 %v7758_v18, 0.0  ;;  %v8507_v31 = vadd.f32 %v16323_v56, %v13857_v30  ;;  %v7761_v39 = vadd.f32 %v16323_v56, %v7760_v50  ;;  %v8498_v12 = vpop.f32.mrb[131].mxu1  ;;  %v14484_v50 = vld [vmem:[%s15420_s29 + $0x6c8] sm:$0xff]  }
 0x27d   : > { %v8078_v6 = vadd.f32 %v8014_v21, %v16071_v36  ;;  %v8750_v63 = vmax.f32 %v8496_v4, 0.0  ;;  %v8015_v5 = vmax.f32 %v7769_v28, 0.0  ;;  %v8499_v60 = vadd.f32 %v16323_v56, %v8498_v12  ;;  %13965 = vmatmul.mubr.msk.bf16.gmra.mrb[236].mxu0 %vm4734_vm1, %v14480_v49 }
 0x27e   : > { %v8076_v20 = vadd.f32 %v8012_v33, %v16075_v16  ;;  %v8013_v44 = vmax.f32 %v7761_v39, 0.0  ;;  %14031 = vmatmul.mubr.msk.bf16.gmra.mrb[236].mxu1 %vm4734_vm1, %v14481_v38  ;;  %13968 = vmatprep.mubr.msk.bf16.mxu0 %vm4734_vm1, %v14482_v19  ;;  %v8753_v30 = vmax.f32 %v8507_v31, 0.0  ;;  %v14485_v33 = vld [vmem:[%s15420_s29 + $0x7c8] sm:$0xff]   ;;  %v14487_v31 = vld [vmem:[%s15420_s29 + $0x6d0] sm:$0xff]  }
 0x27f   : > { %v16549_v46 = vadd.f32 %v8752_v29, %v8078_v6  ;;  %v8079_v18 = vadd.f32 %v8015_v5, %v16078_v43  ;;  %14034 = vmatprep.mubr.msk.bf16.mxu1 %vm4734_vm1, %v14483_v62  ;;  %v8751_v16 = vmax.f32 %v8499_v60, 0.0  ;;  %v14505_v43 = vld [vmem:[%s17536_s3 + $0x38] sm:$0xff]  }
 0x280   : > { %v16553_v36 = vadd.f32 %v8750_v63, %v8076_v20  ;;  %v8077_v49 = vadd.f32 %v8013_v44, %v16082_v22  ;;  %v13794_v21 = vpop.f32.mrb[132].mxu0  ;;  %v14488_v44 = vld [vmem:[%s15420_s29 + $0x7d0] sm:$0xff]   ;;  %14064 = vmatprep.subr.bf16.mxu0 %v14505_v43 }
 0x281   : > { %v16556_v4 = vadd.f32 %v8753_v30, %v8079_v18  ;;  %v7782_v38 = vadd.f32 %v16323_v56, %v13794_v21  ;;  %v13860_v19 = vpop.f32.mrb[132].mxu1  ;;  %v7773_v28 = vpop.f32.mrb[133].mxu0  ;;  %14065 = vmatpush3.bf16.msra.mxu0 %v14505_v43 }
 0x282   : > { %v16563_v5 = vadd.f32 %v8751_v16, %v8077_v49  ;;  %v8520_v63 = vadd.f32 %v16323_v56, %v13860_v19  ;;  %v7774_v22 = vadd.f32 %v16323_v56, %v7773_v28  ;;  %v8511_v62 = vpop.f32.mrb[133].mxu1  ;;  %v13795_v29 = vpop.f32.mrb[134].mxu0 }
 0x283   : > { %v8018_v39 = vmax.f32 %v7782_v38, 0.0  ;;  %v8512_v12 = vadd.f32 %v16323_v56, %v8511_v62  ;;  %v7785_v6 = vadd.f32 %v16323_v56, %v13795_v29  ;;  %v13861_v60 = vpop.f32.mrb[134].mxu1  ;;  %v7776_v20 = vpop.f32.mrb[135].mxu0 }
 0x284   : > { %17612 = vst [vmem:[#allocation25_spill] sm:$0xff] %v16563_v5  ;;  %v8756_v18 = vmax.f32 %v8520_v63, 0.0  ;;  %v8016_v30 = vmax.f32 %v7774_v22, 0.0  ;;  %v8523_v49 = vadd.f32 %v16323_v56, %v13861_v60  ;;  %v7777_v16 = vadd.f32 %v16323_v56, %v7776_v20  ;;  %v8514_v21 = vpop.f32.mrb[135].mxu1  ;;  %v14489_v60 = vld [vmem:[%s15420_s29 + $0x6d8] sm:$0xff]  }
 0x285   : > { %v8082_v19 = vadd.f32 %v8018_v39, %v16099_v42  ;;  %v8754_v28 = vmax.f32 %v8512_v12, 0.0  ;;  %v8019_v38 = vmax.f32 %v7785_v6, 0.0  ;;  %v8515_v62 = vadd.f32 %v16323_v56, %v8514_v21  ;;  %13969 = vmatmul.mubr.msk.bf16.gmra.mrb[240].mxu0 %vm4734_vm1, %v14484_v50 }
 0x286   : > { %v8080_v29 = vadd.f32 %v8016_v30, %v16103_v47  ;;  %v8017_v5 = vmax.f32 %v7777_v16, 0.0  ;;  %14035 = vmatmul.mubr.msk.bf16.gmra.mrb[240].mxu1 %vm4734_vm1, %v14485_v33  ;;  %13972 = vmatprep.mubr.msk.bf16.mxu0 %vm4734_vm1, %v14487_v31  ;;  %v8757_v22 = vmax.f32 %v8523_v49, 0.0  ;;  %v14490_v49 = vld [vmem:[%s15420_s29 + $0x7d8] sm:$0xff]  }
 0x287   : > { %v16580_v63 = vadd.f32 %v8756_v18, %v8082_v19  ;;  %v8083_v43 = vadd.f32 %v8019_v38, %v16106_v37  ;;  %14038 = vmatprep.mubr.msk.bf16.mxu1 %vm4734_vm1, %v14488_v44  ;;  %v8755_v47 = vmax.f32 %v8515_v62, 0.0  ;;  %v14492_v38 = vld [vmem:[%s15420_s29 + $0x7e0] sm:$0xff]  }
 0x288   : > { %v16584_v42 = vadd.f32 %v8754_v28, %v8080_v29  ;;  %v8081_v50 = vadd.f32 %v8017_v5, %v16110_v55  ;;  %v13798_v39 = vpop.f32.mrb[136].mxu0  ;;  %v14491_v55 = vld [vmem:[%s15420_s29 + $0x6e0] sm:$0xff]  }
 0x289   : > { %v16587_v12 = vadd.f32 %v8757_v22, %v8083_v43  ;;  %v7798_v33 = vadd.f32 %v16323_v56, %v13798_v39  ;;  %v13864_v31 = vpop.f32.mrb[136].mxu1  ;;  %v7789_v6 = vpop.f32.mrb[137].mxu0 }
 0x28a   : > { %v16591_v37 = vadd.f32 %v8755_v47, %v8081_v50  ;;  %v8536_v20 = vadd.f32 %v16323_v56, %v13864_v31  ;;  %v7790_v44 = vadd.f32 %v16323_v56, %v7789_v6  ;;  %v8527_v18 = vpop.f32.mrb[137].mxu1  ;;  %v13799_v30 = vpop.f32.mrb[138].mxu0 }
 0x28b   : > { %v8022_v5 = vmax.f32 %v7798_v33, 0.0  ;;  %v8528_v16 = vadd.f32 %v16323_v56, %v8527_v18  ;;  %v7801_v21 = vadd.f32 %v16323_v56, %v13799_v30  ;;  %v13865_v19 = vpop.f32.mrb[138].mxu1  ;;  %v7792_v28 = vpop.f32.mrb[139].mxu0 }
 0x28c   : > { %v8760_v62 = vmax.f32 %v8536_v20, 0.0  ;;  %v8020_v29 = vmax.f32 %v7790_v44, 0.0  ;;  %v8539_v43 = vadd.f32 %v16323_v56, %v13865_v19  ;;  %v7793_v22 = vadd.f32 %v16323_v56, %v7792_v28  ;;  %v8530_v50 = vpop.f32.mrb[139].mxu1  ;;  %v14493_v28 = vld [vmem:[%s15420_s29 + $0x6e8] sm:$0xff]  }
 0x28d   : > { %v8086_v47 = vadd.f32 %v8022_v5, %v16127_v27  ;;  %v8758_v39 = vmax.f32 %v8528_v16, 0.0  ;;  %v8023_v31 = vmax.f32 %v7801_v21, 0.0  ;;  %v8531_v33 = vadd.f32 %v16323_v56, %v8530_v50  ;;  %13973 = vmatmul.mubr.msk.bf16.gmra.mrb[244].mxu0 %vm4734_vm1, %v14489_v60  ;;  %v17613_v60 = vld [vmem:[#allocation27_spill] sm:$0xff]  ;;  %v14496_v50 = vld [vmem:[%s15420_s29 + $0x6f0] sm:$0xff]  }
 0x28e   : > { %v8084_v6 = vadd.f32 %v8020_v29, %v16136_v23  ;;  %v8021_v18 = vmax.f32 %v7793_v22, 0.0  ;;  %14039 = vmatmul.mubr.msk.bf16.gmra.mrb[244].mxu1 %vm4734_vm1, %v14490_v49  ;;  %13976 = vmatprep.mubr.msk.bf16.mxu0 %vm4734_vm1, %v14491_v55  ;;  %v8761_v30 = vmax.f32 %v8539_v43, 0.0  ;;  %v14494_v22 = vld [vmem:[%s15420_s29 + $0x7e8] sm:$0xff]  }
 0x28f   : > { %v16608_v20 = vadd.f32 %v8760_v62, %v8086_v47  ;;  %v8087_v44 = vadd.f32 %v8023_v31, %v16139_v1  ;;  %14042 = vmatprep.mubr.msk.bf16.mxu1 %vm4734_vm1, %v14492_v38  ;;  %v8759_v23 = vmax.f32 %v8531_v33, 0.0 }
 0x290   : > { %v16612_v27 = vadd.f32 %v8758_v39, %v8084_v6  ;;  %v8085_v5 = vadd.f32 %v8021_v18, %v17613_v60  ;;  %v13802_v16 = vpop.f32.mrb[140].mxu0  ;;  %v14497_v18 = vld [vmem:[%s15420_s29 + $0x7f0] sm:$0xff]  }
 0x291   : > { %v16615_v21 = vadd.f32 %v8761_v30, %v8087_v44  ;;  %v7814_v49 = vadd.f32 %v16323_v56, %v13802_v16  ;;  %v13868_v55 = vpop.f32.mrb[140].mxu1  ;;  %v7805_v19 = vpop.f32.mrb[141].mxu0 }
 0x292   : > { %v16619_v1 = vadd.f32 %v8759_v23, %v8085_v5  ;;  %v8552_v62 = vadd.f32 %v16323_v56, %v13868_v55  ;;  %v7806_v38 = vadd.f32 %v16323_v56, %v7805_v19  ;;  %v8543_v29 = vpop.f32.mrb[141].mxu1  ;;  %v13803_v43 = vpop.f32.mrb[142].mxu0 }
 0x293   : > { %v8026_v47 = vmax.f32 %v7814_v49, 0.0  ;;  %v8544_v39 = vadd.f32 %v16323_v56, %v8543_v29  ;;  %v7817_v31 = vadd.f32 %v16323_v56, %v13803_v43  ;;  %v13869_v33 = vpop.f32.mrb[142].mxu1  ;;  %v7808_v6 = vpop.f32.mrb[143].mxu0 }
 0x294   : > { %v8764_v44 = vmax.f32 %v8552_v62, 0.0  ;;  %v8024_v30 = vmax.f32 %v7806_v38, 0.0  ;;  %v8555_v60 = vadd.f32 %v16323_v56, %v13869_v33  ;;  %v7809_v5 = vadd.f32 %v16323_v56, %v7808_v6  ;;  %v8546_v23 = vpop.f32.mrb[143].mxu1  ;;  %v14498_v6 = vld [vmem:[%s15420_s29 + $0x6f8] sm:$0xff]  }
 0x295   : > { %v8090_v16 = vadd.f32 %v8026_v47, %v16161_v48  ;;  %v8762_v55 = vmax.f32 %v8544_v39, 0.0  ;;  %v8027_v19 = vmax.f32 %v7817_v31, 0.0  ;;  %v8547_v49 = vadd.f32 %v16323_v56, %v8546_v23  ;;  %13977 = vmatmul.mubr.msk.bf16.gmra.mrb[248].mxu0 %vm4734_vm1, %v14493_v28 }
 0x296   : > { %v8088_v29 = vadd.f32 %v8024_v30, %v16165_v57  ;;  %v8025_v43 = vmax.f32 %v7809_v5, 0.0  ;;  %14043 = vmatmul.mubr.msk.bf16.gmra.mrb[248].mxu1 %vm4734_vm1, %v14494_v22  ;;  %13980 = vmatprep.mubr.msk.bf16.mxu0 %vm4734_vm1, %v14496_v50  ;;  %v8765_v33 = vmax.f32 %v8555_v60, 0.0  ;;  %v14499_v5 = vld [vmem:[%s15420_s29 + $0x7f8] sm:$0xff]  }
 0x297   : > { %v16636_v62 = vadd.f32 %v8764_v44, %v8090_v16  ;;  %v8091_v38 = vadd.f32 %v8027_v19, %v16168_v26  ;;  %14046 = vmatprep.mubr.msk.bf16.mxu1 %vm4734_vm1, %v14497_v18  ;;  %v8763_v47 = vmax.f32 %v8547_v49, 0.0 }
 0x298   : > { %v16640_v48 = vadd.f32 %v8762_v55, %v8088_v29  ;;  %v8089_v28 = vadd.f32 %v8025_v43, %v16172_v3  ;;  %v13806_v57 = vpop.f32.mrb[144].mxu0 }
 0x299   : > { %v16643_v39 = vadd.f32 %v8765_v33, %v8091_v38  ;;  %v7830_v22 = vadd.f32 %v16323_v56, %v13806_v57  ;;  %v13872_v31 = vpop.f32.mrb[144].mxu1  ;;  %v7821_v50 = vpop.f32.mrb[145].mxu0 }
 0x29a   : > { %v16647_v44 = vadd.f32 %v8763_v47, %v8089_v28  ;;  %v8568_v26 = vadd.f32 %v16323_v56, %v13872_v31  ;;  %v7822_v30 = vadd.f32 %v16323_v56, %v7821_v50  ;;  %v8559_v18 = vpop.f32.mrb[145].mxu1  ;;  %v13807_v60 = vpop.f32.mrb[146].mxu0 }
 0x29b   : > { %v8030_v23 = vmax.f32 %v7830_v22, 0.0  ;;  %v8560_v3 = vadd.f32 %v16323_v56, %v8559_v18  ;;  %v7833_v16 = vadd.f32 %v16323_v56, %v13807_v60  ;;  %v13873_v55 = vpop.f32.mrb[146].mxu1  ;;  %v7824_v19 = vpop.f32.mrb[147].mxu0 }
 0x29c   : > { %v8768_v49 = vmax.f32 %v8568_v26, 0.0  ;;  %v8028_v29 = vmax.f32 %v7822_v30, 0.0  ;;  %v8571_v43 = vadd.f32 %v16323_v56, %v13873_v55  ;;  %v7825_v38 = vadd.f32 %v16323_v56, %v7824_v19  ;;  %v8562_v33 = vpop.f32.mrb[147].mxu1 }
 0x29d   : > { %v8094_v28 = vadd.f32 %v8030_v23, %v16189_v0  ;;  %v8766_v47 = vmax.f32 %v8560_v3, 0.0  ;;  %v8031_v57 = vmax.f32 %v7833_v16, 0.0  ;;  %v8563_v31 = vadd.f32 %v16323_v56, %v8562_v33  ;;  %13981 = vmatmul.mubr.msk.bf16.gmra.mrb[252].mxu0 %vm4734_vm1, %v14498_v6 }
 0x29e   : > { %v8092_v22 = vadd.f32 %v8028_v29, %v16193_v35  ;;  %v8029_v50 = vmax.f32 %v7825_v38, 0.0  ;;  %14047 = vmatmul.mubr.msk.bf16.gmra.mrb[252].mxu1 %vm4734_vm1, %v14499_v5  ;;  %v8769_v18 = vmax.f32 %v8571_v43, 0.0 }
 0x29f   : > { %v16661_v26 = vadd.f32 %v8768_v49, %v8094_v28  ;;  %v8095_v30 = vadd.f32 %v8031_v57, %v16196_v59  ;;  %v8767_v23 = vmax.f32 %v8563_v31, 0.0 }
 0x2a0   : > { %v16664_v60 = vadd.f32 %v8766_v47, %v8092_v22  ;;  %v8093_v0 = vadd.f32 %v8029_v50, %v16200_v41  ;;  %v13810_v3 = vpop.f32.mrb[148].mxu0 }
 0x2a1   : > { %v16667_v16 = vadd.f32 %v8769_v18, %v8095_v30  ;;  %v7846_v6 = vadd.f32 %v16323_v56, %v13810_v3  ;;  %v13876_v55 = vpop.f32.mrb[148].mxu1  ;;  %v7837_v35 = vpop.f32.mrb[149].mxu0 }
 0x2a2   : > { %v16670_v19 = vadd.f32 %v8767_v23, %v8093_v0  ;;  %v8584_v5 = vadd.f32 %v16323_v56, %v13876_v55  ;;  %v7838_v49 = vadd.f32 %v16323_v56, %v7837_v35  ;;  %v8575_v59 = vpop.f32.mrb[149].mxu1  ;;  %v13811_v29 = vpop.f32.mrb[150].mxu0 }
 0x2a3   : > { %v8034_v43 = vmax.f32 %v7846_v6, 0.0  ;;  %v8576_v38 = vadd.f32 %v16323_v56, %v8575_v59  ;;  %v7849_v41 = vadd.f32 %v16323_v56, %v13811_v29  ;;  %v13877_v33 = vpop.f32.mrb[150].mxu1  ;;  %v7840_v28 = vpop.f32.mrb[151].mxu0 }
 0x2a4   : > { %v8772_v47 = vmax.f32 %v8584_v5, 0.0  ;;  %v8032_v57 = vmax.f32 %v7838_v49, 0.0  ;;  %v8587_v31 = vadd.f32 %v16323_v56, %v13877_v33  ;;  %v7841_v22 = vadd.f32 %v16323_v56, %v7840_v28  ;;  %v8578_v50 = vpop.f32.mrb[151].mxu1 }
 0x2a5   : > { %v8098_v30 = vadd.f32 %v8034_v43, %v16220_v11  ;;  %v8770_v18 = vmax.f32 %v8576_v38, 0.0  ;;  %v8035_v0 = vmax.f32 %v7849_v41, 0.0  ;;  %v8579_v23 = vadd.f32 %v16323_v56, %v8578_v50  ;;  %v16692_v11 = vld [vmem:[%s17535_s2] ss:$0 sm:$0xff] }
 0x2a6   : > { %v8096_v3 = vadd.f32 %v8032_v57, %v16225_v14  ;;  %v8033_v6 = vmax.f32 %v7841_v22, 0.0  ;;  %v8773_v5 = vmax.f32 %v8587_v31, 0.0 }
 0x2a7   : > { %v16681_v55 = vadd.f32 %v8772_v47, %v8098_v30  ;;  %v8099_v35 = vadd.f32 %v8035_v0, %v16228_v61  ;;  %v8771_v29 = vmax.f32 %v8579_v23, 0.0 }
 0x2a8   : > { %v16684_v49 = vadd.f32 %v8770_v18, %v8096_v3  ;;  %v8097_v59 = vadd.f32 %v8033_v6, %v16232_v34  ;;  %v13814_v33 = vpop.f32.mrb[152].mxu0 }
 0x2a9   : > { %v16687_v28 = vadd.f32 %v8773_v5, %v8099_v35  ;;  %v7862_v14 = vadd.f32 %v16692_v11, %v13814_v33  ;;  %v13880_v56 = vpop.f32.mrb[152].mxu1  ;;  %v7853_v43 = vpop.f32.mrb[153].mxu0 }
 0x2aa   : > { %v16695_v38 = vadd.f32 %v8771_v29, %v8097_v59  ;;  %v8600_v61 = vadd.f32 %v16692_v11, %v13880_v56  ;;  %v7854_v41 = vadd.f32 %v16692_v11, %v7853_v43  ;;  %v8591_v34 = vpop.f32.mrb[153].mxu1  ;;  %v13815_v47 = vpop.f32.mrb[154].mxu0 }
 0x2ab   : > { %v8038_v57 = vmax.f32 %v7862_v14, 0.0  ;;  %v8592_v31 = vadd.f32 %v16692_v11, %v8591_v34  ;;  %v7865_v22 = vadd.f32 %v16692_v11, %v13815_v47  ;;  %v13881_v50 = vpop.f32.mrb[154].mxu1  ;;  %v7856_v30 = vpop.f32.mrb[155].mxu0 }
 0x2ac   : > { %v8776_v18 = vmax.f32 %v8600_v61, 0.0  ;;  %v8036_v0 = vmax.f32 %v7854_v41, 0.0  ;;  %v8603_v23 = vadd.f32 %v16692_v11, %v13881_v50  ;;  %v7857_v3 = vadd.f32 %v16692_v11, %v7856_v30  ;;  %v8594_v6 = vpop.f32.mrb[155].mxu1 }
 0x2ad   : > { %v8102_v35 = vadd.f32 %v8038_v57, %v16249_v25  ;;  %v8774_v5 = vmax.f32 %v8592_v31, 0.0  ;;  %v8039_v59 = vmax.f32 %v7865_v22, 0.0  ;;  %v8595_v29 = vadd.f32 %v16692_v11, %v8594_v6 }
 0x2ae   : > { %v8100_v33 = vadd.f32 %v8036_v0, %v16256_v51  ;;  %v8037_v14 = vmax.f32 %v7857_v3, 0.0  ;;  %v8777_v61 = vmax.f32 %v8603_v23, 0.0 }
 0x2af   : > { %v16706_v56 = vadd.f32 %v8776_v18, %v8102_v35  ;;  %v8103_v43 = vadd.f32 %v8039_v59, %v16259_v13  ;;  %v8775_v47 = vmax.f32 %v8595_v29, 0.0 }
 0x2b0   : > { %v16709_v41 = vadd.f32 %v8774_v5, %v8100_v33  ;;  %v8101_v34 = vadd.f32 %v8037_v14, %v16263_v15  ;;  %v13818_v50 = vpop.f32.mrb[156].mxu0 }
 0x2b1   : > { %v16712_v30 = vadd.f32 %v8777_v61, %v8103_v43  ;;  %v7878_v25 = vadd.f32 %v16692_v11, %v13818_v50  ;;  %v13884_v57 = vpop.f32.mrb[156].mxu1  ;;  %v7869_v31 = vpop.f32.mrb[157].mxu0 }
 0x2b2   : > { %v16715_v22 = vadd.f32 %v8775_v47, %v8101_v34  ;;  %v8616_v51 = vadd.f32 %v16692_v11, %v13884_v57  ;;  %v7870_v18 = vadd.f32 %v16692_v11, %v7869_v31  ;;  %v8607_v13 = vpop.f32.mrb[157].mxu1  ;;  %v13819_v0 = vpop.f32.mrb[158].mxu0 }
 0x2b3   : > { %v8042_v23 = vmax.f32 %v7878_v25, 0.0  ;;  %v8608_v3 = vadd.f32 %v16692_v11, %v8607_v13  ;;  %v7881_v15 = vadd.f32 %v16692_v11, %v13819_v0  ;;  %v13885_v6 = vpop.f32.mrb[158].mxu1  ;;  %v7872_v35 = vpop.f32.mrb[159].mxu0 }
 0x2b4   : > { %v8780_v5 = vmax.f32 %v8616_v51, 0.0  ;;  %v8040_v59 = vmax.f32 %v7870_v18, 0.0  ;;  %v8619_v29 = vadd.f32 %v16692_v11, %v13885_v6  ;;  %v7873_v33 = vadd.f32 %v16692_v11, %v7872_v35  ;;  %v8610_v14 = vpop.f32.mrb[159].mxu1 }
 0x2b5   : > { %v8106_v43 = vadd.f32 %v8042_v23, %v16280_v32  ;;  %v8778_v61 = vmax.f32 %v8608_v3, 0.0  ;;  %v8043_v34 = vmax.f32 %v7881_v15, 0.0  ;;  %v8611_v47 = vadd.f32 %v16692_v11, %v8610_v14 }
 0x2b6   : > { %v8104_v50 = vadd.f32 %v8040_v59, %v16284_v52  ;;  %v8041_v25 = vmax.f32 %v7873_v33, 0.0  ;;  %v8781_v51 = vmax.f32 %v8619_v29, 0.0 }
 0x2b7   : > { %v16726_v57 = vadd.f32 %v8780_v5, %v8106_v43  ;;  %v8107_v31 = vadd.f32 %v8043_v34, %v16287_v40  ;;  %v8779_v0 = vmax.f32 %v8611_v47, 0.0 }
 0x2b8   : > { %v16729_v18 = vadd.f32 %v8778_v61, %v8104_v50  ;;  %v8105_v13 = vadd.f32 %v8041_v25, %v16291_v58  ;;  %v13822_v6 = vpop.f32.mrb[160].mxu0 }
 0x2b9   : > { %v16732_v35 = vadd.f32 %v8781_v51, %v8107_v31  ;;  %v7894_v32 = vadd.f32 %v16692_v11, %v13822_v6  ;;  %v13888_v23 = vpop.f32.mrb[160].mxu1  ;;  %v7885_v3 = vpop.f32.mrb[161].mxu0 }
 0x2ba   : > { %v16735_v15 = vadd.f32 %v8779_v0, %v8105_v13  ;;  %v8632_v52 = vadd.f32 %v16692_v11, %v13888_v23  ;;  %v7886_v5 = vadd.f32 %v16692_v11, %v7885_v3  ;;  %v8623_v40 = vpop.f32.mrb[161].mxu1  ;;  %v13823_v59 = vpop.f32.mrb[162].mxu0 }
 0x2bb   : > { %v8046_v29 = vmax.f32 %v7894_v32, 0.0  ;;  %v8624_v33 = vadd.f32 %v16692_v11, %v8623_v40  ;;  %v7897_v58 = vadd.f32 %v16692_v11, %v13823_v59  ;;  %v13889_v14 = vpop.f32.mrb[162].mxu1  ;;  %v7888_v43 = vpop.f32.mrb[163].mxu0 }
 0x2bc   : > { %v8784_v61 = vmax.f32 %v8632_v52, 0.0  ;;  %v8044_v34 = vmax.f32 %v7886_v5, 0.0  ;;  %v8635_v47 = vadd.f32 %v16692_v11, %v13889_v14  ;;  %v7889_v50 = vadd.f32 %v16692_v11, %v7888_v43  ;;  %v8626_v25 = vpop.f32.mrb[163].mxu1 }
 0x2bd   : > { %v8110_v31 = vadd.f32 %v8046_v29, %v16308_v45  ;;  %v8782_v51 = vmax.f32 %v8624_v33, 0.0  ;;  %v8047_v13 = vmax.f32 %v7897_v58, 0.0  ;;  %v8627_v0 = vadd.f32 %v16692_v11, %v8626_v25 }
 0x2be   : > { %v8108_v6 = vadd.f32 %v8044_v34, %v16315_v2  ;;  %v8045_v32 = vmax.f32 %v7889_v50, 0.0  ;;  %v8785_v52 = vmax.f32 %v8635_v47, 0.0 }
 0x2bf   : > { %v16746_v23 = vadd.f32 %v8784_v61, %v8110_v31  ;;  %v8111_v3 = vadd.f32 %v8047_v13, %v16318_v8  ;;  %v8783_v59 = vmax.f32 %v8627_v0, 0.0 }
 0x2c0   : > { %v16749_v5 = vadd.f32 %v8782_v51, %v8108_v6  ;;  %v8109_v40 = vadd.f32 %v8045_v32, %v16327_v7  ;;  %v13826_v14 = vpop.f32.mrb[164].mxu0 }
 0x2c1   : > { %v16752_v43 = vadd.f32 %v8785_v52, %v8111_v3  ;;  %v7910_v45 = vadd.f32 %v16692_v11, %v13826_v14  ;;  %v13892_v29 = vpop.f32.mrb[164].mxu1  ;;  %v7901_v33 = vpop.f32.mrb[165].mxu0 }
 0x2c2   : > { %v16755_v58 = vadd.f32 %v8783_v59, %v8109_v40  ;;  %v8648_v2 = vadd.f32 %v16692_v11, %v13892_v29  ;;  %v7902_v61 = vadd.f32 %v16692_v11, %v7901_v33  ;;  %v8639_v8 = vpop.f32.mrb[165].mxu1  ;;  %v13827_v34 = vpop.f32.mrb[166].mxu0 }
 0x2c3   : > { %v8050_v47 = vmax.f32 %v7910_v45, 0.0  ;;  %v8640_v50 = vadd.f32 %v16692_v11, %v8639_v8  ;;  %v7913_v7 = vadd.f32 %v16692_v11, %v13827_v34  ;;  %v13893_v25 = vpop.f32.mrb[166].mxu1  ;;  %v7904_v31 = vpop.f32.mrb[167].mxu0 }
 0x2c4   : > { %v8788_v51 = vmax.f32 %v8648_v2, 0.0  ;;  %v8048_v13 = vmax.f32 %v7902_v61, 0.0  ;;  %v8651_v0 = vadd.f32 %v16692_v11, %v13893_v25  ;;  %v7905_v6 = vadd.f32 %v16692_v11, %v7904_v31  ;;  %v8642_v32 = vpop.f32.mrb[167].mxu1 }
 0x2c5   : > { %v8114_v3 = vadd.f32 %v8050_v47, %v16344_v9  ;;  %v8786_v52 = vmax.f32 %v8640_v50, 0.0  ;;  %v8051_v40 = vmax.f32 %v7913_v7, 0.0  ;;  %v8643_v59 = vadd.f32 %v16692_v11, %v8642_v32 }
 0x2c6   : > { %v8112_v14 = vadd.f32 %v8048_v13, %v16348_v53  ;;  %v8049_v45 = vmax.f32 %v7905_v6, 0.0  ;;  %v8789_v2 = vmax.f32 %v8651_v0, 0.0 }
 0x2c7   : > { %v16766_v29 = vadd.f32 %v8788_v51, %v8114_v3  ;;  %v8115_v33 = vadd.f32 %v8051_v40, %v16351_v54  ;;  %v8787_v34 = vmax.f32 %v8643_v59, 0.0 }
 0x2c8   : > { %v16769_v61 = vadd.f32 %v8786_v52, %v8112_v14  ;;  %v8113_v8 = vadd.f32 %v8049_v45, %v16355_v10  ;;  %v13830_v25 = vpop.f32.mrb[168].mxu0 }
 0x2c9   : > { %17614 = vst [vmem:[#allocation26_spill] sm:$0xff] %v16766_v29  ;;  %v16772_v31 = vadd.f32 %v8789_v2, %v8115_v33  ;;  %v7926_v9 = vadd.f32 %v16692_v11, %v13830_v25  ;;  %v13896_v47 = vpop.f32.mrb[168].mxu1  ;;  %v7917_v50 = vpop.f32.mrb[169].mxu0  ;;  %v17618_v33 = vld [vmem:[#allocation4_spill] sm:$0xff] }
 0x2ca   : > { %17615 = vst [vmem:[#allocation27_spill] sm:$0xff] %v16769_v61  ;;  %v16775_v7 = vadd.f32 %v8787_v34, %v8113_v8  ;;  %v8664_v53 = vadd.f32 %v16692_v11, %v13896_v47  ;;  %v7918_v51 = vadd.f32 %v16692_v11, %v7917_v50  ;;  %v8655_v54 = vpop.f32.mrb[169].mxu1  ;;  %v13831_v13 = vpop.f32.mrb[170].mxu0 }
 0x2cb   : > { %17616 = vst [vmem:[#allocation29_spill] sm:$0xff] %v16772_v31  ;;  %v8054_v0 = vmax.f32 %v7926_v9, 0.0  ;;  %v8656_v6 = vadd.f32 %v16692_v11, %v8655_v54  ;;  %v7929_v10 = vadd.f32 %v16692_v11, %v13831_v13  ;;  %v13897_v32 = vpop.f32.mrb[170].mxu1  ;;  %v7920_v3 = vpop.f32.mrb[171].mxu0  ;;  %v17619_v9 = vld [vmem:[#allocation5_spill] sm:$0xff]  ;;  %v17621_v13 = vld [vmem:[#allocation6_spill] sm:$0xff] }
 0x2cc   : > { %17617 = vst [vmem:[#allocation30_spill] sm:$0xff] %v16775_v7  ;;  %v8792_v52 = vmax.f32 %v8664_v53, 0.0  ;;  %v8052_v40 = vmax.f32 %v7918_v51, 0.0  ;;  %v8667_v59 = vadd.f32 %v16692_v11, %v13897_v32  ;;  %v7921_v14 = vadd.f32 %v16692_v11, %v7920_v3  ;;  %v8658_v45 = vpop.f32.mrb[171].mxu1  ;;  %v17623_v32 = vld [vmem:[#allocation28_spill] sm:$0xff] }
 0x2cd   : > { %v8118_v2 = vadd.f32 %v8054_v0, %v17618_v33  ;;  %v8790_v8 = vmax.f32 %v8656_v6, 0.0  ;;  %v8055_v34 = vmax.f32 %v7929_v10, 0.0  ;;  %v8659_v25 = vadd.f32 %v16692_v11, %v8658_v45 }
 0x2ce   : > { %v8116_v47 = vadd.f32 %v8052_v40, %v17619_v9  ;;  %v8053_v50 = vmax.f32 %v7921_v14, 0.0  ;;  %v8793_v53 = vmax.f32 %v8667_v59, 0.0 }
 0x2cf   : > { %v16786_v54 = vadd.f32 %v8792_v52, %v8118_v2  ;;  %v8119_v7 = vadd.f32 %v8055_v34, %v17621_v13  ;;  %v8791_v3 = vmax.f32 %v8659_v25, 0.0 }
 0x2d0   : > { %v16789_v51 = vadd.f32 %v8790_v8, %v8116_v47  ;;  %v8117_v31 = vadd.f32 %v8053_v50, %v17623_v32  ;;  %v13834_v61 = vpop.f32.mrb[172].mxu0  ;;  %v17626_v50 = vld [vmem:[#allocation7_spill] sm:$0xff] }
 0x2d1   : > { %17620 = vst [vmem:[#allocation4_spill] sm:$0xff] %v16786_v54  ;;  %v16792_v29 = vadd.f32 %v8793_v53, %v8119_v7  ;;  %v7942_v0 = vadd.f32 %v16692_v11, %v13834_v61  ;;  %v13900_v6 = vpop.f32.mrb[172].mxu1  ;;  %v7933_v10 = vpop.f32.mrb[173].mxu0 }
 0x2d2   : > { %17622 = vst [vmem:[#allocation5_spill] sm:$0xff] %v16789_v51  ;;  %v16795_v45 = vadd.f32 %v8791_v3, %v8117_v31  ;;  %v8680_v52 = vadd.f32 %v16692_v11, %v13900_v6  ;;  %v7934_v40 = vadd.f32 %v16692_v11, %v7933_v10  ;;  %v8671_v14 = vpop.f32.mrb[173].mxu1  ;;  %v13835_v59 = vpop.f32.mrb[174].mxu0 }
 0x2d3   : > { %17624 = vst [vmem:[#allocation6_spill] sm:$0xff] %v16792_v29  ;;  %v8058_v33 = vmax.f32 %v7942_v0, 0.0  ;;  %v8672_v2 = vadd.f32 %v16692_v11, %v8671_v14  ;;  %v7945_v8 = vadd.f32 %v16692_v11, %v13835_v59  ;;  %v13901_v34 = vpop.f32.mrb[174].mxu1  ;;  %v7936_v7 = vpop.f32.mrb[175].mxu0  ;;  %v17627_v0 = vld [vmem:[#allocation8_spill] sm:$0xff]  ;;  %v17629_v59 = vld [vmem:[#allocation9_spill] sm:$0xff] }
 0x2d4   : > { %17625 = vst [vmem:[#allocation28_spill] sm:$0xff] %v16795_v45  ;;  %v8796_v25 = vmax.f32 %v8680_v52, 0.0  ;;  %v8056_v9 = vmax.f32 %v7934_v40, 0.0  ;;  %v8683_v61 = vadd.f32 %v16692_v11, %v13901_v34  ;;  %v7937_v31 = vadd.f32 %v16692_v11, %v7936_v7  ;;  %v8674_v47 = vpop.f32.mrb[175].mxu1  ;;  %v17631_v34 = vld [vmem:[#allocation10_spill] sm:$0xff] }
 0x2d5   : > { %v8122_v13 = vadd.f32 %v8058_v33, %v17626_v50  ;;  %v8794_v53 = vmax.f32 %v8672_v2, 0.0  ;;  %v8059_v32 = vmax.f32 %v7945_v8, 0.0  ;;  %v8675_v3 = vadd.f32 %v16692_v11, %v8674_v47 }
 0x2d6   : > { %v8120_v6 = vadd.f32 %v8056_v9, %v17627_v0  ;;  %v8057_v10 = vmax.f32 %v7937_v31, 0.0  ;;  %v8797_v52 = vmax.f32 %v8683_v61, 0.0 }
 0x2d7   : > { %v16806_v14 = vadd.f32 %v8796_v25, %v8122_v13  ;;  %v8123_v45 = vadd.f32 %v8059_v32, %v17629_v59  ;;  %v8795_v7 = vmax.f32 %v8675_v3, 0.0 }
 0x2d8   : > { %v16809_v40 = vadd.f32 %v8794_v53, %v8120_v6  ;;  %v8121_v29 = vadd.f32 %v8057_v10, %v17631_v34  ;;  %v13838_v51 = vpop.f32.mrb[176].mxu0  ;;  %v17634_v10 = vld [vmem:[#allocation11_spill] sm:$0xff] }
 0x2d9   : > { %17628 = vst [vmem:[#allocation7_spill] sm:$0xff] %v16806_v14  ;;  %v16812_v54 = vadd.f32 %v8797_v52, %v8123_v45  ;;  %v7958_v33 = vadd.f32 %v16692_v11, %v13838_v51  ;;  %v13904_v2 = vpop.f32.mrb[176].mxu1  ;;  %v7949_v8 = vpop.f32.mrb[177].mxu0 }
 0x2da   : > { %17630 = vst [vmem:[#allocation8_spill] sm:$0xff] %v16809_v40  ;;  %v16815_v47 = vadd.f32 %v8795_v7, %v8121_v29  ;;  %v8696_v25 = vadd.f32 %v16692_v11, %v13904_v2  ;;  %v7950_v9 = vadd.f32 %v16692_v11, %v7949_v8  ;;  %v8687_v31 = vpop.f32.mrb[177].mxu1  ;;  %v13839_v61 = vpop.f32.mrb[178].mxu0 }
 0x2db   : > { %17632 = vst [vmem:[#allocation9_spill] sm:$0xff] %v16812_v54  ;;  %v8062_v50 = vmax.f32 %v7958_v33, 0.0  ;;  %v8688_v13 = vadd.f32 %v16692_v11, %v8687_v31  ;;  %v7961_v53 = vadd.f32 %v16692_v11, %v13839_v61  ;;  %v13905_v32 = vpop.f32.mrb[178].mxu1  ;;  %v7952_v45 = vpop.f32.mrb[179].mxu0  ;;  %v17635_v33 = vld [vmem:[#allocation12_spill] sm:$0xff]  ;;  %v17637_v61 = vld [vmem:[#allocation13_spill] sm:$0xff] }
 0x2dc   : > { %17633 = vst [vmem:[#allocation10_spill] sm:$0xff] %v16815_v47  ;;  %v8800_v3 = vmax.f32 %v8696_v25, 0.0  ;;  %v8060_v0 = vmax.f32 %v7950_v9, 0.0  ;;  %v8699_v51 = vadd.f32 %v16692_v11, %v13905_v32  ;;  %v7953_v29 = vadd.f32 %v16692_v11, %v7952_v45  ;;  %v8690_v6 = vpop.f32.mrb[179].mxu1  ;;  %v17639_v32 = vld [vmem:[#allocation14_spill] sm:$0xff] }
 0x2dd   : > { %v8126_v59 = vadd.f32 %v8062_v50, %v17634_v10  ;;  %v8798_v52 = vmax.f32 %v8688_v13, 0.0  ;;  %v8063_v34 = vmax.f32 %v7961_v53, 0.0  ;;  %v8691_v7 = vadd.f32 %v16692_v11, %v8690_v6 }
 0x2de   : > { %v8124_v2 = vadd.f32 %v8060_v0, %v17635_v33  ;;  %v8061_v8 = vmax.f32 %v7953_v29, 0.0  ;;  %v8801_v25 = vmax.f32 %v8699_v51, 0.0 }
 0x2df   : > { %v16826_v31 = vadd.f32 %v8800_v3, %v8126_v59  ;;  %v8127_v47 = vadd.f32 %v8063_v34, %v17637_v61  ;;  %v8799_v45 = vmax.f32 %v8691_v7, 0.0 }
 0x2e0   : > { %v16829_v9 = vadd.f32 %v8798_v52, %v8124_v2  ;;  %v8125_v54 = vadd.f32 %v8061_v8, %v17639_v32  ;;  %v13842_v40 = vpop.f32.mrb[180].mxu0  ;;  %v17642_v8 = vld [vmem:[#allocation15_spill] sm:$0xff] }
 0x2e1   : > { %17636 = vst [vmem:[#allocation11_spill] sm:$0xff] %v16826_v31  ;;  %v16832_v14 = vadd.f32 %v8801_v25, %v8127_v47  ;;  %v7974_v50 = vadd.f32 %v16692_v11, %v13842_v40  ;;  %v13908_v13 = vpop.f32.mrb[180].mxu1  ;;  %v7965_v53 = vpop.f32.mrb[181].mxu0 }
 0x2e2   : > { %17638 = vst [vmem:[#allocation12_spill] sm:$0xff] %v16829_v9  ;;  %v16835_v6 = vadd.f32 %v8799_v45, %v8125_v54  ;;  %v8712_v3 = vadd.f32 %v16692_v11, %v13908_v13  ;;  %v7966_v0 = vadd.f32 %v16692_v11, %v7965_v53  ;;  %v8703_v29 = vpop.f32.mrb[181].mxu1  ;;  %v13843_v51 = vpop.f32.mrb[182].mxu0 }
 0x2e3   : > { %17640 = vst [vmem:[#allocation13_spill] sm:$0xff] %v16832_v14  ;;  %v8066_v10 = vmax.f32 %v7974_v50, 0.0  ;;  %v8704_v59 = vadd.f32 %v16692_v11, %v8703_v29  ;;  %v7977_v52 = vadd.f32 %v16692_v11, %v13843_v51  ;;  %v13909_v34 = vpop.f32.mrb[182].mxu1  ;;  %v7968_v47 = vpop.f32.mrb[183].mxu0  ;;  %v17643_v50 = vld [vmem:[#allocation16_spill] sm:$0xff]  ;;  %v17644_v51 = vld [vmem:[#allocation17_spill] sm:$0xff] }
 0x2e4   : > { %17641 = vst [vmem:[#allocation14_spill] sm:$0xff] %v16835_v6  ;;  %v8804_v7 = vmax.f32 %v8712_v3, 0.0  ;;  %v8064_v33 = vmax.f32 %v7966_v0, 0.0  ;;  %v8715_v40 = vadd.f32 %v16692_v11, %v13909_v34  ;;  %v7969_v54 = vadd.f32 %v16692_v11, %v7968_v47  ;;  %v8706_v2 = vpop.f32.mrb[183].mxu1  ;;  %v17645_v34 = vld [vmem:[#allocation18_spill] sm:$0xff] }
 0x2e5   : > { %v8130_v61 = vadd.f32 %v8066_v10, %v17642_v8  ;;  %v8802_v25 = vmax.f32 %v8704_v59, 0.0  ;;  %v8067_v32 = vmax.f32 %v7977_v52, 0.0  ;;  %v8707_v45 = vadd.f32 %v16692_v11, %v8706_v2 }
 0x2e6   : > { %v8128_v13 = vadd.f32 %v8064_v33, %v17643_v50  ;;  %v8065_v53 = vmax.f32 %v7969_v54, 0.0  ;;  %v8805_v3 = vmax.f32 %v8715_v40, 0.0 }
 0x2e7   : > { %v16846_v29 = vadd.f32 %v8804_v7, %v8130_v61  ;;  %v8131_v6 = vadd.f32 %v8067_v32, %v17644_v51  ;;  %v8803_v47 = vmax.f32 %v8707_v45, 0.0 }
 0x2e8   : > { %v16849_v0 = vadd.f32 %v8802_v25, %v8128_v13  ;;  %v8129_v14 = vadd.f32 %v8065_v53, %v17645_v34  ;;  %v13846_v9 = vpop.f32.mrb[184].mxu0  ;;  %v17648_v53 = vld [vmem:[#allocation19_spill] sm:$0xff] }
 0x2e9   : > { %v16852_v31 = vadd.f32 %v8805_v3, %v8131_v6  ;;  %v7990_v10 = vadd.f32 %v16692_v11, %v13846_v9  ;;  %v13912_v59 = vpop.f32.mrb[184].mxu1  ;;  %v7981_v52 = vpop.f32.mrb[185].mxu0 }
 0x2ea   : > { %v16855_v2 = vadd.f32 %v8803_v47, %v8129_v14  ;;  %v8728_v7 = vadd.f32 %v16692_v11, %v13912_v59  ;;  %v7982_v33 = vadd.f32 %v16692_v11, %v7981_v52  ;;  %v8719_v54 = vpop.f32.mrb[185].mxu1  ;;  %v13847_v40 = vpop.f32.mrb[186].mxu0 }
 0x2eb   : > { %17646 = vst [vmem:[#allocation15_spill] sm:$0xff] %v16852_v31  ;;  %v8070_v8 = vmax.f32 %v7990_v10, 0.0  ;;  %v8720_v61 = vadd.f32 %v16692_v11, %v8719_v54  ;;  %v7993_v25 = vadd.f32 %v16692_v11, %v13847_v40  ;;  %v13913_v32 = vpop.f32.mrb[186].mxu1  ;;  %v7984_v6 = vpop.f32.mrb[187].mxu0  ;;  %v17649_v10 = vld [vmem:[#allocation20_spill] sm:$0xff] }
 0x2ec   : > { %17647 = vst [vmem:[#allocation16_spill] sm:$0xff] %v16855_v2  ;;  %v8808_v45 = vmax.f32 %v8728_v7, 0.0  ;;  %v8068_v50 = vmax.f32 %v7982_v33, 0.0  ;;  %v8731_v9 = vadd.f32 %v16692_v11, %v13913_v32  ;;  %v7985_v14 = vadd.f32 %v16692_v11, %v7984_v6  ;;  %v8722_v13 = vpop.f32.mrb[187].mxu1  ;;  %v14506_v54 = vld [vmem:[%s17538_s5] sm:$0xff]   ;;  %v17651_v33 = vld [vmem:[#allocation21_spill] sm:$0xff] }
 0x2ed   : > { %v8134_v51 = vadd.f32 %v8070_v8, %v17648_v53  ;;  %v8806_v3 = vmax.f32 %v8720_v61, 0.0  ;;  %v8071_v34 = vmax.f32 %v7993_v25, 0.0  ;;  %v8723_v47 = vadd.f32 %v16692_v11, %v8722_v13  ;;  %v17653_v2 = vld [vmem:[#allocation22_spill] sm:$0xff]  ;;  %14130 = vmatprep.subr.bf16.mxu1 %v14506_v54 }
 0x2ee   : > { %v8132_v59 = vadd.f32 %v8068_v50, %v17649_v10  ;;  %v8069_v52 = vmax.f32 %v7985_v14, 0.0  ;;  %v8809_v32 = vmax.f32 %v8731_v9, 0.0  ;;  %14131 = vmatpush3.bf16.msra.mxu1 %v14506_v54 }
 0x2ef   : > { %v16869_v7 = vadd.f32 %v8808_v45, %v8134_v51  ;;  %v8135_v40 = vadd.f32 %v8071_v34, %v17651_v33  ;;  %v8807_v61 = vmax.f32 %v8723_v47, 0.0 }
 0x2f0   : > { %v16872_v6 = vadd.f32 %v8806_v3, %v8132_v59  ;;  %v8133_v8 = vadd.f32 %v8069_v52, %v17653_v2  ;;  %v13850_v25 = vpop.f32.mrb[188].mxu0 }
 0x2f1   : > { %17650 = vst [vmem:[#allocation17_spill] sm:$0xff] %v16869_v7  ;;  %v16875_v13 = vadd.f32 %v8809_v32, %v8135_v40  ;;  %v8006_v50 = vadd.f32 %v16692_v11, %v13850_v25  ;;  %v13916_v14 = vpop.f32.mrb[188].mxu1  ;;  %v7997_v53 = vpop.f32.mrb[189].mxu0 }
 0x2f2   : > { %17652 = vst [vmem:[#allocation18_spill] sm:$0xff] %v16872_v6  ;;  %v16878_v10 = vadd.f32 %v8807_v61, %v8133_v8  ;;  %v8744_v45 = vadd.f32 %v16692_v11, %v13916_v14  ;;  %v7998_v9 = vadd.f32 %v16692_v11, %v7997_v53  ;;  %v8735_v51 = vpop.f32.mrb[189].mxu1  ;;  %v13851_v3 = vpop.f32.mrb[190].mxu0 }
 0x2f3   : > { %17654 = vst [vmem:[#allocation19_spill] sm:$0xff] %v16875_v13  ;;  %v8074_v34 = vmax.f32 %v8006_v50, 0.0  ;;  %v8736_v2 = vadd.f32 %v16692_v11, %v8735_v51  ;;  %v8009_v47 = vadd.f32 %v16692_v11, %v13851_v3  ;;  %v13917_v59 = vpop.f32.mrb[190].mxu1  ;;  %v8000_v52 = vpop.f32.mrb[191].mxu0  ;;  %v17656_v3 = vld [vmem:[#allocation23_spill] sm:$0xff] }
 0x2f4   : > { %17655 = vst [vmem:[#allocation20_spill] sm:$0xff] %v16878_v10  ;;  %v8812_v33 = vmax.f32 %v8744_v45, 0.0  ;;  %v8072_v40 = vmax.f32 %v7998_v9, 0.0  ;;  %v8747_v32 = vadd.f32 %v16692_v11, %v13917_v59  ;;  %v8001_v54 = vadd.f32 %v16692_v11, %v8000_v52  ;;  %v8738_v8 = vpop.f32.mrb[191].mxu1  ;;  %v17657_v59 = vld [vmem:[#allocation24_spill] sm:$0xff] }
 0x2f5   : > { %v8138_v61 = vadd.f32 %v8074_v34, %v16521_v24  ;;  %v8810_v25 = vmax.f32 %v8736_v2, 0.0  ;;  %v8075_v14 = vmax.f32 %v8009_v47, 0.0  ;;  %v8739_v53 = vadd.f32 %v16692_v11, %v8738_v8 }
 0x2f6   : > { %v8136_v50 = vadd.f32 %v8072_v40, %v16525_v17  ;;  %v8073_v51 = vmax.f32 %v8001_v54, 0.0  ;;  %v8813_v45 = vmax.f32 %v8747_v32, 0.0 }
 0x2f7   : > { %v16889_v10 = vadd.f32 %v8812_v33, %v8138_v61  ;;  %v8139_v13 = vadd.f32 %v8075_v14, %v17656_v3  ;;  %v8811_v52 = vmax.f32 %v8739_v53, 0.0 }
 0x2f8   : > { %v16892_v9 = vadd.f32 %v8810_v25, %v8136_v50  ;;  %v8137_v6 = vadd.f32 %v8073_v51, %v17657_v59  ;;  %v13922_v7 = vpop.f32.mrb[192].mxu0 }
 0x2f9   : > { %v16895_v31 = vadd.f32 %v8813_v45, %v8139_v13  ;;  %v9242_v24 = vadd.f32 %v16692_v11, %v13922_v7  ;;  %v13988_v34 = vpop.f32.mrb[192].mxu1  ;;  %v9233_v2 = vpop.f32.mrb[193].mxu0 }
 0x2fa   : > { %v16898_v47 = vadd.f32 %v8811_v52, %v8137_v6  ;;  %v9980_v17 = vadd.f32 %v16692_v11, %v13988_v34  ;;  %v9234_v33 = vadd.f32 %v16692_v11, %v9233_v2  ;;  %v9971_v40 = vpop.f32.mrb[193].mxu1  ;;  %v13923_v32 = vpop.f32.mrb[194].mxu0  ;;  %v14507_v34 = vld [vmem:[%s17538_s5 + $0x8] sm:$0xff]  }
 0x2fb   : > { %v9490_v54 = vmax.f32 %v9242_v24, 0.0  ;;  %v9972_v8 = vadd.f32 %v16692_v11, %v9971_v40  ;;  %v9245_v61 = vadd.f32 %v16692_v11, %v13923_v32  ;;  %v13989_v25 = vpop.f32.mrb[194].mxu1  ;;  %v9236_v13 = vpop.f32.mrb[195].mxu0  ;;  %v17659_v32 = vld [vmem:[#allocation25_spill] sm:$0xff]  ;;  %14132 = vmatprep.subr.bf16.mxu1 %v14507_v34 }
 0x2fc   : > { %17658 = vst [vmem:[#allocation21_spill] sm:$0xff] %v16898_v47  ;;  %v10228_v14 = vmax.f32 %v9980_v17, 0.0  ;;  %v9488_v53 = vmax.f32 %v9234_v33, 0.0  ;;  %v9983_v7 = vadd.f32 %v16692_v11, %v13989_v25  ;;  %v9237_v6 = vadd.f32 %v16692_v11, %v9236_v13  ;;  %v9974_v50 = vpop.f32.mrb[195].mxu1  ;;  %14133 = vmatpush3.bf16.msra.mxu1 %v14507_v34  ;;  %v14508_v34 = vld [vmem:[%s17538_s5 + $0x10] sm:$0xff]  }
 0x2fd   : > { %v9554_v51 = vadd.f32 %v9490_v54, %v16549_v46  ;;  %v10226_v3 = vmax.f32 %v9972_v8, 0.0  ;;  %v9491_v45 = vmax.f32 %v9245_v61, 0.0  ;;  %v9975_v59 = vadd.f32 %v16692_v11, %v9974_v50  ;;  %14134 = vmatprep.subr.bf16.mxu1 %v14508_v34 }
 0x2fe   : > { %v9552_v52 = vadd.f32 %v9488_v53, %v16553_v36  ;;  %v9489_v24 = vmax.f32 %v9237_v6, 0.0  ;;  %v10229_v33 = vmax.f32 %v9983_v7, 0.0 }
 0x2ff   : > { %v10292_v2 = vadd.f32 %v10228_v14, %v9554_v51  ;;  %v9555_v17 = vadd.f32 %v9491_v45, %v16556_v4  ;;  %v10227_v13 = vmax.f32 %v9975_v59, 0.0 }
 0x300   : > { %v10290_v40 = vadd.f32 %v10226_v3, %v9552_v52  ;;  %v9553_v25 = vadd.f32 %v9489_v24, %v17659_v32  ;;  %v13926_v46 = vpop.f32.mrb[196].mxu0  ;;  %14135 = vmatpush3.bf16.msra.mxu1 %v14508_v34 }
 0x301   : > { %v10356_v54 = vmul.f32 0.125, %v10292_v2  ;;  %v10293_v8 = vadd.f32 %v10229_v33, %v9555_v17  ;;  %v9258_v61 = vadd.f32 %v16692_v11, %v13926_v46  ;;  %v13992_v36 = vpop.f32.mrb[196].mxu1  ;;  %v9249_v53 = vpop.f32.mrb[197].mxu0  ;;  %v14509_v17 = vld [vmem:[%s17538_s5 + $0x18] sm:$0xff]  }
 0x302   : > { %v10354_v6 = vmul.f32 0.125, %v10290_v40  ;;  %v10291_v50 = vadd.f32 %v10227_v13, %v9553_v25  ;;  %v9996_v14 = vadd.f32 %v16692_v11, %v13992_v36  ;;  %v9250_v4 = vadd.f32 %v16692_v11, %v9249_v53  ;;  %v9987_v7 = vpop.f32.mrb[197].mxu1  ;;  %v13927_v51 = vpop.f32.mrb[198].mxu0  ;;  %14136 = vmatprep.subr.bf16.mxu1 %v14509_v17 }
 0x303   : > { %v10357_v3 = vmul.f32 0.125, %v10293_v8  ;;  %v9494_v45 = vmax.f32 %v9258_v61, 0.0  ;;  %v9988_v59 = vadd.f32 %v16692_v11, %v9987_v7  ;;  %v9261_v52 = vadd.f32 %v16692_v11, %v13927_v51  ;;  %v13993_v24 = vpop.f32.mrb[198].mxu1  ;;  %v9252_v2 = vpop.f32.mrb[199].mxu0 }
 0x304   : > { %v10355_v33 = vmul.f32 0.125, %v10291_v50  ;;  %v10232_v40 = vmax.f32 %v9996_v14, 0.0  ;;  %v9492_v32 = vmax.f32 %v9250_v4, 0.0  ;;  %v9999_v25 = vadd.f32 %v16692_v11, %v13993_v24  ;;  %v9990_v13 = vpop.f32.mrb[199].mxu1  ;;  %14137 = vmatpush3.bf16.msra.mxu1 %v14509_v17 }
 0x305   : > { %v10419_v46 = vpack.c.bf16 %v10357_v3, %v10356_v54  ;;  %v9558_v8 = vadd.f32 %v9494_v45, %v16580_v63  ;;  %v10230_v61 = vmax.f32 %v9988_v59, 0.0  ;;  %v9495_v36 = vmax.f32 %v9261_v52, 0.0  ;;  %v14510_v63 = vld [vmem:[%s17538_s5 + $0x20] sm:$0xff]  }
 0x306   : > { %v9556_v53 = vadd.f32 %v9492_v32, %v16584_v42  ;;  %v9253_v7 = vadd.f32 %v16692_v11, %v9252_v2  ;;  %v9991_v51 = vadd.f32 %v16692_v11, %v9990_v13  ;;  %v10233_v14 = vmax.f32 %v9999_v25, 0.0  ;;  %14138 = vmatprep.subr.bf16.mxu1 %v14510_v63 }
 0x307   : > { %v10296_v47 = vadd.f32 %v10232_v40, %v9558_v8  ;;  %v9559_v50 = vadd.f32 %v9495_v36, %v16587_v12  ;;  %v10418_v4 = vpack.c.bf16 %v10355_v33, %v10354_v6 }
 0x308   : > { %v10294_v54 = vadd.f32 %v10230_v61, %v9556_v53  ;;  %v9493_v3 = vmax.f32 %v9253_v7, 0.0  ;;  %v13930_v45 = vpop.f32.mrb[200].mxu0  ;;  %v10231_v42 = vmax.f32 %v9991_v51, 0.0  ;;  %14139 = vmatpush3.bf16.msra.mxu1 %v14510_v63 }
 0x309   : > { %v10297_v59 = vadd.f32 %v10233_v14, %v9559_v50  ;;  %v9274_v52 = vadd.f32 %v16692_v11, %v13930_v45  ;;  %v13996_v24 = vpop.f32.mrb[200].mxu1  ;;  %14066 = vmatprep.mubr.bf16.mxu0 %v10418_v4  ;;  %v9265_v2 = vpop.f32.mrb[201].mxu0  ;;  %v10360_v34 = vmul.f32 0.125, %v10296_v47 }
 0x30a   : > { %v9557_v12 = vadd.f32 %v9493_v3, %v16591_v37  ;;  %v10012_v6 = vadd.f32 %v16692_v11, %v13996_v24  ;;  %v9266_v33 = vadd.f32 %v16692_v11, %v9265_v2  ;;  %v10003_v40 = vpop.f32.mrb[201].mxu1  ;;  %14067 = vmatmul.mubr.bf16.vlgmr.msra.gmra.mrb[0].mxu0 %v10419_v46  ;;  %v13931_v32 = vpop.f32.mrb[202].mxu0  ;;  %v14511_v37 = vld [vmem:[%s17538_s5 + $0x28] sm:$0xff]   ;;  %v10358_v45 = vmul.f32 0.125, %v10294_v54 }
 0x30b   : > { %v10361_v25 = vmul.f32 0.125, %v10297_v59  ;;  %v9498_v13 = vmax.f32 %v9274_v52, 0.0  ;;  %v10004_v8 = vadd.f32 %v16692_v11, %v10003_v40  ;;  %v9277_v61 = vadd.f32 %v16692_v11, %v13931_v32  ;;  %v13997_v36 = vpop.f32.mrb[202].mxu1  ;;  %v9268_v53 = vpop.f32.mrb[203].mxu0  ;;  %14140 = vmatprep.subr.bf16.mxu1 %v14511_v37 }
 0x30c   : > { %v10295_v47 = vadd.f32 %v10231_v42, %v9557_v12  ;;  %v10236_v7 = vmax.f32 %v10012_v6, 0.0  ;;  %v9496_v51 = vmax.f32 %v9266_v33, 0.0  ;;  %v10015_v46 = vadd.f32 %v16692_v11, %v13997_v36  ;;  %v10006_v50 = vpop.f32.mrb[203].mxu1  ;;  %14141 = vmatpush3.bf16.msra.mxu1 %v14511_v37 }
 0x30d   : > { %v10421_v17 = vpack.c.bf16 %v10361_v25, %v10360_v34  ;;  %v9562_v14 = vadd.f32 %v9498_v13, %v16608_v20  ;;  %v10234_v4 = vmax.f32 %v10004_v8, 0.0  ;;  %v9499_v3 = vmax.f32 %v9277_v61, 0.0  ;;  %v14512_v20 = vld [vmem:[%s17538_s5 + $0x30] sm:$0xff]  }
 0x30e   : > { %v10359_v59 = vmul.f32 0.125, %v10295_v47  ;;  %v9560_v52 = vadd.f32 %v9496_v51, %v16612_v27  ;;  %v9269_v24 = vadd.f32 %v16692_v11, %v9268_v53  ;;  %v10237_v12 = vmax.f32 %v10015_v46, 0.0  ;;  %14142 = vmatprep.subr.bf16.mxu1 %v14512_v20 }
 0x30f   : > { %v10300_v2 = vadd.f32 %v10236_v7, %v9562_v14  ;;  %v9563_v42 = vadd.f32 %v9499_v3, %v16615_v21  ;;  %v10007_v6 = vadd.f32 %v16692_v11, %v10006_v50 }
 0x310   : > { %v10298_v34 = vadd.f32 %v10234_v4, %v9560_v52  ;;  %v9497_v33 = vmax.f32 %v9269_v24, 0.0  ;;  %v13934_v54 = vpop.f32.mrb[204].mxu0  ;;  %v10420_v40 = vpack.c.bf16 %v10359_v59, %v10358_v45  ;;  %14143 = vmatpush3.bf16.msra.mxu1 %v14512_v20 }
 0x311   : > { %v10364_v32 = vmul.f32 0.125, %v10300_v2  ;;  %v10301_v27 = vadd.f32 %v10237_v12, %v9563_v42  ;;  %v9290_v25 = vadd.f32 %v16692_v11, %v13934_v54  ;;  %v14000_v63 = vpop.f32.mrb[204].mxu1  ;;  %v9281_v13 = vpop.f32.mrb[205].mxu0  ;;  %v10235_v8 = vmax.f32 %v10007_v6, 0.0 }
 0x312   : > { %v9561_v21 = vadd.f32 %v9497_v33, %v16619_v1  ;;  %v10028_v61 = vadd.f32 %v16692_v11, %v14000_v63  ;;  %14070 = vmatprep.mubr.bf16.mxu0 %v10420_v40  ;;  %v9282_v36 = vadd.f32 %v16692_v11, %v9281_v13  ;;  %v10019_v53 = vpop.f32.mrb[205].mxu1  ;;  %v13935_v47 = vpop.f32.mrb[206].mxu0  ;;  %v14513_v1 = vld [vmem:[%s17538_s5 + $0x38] sm:$0xff]   ;;  %v10362_v12 = vmul.f32 0.125, %v10298_v34 }
 0x313   : > { %v10365_v7 = vmul.f32 0.125, %v10301_v27  ;;  %v9502_v51 = vmax.f32 %v9290_v25, 0.0  ;;  %v10020_v46 = vadd.f32 %v16692_v11, %v10019_v53  ;;  %14071 = vmatmul.mubr.bf16.gmra.mrb[4].mxu0 %v10421_v17  ;;  %v9293_v50 = vadd.f32 %v16692_v11, %v13935_v47  ;;  %v14001_v14 = vpop.f32.mrb[206].mxu1  ;;  %v9284_v4 = vpop.f32.mrb[207].mxu0  ;;  %14144 = vmatprep.subr.bf16.mxu1 %v14513_v1 }
 0x314   : > { %v10299_v3 = vadd.f32 %v10235_v8, %v9561_v21  ;;  %v10240_v45 = vmax.f32 %v10028_v61, 0.0  ;;  %v9500_v59 = vmax.f32 %v9282_v36, 0.0  ;;  %v10031_v52 = vadd.f32 %v16692_v11, %v14001_v14  ;;  %v10022_v37 = vpop.f32.mrb[207].mxu1  ;;  %14145 = vmatpush3.bf16.msra.mxu1 %v14513_v1 }
 0x315   : > { %v10423_v24 = vpack.c.bf16 %v10365_v7, %v10364_v32  ;;  %v9566_v2 = vadd.f32 %v9502_v51, %v16636_v62  ;;  %v10238_v42 = vmax.f32 %v10020_v46, 0.0  ;;  %v9503_v17 = vmax.f32 %v9293_v50, 0.0 }
 0x316   : > { %v10363_v6 = vmul.f32 0.125, %v10299_v3  ;;  %v9564_v33 = vadd.f32 %v9500_v59, %v16640_v48  ;;  %v9285_v54 = vadd.f32 %v16692_v11, %v9284_v4  ;;  %v10241_v25 = vmax.f32 %v10031_v52, 0.0 }
 0x317   : > { %v10304_v40 = vadd.f32 %v10240_v45, %v9566_v2  ;;  %v9567_v27 = vadd.f32 %v9503_v17, %v16643_v39  ;;  %v10023_v63 = vadd.f32 %v16692_v11, %v10022_v37  ;;  %v16976_v37 = vld [vmem:[%s17535_s2] ss:$0 sm:$0xff] }
 0x318   : > { %v10302_v13 = vadd.f32 %v10238_v42, %v9564_v33  ;;  %v9501_v32 = vmax.f32 %v9285_v54, 0.0  ;;  %v13938_v21 = vpop.f32.mrb[208].mxu0  ;;  %v10422_v62 = vpack.c.bf16 %v10363_v6, %v10362_v12 }
 0x319   : > { %v10368_v8 = vmul.f32 0.125, %v10304_v40  ;;  %v10305_v61 = vadd.f32 %v10241_v25, %v9567_v27  ;;  %v9306_v34 = vadd.f32 %v16692_v11, %v13938_v21  ;;  %v14004_v36 = vpop.f32.mrb[208].mxu1  ;;  %v9297_v48 = vpop.f32.mrb[209].mxu0  ;;  %v10239_v20 = vmax.f32 %v10023_v63, 0.0 }
 0x31a   : > { %v9565_v53 = vadd.f32 %v9501_v32, %v16647_v44  ;;  %v10044_v47 = vadd.f32 %v16692_v11, %v14004_v36  ;;  %14074 = vmatprep.mubr.bf16.mxu0 %v10422_v62  ;;  %v9298_v39 = vadd.f32 %v16692_v11, %v9297_v48  ;;  %v10035_v7 = vpop.f32.mrb[209].mxu1  ;;  %v13939_v51 = vpop.f32.mrb[210].mxu0  ;;  %v10366_v6 = vmul.f32 0.125, %v10302_v13 }
 0x31b   : > { %v10369_v46 = vmul.f32 0.125, %v10305_v61  ;;  %v9506_v50 = vmax.f32 %v9306_v34, 0.0  ;;  %v10036_v14 = vadd.f32 %v16692_v11, %v10035_v7  ;;  %14075 = vmatmul.mubr.bf16.gmra.mrb[8].mxu0 %v10423_v24  ;;  %v9309_v4 = vadd.f32 %v16692_v11, %v13939_v51  ;;  %v14005_v3 = vpop.f32.mrb[210].mxu1  ;;  %v9300_v45 = vpop.f32.mrb[211].mxu0 }
 0x31c   : > { %v10303_v59 = vadd.f32 %v10239_v20, %v9565_v53  ;;  %v10244_v44 = vmax.f32 %v10044_v47, 0.0  ;;  %v9504_v52 = vmax.f32 %v9298_v39, 0.0  ;;  %v10047_v2 = vadd.f32 %v16976_v37, %v14005_v3  ;;  %v10038_v1 = vpop.f32.mrb[211].mxu1 }
 0x31d   : > { %v10425_v42 = vpack.c.bf16 %v10369_v46, %v10368_v8  ;;  %v9570_v17 = vadd.f32 %v9506_v50, %v16661_v26  ;;  %v10242_v12 = vmax.f32 %v10036_v14, 0.0  ;;  %v9507_v24 = vmax.f32 %v9309_v4, 0.0 }
 0x31e   : > { %v10367_v11 = vmul.f32 0.125, %v10303_v59  ;;  %v9568_v33 = vadd.f32 %v9504_v52, %v16664_v60  ;;  %v9301_v54 = vadd.f32 %v16976_v37, %v9300_v45  ;;  %v10245_v25 = vmax.f32 %v10047_v2, 0.0 }
 0x31f   : > { %v10308_v40 = vadd.f32 %v10244_v44, %v9570_v17  ;;  %v9571_v27 = vadd.f32 %v9507_v24, %v16667_v16  ;;  %v10039_v63 = vadd.f32 %v16976_v37, %v10038_v1 }
 0x320   : > { %v10306_v32 = vadd.f32 %v10242_v12, %v9568_v33  ;;  %v9505_v21 = vmax.f32 %v9301_v54, 0.0  ;;  %v13942_v62 = vpop.f32.mrb[212].mxu0  ;;  %v10424_v8 = vpack.c.bf16 %v10367_v11, %v10366_v6 }
 0x321   : > { %v10372_v61 = vmul.f32 0.125, %v10308_v40  ;;  %v10309_v26 = vadd.f32 %v10245_v25, %v9571_v27  ;;  %v9322_v34 = vadd.f32 %v16976_v37, %v13942_v62  ;;  %v14008_v13 = vpop.f32.mrb[212].mxu1  ;;  %v9313_v36 = vpop.f32.mrb[213].mxu0  ;;  %v10243_v48 = vmax.f32 %v10039_v63, 0.0 }
 0x322   : > { %v9569_v60 = vadd.f32 %v9505_v21, %v16670_v19  ;;  %v10060_v53 = vadd.f32 %v16976_v37, %v14008_v13  ;;  %14078 = vmatprep.mubr.bf16.mxu0 %v10424_v8  ;;  %v9314_v16 = vadd.f32 %v16976_v37, %v9313_v36  ;;  %v10051_v20 = vpop.f32.mrb[213].mxu1  ;;  %v13943_v47 = vpop.f32.mrb[214].mxu0  ;;  %v10370_v17 = vmul.f32 0.125, %v10306_v32 }
 0x323   : > { %v10373_v39 = vmul.f32 0.125, %v10309_v26  ;;  %v9510_v7 = vmax.f32 %v9322_v34, 0.0  ;;  %v10052_v51 = vadd.f32 %v16976_v37, %v10051_v20  ;;  %14079 = vmatmul.mubr.bf16.gmra.mrb[12].mxu0 %v10425_v42  ;;  %v9325_v46 = vadd.f32 %v16976_v37, %v13943_v47  ;;  %v14009_v50 = vpop.f32.mrb[214].mxu1  ;;  %v9316_v14 = vpop.f32.mrb[215].mxu0 }
 0x324   : > { %v10307_v4 = vadd.f32 %v10243_v48, %v9569_v60  ;;  %v10248_v3 = vmax.f32 %v10060_v53, 0.0  ;;  %v9508_v19 = vmax.f32 %v9314_v16, 0.0  ;;  %v10063_v45 = vadd.f32 %v16976_v37, %v14009_v50  ;;  %v10054_v59 = vpop.f32.mrb[215].mxu1 }
 0x325   : > { %v10427_v44 = vpack.c.bf16 %v10373_v39, %v10372_v61  ;;  %v9574_v52 = vadd.f32 %v9510_v7, %v16681_v55  ;;  %v10246_v2 = vmax.f32 %v10052_v51, 0.0  ;;  %v9511_v1 = vmax.f32 %v9325_v46, 0.0 }
 0x326   : > { %v10371_v12 = vmul.f32 0.125, %v10307_v4  ;;  %v9572_v24 = vadd.f32 %v9508_v19, %v16684_v49  ;;  %v9317_v42 = vadd.f32 %v16976_v37, %v9316_v14  ;;  %v10249_v33 = vmax.f32 %v10063_v45, 0.0 }
 0x327   : > { %v10312_v6 = vadd.f32 %v10248_v3, %v9574_v52  ;;  %v9575_v11 = vadd.f32 %v9511_v1, %v16687_v28  ;;  %v10055_v54 = vadd.f32 %v16976_v37, %v10054_v59 }
 0x328   : > { %v10310_v40 = vadd.f32 %v10246_v2, %v9572_v24  ;;  %v9509_v27 = vmax.f32 %v9317_v42, 0.0  ;;  %v13946_v25 = vpop.f32.mrb[216].mxu0  ;;  %v10426_v63 = vpack.c.bf16 %v10371_v12, %v10370_v17 }
 0x329   : > { %v10376_v21 = vmul.f32 0.125, %v10312_v6  ;;  %v10313_v55 = vadd.f32 %v10249_v33, %v9575_v11  ;;  %v9338_v62 = vadd.f32 %v16976_v37, %v13946_v25  ;;  %v14012_v32 = vpop.f32.mrb[216].mxu1  ;;  %v9329_v8 = vpop.f32.mrb[217].mxu0  ;;  %v10247_v61 = vmax.f32 %v10055_v54, 0.0 }
 0x32a   : > { %v9573_v49 = vadd.f32 %v9509_v27, %v16695_v38  ;;  %v10076_v26 = vadd.f32 %v16976_v37, %v14012_v32  ;;  %14082 = vmatprep.mubr.bf16.mxu0 %v10426_v63  ;;  %v9330_v28 = vadd.f32 %v16976_v37, %v9329_v8  ;;  %v10067_v34 = vpop.f32.mrb[217].mxu1  ;;  %v13947_v13 = vpop.f32.mrb[218].mxu0  ;;  %v10374_v3 = vmul.f32 0.125, %v10310_v40 }
 0x32b   : > { %v10377_v36 = vmul.f32 0.125, %v10313_v55  ;;  %v9514_v60 = vmax.f32 %v9338_v62, 0.0  ;;  %v10068_v48 = vadd.f32 %v16976_v37, %v10067_v34  ;;  %14083 = vmatmul.mubr.bf16.gmra.mrb[16].mxu0 %v10427_v44  ;;  %v9341_v53 = vadd.f32 %v16976_v37, %v13947_v13  ;;  %v14013_v16 = vpop.f32.mrb[218].mxu1  ;;  %v9332_v20 = vpop.f32.mrb[219].mxu0 }
 0x32c   : > { %v10311_v47 = vadd.f32 %v10247_v61, %v9573_v49  ;;  %v10252_v39 = vmax.f32 %v10076_v26, 0.0  ;;  %v9512_v38 = vmax.f32 %v9330_v28, 0.0  ;;  %v10079_v7 = vadd.f32 %v16976_v37, %v14013_v16  ;;  %v10070_v51 = vpop.f32.mrb[219].mxu1 }
 0x32d   : > { %v10429_v46 = vpack.c.bf16 %v10377_v36, %v10376_v21  ;;  %v9578_v50 = vadd.f32 %v9514_v60, %v16706_v56  ;;  %v10250_v14 = vmax.f32 %v10068_v48, 0.0  ;;  %v9515_v4 = vmax.f32 %v9341_v53, 0.0 }
 0x32e   : > { %v10375_v19 = vmul.f32 0.125, %v10311_v47  ;;  %v9576_v45 = vadd.f32 %v9512_v38, %v16709_v41  ;;  %v9333_v59 = vadd.f32 %v16976_v37, %v9332_v20  ;;  %v10253_v2 = vmax.f32 %v10079_v7, 0.0 }
 0x32f   : > { %v10316_v44 = vadd.f32 %v10252_v39, %v9578_v50  ;;  %v9579_v52 = vadd.f32 %v9515_v4, %v16712_v30  ;;  %v10071_v1 = vadd.f32 %v16976_v37, %v10070_v51 }
 0x330   : > { %v10314_v17 = vadd.f32 %v10250_v14, %v9576_v45  ;;  %v9513_v12 = vmax.f32 %v9333_v59, 0.0  ;;  %v13950_v24 = vpop.f32.mrb[220].mxu0  ;;  %v10428_v42 = vpack.c.bf16 %v10375_v19, %v10374_v3 }
 0x331   : > { %v10380_v6 = vmul.f32 0.125, %v10316_v44  ;;  %v10317_v56 = vadd.f32 %v10253_v2, %v9579_v52  ;;  %v9354_v11 = vadd.f32 %v16976_v37, %v13950_v24  ;;  %v14016_v33 = vpop.f32.mrb[220].mxu1  ;;  %v9345_v54 = vpop.f32.mrb[221].mxu0  ;;  %v10251_v40 = vmax.f32 %v10071_v1, 0.0 }
 0x332   : > { %v9577_v41 = vadd.f32 %v9513_v12, %v16715_v22  ;;  %v10092_v27 = vadd.f32 %v16976_v37, %v14016_v33  ;;  %14086 = vmatprep.mubr.bf16.mxu0 %v10428_v42  ;;  %v9346_v30 = vadd.f32 %v16976_v37, %v9345_v54  ;;  %v10083_v25 = vpop.f32.mrb[221].mxu1  ;;  %v13951_v63 = vpop.f32.mrb[222].mxu0  ;;  %v10378_v53 = vmul.f32 0.125, %v10314_v17 }
 0x333   : > { %v10381_v21 = vmul.f32 0.125, %v10317_v56  ;;  %v9518_v55 = vmax.f32 %v9354_v11, 0.0  ;;  %v10084_v62 = vadd.f32 %v16976_v37, %v10083_v25  ;;  %14087 = vmatmul.mubr.bf16.gmra.mrb[20].mxu0 %v10429_v46  ;;  %v9357_v32 = vadd.f32 %v16976_v37, %v13951_v63  ;;  %v14017_v8 = vpop.f32.mrb[222].mxu1  ;;  %v9348_v49 = vpop.f32.mrb[223].mxu0 }
 0x334   : > { %v10315_v61 = vadd.f32 %v10251_v40, %v9577_v41  ;;  %v10256_v26 = vmax.f32 %v10092_v27, 0.0  ;;  %v9516_v22 = vmax.f32 %v9346_v30, 0.0  ;;  %v10095_v28 = vadd.f32 %v16976_v37, %v14017_v8  ;;  %v10086_v34 = vpop.f32.mrb[223].mxu1 }
 0x335   : > { %v10431_v13 = vpack.c.bf16 %v10381_v21, %v10380_v6  ;;  %v9582_v36 = vadd.f32 %v9518_v55, %v16726_v57  ;;  %v10254_v60 = vmax.f32 %v10084_v62, 0.0  ;;  %v9519_v48 = vmax.f32 %v9357_v32, 0.0 }
 0x336   : > { %v10379_v16 = vmul.f32 0.125, %v10315_v61  ;;  %v9580_v20 = vadd.f32 %v9516_v22, %v16729_v18  ;;  %v9349_v47 = vadd.f32 %v16976_v37, %v9348_v49  ;;  %v10257_v7 = vmax.f32 %v10095_v28, 0.0 }
 0x337   : > { %v10320_v39 = vadd.f32 %v10256_v26, %v9582_v36  ;;  %v9583_v38 = vadd.f32 %v9519_v48, %v16732_v35  ;;  %v10087_v51 = vadd.f32 %v16976_v37, %v10086_v34 }
 0x338   : > { %v10318_v46 = vadd.f32 %v10254_v60, %v9580_v20  ;;  %v9517_v50 = vmax.f32 %v9349_v47, 0.0  ;;  %v13954_v14 = vpop.f32.mrb[224].mxu0  ;;  %v10430_v4 = vpack.c.bf16 %v10379_v16, %v10378_v53 }
 0x339   : > { %v10384_v3 = vmul.f32 0.125, %v10320_v39  ;;  %v10321_v57 = vadd.f32 %v10257_v7, %v9583_v38  ;;  %v9370_v19 = vadd.f32 %v16976_v37, %v13954_v14  ;;  %v14020_v45 = vpop.f32.mrb[224].mxu1  ;;  %v9361_v59 = vpop.f32.mrb[225].mxu0  ;;  %v10255_v44 = vmax.f32 %v10087_v51, 0.0 }
 0x33a   : > { %v9581_v18 = vadd.f32 %v9517_v50, %v16735_v15  ;;  %v10108_v52 = vadd.f32 %v16976_v37, %v14020_v45  ;;  %14090 = vmatprep.mubr.bf16.mxu0 %v10430_v4  ;;  %v9362_v35 = vadd.f32 %v16976_v37, %v9361_v59  ;;  %v10099_v2 = vpop.f32.mrb[225].mxu1  ;;  %v13955_v1 = vpop.f32.mrb[226].mxu0  ;;  %v10382_v63 = vmul.f32 0.125, %v10318_v46  ;;  %v17660_v45 = vld [vmem:[#allocation26_spill] sm:$0xff] }
 0x33b   : > { %v10385_v17 = vmul.f32 0.125, %v10321_v57  ;;  %v9522_v12 = vmax.f32 %v9370_v19, 0.0  ;;  %v10100_v24 = vadd.f32 %v16976_v37, %v10099_v2  ;;  %14091 = vmatmul.mubr.bf16.gmra.mrb[24].mxu0 %v10431_v13  ;;  %v9373_v42 = vadd.f32 %v16976_v37, %v13955_v1  ;;  %v14021_v6 = vpop.f32.mrb[226].mxu1  ;;  %v9364_v56 = vpop.f32.mrb[227].mxu0  ;;  %v17661_v2 = vld [vmem:[#allocation27_spill] sm:$0xff] }
 0x33c   : > { %v10319_v11 = vadd.f32 %v10255_v44, %v9581_v18  ;;  %v10260_v33 = vmax.f32 %v10108_v52, 0.0  ;;  %v9520_v15 = vmax.f32 %v9362_v35, 0.0  ;;  %v10111_v54 = vadd.f32 %v16976_v37, %v14021_v6  ;;  %v10102_v41 = vpop.f32.mrb[227].mxu1 }
 0x33d   : > { %v10433_v40 = vpack.c.bf16 %v10385_v17, %v10384_v3  ;;  %v9586_v27 = vadd.f32 %v9522_v12, %v16746_v23  ;;  %v10258_v30 = vmax.f32 %v10100_v24, 0.0  ;;  %v9523_v25 = vmax.f32 %v9373_v42, 0.0  ;;  %v17662_v24 = vld [vmem:[#allocation29_spill] sm:$0xff] }
 0x33e   : > { %v10383_v21 = vmul.f32 0.125, %v10319_v11  ;;  %v9584_v55 = vadd.f32 %v9520_v15, %v16749_v5  ;;  %v9365_v62 = vadd.f32 %v16976_v37, %v9364_v56  ;;  %v10261_v49 = vmax.f32 %v10111_v54, 0.0 }
 0x33f   : > { %v10324_v32 = vadd.f32 %v10260_v33, %v9586_v27  ;;  %v9587_v8 = vadd.f32 %v9523_v25, %v16752_v43  ;;  %v10103_v61 = vadd.f32 %v16976_v37, %v10102_v41 }
 0x340   : > { %v10322_v26 = vadd.f32 %v10258_v30, %v9584_v55  ;;  %v9521_v22 = vmax.f32 %v9365_v62, 0.0  ;;  %v13958_v28 = vpop.f32.mrb[228].mxu0  ;;  %v10432_v34 = vpack.c.bf16 %v10383_v21, %v10382_v63  ;;  %v17663_v63 = vld [vmem:[#allocation30_spill] sm:$0xff] }
 0x341   : > { %v10388_v13 = vmul.f32 0.125, %v10324_v32  ;;  %v10325_v23 = vadd.f32 %v10261_v49, %v9587_v8  ;;  %v9386_v36 = vadd.f32 %v16976_v37, %v13958_v28  ;;  %v14024_v60 = vpop.f32.mrb[228].mxu1  ;;  %v9377_v48 = vpop.f32.mrb[229].mxu0  ;;  %v10259_v53 = vmax.f32 %v10103_v61, 0.0 }
 0x342   : > { %v9585_v5 = vadd.f32 %v9521_v22, %v16755_v58  ;;  %v10124_v16 = vadd.f32 %v16976_v37, %v14024_v60  ;;  %14094 = vmatprep.mubr.bf16.mxu0 %v10432_v34  ;;  %v9378_v43 = vadd.f32 %v16976_v37, %v9377_v48  ;;  %v10115_v20 = vpop.f32.mrb[229].mxu1  ;;  %v13959_v47 = vpop.f32.mrb[230].mxu0  ;;  %v10386_v52 = vmul.f32 0.125, %v10322_v26 }
 0x343   : > { %v10389_v39 = vmul.f32 0.125, %v10325_v23  ;;  %v9526_v38 = vmax.f32 %v9386_v36, 0.0  ;;  %v10116_v7 = vadd.f32 %v16976_v37, %v10115_v20  ;;  %14095 = vmatmul.mubr.bf16.gmra.mrb[28].mxu0 %v10433_v40  ;;  %v9389_v51 = vadd.f32 %v16976_v37, %v13959_v47  ;;  %v14025_v46 = vpop.f32.mrb[230].mxu1  ;;  %v9380_v50 = vpop.f32.mrb[231].mxu0 }
 0x344   : > { %v10323_v14 = vadd.f32 %v10259_v53, %v9585_v5  ;;  %v10264_v4 = vmax.f32 %v10124_v16, 0.0  ;;  %v9524_v58 = vmax.f32 %v9378_v43, 0.0  ;;  %v10127_v3 = vadd.f32 %v16976_v37, %v14025_v46  ;;  %v10118_v57 = vpop.f32.mrb[231].mxu1  ;;  %v17664_v16 = vld [vmem:[#allocation4_spill] sm:$0xff] }
 0x345   : > { %v10435_v19 = vpack.c.bf16 %v10389_v39, %v10388_v13  ;;  %v9590_v59 = vadd.f32 %v9526_v38, %v17660_v45  ;;  %v10262_v18 = vmax.f32 %v10116_v7, 0.0  ;;  %v9527_v44 = vmax.f32 %v9389_v51, 0.0  ;;  %v17665_v7 = vld [vmem:[#allocation5_spill] sm:$0xff] }
 0x346   : > { %v10387_v35 = vmul.f32 0.125, %v10323_v14  ;;  %v9588_v1 = vadd.f32 %v9524_v58, %v17661_v2  ;;  %v9381_v17 = vadd.f32 %v16976_v37, %v9380_v50  ;;  %v10265_v6 = vmax.f32 %v10127_v3, 0.0  ;;  %v17666_v14 = vld [vmem:[#allocation6_spill] sm:$0xff] }
 0x347   : > { %v10328_v12 = vadd.f32 %v10264_v4, %v9590_v59  ;;  %v9591_v42 = vadd.f32 %v9527_v44, %v17662_v24  ;;  %v10119_v56 = vadd.f32 %v16976_v37, %v10118_v57 }
 0x348   : > { %v10326_v11 = vadd.f32 %v10262_v18, %v9588_v1  ;;  %v9525_v33 = vmax.f32 %v9381_v17, 0.0  ;;  %v13962_v15 = vpop.f32.mrb[232].mxu0  ;;  %v10434_v54 = vpack.c.bf16 %v10387_v35, %v10386_v52  ;;  %v17667_v1 = vld [vmem:[#allocation28_spill] sm:$0xff] }
 0x349   : > { %v10392_v41 = vmul.f32 0.125, %v10328_v12  ;;  %v10329_v40 = vadd.f32 %v10265_v6, %v9591_v42  ;;  %v9402_v27 = vadd.f32 %v16976_v37, %v13962_v15  ;;  %v14028_v30 = vpop.f32.mrb[232].mxu1  ;;  %v9393_v25 = vpop.f32.mrb[233].mxu0  ;;  %v10263_v55 = vmax.f32 %v10119_v56, 0.0 }
 0x34a   : > { %v9589_v21 = vadd.f32 %v9525_v33, %v17663_v63  ;;  %v10140_v62 = vadd.f32 %v16976_v37, %v14028_v30  ;;  %14098 = vmatprep.mubr.bf16.mxu0 %v10434_v54  ;;  %v9394_v32 = vadd.f32 %v16976_v37, %v9393_v25  ;;  %v10131_v8 = vpop.f32.mrb[233].mxu1  ;;  %v13963_v49 = vpop.f32.mrb[234].mxu0  ;;  %v10390_v39 = vmul.f32 0.125, %v10326_v11 }
 0x34b   : > { %v10393_v61 = vmul.f32 0.125, %v10329_v40  ;;  %v9530_v26 = vmax.f32 %v9402_v27, 0.0  ;;  %v10132_v22 = vadd.f32 %v16976_v37, %v10131_v8  ;;  %14099 = vmatmul.mubr.bf16.gmra.mrb[32].mxu0 %v10435_v19  ;;  %v9405_v28 = vadd.f32 %v16976_v37, %v13963_v49  ;;  %v14029_v34 = vpop.f32.mrb[234].mxu1  ;;  %v9396_v13 = vpop.f32.mrb[235].mxu0 }
 0x34c   : > { %v10327_v23 = vadd.f32 %v10263_v55, %v9589_v21  ;;  %v10268_v36 = vmax.f32 %v10140_v62, 0.0  ;;  %v9528_v60 = vmax.f32 %v9394_v32, 0.0  ;;  %v10143_v48 = vadd.f32 %v16976_v37, %v14029_v34  ;;  %v10134_v5 = vpop.f32.mrb[235].mxu1  ;;  %v17668_v62 = vld [vmem:[#allocation7_spill] sm:$0xff] }
 0x34d   : > { %v10437_v53 = vpack.c.bf16 %v10393_v61, %v10392_v41  ;;  %v9594_v43 = vadd.f32 %v9530_v26, %v17664_v16  ;;  %v10266_v20 = vmax.f32 %v10132_v22, 0.0  ;;  %v9531_v47 = vmax.f32 %v9405_v28, 0.0  ;;  %v17669_v22 = vld [vmem:[#allocation8_spill] sm:$0xff] }
 0x34e   : > { %v10391_v38 = vmul.f32 0.125, %v10327_v23  ;;  %v9592_v51 = vadd.f32 %v9528_v60, %v17665_v7  ;;  %v9397_v46 = vadd.f32 %v16976_v37, %v9396_v13  ;;  %v10269_v58 = vmax.f32 %v10143_v48, 0.0  ;;  %v17670_v23 = vld [vmem:[#allocation9_spill] sm:$0xff] }
 0x34f   : > { %v10332_v50 = vadd.f32 %v10268_v36, %v9594_v43  ;;  %v9595_v4 = vadd.f32 %v9531_v47, %v17666_v14  ;;  %v10135_v3 = vadd.f32 %v16976_v37, %v10134_v5 }
 0x350   : > { %v10330_v57 = vadd.f32 %v10266_v20, %v9592_v51  ;;  %v9529_v19 = vmax.f32 %v9397_v46, 0.0  ;;  %v13966_v45 = vpop.f32.mrb[236].mxu0  ;;  %v10436_v59 = vpack.c.bf16 %v10391_v38, %v10390_v39  ;;  %v17671_v51 = vld [vmem:[#allocation10_spill] sm:$0xff] }
 0x351   : > { %v10396_v18 = vmul.f32 0.125, %v10332_v50  ;;  %v10333_v44 = vadd.f32 %v10269_v58, %v9595_v4  ;;  %v9418_v52 = vadd.f32 %v16976_v37, %v13966_v45  ;;  %v14032_v35 = vpop.f32.mrb[236].mxu1  ;;  %v9409_v2 = vpop.f32.mrb[237].mxu0  ;;  %v10267_v12 = vmax.f32 %v10135_v3, 0.0 }
 0x352   : > { %v9593_v17 = vadd.f32 %v9529_v19, %v17667_v1  ;;  %v10156_v24 = vadd.f32 %v16976_v37, %v14032_v35  ;;  %14102 = vmatprep.mubr.bf16.mxu0 %v10436_v59  ;;  %v9410_v42 = vadd.f32 %v16976_v37, %v9409_v2  ;;  %v10147_v6 = vpop.f32.mrb[237].mxu1  ;;  %v13967_v56 = vpop.f32.mrb[238].mxu0  ;;  %v10394_v61 = vmul.f32 0.125, %v10330_v57 }
 0x353   : > { %v10397_v11 = vmul.f32 0.125, %v10333_v44  ;;  %v9534_v33 = vmax.f32 %v9418_v52, 0.0  ;;  %v10148_v15 = vadd.f32 %v16976_v37, %v10147_v6  ;;  %14103 = vmatmul.mubr.bf16.gmra.mrb[36].mxu0 %v10437_v53  ;;  %v9421_v54 = vadd.f32 %v16976_v37, %v13967_v56  ;;  %v14033_v41 = vpop.f32.mrb[238].mxu1  ;;  %v9412_v40 = vpop.f32.mrb[239].mxu0 }
 0x354   : > { %v10331_v27 = vadd.f32 %v10267_v12, %v9593_v17  ;;  %v10272_v30 = vmax.f32 %v10156_v24, 0.0  ;;  %v9532_v25 = vmax.f32 %v9410_v42, 0.0  ;;  %v10159_v63 = vadd.f32 %v16976_v37, %v14033_v41  ;;  %v10150_v21 = vpop.f32.mrb[239].mxu1  ;;  %v17672_v24 = vld [vmem:[#allocation11_spill] sm:$0xff] }
 0x355   : > { %v10439_v55 = vpack.c.bf16 %v10397_v11, %v10396_v18  ;;  %v9598_v32 = vadd.f32 %v9534_v33, %v17668_v62  ;;  %v10270_v8 = vmax.f32 %v10148_v15, 0.0  ;;  %v9535_v49 = vmax.f32 %v9421_v54, 0.0  ;;  %v17673_v15 = vld [vmem:[#allocation12_spill] sm:$0xff] }
 0x356   : > { %v10395_v26 = vmul.f32 0.125, %v10331_v27  ;;  %v9596_v28 = vadd.f32 %v9532_v25, %v17669_v22  ;;  %v9413_v34 = vadd.f32 %v16976_v37, %v9412_v40  ;;  %v10273_v60 = vmax.f32 %v10159_v63, 0.0  ;;  %v17674_v27 = vld [vmem:[#allocation13_spill] sm:$0xff] }
 0x357   : > { %v10336_v13 = vadd.f32 %v10272_v30, %v9598_v32  ;;  %v9599_v36 = vadd.f32 %v9535_v49, %v17670_v23  ;;  %v10151_v48 = vadd.f32 %v16976_v37, %v10150_v21 }
 0x358   : > { %v10334_v5 = vadd.f32 %v10270_v8, %v9596_v28  ;;  %v9533_v53 = vmax.f32 %v9413_v34, 0.0  ;;  %v13970_v16 = vpop.f32.mrb[240].mxu0  ;;  %v10438_v43 = vpack.c.bf16 %v10395_v26, %v10394_v61  ;;  %v17675_v28 = vld [vmem:[#allocation14_spill] sm:$0xff] }
 0x359   : > { %v10400_v20 = vmul.f32 0.125, %v10336_v13  ;;  %v10337_v47 = vadd.f32 %v10273_v60, %v9599_v36  ;;  %v9434_v39 = vadd.f32 %v16976_v37, %v13970_v16  ;;  %v14036_v38 = vpop.f32.mrb[240].mxu1  ;;  %v9425_v7 = vpop.f32.mrb[241].mxu0  ;;  %v10271_v50 = vmax.f32 %v10151_v48, 0.0 }
 0x35a   : > { %v9597_v46 = vadd.f32 %v9533_v53, %v17671_v51  ;;  %v10172_v14 = vadd.f32 %v16976_v37, %v14036_v38  ;;  %14106 = vmatprep.mubr.bf16.mxu0 %v10438_v43  ;;  %v9426_v4 = vadd.f32 %v16976_v37, %v9425_v7  ;;  %v10163_v58 = vpop.f32.mrb[241].mxu1  ;;  %v13971_v3 = vpop.f32.mrb[242].mxu0  ;;  %v10398_v11 = vmul.f32 0.125, %v10334_v5 }
 0x35b   : > { %v10401_v57 = vmul.f32 0.125, %v10337_v47  ;;  %v9538_v19 = vmax.f32 %v9434_v39, 0.0  ;;  %v10164_v45 = vadd.f32 %v16976_v37, %v10163_v58  ;;  %14107 = vmatmul.mubr.bf16.gmra.mrb[40].mxu0 %v10439_v55  ;;  %v9437_v59 = vadd.f32 %v16976_v37, %v13971_v3  ;;  %v14037_v18 = vpop.f32.mrb[242].mxu1  ;;  %v9428_v44 = vpop.f32.mrb[243].mxu0 }
 0x35c   : > { %v10335_v52 = vadd.f32 %v10271_v50, %v9597_v46  ;;  %v10276_v35 = vmax.f32 %v10172_v14, 0.0  ;;  %v9536_v2 = vmax.f32 %v9426_v4, 0.0  ;;  %v10175_v1 = vadd.f32 %v16976_v37, %v14037_v18  ;;  %v10166_v17 = vpop.f32.mrb[243].mxu1  ;;  %v17676_v18 = vld [vmem:[#allocation15_spill] sm:$0xff] }
 0x35d   : > { %v10441_v12 = vpack.c.bf16 %v10401_v57, %v10400_v20  ;;  %v9602_v42 = vadd.f32 %v9538_v19, %v17672_v24  ;;  %v10274_v6 = vmax.f32 %v10164_v45, 0.0  ;;  %v9539_v56 = vmax.f32 %v9437_v59, 0.0 }
 0x35e   : > { %v10399_v33 = vmul.f32 0.125, %v10335_v52  ;;  %v9600_v54 = vadd.f32 %v9536_v2, %v17673_v15  ;;  %v9429_v41 = vadd.f32 %v16976_v37, %v9428_v44  ;;  %v10277_v25 = vmax.f32 %v10175_v1, 0.0 }
 0x35f   : > { %v10340_v40 = vadd.f32 %v10276_v35, %v9602_v42  ;;  %v9603_v30 = vadd.f32 %v9539_v56, %v17674_v27  ;;  %v10167_v63 = vadd.f32 %v16976_v37, %v10166_v17 }
 0x360   : > { %v10338_v21 = vadd.f32 %v10274_v6, %v9600_v54  ;;  %v9537_v55 = vmax.f32 %v9429_v41, 0.0  ;;  %v13974_v62 = vpop.f32.mrb[244].mxu0  ;;  %v10440_v32 = vpack.c.bf16 %v10399_v33, %v10398_v11  ;;  %v17677_v11 = vld [vmem:[#allocation16_spill] sm:$0xff] }
 0x361   : > { %v10404_v8 = vmul.f32 0.125, %v10340_v40  ;;  %v10341_v49 = vadd.f32 %v10277_v25, %v9603_v30  ;;  %v9450_v61 = vadd.f32 %v16976_v37, %v13974_v62  ;;  %v14040_v26 = vpop.f32.mrb[244].mxu1  ;;  %v9441_v22 = vpop.f32.mrb[245].mxu0  ;;  %v10275_v13 = vmax.f32 %v10167_v63, 0.0 }
 0x362   : > { %v9601_v34 = vadd.f32 %v9537_v55, %v17675_v28  ;;  %v10188_v23 = vadd.f32 %v16976_v37, %v14040_v26  ;;  %14110 = vmatprep.mubr.bf16.mxu0 %v10440_v32  ;;  %v9442_v36 = vadd.f32 %v16976_v37, %v9441_v22  ;;  %v10179_v60 = vpop.f32.mrb[245].mxu1  ;;  %v13975_v48 = vpop.f32.mrb[246].mxu0  ;;  %v10402_v3 = vmul.f32 0.125, %v10338_v21  ;;  %v17678_v22 = vld [vmem:[#allocation17_spill] sm:$0xff] }
 0x363   : > { %v10405_v5 = vmul.f32 0.125, %v10341_v49  ;;  %v9542_v53 = vmax.f32 %v9450_v61, 0.0  ;;  %v10180_v16 = vadd.f32 %v16976_v37, %v10179_v60  ;;  %14111 = vmatmul.mubr.bf16.gmra.mrb[44].mxu0 %v10441_v12  ;;  %v9453_v43 = vadd.f32 %v16976_v37, %v13975_v48  ;;  %v14041_v20 = vpop.f32.mrb[246].mxu1  ;;  %v9444_v47 = vpop.f32.mrb[247].mxu0  ;;  %v17679_v60 = vld [vmem:[#allocation18_spill] sm:$0xff] }
 0x364   : > { %v10339_v39 = vadd.f32 %v10275_v13, %v9601_v34  ;;  %v10280_v38 = vmax.f32 %v10188_v23, 0.0  ;;  %v9540_v7 = vmax.f32 %v9442_v36, 0.0  ;;  %v10191_v51 = vadd.f32 %v16976_v37, %v14041_v20  ;;  %v10182_v46 = vpop.f32.mrb[247].mxu1 }
 0x365   : > { %v10443_v50 = vpack.c.bf16 %v10405_v5, %v10404_v8  ;;  %v9606_v14 = vadd.f32 %v9542_v53, %v16846_v29  ;;  %v10278_v4 = vmax.f32 %v10180_v16, 0.0  ;;  %v9543_v58 = vmax.f32 %v9453_v43, 0.0  ;;  %v17680_v16 = vld [vmem:[#allocation19_spill] sm:$0xff] }
 0x366   : > { %v10403_v57 = vmul.f32 0.125, %v10339_v39  ;;  %v9604_v19 = vadd.f32 %v9540_v7, %v16849_v0  ;;  %v9445_v45 = vadd.f32 %v16976_v37, %v9444_v47  ;;  %v10281_v52 = vmax.f32 %v10191_v51, 0.0 }
 0x367   : > { %v10344_v59 = vadd.f32 %v10280_v38, %v9606_v14  ;;  %v9607_v44 = vadd.f32 %v9543_v58, %v17676_v18  ;;  %v10183_v35 = vadd.f32 %v16976_v37, %v10182_v46 }
 0x368   : > { %v10342_v2 = vadd.f32 %v10278_v4, %v9604_v19  ;;  %v9541_v1 = vmax.f32 %v9445_v45, 0.0  ;;  %v13978_v17 = vpop.f32.mrb[248].mxu0  ;;  %v10442_v12 = vpack.c.bf16 %v10403_v57, %v10402_v3  ;;  %v17681_v3 = vld [vmem:[#allocation20_spill] sm:$0xff] }
 0x369   : > { %v10408_v24 = vmul.f32 0.125, %v10344_v59  ;;  %v10345_v29 = vadd.f32 %v10281_v52, %v9607_v44  ;;  %v9466_v42 = vadd.f32 %v16976_v37, %v13978_v17  ;;  %v14044_v6 = vpop.f32.mrb[248].mxu1  ;;  %v9457_v56 = vpop.f32.mrb[249].mxu0  ;;  %v10279_v33 = vmax.f32 %v10183_v35, 0.0 }
 0x36a   : > { %v9605_v0 = vadd.f32 %v9541_v1, %v17677_v11  ;;  %v10204_v15 = vadd.f32 %v16976_v37, %v14044_v6  ;;  %14114 = vmatprep.mubr.bf16.mxu0 %v10442_v12  ;;  %v9458_v54 = vadd.f32 %v16976_v37, %v9457_v56  ;;  %v10195_v41 = vpop.f32.mrb[249].mxu1  ;;  %v13979_v40 = vpop.f32.mrb[250].mxu0  ;;  %v10406_v23 = vmul.f32 0.125, %v10342_v2 }
 0x36b   : > { %v10409_v27 = vmul.f32 0.125, %v10345_v29  ;;  %v9546_v30 = vmax.f32 %v9466_v42, 0.0  ;;  %v10196_v25 = vadd.f32 %v16976_v37, %v10195_v41  ;;  %14115 = vmatmul.mubr.bf16.gmra.mrb[48].mxu0 %v10443_v50  ;;  %v9469_v63 = vadd.f32 %v16976_v37, %v13979_v40  ;;  %v14045_v21 = vpop.f32.mrb[250].mxu1  ;;  %v9460_v55 = vpop.f32.mrb[251].mxu0 }
 0x36c   : > { %v10343_v62 = vadd.f32 %v10279_v33, %v9605_v0  ;;  %v10284_v32 = vmax.f32 %v10204_v15, 0.0  ;;  %v9544_v8 = vmax.f32 %v9458_v54, 0.0  ;;  %v10207_v49 = vadd.f32 %v16976_v37, %v14045_v21  ;;  %v10198_v61 = vpop.f32.mrb[251].mxu1 }
 0x36d   : > { %v10445_v26 = vpack.c.bf16 %v10409_v27, %v10408_v24  ;;  %v9610_v28 = vadd.f32 %v9546_v30, %v17678_v22  ;;  %v10282_v34 = vmax.f32 %v10196_v25, 0.0  ;;  %v9547_v13 = vmax.f32 %v9469_v63, 0.0 }
 0x36e   : > { %v10407_v36 = vmul.f32 0.125, %v10343_v62  ;;  %v9608_v48 = vadd.f32 %v9544_v8, %v17679_v60  ;;  %v9461_v5 = vadd.f32 %v16976_v37, %v9460_v55  ;;  %v10285_v20 = vmax.f32 %v10207_v49, 0.0  ;;  %v17682_v49 = vld [vmem:[#allocation21_spill] sm:$0xff] }
 0x36f   : > { %v10348_v53 = vadd.f32 %v10284_v32, %v9610_v28  ;;  %v9611_v43 = vadd.f32 %v9547_v13, %v17680_v16  ;;  %v10199_v47 = vadd.f32 %v16976_v37, %v10198_v61 }
 0x370   : > { %v10346_v39 = vadd.f32 %v10282_v34, %v9608_v48  ;;  %v9545_v38 = vmax.f32 %v9461_v5, 0.0  ;;  %v13982_v7 = vpop.f32.mrb[252].mxu0  ;;  %v10444_v51 = vpack.c.bf16 %v10407_v36, %v10406_v23 }
 0x371   : > { %v10412_v46 = vmul.f32 0.125, %v10348_v53  ;;  %v10349_v50 = vadd.f32 %v10285_v20, %v9611_v43  ;;  %v9482_v14 = vadd.f32 %v16976_v37, %v13982_v7  ;;  %v14048_v4 = vpop.f32.mrb[252].mxu1  ;;  %v9473_v58 = vpop.f32.mrb[253].mxu0  ;;  %v10283_v19 = vmax.f32 %v10199_v47, 0.0 }
 0x372   : > { %v9609_v57 = vadd.f32 %v9545_v38, %v17681_v3  ;;  %v10220_v45 = vadd.f32 %v16976_v37, %v14048_v4  ;;  %14118 = vmatprep.mubr.bf16.mxu0 %v10444_v51  ;;  %v9474_v59 = vadd.f32 %v16976_v37, %v9473_v58  ;;  %v10211_v18 = vpop.f32.mrb[253].mxu1  ;;  %v13983_v44 = vpop.f32.mrb[254].mxu0  ;;  %v10410_v54 = vmul.f32 0.125, %v10346_v39 }
 0x373   : > { %v10413_v52 = vmul.f32 0.125, %v10349_v50  ;;  %v9550_v35 = vmax.f32 %v9482_v14, 0.0  ;;  %v10212_v2 = vadd.f32 %v16976_v37, %v10211_v18  ;;  %14119 = vmatmul.mubr.bf16.gmra.mrb[52].mxu0 %v10445_v26  ;;  %v9485_v1 = vadd.f32 %v16976_v37, %v13983_v44  ;;  %v14049_v17 = vpop.f32.mrb[254].mxu1  ;;  %v9476_v12 = vpop.f32.mrb[255].mxu0 }
 0x374   : > { %v10347_v24 = vadd.f32 %v10283_v19, %v9609_v57  ;;  %v10288_v29 = vmax.f32 %v10220_v45, 0.0  ;;  %v9548_v42 = vmax.f32 %v9474_v59, 0.0  ;;  %v10223_v6 = vadd.f32 %v16976_v37, %v14049_v17  ;;  %v10214_v56 = vpop.f32.mrb[255].mxu1 }
 0x375   : > { %v10447_v11 = vpack.c.bf16 %v10413_v52, %v10412_v46  ;;  %v9614_v0 = vadd.f32 %v9550_v35, %v16889_v10  ;;  %v10286_v33 = vmax.f32 %v10212_v2, 0.0  ;;  %v9551_v15 = vmax.f32 %v9485_v1, 0.0 }
 0x376   : > { %v10411_v41 = vmul.f32 0.125, %v10347_v24  ;;  %v9612_v40 = vadd.f32 %v9548_v42, %v16892_v9  ;;  %v9477_v27 = vadd.f32 %v16976_v37, %v9476_v12  ;;  %v10289_v63 = vmax.f32 %v10223_v6, 0.0 }
 0x377   : > { %v10352_v30 = vadd.f32 %v10288_v29, %v9614_v0  ;;  %v9615_v25 = vadd.f32 %v9551_v15, %v16895_v31  ;;  %v10215_v21 = vadd.f32 %v16976_v37, %v10214_v56  ;;  %v17120_v31 = vld [vmem:[%s17537_s4] ss:$0 sm:$0xff] }
 0x378   : > { %v10350_v55 = vadd.f32 %v10286_v33, %v9612_v40  ;;  %v9549_v62 = vmax.f32 %v9477_v27, 0.0  ;;  %v10446_v32 = vpack.c.bf16 %v10411_v41, %v10410_v54 }
 0x379   : > { %v10353_v8 = vadd.f32 %v10289_v63, %v9615_v25  ;;  %v10287_v61 = vmax.f32 %v10215_v21, 0.0  ;;  %v10416_v26 = vmul.f32 0.125, %v10352_v30 }
 0x37a   : > { %v9613_v10 = vadd.f32 %v9549_v62, %v17682_v49  ;;  %14122 = vmatprep.mubr.bf16.mxu0 %v10446_v32  ;;  %v10414_v34 = vmul.f32 0.125, %v10350_v55 }
 0x37b   : > { %v10417_v22 = vmul.f32 0.125, %v10353_v8  ;;  %14123 = vmatmul.mubr.bf16.gmra.mrb[56].mxu0 %v10447_v11 }
 0x37c   : > { %v10351_v9 = vadd.f32 %v10287_v61, %v9613_v10 }
 0x37d   : > { %v10449_v28 = vpack.c.bf16 %v10417_v22, %v10416_v26 }
 0x37e   : > { %v10415_v13 = vmul.f32 0.125, %v10351_v9 }
 0x380   : > { %v10448_v23 = vpack.c.bf16 %v10415_v13, %v10414_v34 }
 0x382   : > { %14126 = vmatprep.mubr.bf16.mxu0 %v10448_v23 }
 0x383   : > { %14127 = vmatmul.mubr.bf16.gmra.mrb[60].mxu0 %v10449_v28 }
 0x3dd   : > { %v14068_v37 = vpop.f32.mrb[0].mxu0 }
 0x3de   : > { %v10564_v36 = vadd.f32 %v14068_v37, %v17120_v31  ;;  %v10555_v60 = vpop.f32.mrb[1].mxu0 }
 0x3df   : > { %v10556_v48 = vadd.f32 %v17120_v31, %v10555_v60  ;;  %v14069_v5 = vpop.f32.mrb[2].mxu0 }
 0x3e0   : > { %v10567_v53 = vadd.f32 %v14069_v5, %v17120_v31  ;;  %v10558_v16 = vpop.f32.mrb[3].mxu0  ;;  %v10812_v20 = vmax.f32 %v10564_v36, 0.0 }
 0x3e1   : > { %v10559_v43 = vadd.f32 %v17120_v31, %v10558_v16  ;;  %v10810_v39 = vmax.f32 %v10556_v48, 0.0 }
 0x3e2   : > { %v10813_v47 = vmax.f32 %v10567_v53, 0.0 }
 0x3e3   : > { %v10811_v38 = vmax.f32 %v10559_v43, 0.0 }
 0x3e4   : > { %v10875_v7 = vpack.c.bf16 %v10813_v47, %v10812_v20 }
 0x3e5   : > { %v10874_v51 = vpack.c.bf16 %v10811_v38, %v10810_v39 }
 0x3e6   : > { %v14072_v46 = vpop.f32.mrb[4].mxu0 }
 0x3e7   : > { %v10580_v50 = vadd.f32 %v14072_v46, %v17120_v31  ;;  %v10571_v14 = vpop.f32.mrb[5].mxu0  ;;  %14146 = vmatprep.mubr.bf16.mxu1 %v10874_v51 }
 0x3e8   : > { %v10572_v4 = vadd.f32 %v17120_v31, %v10571_v14  ;;  %v14073_v58 = vpop.f32.mrb[6].mxu0  ;;  %14147 = vmatmul.mubr.bf16.vlgmr.msra.gmra.mrb[0].mxu1 %v10875_v7 }
 0x3e9   : > { %v10583_v3 = vadd.f32 %v14073_v58, %v17120_v31  ;;  %v10574_v57 = vpop.f32.mrb[7].mxu0  ;;  %v10816_v45 = vmax.f32 %v10580_v50, 0.0 }
 0x3ea   : > { %v10575_v19 = vadd.f32 %v17120_v31, %v10574_v57  ;;  %v10814_v18 = vmax.f32 %v10572_v4, 0.0 }
 0x3eb   : > { %v10817_v59 = vmax.f32 %v10583_v3, 0.0 }
 0x3ec   : > { %v10815_v44 = vmax.f32 %v10575_v19, 0.0 }
 0x3ed   : > { %v10877_v52 = vpack.c.bf16 %v10817_v59, %v10816_v45 }
 0x3ee   : > { %v10876_v35 = vpack.c.bf16 %v10815_v44, %v10814_v18  ;;  %v14076_v2 = vpop.f32.mrb[8].mxu0 }
 0x3ef   : > { %v10596_v1 = vadd.f32 %v14076_v2, %v17120_v31  ;;  %v10587_v17 = vpop.f32.mrb[9].mxu0 }
 0x3f0   : > { %v10588_v12 = vadd.f32 %v17120_v31, %v10587_v17  ;;  %v14077_v24 = vpop.f32.mrb[10].mxu0  ;;  %14150 = vmatprep.mubr.bf16.mxu1 %v10876_v35 }
 0x3f1   : > { %v10599_v29 = vadd.f32 %v14077_v24, %v17120_v31  ;;  %v10590_v42 = vpop.f32.mrb[11].mxu0  ;;  %14151 = vmatmul.mubr.bf16.gmra.mrb[4].mxu1 %v10877_v52  ;;  %v10820_v56 = vmax.f32 %v10596_v1, 0.0 }
 0x3f2   : > { %v10591_v6 = vadd.f32 %v17120_v31, %v10590_v42  ;;  %v10818_v0 = vmax.f32 %v10588_v12, 0.0 }
 0x3f3   : > { %v10821_v11 = vmax.f32 %v10599_v29, 0.0 }
 0x3f4   : > { %v10819_v33 = vmax.f32 %v10591_v6, 0.0 }
 0x3f5   : > { %v10879_v15 = vpack.c.bf16 %v10821_v11, %v10820_v56 }
 0x3f6   : > { %v10878_v54 = vpack.c.bf16 %v10819_v33, %v10818_v0  ;;  %v14080_v41 = vpop.f32.mrb[12].mxu0 }
 0x3f7   : > { %v10612_v40 = vadd.f32 %v14080_v41, %v17120_v31  ;;  %v10603_v27 = vpop.f32.mrb[13].mxu0 }
 0x3f8   : > { %v10604_v30 = vadd.f32 %v17120_v31, %v10603_v27  ;;  %v14081_v25 = vpop.f32.mrb[14].mxu0  ;;  %14154 = vmatprep.mubr.bf16.mxu1 %v10878_v54 }
 0x3f9   : > { %v10615_v63 = vadd.f32 %v14081_v25, %v17120_v31  ;;  %v10606_v21 = vpop.f32.mrb[15].mxu0  ;;  %14155 = vmatmul.mubr.bf16.gmra.mrb[8].mxu1 %v10879_v15  ;;  %v10824_v62 = vmax.f32 %v10612_v40, 0.0 }
 0x3fa   : > { %v10607_v55 = vadd.f32 %v17120_v31, %v10606_v21  ;;  %v10822_v8 = vmax.f32 %v10604_v30, 0.0 }
 0x3fb   : > { %v10825_v32 = vmax.f32 %v10615_v63, 0.0 }
 0x3fc   : > { %v10823_v49 = vmax.f32 %v10607_v55, 0.0 }
 0x3fd   : > { %v10881_v10 = vpack.c.bf16 %v10825_v32, %v10824_v62 }
 0x3fe   : > { %v10880_v61 = vpack.c.bf16 %v10823_v49, %v10822_v8  ;;  %v14084_v26 = vpop.f32.mrb[16].mxu0 }
 0x3ff   : > { %v10628_v22 = vadd.f32 %v14084_v26, %v17120_v31  ;;  %v10619_v9 = vpop.f32.mrb[17].mxu0 }
 0x400   : > { %v10620_v28 = vadd.f32 %v17120_v31, %v10619_v9  ;;  %v14085_v34 = vpop.f32.mrb[18].mxu0  ;;  %14158 = vmatprep.mubr.bf16.mxu1 %v10880_v61 }
 0x401   : > { %v10631_v13 = vadd.f32 %v14085_v34, %v17120_v31  ;;  %v10622_v23 = vpop.f32.mrb[19].mxu0  ;;  %14159 = vmatmul.mubr.bf16.gmra.mrb[12].mxu1 %v10881_v10  ;;  %v10828_v36 = vmax.f32 %v10628_v22, 0.0 }
 0x402   : > { %v10623_v37 = vadd.f32 %v17120_v31, %v10622_v23  ;;  %v10826_v48 = vmax.f32 %v10620_v28, 0.0 }
 0x403   : > { %v10829_v60 = vmax.f32 %v10631_v13, 0.0 }
 0x404   : > { %v10827_v5 = vmax.f32 %v10623_v37, 0.0 }
 0x405   : > { %v10883_v53 = vpack.c.bf16 %v10829_v60, %v10828_v36 }
 0x406   : > { %v10882_v16 = vpack.c.bf16 %v10827_v5, %v10826_v48  ;;  %v14088_v43 = vpop.f32.mrb[20].mxu0 }
 0x407   : > { %v10644_v20 = vadd.f32 %v14088_v43, %v17120_v31  ;;  %v10635_v47 = vpop.f32.mrb[21].mxu0 }
 0x408   : > { %v10636_v39 = vadd.f32 %v17120_v31, %v10635_v47  ;;  %v14089_v38 = vpop.f32.mrb[22].mxu0  ;;  %14162 = vmatprep.mubr.bf16.mxu1 %v10882_v16 }
 0x409   : > { %v10647_v7 = vadd.f32 %v14089_v38, %v17120_v31  ;;  %v10638_v51 = vpop.f32.mrb[23].mxu0  ;;  %14163 = vmatmul.mubr.bf16.gmra.mrb[16].mxu1 %v10883_v53  ;;  %v10832_v50 = vmax.f32 %v10644_v20, 0.0 }
 0x40a   : > { %v10639_v46 = vadd.f32 %v17120_v31, %v10638_v51  ;;  %v10830_v4 = vmax.f32 %v10636_v39, 0.0 }
 0x40b   : > { %v10833_v14 = vmax.f32 %v10647_v7, 0.0 }
 0x40c   : > { %v10831_v58 = vmax.f32 %v10639_v46, 0.0 }
 0x40d   : > { %v10885_v3 = vpack.c.bf16 %v10833_v14, %v10832_v50 }
 0x40e   : > { %v10884_v57 = vpack.c.bf16 %v10831_v58, %v10830_v4  ;;  %v14092_v19 = vpop.f32.mrb[24].mxu0 }
 0x40f   : > { %v10660_v45 = vadd.f32 %v14092_v19, %v17120_v31  ;;  %v10651_v59 = vpop.f32.mrb[25].mxu0 }
 0x410   : > { %v10652_v18 = vadd.f32 %v17120_v31, %v10651_v59  ;;  %v14093_v44 = vpop.f32.mrb[26].mxu0  ;;  %14166 = vmatprep.mubr.bf16.mxu1 %v10884_v57 }
 0x411   : > { %v10663_v52 = vadd.f32 %v14093_v44, %v17120_v31  ;;  %v10654_v35 = vpop.f32.mrb[27].mxu0  ;;  %14167 = vmatmul.mubr.bf16.gmra.mrb[20].mxu1 %v10885_v3  ;;  %v10836_v1 = vmax.f32 %v10660_v45, 0.0 }
 0x412   : > { %v10655_v2 = vadd.f32 %v17120_v31, %v10654_v35  ;;  %v10834_v12 = vmax.f32 %v10652_v18, 0.0 }
 0x413   : > { %v10837_v17 = vmax.f32 %v10663_v52, 0.0 }
 0x414   : > { %v10835_v24 = vmax.f32 %v10655_v2, 0.0 }
 0x415   : > { %v10887_v29 = vpack.c.bf16 %v10837_v17, %v10836_v1 }
 0x416   : > { %v10886_v42 = vpack.c.bf16 %v10835_v24, %v10834_v12  ;;  %v14096_v6 = vpop.f32.mrb[28].mxu0 }
 0x417   : > { %v10676_v56 = vadd.f32 %v14096_v6, %v17120_v31  ;;  %v10667_v11 = vpop.f32.mrb[29].mxu0 }
 0x418   : > { %v10668_v0 = vadd.f32 %v17120_v31, %v10667_v11  ;;  %v14097_v33 = vpop.f32.mrb[30].mxu0  ;;  %14170 = vmatprep.mubr.bf16.mxu1 %v10886_v42 }
 0x419   : > { %v10679_v15 = vadd.f32 %v14097_v33, %v17120_v31  ;;  %v10670_v54 = vpop.f32.mrb[31].mxu0  ;;  %14171 = vmatmul.mubr.bf16.gmra.mrb[24].mxu1 %v10887_v29  ;;  %v10840_v40 = vmax.f32 %v10676_v56, 0.0 }
 0x41a   : > { %v10671_v41 = vadd.f32 %v17120_v31, %v10670_v54  ;;  %v10838_v30 = vmax.f32 %v10668_v0, 0.0 }
 0x41b   : > { %v10841_v27 = vmax.f32 %v10679_v15, 0.0 }
 0x41c   : > { %v10839_v25 = vmax.f32 %v10671_v41, 0.0 }
 0x41d   : > { %v10889_v63 = vpack.c.bf16 %v10841_v27, %v10840_v40 }
 0x41e   : > { %v10888_v21 = vpack.c.bf16 %v10839_v25, %v10838_v30  ;;  %v14100_v55 = vpop.f32.mrb[32].mxu0 }
 0x41f   : > { %v10692_v62 = vadd.f32 %v14100_v55, %v17120_v31  ;;  %v10683_v32 = vpop.f32.mrb[33].mxu0 }
 0x420   : > { %v10684_v8 = vadd.f32 %v17120_v31, %v10683_v32  ;;  %v14101_v49 = vpop.f32.mrb[34].mxu0  ;;  %14174 = vmatprep.mubr.bf16.mxu1 %v10888_v21 }
 0x421   : > { %v10695_v10 = vadd.f32 %v14101_v49, %v17120_v31  ;;  %v10686_v61 = vpop.f32.mrb[35].mxu0  ;;  %14175 = vmatmul.mubr.bf16.gmra.mrb[28].mxu1 %v10889_v63  ;;  %v10844_v22 = vmax.f32 %v10692_v62, 0.0 }
 0x422   : > { %v10687_v26 = vadd.f32 %v17120_v31, %v10686_v61  ;;  %v10842_v28 = vmax.f32 %v10684_v8, 0.0 }
 0x423   : > { %v10845_v9 = vmax.f32 %v10695_v10, 0.0 }
 0x424   : > { %v10843_v34 = vmax.f32 %v10687_v26, 0.0 }
 0x425   : > { %v10891_v13 = vpack.c.bf16 %v10845_v9, %v10844_v22 }
 0x426   : > { %v10890_v23 = vpack.c.bf16 %v10843_v34, %v10842_v28  ;;  %v14104_v37 = vpop.f32.mrb[36].mxu0 }
 0x427   : > { %v10708_v36 = vadd.f32 %v14104_v37, %v17120_v31  ;;  %v10699_v60 = vpop.f32.mrb[37].mxu0 }
 0x428   : > { %v10700_v48 = vadd.f32 %v17120_v31, %v10699_v60  ;;  %v14105_v5 = vpop.f32.mrb[38].mxu0  ;;  %14178 = vmatprep.mubr.bf16.mxu1 %v10890_v23 }
 0x429   : > { %v10711_v53 = vadd.f32 %v14105_v5, %v17120_v31  ;;  %v10702_v16 = vpop.f32.mrb[39].mxu0  ;;  %14179 = vmatmul.mubr.bf16.gmra.mrb[32].mxu1 %v10891_v13  ;;  %v10848_v20 = vmax.f32 %v10708_v36, 0.0 }
 0x42a   : > { %v10703_v43 = vadd.f32 %v17120_v31, %v10702_v16  ;;  %v10846_v39 = vmax.f32 %v10700_v48, 0.0 }
 0x42b   : > { %v10849_v47 = vmax.f32 %v10711_v53, 0.0 }
 0x42c   : > { %v10847_v38 = vmax.f32 %v10703_v43, 0.0 }
 0x42d   : > { %v10893_v7 = vpack.c.bf16 %v10849_v47, %v10848_v20 }
 0x42e   : > { %v10892_v51 = vpack.c.bf16 %v10847_v38, %v10846_v39  ;;  %v14108_v46 = vpop.f32.mrb[40].mxu0 }
 0x42f   : > { %v10724_v50 = vadd.f32 %v14108_v46, %v17120_v31  ;;  %v10715_v14 = vpop.f32.mrb[41].mxu0 }
 0x430   : > { %v10716_v4 = vadd.f32 %v17120_v31, %v10715_v14  ;;  %v14109_v58 = vpop.f32.mrb[42].mxu0  ;;  %14182 = vmatprep.mubr.bf16.mxu1 %v10892_v51 }
 0x431   : > { %v10727_v3 = vadd.f32 %v14109_v58, %v17120_v31  ;;  %v10718_v57 = vpop.f32.mrb[43].mxu0  ;;  %14183 = vmatmul.mubr.bf16.gmra.mrb[36].mxu1 %v10893_v7  ;;  %v10852_v45 = vmax.f32 %v10724_v50, 0.0 }
 0x432   : > { %v10719_v19 = vadd.f32 %v17120_v31, %v10718_v57  ;;  %v10850_v18 = vmax.f32 %v10716_v4, 0.0 }
 0x433   : > { %v10853_v59 = vmax.f32 %v10727_v3, 0.0 }
 0x434   : > { %v10851_v44 = vmax.f32 %v10719_v19, 0.0 }
 0x435   : > { %v10895_v52 = vpack.c.bf16 %v10853_v59, %v10852_v45 }
 0x436   : > { %v10894_v35 = vpack.c.bf16 %v10851_v44, %v10850_v18  ;;  %v14112_v2 = vpop.f32.mrb[44].mxu0 }
 0x437   : > { %v10740_v1 = vadd.f32 %v14112_v2, %v17120_v31  ;;  %v10731_v17 = vpop.f32.mrb[45].mxu0 }
 0x438   : > { %v10732_v12 = vadd.f32 %v17120_v31, %v10731_v17  ;;  %v14113_v24 = vpop.f32.mrb[46].mxu0  ;;  %14186 = vmatprep.mubr.bf16.mxu1 %v10894_v35 }
 0x439   : > { %v10743_v29 = vadd.f32 %v14113_v24, %v17120_v31  ;;  %v10734_v42 = vpop.f32.mrb[47].mxu0  ;;  %14187 = vmatmul.mubr.bf16.gmra.mrb[40].mxu1 %v10895_v52  ;;  %v10856_v56 = vmax.f32 %v10740_v1, 0.0 }
 0x43a   : > { %v10735_v6 = vadd.f32 %v17120_v31, %v10734_v42  ;;  %v10854_v0 = vmax.f32 %v10732_v12, 0.0 }
 0x43b   : > { %v10857_v11 = vmax.f32 %v10743_v29, 0.0 }
 0x43c   : > { %v10855_v33 = vmax.f32 %v10735_v6, 0.0  ;;  %v17189_v6 = vld [vmem:[%s17539_s6] ss:$0 sm:$0xff] }
 0x43d   : > { %v10897_v15 = vpack.c.bf16 %v10857_v11, %v10856_v56 }
 0x43e   : > { %v10896_v54 = vpack.c.bf16 %v10855_v33, %v10854_v0  ;;  %v14116_v41 = vpop.f32.mrb[48].mxu0 }
 0x43f   : > { %v10756_v40 = vadd.f32 %v14116_v41, %v17120_v31  ;;  %v10747_v27 = vpop.f32.mrb[49].mxu0 }
 0x440   : > { %v10748_v30 = vadd.f32 %v17120_v31, %v10747_v27  ;;  %v14117_v25 = vpop.f32.mrb[50].mxu0  ;;  %14190 = vmatprep.mubr.bf16.mxu1 %v10896_v54 }
 0x441   : > { %v10759_v63 = vadd.f32 %v14117_v25, %v17120_v31  ;;  %v10750_v21 = vpop.f32.mrb[51].mxu0  ;;  %14191 = vmatmul.mubr.bf16.gmra.mrb[44].mxu1 %v10897_v15  ;;  %v10860_v62 = vmax.f32 %v10756_v40, 0.0  ;;  %v17196_v15 = vld [vmem:[%s17540_s7] ss:$0 sm:$0xff] }
 0x442   : > { %v10751_v55 = vadd.f32 %v17120_v31, %v10750_v21  ;;  %v10858_v8 = vmax.f32 %v10748_v30, 0.0 }
 0x443   : > { %v10861_v32 = vmax.f32 %v10759_v63, 0.0 }
 0x444   : > { %v10859_v49 = vmax.f32 %v10751_v55, 0.0 }
 0x445   : > { %v10899_v10 = vpack.c.bf16 %v10861_v32, %v10860_v62 }
 0x446   : > { %v10898_v61 = vpack.c.bf16 %v10859_v49, %v10858_v8  ;;  %v14120_v26 = vpop.f32.mrb[52].mxu0 }
 0x447   : > { %v10772_v22 = vadd.f32 %v14120_v26, %v17120_v31  ;;  %v10763_v9 = vpop.f32.mrb[53].mxu0 }
 0x448   : > { %v10764_v28 = vadd.f32 %v17120_v31, %v10763_v9  ;;  %v14121_v34 = vpop.f32.mrb[54].mxu0  ;;  %14194 = vmatprep.mubr.bf16.mxu1 %v10898_v61 }
 0x449   : > { %v10775_v13 = vadd.f32 %v14121_v34, %v17120_v31  ;;  %v10766_v23 = vpop.f32.mrb[55].mxu0  ;;  %14195 = vmatmul.mubr.bf16.gmra.mrb[48].mxu1 %v10899_v10  ;;  %v10864_v36 = vmax.f32 %v10772_v22, 0.0 }
 0x44a   : > { %v10767_v37 = vadd.f32 %v17120_v31, %v10766_v23  ;;  %v10862_v48 = vmax.f32 %v10764_v28, 0.0 }
 0x44b   : > { %v10865_v60 = vmax.f32 %v10775_v13, 0.0 }
 0x44c   : > { %v10863_v5 = vmax.f32 %v10767_v37, 0.0 }
 0x44d   : > { %v10901_v53 = vpack.c.bf16 %v10865_v60, %v10864_v36 }
 0x44e   : > { %v10900_v16 = vpack.c.bf16 %v10863_v5, %v10862_v48  ;;  %v14124_v43 = vpop.f32.mrb[56].mxu0 }
 0x44f   : > { %v10788_v20 = vadd.f32 %v14124_v43, %v17120_v31  ;;  %v10779_v47 = vpop.f32.mrb[57].mxu0 }
 0x450   : > { %v10780_v39 = vadd.f32 %v17120_v31, %v10779_v47  ;;  %v14125_v38 = vpop.f32.mrb[58].mxu0  ;;  %14198 = vmatprep.mubr.bf16.mxu1 %v10900_v16 }
 0x451   : > { %v10791_v7 = vadd.f32 %v14125_v38, %v17120_v31  ;;  %v10782_v51 = vpop.f32.mrb[59].mxu0  ;;  %14199 = vmatmul.mubr.bf16.gmra.mrb[52].mxu1 %v10901_v53  ;;  %v10868_v50 = vmax.f32 %v10788_v20, 0.0 }
 0x452   : > { %v10783_v46 = vadd.f32 %v17120_v31, %v10782_v51  ;;  %v10866_v4 = vmax.f32 %v10780_v39, 0.0 }
 0x453   : > { %v10869_v14 = vmax.f32 %v10791_v7, 0.0 }
 0x454   : > { %v10867_v58 = vmax.f32 %v10783_v46, 0.0 }
 0x455   : > { %v10903_v3 = vpack.c.bf16 %v10869_v14, %v10868_v50 }
 0x456   : > { %v10902_v57 = vpack.c.bf16 %v10867_v58, %v10866_v4  ;;  %v14128_v19 = vpop.f32.mrb[60].mxu0 }
 0x457   : > { %v10804_v45 = vadd.f32 %v14128_v19, %v17120_v31  ;;  %v10795_v59 = vpop.f32.mrb[61].mxu0 }
 0x458   : > { %v10796_v18 = vadd.f32 %v17120_v31, %v10795_v59  ;;  %v14129_v44 = vpop.f32.mrb[62].mxu0  ;;  %14202 = vmatprep.mubr.bf16.mxu1 %v10902_v57 }
 0x459   : > { %v10807_v52 = vadd.f32 %v14129_v44, %v17120_v31  ;;  %v10798_v35 = vpop.f32.mrb[63].mxu0  ;;  %14203 = vmatmul.mubr.bf16.gmra.mrb[56].mxu1 %v10903_v3  ;;  %v10872_v1 = vmax.f32 %v10804_v45, 0.0 }
 0x45a   : > { %v10799_v2 = vadd.f32 %v17120_v31, %v10798_v35  ;;  %v10870_v12 = vmax.f32 %v10796_v18, 0.0 }
 0x45b   : > { %v10873_v17 = vmax.f32 %v10807_v52, 0.0 }
 0x45c   : > { %v10871_v24 = vmax.f32 %v10799_v2, 0.0 }
 0x45d   : > { %v10905_v29 = vpack.c.bf16 %v10873_v17, %v10872_v1 }
 0x45e   : > { %v10904_v42 = vpack.c.bf16 %v10871_v24, %v10870_v12 }
 0x460   : > { %14206 = vmatprep.mubr.bf16.mxu1 %v10904_v42 }
 0x461   : > { %14207 = vmatmul.mubr.bf16.gmra.mrb[60].mxu1 %v10905_v29 }
 0x4bb   : > { %v14148_v56 = vpop.f32.mrb[0].mxu1 }
 0x4bc   : > { %v11020_v11 = vadd.f32 %v14148_v56, %v17189_v6  ;;  %v11011_v0 = vpop.f32.mrb[1].mxu1 }
 0x4bd   : > { %v11012_v33 = vadd.f32 %v17189_v6, %v11011_v0  ;;  %v14149_v31 = vpop.f32.mrb[2].mxu1 }
 0x4be   : > { %v11268_v54 = vmax.f32 %v11020_v11, 0.0  ;;  %v11023_v41 = vadd.f32 %v14149_v31, %v17189_v6  ;;  %v11014_v40 = vpop.f32.mrb[3].mxu1 }
 0x4bf   : > { %v11266_v27 = vmax.f32 %v11012_v33, 0.0  ;;  %v11015_v30 = vadd.f32 %v17189_v6, %v11014_v40 }
 0x4c0   : > { %v11269_v25 = vmax.f32 %v11023_v41, 0.0  ;;  %v11339_v63 = vmul.f32 %v17196_v15, %v11268_v54 }
 0x4c1   : > { %v11267_v21 = vmax.f32 %v11015_v30, 0.0  ;;  %v11337_v55 = vmul.f32 %v17196_v15, %v11266_v27 }
 0x4c2   : > { %11405 = vadd.xlane.f32.xlu1 %v11339_v63  ;;  %v11340_v32 = vmul.f32 %v17196_v15, %v11269_v25 }
 0x4c3   : > { %11401 = vadd.xlane.f32.xlu0 %v11337_v55  ;;  %v11338_v10 = vmul.f32 %v17196_v15, %v11267_v21 }
 0x4c4   : > { %v14152_v62 = vpop.f32.mrb[4].mxu1 }
 0x4c5   : > { %v11036_v8 = vadd.f32 %v14152_v62, %v17189_v6  ;;  %v11027_v49 = vpop.f32.mrb[5].mxu1 }
 0x4c6   : > { %v11028_v61 = vadd.f32 %v17189_v6, %v11027_v49  ;;  %v14153_v26 = vpop.f32.mrb[6].mxu1  ;;  %11407 = vadd.xlane.f32.xlu1 %v11340_v32 }
 0x4c7   : > { %v11272_v22 = vmax.f32 %v11036_v8, 0.0  ;;  %v11039_v9 = vadd.f32 %v14153_v26, %v17189_v6  ;;  %v11030_v28 = vpop.f32.mrb[7].mxu1  ;;  %11403 = vadd.xlane.f32.xlu0 %v11338_v10 }
 0x4c8   : > { %v11031_v34 = vadd.f32 %v17189_v6, %v11030_v28  ;;  %v11270_v13 = vmax.f32 %v11028_v61, 0.0 }
 0x4c9   : > { %v11273_v23 = vmax.f32 %v11039_v9, 0.0  ;;  %v11343_v37 = vmul.f32 %v17196_v15, %v11272_v22 }
 0x4ca   : > { %v11271_v36 = vmax.f32 %v11031_v34, 0.0  ;;  %v11341_v16 = vmul.f32 %v17196_v15, %v11270_v13 }
 0x4cb   : > { %11413 = vadd.xlane.f32.xlu0 %v11343_v37  ;;  %v11344_v60 = vmul.f32 %v17196_v15, %v11273_v23 }
 0x4cc   : > { %v14156_v48 = vpop.f32.mrb[8].mxu1  ;;  %v11342_v7 = vmul.f32 %v17196_v15, %v11271_v36 }
 0x4cd   : > { %v11052_v5 = vadd.f32 %v14156_v48, %v17189_v6  ;;  %11415 = vadd.xlane.f32.xlu1 %v11344_v60  ;;  %v11043_v53 = vpop.f32.mrb[9].mxu1 }
 0x4ce   : > { %v11044_v43 = vadd.f32 %v17189_v6, %v11043_v53  ;;  %v14157_v20 = vpop.f32.mrb[10].mxu1 }
 0x4cf   : > { %v11276_v47 = vmax.f32 %v11052_v5, 0.0  ;;  %v11055_v39 = vadd.f32 %v14157_v20, %v17189_v6  ;;  %v11046_v38 = vpop.f32.mrb[11].mxu1  ;;  %11409 = vadd.xlane.f32.xlu0 %v11341_v16 }
 0x4d0   : > { %v11047_v51 = vadd.f32 %v17189_v6, %v11046_v38  ;;  %v11274_v46 = vmax.f32 %v11044_v43, 0.0 }
 0x4d1   : > { %v11277_v50 = vmax.f32 %v11055_v39, 0.0  ;;  %11411 = vadd.xlane.f32.xlu1 %v11342_v7  ;;  %v11347_v14 = vmul.f32 %v17196_v15, %v11276_v47 }
 0x4d2   : > { %v11275_v4 = vmax.f32 %v11047_v51, 0.0  ;;  %v11345_v45 = vmul.f32 %v17196_v15, %v11274_v46 }
 0x4d3   : > { %11421 = vadd.xlane.f32.xlu0 %v11347_v14  ;;  %v11348_v58 = vmul.f32 %v17196_v15, %v11277_v50 }
 0x4d4   : > { %v14160_v3 = vpop.f32.mrb[12].mxu1  ;;  %v11346_v2 = vmul.f32 %v17196_v15, %v11275_v4 }
 0x4d5   : > { %v11068_v57 = vadd.f32 %v14160_v3, %v17189_v6  ;;  %v11059_v19 = vpop.f32.mrb[13].mxu1  ;;  %11423 = vadd.xlane.f32.xlu1 %v11348_v58 }
 0x4d6   : > { %v11060_v59 = vadd.f32 %v17189_v6, %v11059_v19  ;;  %v14161_v18 = vpop.f32.mrb[14].mxu1 }
 0x4d7   : > { %v11280_v44 = vmax.f32 %v11068_v57, 0.0  ;;  %v11071_v52 = vadd.f32 %v14161_v18, %v17189_v6  ;;  %v11062_v35 = vpop.f32.mrb[15].mxu1  ;;  %11417 = vadd.xlane.f32.xlu0 %v11345_v45 }
 0x4d8   : > { %v11063_v1 = vadd.f32 %v17189_v6, %v11062_v35  ;;  %v11278_v17 = vmax.f32 %v11060_v59, 0.0 }
 0x4d9   : > { %v11281_v12 = vmax.f32 %v11071_v52, 0.0  ;;  %11419 = vadd.xlane.f32.xlu1 %v11346_v2  ;;  %v11351_v24 = vmul.f32 %v17196_v15, %v11280_v44 }
 0x4da   : > { %v11279_v29 = vmax.f32 %v11063_v1, 0.0  ;;  %v11349_v33 = vmul.f32 %v17196_v15, %v11278_v17 }
 0x4db   : > { %11429 = vadd.xlane.f32.xlu0 %v11351_v24  ;;  %v11352_v42 = vmul.f32 %v17196_v15, %v11281_v12 }
 0x4dc   : > { %v14164_v56 = vpop.f32.mrb[16].mxu1  ;;  %v11350_v30 = vmul.f32 %v17196_v15, %v11279_v29 }
 0x4dd   : > { %v11084_v11 = vadd.f32 %v14164_v56, %v17189_v6  ;;  %v11075_v0 = vpop.f32.mrb[17].mxu1  ;;  %11431 = vadd.xlane.f32.xlu1 %v11352_v42 }
 0x4de   : > { %v11076_v31 = vadd.f32 %v17189_v6, %v11075_v0  ;;  %v14165_v54 = vpop.f32.mrb[18].mxu1 }
 0x4df   : > { %v11284_v41 = vmax.f32 %v11084_v11, 0.0  ;;  %v11087_v40 = vadd.f32 %v14165_v54, %v17189_v6  ;;  %v11078_v27 = vpop.f32.mrb[19].mxu1  ;;  %11425 = vadd.xlane.f32.xlu0 %v11349_v33 }
 0x4e0   : > { %v11079_v25 = vadd.f32 %v17189_v6, %v11078_v27  ;;  %v11282_v63 = vmax.f32 %v11076_v31, 0.0 }
 0x4e1   : > { %v11285_v21 = vmax.f32 %v11087_v40, 0.0  ;;  %11427 = vadd.xlane.f32.xlu1 %v11350_v30  ;;  %v11355_v55 = vmul.f32 %v17196_v15, %v11284_v41 }
 0x4e2   : > { %v11283_v62 = vmax.f32 %v11079_v25, 0.0  ;;  %v11353_v61 = vmul.f32 %v17196_v15, %v11282_v63 }
 0x4e3   : > { %11437 = vadd.xlane.f32.xlu0 %v11355_v55  ;;  %v11356_v32 = vmul.f32 %v17196_v15, %v11285_v21 }
 0x4e4   : > { %v14168_v8 = vpop.f32.mrb[20].mxu1  ;;  %v11354_v13 = vmul.f32 %v17196_v15, %v11283_v62 }
 0x4e5   : > { %v11100_v49 = vadd.f32 %v14168_v8, %v17189_v6  ;;  %v11091_v10 = vpop.f32.mrb[21].mxu1  ;;  %11439 = vadd.xlane.f32.xlu1 %v11356_v32 }
 0x4e6   : > { %v11092_v26 = vadd.f32 %v17189_v6, %v11091_v10  ;;  %v14169_v22 = vpop.f32.mrb[22].mxu1 }
 0x4e7   : > { %v11288_v9 = vmax.f32 %v11100_v49, 0.0  ;;  %v11103_v28 = vadd.f32 %v14169_v22, %v17189_v6  ;;  %v11094_v34 = vpop.f32.mrb[23].mxu1  ;;  %11433 = vadd.xlane.f32.xlu0 %v11353_v61 }
 0x4e8   : > { %v11095_v23 = vadd.f32 %v17189_v6, %v11094_v34  ;;  %v11286_v37 = vmax.f32 %v11092_v26, 0.0 }
 0x4e9   : > { %v11289_v36 = vmax.f32 %v11103_v28, 0.0  ;;  %11435 = vadd.xlane.f32.xlu1 %v11354_v13  ;;  %v11359_v60 = vmul.f32 %v17196_v15, %v11288_v9 }
 0x4ea   : > { %v11287_v48 = vmax.f32 %v11095_v23, 0.0  ;;  %v11357_v20 = vmul.f32 %v17196_v15, %v11286_v37 }
 0x4eb   : > { %11445 = vadd.xlane.f32.xlu0 %v11359_v60  ;;  %v11360_v5 = vmul.f32 %v17196_v15, %v11289_v36 }
 0x4ec   : > { %v14172_v53 = vpop.f32.mrb[24].mxu1  ;;  %v11358_v46 = vmul.f32 %v17196_v15, %v11287_v48 }
 0x4ed   : > { %v11116_v16 = vadd.f32 %v14172_v53, %v17189_v6  ;;  %v11107_v43 = vpop.f32.mrb[25].mxu1  ;;  %11447 = vadd.xlane.f32.xlu1 %v11360_v5 }
 0x4ee   : > { %v11108_v47 = vadd.f32 %v17189_v6, %v11107_v43  ;;  %v14173_v39 = vpop.f32.mrb[26].mxu1 }
 0x4ef   : > { %v11292_v38 = vmax.f32 %v11116_v16, 0.0  ;;  %v11119_v7 = vadd.f32 %v14173_v39, %v17189_v6  ;;  %v11110_v51 = vpop.f32.mrb[27].mxu1  ;;  %11441 = vadd.xlane.f32.xlu0 %v11357_v20 }
 0x4f0   : > { %v11111_v50 = vadd.f32 %v17189_v6, %v11110_v51  ;;  %v11290_v14 = vmax.f32 %v11108_v47, 0.0 }
 0x4f1   : > { %v11293_v4 = vmax.f32 %v11119_v7, 0.0  ;;  %11443 = vadd.xlane.f32.xlu1 %v11358_v46  ;;  %v11363_v58 = vmul.f32 %v17196_v15, %v11292_v38 }
 0x4f2   : > { %v11291_v3 = vmax.f32 %v11111_v50, 0.0  ;;  %v11361_v18 = vmul.f32 %v17196_v15, %v11290_v14 }
 0x4f3   : > { %11453 = vadd.xlane.f32.xlu0 %v11363_v58  ;;  %v11364_v57 = vmul.f32 %v17196_v15, %v11293_v4 }
 0x4f4   : > { %v14176_v19 = vpop.f32.mrb[28].mxu1  ;;  %v11362_v17 = vmul.f32 %v17196_v15, %v11291_v3 }
 0x4f5   : > { %v11132_v45 = vadd.f32 %v14176_v19, %v17189_v6  ;;  %v11123_v59 = vpop.f32.mrb[29].mxu1  ;;  %11455 = vadd.xlane.f32.xlu1 %v11364_v57 }
 0x4f6   : > { %v11124_v44 = vadd.f32 %v17189_v6, %v11123_v59  ;;  %v14177_v52 = vpop.f32.mrb[30].mxu1 }
 0x4f7   : > { %v11296_v35 = vmax.f32 %v11132_v45, 0.0  ;;  %v11135_v2 = vadd.f32 %v14177_v52, %v17189_v6  ;;  %v11126_v1 = vpop.f32.mrb[31].mxu1  ;;  %11449 = vadd.xlane.f32.xlu0 %v11361_v18 }
 0x4f8   : > { %v11127_v12 = vadd.f32 %v17189_v6, %v11126_v1  ;;  %v11294_v24 = vmax.f32 %v11124_v44, 0.0 }
 0x4f9   : > { %v11297_v29 = vmax.f32 %v11135_v2, 0.0  ;;  %11451 = vadd.xlane.f32.xlu1 %v11362_v17  ;;  %v11367_v42 = vmul.f32 %v17196_v15, %v11296_v35 }
 0x4fa   : > { %v11295_v56 = vmax.f32 %v11127_v12, 0.0  ;;  %v11365_v54 = vmul.f32 %v17196_v15, %v11294_v24 }
 0x4fb   : > { %11461 = vadd.xlane.f32.xlu0 %v11367_v42  ;;  %v11368_v11 = vmul.f32 %v17196_v15, %v11297_v29 }
 0x4fc   : > { %v14180_v0 = vpop.f32.mrb[32].mxu1  ;;  %v11366_v63 = vmul.f32 %v17196_v15, %v11295_v56 }
 0x4fd   : > { %v11148_v33 = vadd.f32 %v14180_v0, %v17189_v6  ;;  %v11139_v31 = vpop.f32.mrb[33].mxu1  ;;  %11463 = vadd.xlane.f32.xlu1 %v11368_v11 }
 0x4fe   : > { %v11140_v41 = vadd.f32 %v17189_v6, %v11139_v31  ;;  %v14181_v40 = vpop.f32.mrb[34].mxu1 }
 0x4ff   : > { %v11300_v27 = vmax.f32 %v11148_v33, 0.0  ;;  %v11151_v30 = vadd.f32 %v14181_v40, %v17189_v6  ;;  %v11142_v25 = vpop.f32.mrb[35].mxu1  ;;  %11457 = vadd.xlane.f32.xlu0 %v11365_v54 }
 0x500   : > { %v11143_v21 = vadd.f32 %v17189_v6, %v11142_v25  ;;  %v11298_v55 = vmax.f32 %v11140_v41, 0.0 }
 0x501   : > { %v11301_v62 = vmax.f32 %v11151_v30, 0.0  ;;  %11459 = vadd.xlane.f32.xlu1 %v11366_v63  ;;  %v11371_v32 = vmul.f32 %v17196_v15, %v11300_v27 }
 0x502   : > { %v11299_v8 = vmax.f32 %v11143_v21, 0.0  ;;  %v11369_v22 = vmul.f32 %v17196_v15, %v11298_v55 }
 0x503   : > { %11469 = vadd.xlane.f32.xlu0 %v11371_v32  ;;  %v11372_v49 = vmul.f32 %v17196_v15, %v11301_v62 }
 0x504   : > { %v14184_v10 = vpop.f32.mrb[36].mxu1  ;;  %v11370_v37 = vmul.f32 %v17196_v15, %v11299_v8 }
 0x505   : > { %v11164_v61 = vadd.f32 %v14184_v10, %v17189_v6  ;;  %v11155_v26 = vpop.f32.mrb[37].mxu1  ;;  %11471 = vadd.xlane.f32.xlu1 %v11372_v49 }
 0x506   : > { %v11156_v9 = vadd.f32 %v17189_v6, %v11155_v26  ;;  %v14185_v28 = vpop.f32.mrb[38].mxu1 }
 0x507   : > { %v11304_v34 = vmax.f32 %v11164_v61, 0.0  ;;  %v11167_v13 = vadd.f32 %v14185_v28, %v17189_v6  ;;  %v11158_v23 = vpop.f32.mrb[39].mxu1  ;;  %11465 = vadd.xlane.f32.xlu0 %v11369_v22 }
 0x508   : > { %v11159_v36 = vadd.f32 %v17189_v6, %v11158_v23  ;;  %v11302_v60 = vmax.f32 %v11156_v9, 0.0 }
 0x509   : > { %v11305_v48 = vmax.f32 %v11167_v13, 0.0  ;;  %11467 = vadd.xlane.f32.xlu1 %v11370_v37  ;;  %v11375_v5 = vmul.f32 %v17196_v15, %v11304_v34 }
 0x50a   : > { %v11303_v53 = vmax.f32 %v11159_v36, 0.0  ;;  %v11373_v39 = vmul.f32 %v17196_v15, %v11302_v60 }
 0x50b   : > { %11477 = vadd.xlane.f32.xlu0 %v11375_v5  ;;  %v11376_v16 = vmul.f32 %v17196_v15, %v11305_v48 }
 0x50c   : > { %v14188_v43 = vpop.f32.mrb[40].mxu1  ;;  %v11374_v14 = vmul.f32 %v17196_v15, %v11303_v53 }
 0x50d   : > { %v11180_v20 = vadd.f32 %v14188_v43, %v17189_v6  ;;  %v11171_v47 = vpop.f32.mrb[41].mxu1  ;;  %11479 = vadd.xlane.f32.xlu1 %v11376_v16 }
 0x50e   : > { %v11172_v38 = vadd.f32 %v17189_v6, %v11171_v47  ;;  %v14189_v7 = vpop.f32.mrb[42].mxu1 }
 0x50f   : > { %v11308_v51 = vmax.f32 %v11180_v20, 0.0  ;;  %v11183_v46 = vadd.f32 %v14189_v7, %v17189_v6  ;;  %v11174_v50 = vpop.f32.mrb[43].mxu1  ;;  %11473 = vadd.xlane.f32.xlu0 %v11373_v39 }
 0x510   : > { %v11175_v4 = vadd.f32 %v17189_v6, %v11174_v50  ;;  %v11306_v58 = vmax.f32 %v11172_v38, 0.0 }
 0x511   : > { %v11309_v3 = vmax.f32 %v11183_v46, 0.0  ;;  %11475 = vadd.xlane.f32.xlu1 %v11374_v14  ;;  %v11379_v57 = vmul.f32 %v17196_v15, %v11308_v51 }
 0x512   : > { %v11307_v19 = vmax.f32 %v11175_v4, 0.0  ;;  %v11377_v52 = vmul.f32 %v17196_v15, %v11306_v58 }
 0x513   : > { %11485 = vadd.xlane.f32.xlu0 %v11379_v57  ;;  %v11380_v45 = vmul.f32 %v17196_v15, %v11309_v3 }
 0x514   : > { %v14192_v59 = vpop.f32.mrb[44].mxu1  ;;  %v11378_v24 = vmul.f32 %v17196_v15, %v11307_v19 }
 0x515   : > { %v11196_v18 = vadd.f32 %v14192_v59, %v17189_v6  ;;  %v11187_v44 = vpop.f32.mrb[45].mxu1  ;;  %11487 = vadd.xlane.f32.xlu1 %v11380_v45 }
 0x516   : > { %v11188_v35 = vadd.f32 %v17189_v6, %v11187_v44  ;;  %v14193_v2 = vpop.f32.mrb[46].mxu1 }
 0x517   : > { %v11312_v1 = vmax.f32 %v11196_v18, 0.0  ;;  %v11199_v17 = vadd.f32 %v14193_v2, %v17189_v6  ;;  %v11190_v12 = vpop.f32.mrb[47].mxu1  ;;  %11481 = vadd.xlane.f32.xlu0 %v11377_v52 }
 0x518   : > { %v11191_v29 = vadd.f32 %v17189_v6, %v11190_v12  ;;  %v11310_v42 = vmax.f32 %v11188_v35, 0.0 }
 0x519   : > { %v11313_v56 = vmax.f32 %v11199_v17, 0.0  ;;  %11483 = vadd.xlane.f32.xlu1 %v11378_v24  ;;  %v11383_v11 = vmul.f32 %v17196_v15, %v11312_v1 }
 0x51a   : > { %v11311_v0 = vmax.f32 %v11191_v29, 0.0  ;;  %v11381_v40 = vmul.f32 %v17196_v15, %v11310_v42 }
 0x51b   : > { %11493 = vadd.xlane.f32.xlu0 %v11383_v11  ;;  %v11384_v33 = vmul.f32 %v17196_v15, %v11313_v56 }
 0x51c   : > { %v14196_v31 = vpop.f32.mrb[48].mxu1  ;;  %v11382_v55 = vmul.f32 %v17196_v15, %v11311_v0 }
 0x51d   : > { %v11212_v54 = vadd.f32 %v14196_v31, %v17189_v6  ;;  %v11203_v41 = vpop.f32.mrb[49].mxu1  ;;  %11495 = vadd.xlane.f32.xlu1 %v11384_v33 }
 0x51e   : > { %v11204_v27 = vadd.f32 %v17189_v6, %v11203_v41  ;;  %v14197_v30 = vpop.f32.mrb[50].mxu1 }
 0x51f   : > { %v11316_v25 = vmax.f32 %v11212_v54, 0.0  ;;  %v11215_v63 = vadd.f32 %v14197_v30, %v17189_v6  ;;  %v11206_v21 = vpop.f32.mrb[51].mxu1  ;;  %11489 = vadd.xlane.f32.xlu0 %v11381_v40 }
 0x520   : > { %v11207_v62 = vadd.f32 %v17189_v6, %v11206_v21  ;;  %v11314_v32 = vmax.f32 %v11204_v27, 0.0  ;;  %v17324_v27 = vld [vmem:[#allocation2] ss:$0 sm:$0xff] }
 0x521   : > { %v11317_v8 = vmax.f32 %v11215_v63, 0.0  ;;  %11491 = vadd.xlane.f32.xlu1 %v11382_v55  ;;  %v11387_v49 = vmul.f32 %v17196_v15, %v11316_v25 }
 0x522   : > { %v11315_v10 = vmax.f32 %v11207_v62, 0.0  ;;  %v11385_v28 = vmul.f32 %v17196_v15, %v11314_v32 }
 0x523   : > { %11501 = vadd.xlane.f32.xlu0 %v11387_v49  ;;  %v11388_v61 = vmul.f32 %v17196_v15, %v11317_v8 }
 0x524   : > { %v14200_v26 = vpop.f32.mrb[52].mxu1  ;;  %v11386_v60 = vmul.f32 %v17196_v15, %v11315_v10 }
 0x525   : > { %v11228_v22 = vadd.f32 %v14200_v26, %v17189_v6  ;;  %v11219_v9 = vpop.f32.mrb[53].mxu1  ;;  %11503 = vadd.xlane.f32.xlu1 %v11388_v61 }
 0x526   : > { %v11220_v34 = vadd.f32 %v17189_v6, %v11219_v9  ;;  %v14201_v13 = vpop.f32.mrb[54].mxu1 }
 0x527   : > { %v11320_v23 = vmax.f32 %v11228_v22, 0.0  ;;  %v11231_v37 = vadd.f32 %v14201_v13, %v17189_v6  ;;  %v11222_v36 = vpop.f32.mrb[55].mxu1  ;;  %11497 = vadd.xlane.f32.xlu0 %v11385_v28 }
 0x528   : > { %v11223_v48 = vadd.f32 %v17189_v6, %v11222_v36  ;;  %v11318_v5 = vmax.f32 %v11220_v34, 0.0 }
 0x529   : > { %v11321_v53 = vmax.f32 %v11231_v37, 0.0  ;;  %11499 = vadd.xlane.f32.xlu1 %v11386_v60  ;;  %v11391_v16 = vmul.f32 %v17196_v15, %v11320_v23 }
 0x52a   : > { %v11319_v43 = vmax.f32 %v11223_v48, 0.0  ;;  %v11389_v7 = vmul.f32 %v17196_v15, %v11318_v5 }
 0x52b   : > { %11509 = vadd.xlane.f32.xlu0 %v11391_v16  ;;  %v11392_v20 = vmul.f32 %v17196_v15, %v11321_v53 }
 0x52c   : > { %v14204_v47 = vpop.f32.mrb[56].mxu1  ;;  %v11390_v58 = vmul.f32 %v17196_v15, %v11319_v43 }
 0x52d   : > { %v11244_v39 = vadd.f32 %v14204_v47, %v17189_v6  ;;  %v11235_v38 = vpop.f32.mrb[57].mxu1  ;;  %11511 = vadd.xlane.f32.xlu1 %v11392_v20 }
 0x52e   : > { %v11236_v51 = vadd.f32 %v17189_v6, %v11235_v38  ;;  %v14205_v46 = vpop.f32.mrb[58].mxu1 }
 0x52f   : > { %v11324_v50 = vmax.f32 %v11244_v39, 0.0  ;;  %v11247_v14 = vadd.f32 %v14205_v46, %v17189_v6  ;;  %v11238_v4 = vpop.f32.mrb[59].mxu1  ;;  %11505 = vadd.xlane.f32.xlu0 %v11389_v7 }
 0x530   : > { %v11239_v3 = vadd.f32 %v17189_v6, %v11238_v4  ;;  %v11322_v57 = vmax.f32 %v11236_v51, 0.0 }
 0x531   : > { %v11325_v19 = vmax.f32 %v11247_v14, 0.0  ;;  %11507 = vadd.xlane.f32.xlu1 %v11390_v58  ;;  %v11395_v45 = vmul.f32 %v17196_v15, %v11324_v50 }
 0x532   : > { %v11323_v59 = vmax.f32 %v11239_v3, 0.0  ;;  %v11393_v35 = vmul.f32 %v17196_v15, %v11322_v57 }
 0x533   : > { %11517 = vadd.xlane.f32.xlu0 %v11395_v45  ;;  %v11396_v18 = vmul.f32 %v17196_v15, %v11325_v19 }
 0x534   : > { %v14208_v44 = vpop.f32.mrb[60].mxu1  ;;  %v11394_v24 = vmul.f32 %v17196_v15, %v11323_v59 }
 0x535   : > { %v11251_v52 = vpop.f32.mrb[61].mxu1  ;;  %11519 = vadd.xlane.f32.xlu1 %v11396_v18  ;;  %v11260_v2 = vadd.f32 %v14208_v44, %v17189_v6 }
 0x536   : > { %v11252_v1 = vadd.f32 %v17189_v6, %v11251_v52  ;;  %v14209_v17 = vpop.f32.mrb[62].mxu1 }
 0x537   : > { %v11254_v12 = vpop.f32.mrb[63].mxu1  ;;  %11513 = vadd.xlane.f32.xlu0 %v11393_v35  ;;  %v11263_v42 = vadd.f32 %v14209_v17, %v17189_v6  ;;  %v11328_v11 = vmax.f32 %v11260_v2, 0.0 }
 0x538   : > { %v11326_v29 = vmax.f32 %v11252_v1, 0.0  ;;  %v11255_v56 = vadd.f32 %v17189_v6, %v11254_v12 }
 0x539   : > { %11515 = vadd.xlane.f32.xlu1 %v11394_v24  ;;  %v11329_v31 = vmax.f32 %v11263_v42, 0.0  ;;  %v11399_v41 = vmul.f32 %v17196_v15, %v11328_v11 }
 0x53a   : > { %v11327_v0 = vmax.f32 %v11255_v56, 0.0  ;;  %v11397_v33 = vmul.f32 %v17196_v15, %v11326_v29 }
 0x53b   : > { %v11400_v40 = vmul.f32 %v17196_v15, %v11329_v31 }
 0x53c   : > { %11521 = vadd.xlane.f32.xlu0 %v11397_v33  ;;  %v11398_v54 = vmul.f32 %v17196_v15, %v11327_v0 }
 0x53e   : > { %11523 = vadd.xlane.f32.xlu1 %v11398_v54 }
 0x540   : > { %11525 = vadd.xlane.f32.xlu0 %v11399_v41 }
 0x542   : > { %11527 = vadd.xlane.f32.xlu1 %v11400_v40 }
 0x54f   : > { %v11406_v30 = vpop.xlane.xlu1 %11405 }
 0x550   : > { %v11538_v6 = vadd.f32 %v17324_v27, %v11406_v30  ;;  %v11402_v25 = vpop.xlane.xlu0 %11401 }
 0x551   : > { %v11536_v63 = vadd.f32 %v17324_v27, %v11402_v25 }
 0x552   : > { %v13113_v21 = vmul.f32 -1.442695, %v11538_v6 }
 0x553   : > { %v13111_v55 = vmul.f32 -1.442695, %v11536_v63  ;;  %v11408_v62 = vpop.xlane.xlu1 %11407 }
 0x554   : > { %14514 = vpow2.f32 %v13113_v21  ;;  %v11539_v32 = vadd.f32 %v17324_v27, %v11408_v62  ;;  %v11404_v8 = vpop.xlane.xlu0 %11403 }
 0x555   : > { %14516 = vpow2.f32 %v13111_v55  ;;  %v11537_v15 = vadd.f32 %v17324_v27, %v11404_v8 }
 0x556   : > { %v13114_v49 = vmul.f32 -1.442695, %v11539_v32 }
 0x557   : > { %v13112_v10 = vmul.f32 -1.442695, %v11537_v15 }
 0x558   : > { %14518 = vpow2.f32 %v13114_v49  ;;  %v11414_v61 = vpop.xlane.xlu0 %11413 }
 0x559   : > { %14520 = vpow2.f32 %v13112_v10  ;;  %v11542_v26 = vadd.f32 %v17324_v27, %v11414_v61 }
 0x55a   : > { %v11416_v22 = vpop.xlane.xlu1 %11415 }
 0x55b   : > { %v13117_v9 = vmul.f32 -1.442695, %v11542_v26  ;;  %v11543_v28 = vadd.f32 %v17324_v27, %v11416_v22 }
 0x55c   : > { %v11410_v34 = vpop.xlane.xlu0 %11409 }
 0x55d   : > { %14522 = vpow2.f32 %v13117_v9  ;;  %v13118_v13 = vmul.f32 -1.442695, %v11543_v28  ;;  %v11540_v23 = vadd.f32 %v17324_v27, %v11410_v34 }
 0x55e   : > { %v14515_v37 = vpop.eup %14514  ;;  %v11412_v36 = vpop.xlane.xlu1 %11411 }
 0x55f   : > { %v14517_v60 = vpop.eup %14516  ;;  %v11794_v48 = vadd.f32 1.0, %v14515_v37  ;;  %14524 = vpow2.f32 %v13118_v13  ;;  %v13115_v5 = vmul.f32 -1.442695, %v11540_v23  ;;  %v11541_v53 = vadd.f32 %v17324_v27, %v11412_v36 }
 0x560   : > { %v11792_v16 = vadd.f32 1.0, %v14517_v60  ;;  %v11422_v43 = vpop.xlane.xlu0 %11421 }
 0x561   : > { %14526 = vrcp.f32 %v11794_v48  ;;  %v13116_v20 = vmul.f32 -1.442695, %v11541_v53  ;;  %v11546_v47 = vadd.f32 %v17324_v27, %v11422_v43 }
 0x562   : > { %v14519_v39 = vpop.eup %14518  ;;  %14528 = vrcp.f32 %v11792_v16  ;;  %v11424_v38 = vpop.xlane.xlu1 %11423 }
 0x563   : > { %v14521_v7 = vpop.eup %14520  ;;  %v11795_v51 = vadd.f32 1.0, %v14519_v39  ;;  %14530 = vpow2.f32 %v13115_v5  ;;  %v13121_v46 = vmul.f32 -1.442695, %v11546_v47  ;;  %v11547_v50 = vadd.f32 %v17324_v27, %v11424_v38 }
 0x564   : > { %v11793_v14 = vadd.f32 1.0, %v14521_v7  ;;  %14532 = vpow2.f32 %v13116_v20  ;;  %v11418_v4 = vpop.xlane.xlu0 %11417 }
 0x565   : > { %14534 = vrcp.f32 %v11795_v51  ;;  %v13122_v58 = vmul.f32 -1.442695, %v11547_v50  ;;  %v11544_v3 = vadd.f32 %v17324_v27, %v11418_v4 }
 0x566   : > { %14536 = vrcp.f32 %v11793_v14  ;;  %v11420_v57 = vpop.xlane.xlu1 %11419 }
 0x567   : > { %v14523_v19 = vpop.eup %14522  ;;  %14538 = vpow2.f32 %v13121_v46  ;;  %v13119_v45 = vmul.f32 -1.442695, %v11544_v3  ;;  %v11545_v59 = vadd.f32 %v17324_v27, %v11420_v57 }
 0x568   : > { %v11798_v18 = vadd.f32 1.0, %v14523_v19  ;;  %14540 = vpow2.f32 %v13122_v58  ;;  %v11430_v44 = vpop.xlane.xlu0 %11429 }
 0x569   : > { %v14525_v52 = vpop.eup %14524  ;;  %14542 = vpow2.f32 %v13119_v45  ;;  %v13120_v35 = vmul.f32 -1.442695, %v11545_v59  ;;  %v11550_v2 = vadd.f32 %v17324_v27, %v11430_v44 }
 0x56a   : > { %14544 = vrcp.f32 %v11798_v18  ;;  %v11799_v1 = vadd.f32 1.0, %v14525_v52  ;;  %v11432_v17 = vpop.xlane.xlu1 %11431 }
 0x56b   : > { %v14527_v12 = vpop.eup %14526  ;;  %14546 = vpow2.f32 %v13120_v35  ;;  %v13125_v24 = vmul.f32 -1.442695, %v11550_v2  ;;  %v11551_v29 = vadd.f32 %v17324_v27, %v11432_v17 }
 0x56c   : > { %v14529_v42 = vpop.eup %14528  ;;  %11987 = vst.msk [vmem:[%s17343_s30 + $0x10] sm:$0xff] %vm11984_vm2, %v14527_v12  ;;  %14548 = vrcp.f32 %v11799_v1  ;;  %v11426_v56 = vpop.xlane.xlu0 %11425 }
 0x56d   : > { %v14531_v11 = vpop.eup %14530  ;;  %11985 = vst.msk [vmem:[%s17343_s30] sm:$0xff] %vm11984_vm2, %v14529_v42  ;;  %14550 = vpow2.f32 %v13125_v24  ;;  %v13126_v0 = vmul.f32 -1.442695, %v11551_v29  ;;  %v11548_v33 = vadd.f32 %v17324_v27, %v11426_v56 }
 0x56e   : > { %v14533_v31 = vpop.eup %14532  ;;  %v11796_v54 = vadd.f32 1.0, %v14531_v11  ;;  %v11428_v41 = vpop.xlane.xlu1 %11427 }
 0x56f   : > { %v14535_v40 = vpop.eup %14534  ;;  %v11797_v30 = vadd.f32 1.0, %v14533_v31  ;;  %14552 = vpow2.f32 %v13126_v0  ;;  %v13123_v6 = vmul.f32 -1.442695, %v11548_v33  ;;  %v11549_v25 = vadd.f32 %v17324_v27, %v11428_v41 }
 0x570   : > { %v14537_v63 = vpop.eup %14536  ;;  %11988 = vst.msk [vmem:[%s17343_s30 + $0x18] sm:$0xff] %vm11984_vm2, %v14535_v40  ;;  %14554 = vrcp.f32 %v11796_v54  ;;  %v11438_v21 = vpop.xlane.xlu0 %11437 }
 0x571   : > { %v14539_v55 = vpop.eup %14538  ;;  %11986 = vst.msk [vmem:[%s17343_s30 + $0x8] sm:$0xff] %vm11984_vm2, %v14537_v63  ;;  %14556 = vrcp.f32 %v11797_v30  ;;  %v13124_v62 = vmul.f32 -1.442695, %v11549_v25  ;;  %v11554_v32 = vadd.f32 %v17324_v27, %v11438_v21 }
 0x572   : > { %v14541_v8 = vpop.eup %14540  ;;  %v11802_v15 = vadd.f32 1.0, %v14539_v55  ;;  %14558 = vpow2.f32 %v13123_v6  ;;  %v11440_v49 = vpop.xlane.xlu1 %11439 }
 0x573   : > { %v14543_v10 = vpop.eup %14542  ;;  %v11803_v61 = vadd.f32 1.0, %v14541_v8  ;;  %14560 = vpow2.f32 %v13124_v62  ;;  %v13129_v26 = vmul.f32 -1.442695, %v11554_v32  ;;  %v11555_v22 = vadd.f32 %v17324_v27, %v11440_v49 }
 0x574   : > { %v14545_v9 = vpop.eup %14544  ;;  %14562 = vrcp.f32 %v11802_v15  ;;  %v11800_v28 = vadd.f32 1.0, %v14543_v10  ;;  %v11434_v34 = vpop.xlane.xlu0 %11433 }
 0x575   : > { %v14547_v13 = vpop.eup %14546  ;;  %11991 = vst.msk [vmem:[%s17343_s30 + $0x30] sm:$0xff] %vm11984_vm2, %v14545_v9  ;;  %14564 = vrcp.f32 %v11803_v61  ;;  %v13130_v23 = vmul.f32 -1.442695, %v11555_v22  ;;  %v11552_v37 = vadd.f32 %v17324_v27, %v11434_v34 }
 0x576   : > { %v14549_v36 = vpop.eup %14548  ;;  %14566 = vrcp.f32 %v11800_v28  ;;  %v11801_v60 = vadd.f32 1.0, %v14547_v13  ;;  %v11436_v48 = vpop.xlane.xlu1 %11435 }
 0x577   : > { %v14551_v5 = vpop.eup %14550  ;;  %11992 = vst.msk [vmem:[%s17343_s30 + $0x38] sm:$0xff] %vm11984_vm2, %v14549_v36  ;;  %14568 = vpow2.f32 %v13129_v26  ;;  %v13127_v53 = vmul.f32 -1.442695, %v11552_v37  ;;  %v11553_v16 = vadd.f32 %v17324_v27, %v11436_v48 }
 0x578   : > { %14570 = vrcp.f32 %v11801_v60  ;;  %v11806_v43 = vadd.f32 1.0, %v14551_v5  ;;  %v11446_v20 = vpop.xlane.xlu0 %11445 }
 0x579   : > { %v14553_v47 = vpop.eup %14552  ;;  %14572 = vpow2.f32 %v13130_v23  ;;  %v13128_v39 = vmul.f32 -1.442695, %v11553_v16  ;;  %v11558_v38 = vadd.f32 %v17324_v27, %v11446_v20 }
 0x57a   : > { %v14555_v7 = vpop.eup %14554  ;;  %14574 = vrcp.f32 %v11806_v43  ;;  %v11807_v51 = vadd.f32 1.0, %v14553_v47  ;;  %v11448_v46 = vpop.xlane.xlu1 %11447 }
 0x57b   : > { %v14557_v50 = vpop.eup %14556  ;;  %11989 = vst.msk [vmem:[%s17343_s30 + $0x20] sm:$0xff] %vm11984_vm2, %v14555_v7  ;;  %14576 = vpow2.f32 %v13127_v53  ;;  %v13133_v14 = vmul.f32 -1.442695, %v11558_v38  ;;  %v11559_v4 = vadd.f32 %v17324_v27, %v11448_v46 }
 0x57c   : > { %v14559_v58 = vpop.eup %14558  ;;  %11990 = vst.msk [vmem:[%s17343_s30 + $0x28] sm:$0xff] %vm11984_vm2, %v14557_v50  ;;  %14578 = vrcp.f32 %v11807_v51  ;;  %v11442_v3 = vpop.xlane.xlu0 %11441 }
 0x57d   : > { %v14561_v57 = vpop.eup %14560  ;;  %v11804_v19 = vadd.f32 1.0, %v14559_v58  ;;  %14580 = vpow2.f32 %v13128_v39  ;;  %v13134_v45 = vmul.f32 -1.442695, %v11559_v4  ;;  %v11556_v59 = vadd.f32 %v17324_v27, %v11442_v3 }
 0x57e   : > { %v14563_v18 = vpop.eup %14562  ;;  %v11805_v44 = vadd.f32 1.0, %v14561_v57  ;;  %14582 = vpow2.f32 %v13133_v14  ;;  %v11444_v52 = vpop.xlane.xlu1 %11443 }
 0x57f   : > { %v14565_v35 = vpop.eup %14564  ;;  %11995 = vst.msk [vmem:[%s17343_s30 + $0x50] sm:$0xff] %vm11984_vm2, %v14563_v18  ;;  %14584 = vrcp.f32 %v11804_v19  ;;  %v13131_v2 = vmul.f32 -1.442695, %v11556_v59  ;;  %v11557_v1 = vadd.f32 %v17324_v27, %v11444_v52 }
 0x580   : > { %v14567_v17 = vpop.eup %14566  ;;  %11996 = vst.msk [vmem:[%s17343_s30 + $0x58] sm:$0xff] %vm11984_vm2, %v14565_v35  ;;  %14586 = vrcp.f32 %v11805_v44  ;;  %v11454_v12 = vpop.xlane.xlu0 %11453 }
 0x581   : > { %v14569_v24 = vpop.eup %14568  ;;  %11993 = vst.msk [vmem:[%s17343_s30 + $0x40] sm:$0xff] %vm11984_vm2, %v14567_v17  ;;  %14588 = vpow2.f32 %v13134_v45  ;;  %v13132_v29 = vmul.f32 -1.442695, %v11557_v1  ;;  %v11562_v42 = vadd.f32 %v17324_v27, %v11454_v12 }
 0x582   : > { %v14571_v56 = vpop.eup %14570  ;;  %v11810_v11 = vadd.f32 1.0, %v14569_v24  ;;  %14590 = vpow2.f32 %v13131_v2  ;;  %v11456_v0 = vpop.xlane.xlu1 %11455 }
 0x583   : > { %v14573_v33 = vpop.eup %14572  ;;  %11994 = vst.msk [vmem:[%s17343_s30 + $0x48] sm:$0xff] %vm11984_vm2, %v14571_v56  ;;  %14592 = vpow2.f32 %v13132_v29  ;;  %v13137_v31 = vmul.f32 -1.442695, %v11562_v42  ;;  %v11563_v54 = vadd.f32 %v17324_v27, %v11456_v0 }
 0x584   : > { %v14575_v41 = vpop.eup %14574  ;;  %14594 = vrcp.f32 %v11810_v11  ;;  %v11811_v40 = vadd.f32 1.0, %v14573_v33  ;;  %v11450_v30 = vpop.xlane.xlu0 %11449 }
 0x585   : > { %v14577_v6 = vpop.eup %14576  ;;  %11999 = vst.msk [vmem:[%s17343_s30 + $0x70] sm:$0xff] %vm11984_vm2, %v14575_v41  ;;  %14596 = vpow2.f32 %v13137_v31  ;;  %v13138_v25 = vmul.f32 -1.442695, %v11563_v54  ;;  %v11560_v63 = vadd.f32 %v17324_v27, %v11450_v30 }
 0x586   : > { %v14579_v21 = vpop.eup %14578  ;;  %14598 = vrcp.f32 %v11811_v40  ;;  %v11808_v55 = vadd.f32 1.0, %v14577_v6  ;;  %v11452_v62 = vpop.xlane.xlu1 %11451 }
 0x587   : > { %v14581_v32 = vpop.eup %14580  ;;  %12000 = vst.msk [vmem:[%s17343_s30 + $0x78] sm:$0xff] %vm11984_vm2, %v14579_v21  ;;  %14600 = vpow2.f32 %v13138_v25  ;;  %v13135_v8 = vmul.f32 -1.442695, %v11560_v63  ;;  %v11561_v15 = vadd.f32 %v17324_v27, %v11452_v62 }
 0x588   : > { %v14583_v49 = vpop.eup %14582  ;;  %14602 = vrcp.f32 %v11808_v55  ;;  %v11809_v10 = vadd.f32 1.0, %v14581_v32  ;;  %v11462_v61 = vpop.xlane.xlu0 %11461 }
 0x589   : > { %v14585_v26 = vpop.eup %14584  ;;  %v11814_v22 = vadd.f32 1.0, %v14583_v49  ;;  %14604 = vpow2.f32 %v13135_v8  ;;  %v13136_v9 = vmul.f32 -1.442695, %v11561_v15  ;;  %v11566_v28 = vadd.f32 %v17324_v27, %v11462_v61 }
 0x58a   : > { %v14587_v34 = vpop.eup %14586  ;;  %11997 = vst.msk [vmem:[%s17343_s30 + $0x60] sm:$0xff] %vm11984_vm2, %v14585_v26  ;;  %14606 = vrcp.f32 %v11809_v10  ;;  %v11464_v13 = vpop.xlane.xlu1 %11463 }
 0x58b   : > { %v14589_v23 = vpop.eup %14588  ;;  %11998 = vst.msk [vmem:[%s17343_s30 + $0x68] sm:$0xff] %vm11984_vm2, %v14587_v34  ;;  %14608 = vrcp.f32 %v11814_v22  ;;  %v13141_v37 = vmul.f32 -1.442695, %v11566_v28  ;;  %v11567_v36 = vadd.f32 %v17324_v27, %v11464_v13 }
 0x58c   : > { %v14591_v60 = vpop.eup %14590  ;;  %v11815_v48 = vadd.f32 1.0, %v14589_v23  ;;  %14610 = vpow2.f32 %v13136_v9  ;;  %v11458_v5 = vpop.xlane.xlu0 %11457 }
 0x58d   : > { %v14593_v53 = vpop.eup %14592  ;;  %v11812_v16 = vadd.f32 1.0, %v14591_v60  ;;  %14612 = vpow2.f32 %v13141_v37  ;;  %v13142_v43 = vmul.f32 -1.442695, %v11567_v36  ;;  %v11564_v20 = vadd.f32 %v17324_v27, %v11458_v5 }
 0x58e   : > { %v14595_v47 = vpop.eup %14594  ;;  %14614 = vrcp.f32 %v11815_v48  ;;  %v11813_v39 = vadd.f32 1.0, %v14593_v53  ;;  %v11460_v38 = vpop.xlane.xlu1 %11459 }
 0x58f   : > { %v14597_v7 = vpop.eup %14596  ;;  %12003 = vst.msk [vmem:[%s17343_s30 + $0x90] sm:$0xff] %vm11984_vm2, %v14595_v47  ;;  %14616 = vrcp.f32 %v11812_v16  ;;  %v13139_v51 = vmul.f32 -1.442695, %v11564_v20  ;;  %v11565_v46 = vadd.f32 %v17324_v27, %v11460_v38 }
 0x590   : > { %v14599_v50 = vpop.eup %14598  ;;  %14618 = vrcp.f32 %v11813_v39  ;;  %v11818_v14 = vadd.f32 1.0, %v14597_v7  ;;  %v11470_v4 = vpop.xlane.xlu0 %11469 }
 0x591   : > { %v14601_v58 = vpop.eup %14600  ;;  %12004 = vst.msk [vmem:[%s17343_s30 + $0x98] sm:$0xff] %vm11984_vm2, %v14599_v50  ;;  %14620 = vpow2.f32 %v13142_v43  ;;  %v13140_v3 = vmul.f32 -1.442695, %v11565_v46  ;;  %v11570_v57 = vadd.f32 %v17324_v27, %v11470_v4 }
 0x592   : > { %v14603_v19 = vpop.eup %14602  ;;  %14622 = vrcp.f32 %v11818_v14  ;;  %v11819_v45 = vadd.f32 1.0, %v14601_v58  ;;  %v11472_v59 = vpop.xlane.xlu1 %11471 }
 0x593   : > { %v14605_v18 = vpop.eup %14604  ;;  %12001 = vst.msk [vmem:[%s17343_s30 + $0x80] sm:$0xff] %vm11984_vm2, %v14603_v19  ;;  %14624 = vpow2.f32 %v13139_v51  ;;  %v13145_v44 = vmul.f32 -1.442695, %v11570_v57  ;;  %v11571_v52 = vadd.f32 %v17324_v27, %v11472_v59 }
 0x594   : > { %v14607_v35 = vpop.eup %14606  ;;  %14626 = vrcp.f32 %v11819_v45  ;;  %v11816_v2 = vadd.f32 1.0, %v14605_v18  ;;  %v11466_v1 = vpop.xlane.xlu0 %11465 }
 0x595   : > { %v14609_v17 = vpop.eup %14608  ;;  %12002 = vst.msk [vmem:[%s17343_s30 + $0x88] sm:$0xff] %vm11984_vm2, %v14607_v35  ;;  %14628 = vpow2.f32 %v13140_v3  ;;  %v13146_v12 = vmul.f32 -1.442695, %v11571_v52  ;;  %v11568_v24 = vadd.f32 %v17324_v27, %v11466_v1 }
 0x596   : > { %v14611_v29 = vpop.eup %14610  ;;  %12007 = vst.msk [vmem:[%s17343_s30 + $0xb0] sm:$0xff] %vm11984_vm2, %v14609_v17  ;;  %14630 = vrcp.f32 %v11816_v2  ;;  %v11468_v42 = vpop.xlane.xlu1 %11467 }
 0x597   : > { %v14613_v56 = vpop.eup %14612  ;;  %v11817_v11 = vadd.f32 1.0, %v14611_v29  ;;  %14632 = vpow2.f32 %v13145_v44  ;;  %v13143_v0 = vmul.f32 -1.442695, %v11568_v24  ;;  %v11569_v33 = vadd.f32 %v17324_v27, %v11468_v42 }
 0x598   : > { %v14615_v31 = vpop.eup %14614  ;;  %v11822_v54 = vadd.f32 1.0, %v14613_v56  ;;  %14634 = vpow2.f32 %v13146_v12  ;;  %v11478_v41 = vpop.xlane.xlu0 %11477 }
 0x599   : > { %v14617_v40 = vpop.eup %14616  ;;  %12008 = vst.msk [vmem:[%s17343_s30 + $0xb8] sm:$0xff] %vm11984_vm2, %v14615_v31  ;;  %14636 = vrcp.f32 %v11817_v11  ;;  %v13144_v30 = vmul.f32 -1.442695, %v11569_v33  ;;  %v11574_v6 = vadd.f32 %v17324_v27, %v11478_v41 }
 0x59a   : > { %v14619_v25 = vpop.eup %14618  ;;  %12005 = vst.msk [vmem:[%s17343_s30 + $0xa0] sm:$0xff] %vm11984_vm2, %v14617_v40  ;;  %14638 = vrcp.f32 %v11822_v54  ;;  %v11480_v63 = vpop.xlane.xlu1 %11479 }
 0x59b   : > { %v14621_v21 = vpop.eup %14620  ;;  %12006 = vst.msk [vmem:[%s17343_s30 + $0xa8] sm:$0xff] %vm11984_vm2, %v14619_v25  ;;  %14640 = vpow2.f32 %v13143_v0  ;;  %v13149_v55 = vmul.f32 -1.442695, %v11574_v6  ;;  %v11575_v62 = vadd.f32 %v17324_v27, %v11480_v63 }
 0x59c   : > { %v14623_v32 = vpop.eup %14622  ;;  %v11823_v8 = vadd.f32 1.0, %v14621_v21  ;;  %14642 = vpow2.f32 %v13144_v30  ;;  %v11474_v15 = vpop.xlane.xlu0 %11473 }
 0x59d   : > { %v14625_v49 = vpop.eup %14624  ;;  %12011 = vst.msk [vmem:[%s17343_s30 + $0xd0] sm:$0xff] %vm11984_vm2, %v14623_v32  ;;  %14644 = vpow2.f32 %v13149_v55  ;;  %v13150_v10 = vmul.f32 -1.442695, %v11575_v62  ;;  %v11572_v61 = vadd.f32 %v17324_v27, %v11474_v15 }
 0x59e   : > { %v14627_v26 = vpop.eup %14626  ;;  %14646 = vrcp.f32 %v11823_v8  ;;  %v11820_v22 = vadd.f32 1.0, %v14625_v49  ;;  %v11476_v9 = vpop.xlane.xlu1 %11475 }
 0x59f   : > { %v14629_v28 = vpop.eup %14628  ;;  %12012 = vst.msk [vmem:[%s17343_s30 + $0xd8] sm:$0xff] %vm11984_vm2, %v14627_v26  ;;  %14648 = vpow2.f32 %v13150_v10  ;;  %v13147_v34 = vmul.f32 -1.442695, %v11572_v61  ;;  %v11573_v13 = vadd.f32 %v17324_v27, %v11476_v9 }
 0x5a0   : > { %v14631_v23 = vpop.eup %14630  ;;  %14650 = vrcp.f32 %v11820_v22  ;;  %v11821_v37 = vadd.f32 1.0, %v14629_v28  ;;  %v11486_v36 = vpop.xlane.xlu0 %11485 }
 0x5a1   : > { %v14633_v60 = vpop.eup %14632  ;;  %12009 = vst.msk [vmem:[%s17343_s30 + $0xc0] sm:$0xff] %vm11984_vm2, %v14631_v23  ;;  %14652 = vpow2.f32 %v13147_v34  ;;  %v13148_v48 = vmul.f32 -1.442695, %v11573_v13  ;;  %v11578_v5 = vadd.f32 %v17324_v27, %v11486_v36 }
 0x5a2   : > { %v14635_v53 = vpop.eup %14634  ;;  %14654 = vrcp.f32 %v11821_v37  ;;  %v11826_v16 = vadd.f32 1.0, %v14633_v60  ;;  %v11488_v43 = vpop.xlane.xlu1 %11487 }
 0x5a3   : > { %v14637_v20 = vpop.eup %14636  ;;  %v11827_v47 = vadd.f32 1.0, %v14635_v53  ;;  %14656 = vpow2.f32 %v13148_v48  ;;  %v13153_v39 = vmul.f32 -1.442695, %v11578_v5  ;;  %v11579_v38 = vadd.f32 %v17324_v27, %v11488_v43 }
 0x5a4   : > { %v14639_v7 = vpop.eup %14638  ;;  %12010 = vst.msk [vmem:[%s17343_s30 + $0xc8] sm:$0xff] %vm11984_vm2, %v14637_v20  ;;  %14658 = vrcp.f32 %v11826_v16  ;;  %v11482_v51 = vpop.xlane.xlu0 %11481 }
 0x5a5   : > { %v14641_v46 = vpop.eup %14640  ;;  %12015 = vst.msk [vmem:[%s17343_s30 + $0xf0] sm:$0xff] %vm11984_vm2, %v14639_v7  ;;  %14660 = vrcp.f32 %v11827_v47  ;;  %v13154_v50 = vmul.f32 -1.442695, %v11579_v38  ;;  %v11576_v14 = vadd.f32 %v17324_v27, %v11482_v51 }
 0x5a6   : > { %v14643_v4 = vpop.eup %14642  ;;  %v11824_v58 = vadd.f32 1.0, %v14641_v46  ;;  %14662 = vpow2.f32 %v13153_v39  ;;  %v11484_v3 = vpop.xlane.xlu1 %11483 }
 0x5a7   : > { %v14645_v57 = vpop.eup %14644  ;;  %v11825_v19 = vadd.f32 1.0, %v14643_v4  ;;  %14664 = vpow2.f32 %v13154_v50  ;;  %v13151_v45 = vmul.f32 -1.442695, %v11576_v14  ;;  %v11577_v59 = vadd.f32 %v17324_v27, %v11484_v3 }
 0x5a8   : > { %v14647_v18 = vpop.eup %14646  ;;  %14666 = vrcp.f32 %v11824_v58  ;;  %v11830_v44 = vadd.f32 1.0, %v14645_v57  ;;  %v11494_v52 = vpop.xlane.xlu0 %11493 }
 0x5a9   : > { %v14649_v35 = vpop.eup %14648  ;;  %12016 = vst.msk [vmem:[%s17343_s30 + $0xf8] sm:$0xff] %vm11984_vm2, %v14647_v18  ;;  %14668 = vrcp.f32 %v11825_v19  ;;  %v13152_v2 = vmul.f32 -1.442695, %v11577_v59  ;;  %v11582_v1 = vadd.f32 %v17324_v27, %v11494_v52 }
 0x5aa   : > { %v14651_v17 = vpop.eup %14650  ;;  %14670 = vrcp.f32 %v11830_v44  ;;  %v11831_v12 = vadd.f32 1.0, %v14649_v35  ;;  %v11496_v24 = vpop.xlane.xlu1 %11495 }
 0x5ab   : > { %v14653_v29 = vpop.eup %14652  ;;  %12013 = vst.msk [vmem:[%s17343_s30 + $0xe0] sm:$0xff] %vm11984_vm2, %v14651_v17  ;;  %14672 = vpow2.f32 %v13151_v45  ;;  %v13157_v42 = vmul.f32 -1.442695, %v11582_v1  ;;  %v11583_v56 = vadd.f32 %v17324_v27, %v11496_v24 }
 0x5ac   : > { %v14655_v11 = vpop.eup %14654  ;;  %14674 = vrcp.f32 %v11831_v12  ;;  %v11828_v0 = vadd.f32 1.0, %v14653_v29  ;;  %v11490_v33 = vpop.xlane.xlu0 %11489 }
 0x5ad   : > { %v14657_v31 = vpop.eup %14656  ;;  %12014 = vst.msk [vmem:[%s17343_s30 + $0xe8] sm:$0xff] %vm11984_vm2, %v14655_v11  ;;  %14676 = vpow2.f32 %v13152_v2  ;;  %v13158_v54 = vmul.f32 -1.442695, %v11583_v56  ;;  %v11580_v41 = vadd.f32 %v17324_v27, %v11490_v33 }
 0x5ae   : > { %v14659_v40 = vpop.eup %14658  ;;  %14678 = vrcp.f32 %v11828_v0  ;;  %v11829_v30 = vadd.f32 1.0, %v14657_v31  ;;  %v11492_v6 = vpop.xlane.xlu1 %11491 }
 0x5af   : > { %v14661_v25 = vpop.eup %14660  ;;  %12019 = vst.msk [vmem:[%s17343_s30 + $0x110] sm:$0xff] %vm11984_vm2, %v14659_v40  ;;  %14680 = vpow2.f32 %v13157_v42  ;;  %v13155_v63 = vmul.f32 -1.442695, %v11580_v41  ;;  %v11581_v21 = vadd.f32 %v17324_v27, %v11492_v6 }
 0x5b0   : > { %v14663_v55 = vpop.eup %14662  ;;  %12020 = vst.msk [vmem:[%s17343_s30 + $0x118] sm:$0xff] %vm11984_vm2, %v14661_v25  ;;  %14682 = vrcp.f32 %v11829_v30  ;;  %v11502_v62 = vpop.xlane.xlu0 %11501 }
 0x5b1   : > { %v14665_v32 = vpop.eup %14664  ;;  %v11834_v8 = vadd.f32 1.0, %v14663_v55  ;;  %14684 = vpow2.f32 %v13158_v54  ;;  %v13156_v15 = vmul.f32 -1.442695, %v11581_v21  ;;  %v11586_v49 = vadd.f32 %v17324_v27, %v11502_v62 }
 0x5b2   : > { %v14667_v10 = vpop.eup %14666  ;;  %v11835_v61 = vadd.f32 1.0, %v14665_v32  ;;  %14686 = vpow2.f32 %v13155_v63  ;;  %v11504_v26 = vpop.xlane.xlu1 %11503 }
 0x5b3   : > { %v14669_v22 = vpop.eup %14668  ;;  %12017 = vst.msk [vmem:[%s17343_s30 + $0x100] sm:$0xff] %vm11984_vm2, %v14667_v10  ;;  %14688 = vrcp.f32 %v11834_v8  ;;  %v13161_v9 = vmul.f32 -1.442695, %v11586_v49  ;;  %v11587_v28 = vadd.f32 %v17324_v27, %v11504_v26 }
 0x5b4   : > { %v14671_v34 = vpop.eup %14670  ;;  %12018 = vst.msk [vmem:[%s17343_s30 + $0x108] sm:$0xff] %vm11984_vm2, %v14669_v22  ;;  %14690 = vrcp.f32 %v11835_v61  ;;  %v11498_v13 = vpop.xlane.xlu0 %11497 }
 0x5b5   : > { %v14673_v23 = vpop.eup %14672  ;;  %12023 = vst.msk [vmem:[%s17343_s30 + $0x130] sm:$0xff] %vm11984_vm2, %v14671_v34  ;;  %14692 = vpow2.f32 %v13156_v15  ;;  %v13162_v37 = vmul.f32 -1.442695, %v11587_v28  ;;  %v11584_v36 = vadd.f32 %v17324_v27, %v11498_v13 }
 0x5b6   : > { %v14675_v60 = vpop.eup %14674  ;;  %v11832_v48 = vadd.f32 1.0, %v14673_v23  ;;  %14694 = vpow2.f32 %v13161_v9  ;;  %v11500_v5 = vpop.xlane.xlu1 %11499 }
 0x5b7   : > { %v14677_v53 = vpop.eup %14676  ;;  %12024 = vst.msk [vmem:[%s17343_s30 + $0x138] sm:$0xff] %vm11984_vm2, %v14675_v60  ;;  %14696 = vpow2.f32 %v13162_v37  ;;  %v13159_v16 = vmul.f32 -1.442695, %v11584_v36  ;;  %v11585_v43 = vadd.f32 %v17324_v27, %v11500_v5 }
 0x5b8   : > { %v14679_v20 = vpop.eup %14678  ;;  %14698 = vrcp.f32 %v11832_v48  ;;  %v11833_v47 = vadd.f32 1.0, %v14677_v53  ;;  %v11510_v39 = vpop.xlane.xlu0 %11509 }
 0x5b9   : > { %v14681_v38 = vpop.eup %14680  ;;  %12021 = vst.msk [vmem:[%s17343_s30 + $0x120] sm:$0xff] %vm11984_vm2, %v14679_v20  ;;  %14700 = vpow2.f32 %v13159_v16  ;;  %v13160_v7 = vmul.f32 -1.442695, %v11585_v43  ;;  %v11590_v51 = vadd.f32 %v17324_v27, %v11510_v39 }
 0x5ba   : > { %v14683_v46 = vpop.eup %14682  ;;  %14702 = vrcp.f32 %v11833_v47  ;;  %v11838_v50 = vadd.f32 1.0, %v14681_v38  ;;  %v11512_v14 = vpop.xlane.xlu1 %11511 }
 0x5bb   : > { %v14685_v4 = vpop.eup %14684  ;;  %12022 = vst.msk [vmem:[%s17343_s30 + $0x128] sm:$0xff] %vm11984_vm2, %v14683_v46  ;;  %14704 = vpow2.f32 %v13160_v7  ;;  %v13165_v58 = vmul.f32 -1.442695, %v11590_v51  ;;  %v11591_v3 = vadd.f32 %v17324_v27, %v11512_v14  ;;  %v14774_v7 = vld [vmem:[#allocation2] ss:$0 sm:$0xff] }
 0x5bc   : > { %v14687_v57 = vpop.eup %14686  ;;  %14706 = vrcp.f32 %v11838_v50  ;;  %v11839_v19 = vadd.f32 1.0, %v14685_v4  ;;  %v11506_v45 = vpop.xlane.xlu0 %11505 }
 0x5bd   : > { %v14689_v59 = vpop.eup %14688  ;;  %v11836_v18 = vadd.f32 1.0, %v14687_v57  ;;  %14708 = vpow2.f32 %v13165_v58  ;;  %v13166_v44 = vmul.f32 -1.442695, %v11591_v3  ;;  %v11588_v52 = vadd.f32 %v17324_v27, %v11506_v45 }
 0x5be   : > { %v14691_v35 = vpop.eup %14690  ;;  %12027 = vst.msk [vmem:[%s17343_s30 + $0x150] sm:$0xff] %vm11984_vm2, %v14689_v59  ;;  %14710 = vrcp.f32 %v11839_v19  ;;  %v11508_v2 = vpop.xlane.xlu1 %11507 }
 0x5bf   : > { %v14693_v1 = vpop.eup %14692  ;;  %12028 = vst.msk [vmem:[%s17343_s30 + $0x158] sm:$0xff] %vm11984_vm2, %v14691_v35  ;;  %14712 = vrcp.f32 %v11836_v18  ;;  %v13163_v17 = vmul.f32 -1.442695, %v11588_v52  ;;  %v11589_v12 = vadd.f32 %v17324_v27, %v11508_v2 }
 0x5c0   : > { %v14695_v24 = vpop.eup %14694  ;;  %v11837_v29 = vadd.f32 1.0, %v14693_v1  ;;  %14714 = vpow2.f32 %v13166_v44  ;;  %v11518_v42 = vpop.xlane.xlu0 %11517 }
 0x5c1   : > { %v14697_v56 = vpop.eup %14696  ;;  %v11842_v11 = vadd.f32 1.0, %v14695_v24  ;;  %14716 = vpow2.f32 %v13163_v17  ;;  %v13164_v0 = vmul.f32 -1.442695, %v11589_v12  ;;  %v11594_v33 = vadd.f32 %v17324_v27, %v11518_v42 }
 0x5c2   : > { %v14699_v31 = vpop.eup %14698  ;;  %14718 = vrcp.f32 %v11837_v29  ;;  %v11843_v54 = vadd.f32 1.0, %v14697_v56  ;;  %v11520_v41 = vpop.xlane.xlu1 %11519 }
 0x5c3   : > { %v14701_v40 = vpop.eup %14700  ;;  %12025 = vst.msk [vmem:[%s17343_s30 + $0x140] sm:$0xff] %vm11984_vm2, %v14699_v31  ;;  %14720 = vrcp.f32 %v11842_v11  ;;  %v13169_v30 = vmul.f32 -1.442695, %v11594_v33  ;;  %v11595_v6 = vadd.f32 %v17324_v27, %v11520_v41 }
 0x5c4   : > { %v14703_v25 = vpop.eup %14702  ;;  %14722 = vrcp.f32 %v11843_v54  ;;  %v11840_v63 = vadd.f32 1.0, %v14701_v40  ;;  %v11514_v21 = vpop.xlane.xlu0 %11513 }
 0x5c5   : > { %v14705_v55 = vpop.eup %14704  ;;  %12026 = vst.msk [vmem:[%s17343_s30 + $0x148] sm:$0xff] %vm11984_vm2, %v14703_v25  ;;  %14724 = vpow2.f32 %v13164_v0  ;;  %v13170_v62 = vmul.f32 -1.442695, %v11595_v6  ;;  %v11592_v32 = vadd.f32 %v17324_v27, %v11514_v21 }
 0x5c6   : > { %v14707_v8 = vpop.eup %14706  ;;  %14726 = vrcp.f32 %v11840_v63  ;;  %v11841_v15 = vadd.f32 1.0, %v14705_v55  ;;  %v11516_v49 = vpop.xlane.xlu1 %11515 }
 0x5c7   : > { %v14709_v10 = vpop.eup %14708  ;;  %12031 = vst.msk [vmem:[%s17343_s30 + $0x170] sm:$0xff] %vm11984_vm2, %v14707_v8  ;;  %14728 = vpow2.f32 %v13169_v30  ;;  %v13167_v61 = vmul.f32 -1.442695, %v11592_v32  ;;  %v11593_v26 = vadd.f32 %v17324_v27, %v11516_v49 }
 0x5c8   : > { %v14711_v22 = vpop.eup %14710  ;;  %14730 = vrcp.f32 %v11841_v15  ;;  %v11846_v9 = vadd.f32 1.0, %v14709_v10 }
 0x5c9   : > { %v14713_v28 = vpop.eup %14712  ;;  %12032 = vst.msk [vmem:[%s17343_s30 + $0x178] sm:$0xff] %vm11984_vm2, %v14711_v22  ;;  %14732 = vpow2.f32 %v13170_v62  ;;  %v13168_v34 = vmul.f32 -1.442695, %v11593_v26  ;;  %v11522_v13 = vpop.xlane.xlu0 %11521 }
 0x5ca   : > { %v14715_v23 = vpop.eup %14714  ;;  %12029 = vst.msk [vmem:[%s17343_s30 + $0x160] sm:$0xff] %vm11984_vm2, %v14713_v28  ;;  %14734 = vrcp.f32 %v11846_v9  ;;  %v11596_v37 = vadd.f32 %v17324_v27, %v11522_v13 }
 0x5cb   : > { %v14717_v36 = vpop.eup %14716  ;;  %v11847_v60 = vadd.f32 1.0, %v14715_v23  ;;  %14736 = vpow2.f32 %v13167_v61  ;;  %v11524_v48 = vpop.xlane.xlu1 %11523 }
 0x5cc   : > { %v14719_v5 = vpop.eup %14718  ;;  %v11844_v53 = vadd.f32 1.0, %v14717_v36  ;;  %14738 = vpow2.f32 %v13168_v34  ;;  %v13171_v16 = vmul.f32 -1.442695, %v11596_v37  ;;  %v11597_v43 = vadd.f32 %v17324_v27, %v11524_v48 }
 0x5cd   : > { %v14721_v20 = vpop.eup %14720  ;;  %12030 = vst.msk [vmem:[%s17343_s30 + $0x168] sm:$0xff] %vm11984_vm2, %v14719_v5  ;;  %14740 = vrcp.f32 %v11847_v60  ;;  %v11526_v47 = vpop.xlane.xlu0 %11525 }
 0x5ce   : > { %v14723_v39 = vpop.eup %14722  ;;  %12035 = vst.msk [vmem:[%s17343_s30 + $0x190] sm:$0xff] %vm11984_vm2, %v14721_v20  ;;  %14742 = vrcp.f32 %v11844_v53  ;;  %v13172_v38 = vmul.f32 -1.442695, %v11597_v43  ;;  %v11598_v51 = vadd.f32 %v14774_v7, %v11526_v47 }
 0x5cf   : > { %v14725_v46 = vpop.eup %14724  ;;  %12036 = vst.msk [vmem:[%s17343_s30 + $0x198] sm:$0xff] %vm11984_vm2, %v14723_v39  ;;  %14744 = vpow2.f32 %v13171_v16  ;;  %v11528_v50 = vpop.xlane.xlu1 %11527 }
 0x5d0   : > { %v14727_v27 = vpop.eup %14726  ;;  %v11845_v14 = vadd.f32 1.0, %v14725_v46  ;;  %14746 = vpow2.f32 %v13172_v38  ;;  %v13173_v4 = vmul.f32 -1.442695, %v11598_v51  ;;  %v11599_v58 = vadd.f32 %v14774_v7, %v11528_v50 }
 0x5d1   : > { %v14729_v3 = vpop.eup %14728  ;;  %12033 = vst.msk [vmem:[%s17343_s30 + $0x180] sm:$0xff] %vm11984_vm2, %v14727_v27 }
 0x5d2   : > { %v14731_v57 = vpop.eup %14730  ;;  %14748 = vrcp.f32 %v11845_v14  ;;  %v11850_v19 = vadd.f32 1.0, %v14729_v3  ;;  %v13174_v45 = vmul.f32 -1.442695, %v11599_v58 }
 0x5d3   : > { %v14733_v59 = vpop.eup %14732  ;;  %12034 = vst.msk [vmem:[%s17343_s30 + $0x188] sm:$0xff] %vm11984_vm2, %v14731_v57  ;;  %14750 = vpow2.f32 %v13173_v4 }
 0x5d4   : > { %v14735_v18 = vpop.eup %14734  ;;  %14752 = vrcp.f32 %v11850_v19  ;;  %v11851_v44 = vadd.f32 1.0, %v14733_v59 }
 0x5d5   : > { %v14737_v52 = vpop.eup %14736  ;;  %12039 = vst.msk [vmem:[%s17343_s30 + $0x1b0] sm:$0xff] %vm11984_vm2, %v14735_v18  ;;  %14754 = vpow2.f32 %v13174_v45 }
 0x5d6   : > { %v14739_v35 = vpop.eup %14738  ;;  %14756 = vrcp.f32 %v11851_v44  ;;  %v11848_v2 = vadd.f32 1.0, %v14737_v52 }
 0x5d7   : > { %v14741_v1 = vpop.eup %14740  ;;  %v11849_v17 = vadd.f32 1.0, %v14739_v35 }
 0x5d8   : > { %v14743_v12 = vpop.eup %14742  ;;  %12040 = vst.msk [vmem:[%s17343_s30 + $0x1b8] sm:$0xff] %vm11984_vm2, %v14741_v1  ;;  %14758 = vrcp.f32 %v11848_v2 }
 0x5d9   : > { %v14745_v24 = vpop.eup %14744  ;;  %12037 = vst.msk [vmem:[%s17343_s30 + $0x1a0] sm:$0xff] %vm11984_vm2, %v14743_v12  ;;  %14760 = vrcp.f32 %v11849_v17 }
 0x5da   : > { %v14747_v29 = vpop.eup %14746  ;;  %v11852_v42 = vadd.f32 1.0, %v14745_v24 }
 0x5db   : > { %v11853_v56 = vadd.f32 1.0, %v14747_v29 }
 0x5dc   : > { %v14749_v11 = vpop.eup %14748  ;;  %14762 = vrcp.f32 %v11852_v42 }
 0x5dd   : > { %v14751_v0 = vpop.eup %14750  ;;  %12038 = vst.msk [vmem:[%s17343_s30 + $0x1a8] sm:$0xff] %vm11984_vm2, %v14749_v11  ;;  %14764 = vrcp.f32 %v11853_v56 }
 0x5de   : > { %v14753_v33 = vpop.eup %14752  ;;  %v11854_v31 = vadd.f32 1.0, %v14751_v0 }
 0x5df   : > { %v14755_v54 = vpop.eup %14754  ;;  %12043 = vst.msk [vmem:[%s17343_s30 + $0x1d0] sm:$0xff] %vm11984_vm2, %v14753_v33 }
 0x5e0   : > { %v14757_v41 = vpop.eup %14756  ;;  %14766 = vrcp.f32 %v11854_v31  ;;  %v11855_v40 = vadd.f32 1.0, %v14755_v54 }
 0x5e1   : > { %12044 = vst.msk [vmem:[%s17343_s30 + $0x1d8] sm:$0xff] %vm11984_vm2, %v14757_v41 }
 0x5e2   : > { %v14759_v30 = vpop.eup %14758  ;;  %14768 = vrcp.f32 %v11855_v40 }
 0x5e3   : > { %v14761_v6 = vpop.eup %14760  ;;  %12041 = vst.msk [vmem:[%s17343_s30 + $0x1c0] sm:$0xff] %vm11984_vm2, %v14759_v30 }
 0x5e4   : > { %12042 = vst.msk [vmem:[%s17343_s30 + $0x1c8] sm:$0xff] %vm11984_vm2, %v14761_v6 }
 0x5e6   : > { %v14763_v25 = vpop.eup %14762 }
 0x5e7   : > { %v14765_v63 = vpop.eup %14764  ;;  %12045 = vst.msk [vmem:[%s17343_s30 + $0x1e0] sm:$0xff] %vm11984_vm2, %v14763_v25 }
 0x5e8   : > { %12046 = vst.msk [vmem:[%s17343_s30 + $0x1e8] sm:$0xff] %vm11984_vm2, %v14765_v63 }
 0x5ea   : > { %v14767_v21 = vpop.eup %14766 }
 0x5eb   : > { %12047 = vst.msk [vmem:[%s17343_s30 + $0x1f0] sm:$0xff] %vm11984_vm2, %v14767_v21 }
 0x5ec   : > { %v14769_v55 = vpop.eup %14768 }
 0x5ed   : > { %12048 = vst.msk [vmem:[%s17343_s30 + $0x1f8] sm:$0xff] %vm11984_vm2, %v14769_v55 }
 0x5ee PF: > { %p18_p9 = scmp.ge.s32.totalorder %s14869_s14, 4   ;;  %s17683_s11 = smov %s14793_s12 }
 0x5ef   : > { %s17684_s12 = smov %s14878_s17  ;;  %s17685_s13 = smov %s14869_s14 }
 0x5f0   :  { %20 = sbr.rel (!%p18_p9) target bundleno = 5 (0x5), region = 154 }

</bundles_post_ra>
